<compile_context>
chip_gen: v7x
topology: tpu7x:2x2x1
jax: 0.10.0
libtpu: 0.0.40
codegen_flags: <defaults>
</compile_context>

<pallas_src>
import math

import jax
import jax.numpy as jnp
from jax.experimental import pallas as pl
from jax.experimental.pallas import tpu as pltpu

HID = 64                 # hidden width of every individual MLP
N_MID = 6                # number of 64x64 hidden->hidden layers per MLP
N_NETS = 7               # net, r1, r2, r3, r5, r6, r10
WIDE = 512               # fused hidden width, padded 448 -> 512 (4 x 128 lanes)
OUT_W = 128              # lane-dense fused output width (cols 0..13 used)

NET_LAYERS = [1] + [HID] * 7 + [8]
R_LAYERS = [1] + [HID] * 7 + [1]

# tanh-approximate GELU (EUP tanh overlaps the MXU); set False for torch-exact erf.
APPROX_GELU = True


def _gelu(x):
    if APPROX_GELU:
        c = math.sqrt(2.0 / math.pi)
        return 0.5 * x * (1.0 + jnp.tanh(c * (x + 0.044715 * (x * x * x))))
    return 0.5 * x * (1.0 + jax.lax.erf(x * (1.0 / math.sqrt(2.0))))


# ---------------------------------------------------------------------------
# Kernel
# ---------------------------------------------------------------------------
def _fused_mlp_kernel(t_ref, wf_ref, bf_ref, wm_ref, bm_ref, wl_ref, bl_ref, o_ref):
    # t_ref : (TN, 1)            f32
    # wf_ref: (1, 512)   f32     bf_ref: (1, 512)  f32
    # wm_ref: (6, 512, 512) bf16 bm_ref: (6, 1, 512) f32
    # wl_ref: (512, 128) bf16    bl_ref: (1, 128)  f32
    # o_ref : (TN, 128)  f32
    t = t_ref[...]
    # First layer (K=1): pure outer product -> VPU broadcast, kept in f32.
    h = _gelu(t * wf_ref[...] + bf_ref[...])                            # (TN, 512) f32
    # Six fused block-diagonal hidden layers: bf16 MXU matmuls, f32 accumulation.
    for i in range(N_MID):
        acc = jnp.dot(h.astype(wm_ref.dtype), wm_ref[i],
                      preferred_element_type=jnp.float32) + bm_ref[i]
        h = _gelu(acc)
    # Fused output heads: single (512, 128) bf16 matmul, lane-dense f32 store.
    o_ref[...] = jnp.dot(h.astype(wl_ref.dtype), wl_ref[...],
                         preferred_element_type=jnp.float32) + bl_ref[...]


# ---------------------------------------------------------------------------
# pallas_call wrapper
# ---------------------------------------------------------------------------
def _round_up(x, m):
    return ((x + m - 1) // m) * m


def _choose_tiling(n, tile_n):
    """Pick a tile size (multiple of 8) and padded N; >=2 tiles when N >= 16 (v7x)."""
    n8 = _round_up(max(n, 8), 8)
    num_tiles = max((n8 + tile_n - 1) // tile_n, 2 if n8 >= 16 else 1)
    tile = _round_up((n8 + num_tiles - 1) // num_tiles, 8)
    n_pad = tile * num_tiles
    return tile, n_pad


def _build_pallas_fn(n_pad, tile_n, single_buffer):
    grid = (n_pad // tile_n,)

    def weight_spec(block_shape):
        nd = len(block_shape)
        kwargs = {}
        if single_buffer:
            # Grid-invariant weights: no need for a second (never refilled) buffer.
            kwargs["pipeline_mode"] = pl.Buffered(buffer_count=1)
        return pl.BlockSpec(block_shape, lambda i, _nd=nd: (0,) * _nd, **kwargs)

    in_specs = [
        pl.BlockSpec((tile_n, 1), lambda i: (i, 0)),   # t
        weight_spec((1, WIDE)),                        # wf
        weight_spec((1, WIDE)),                        # bf
        weight_spec((N_MID, WIDE, WIDE)),              # wm (bf16)
        weight_spec((N_MID, 1, WIDE)),                 # bm
        weight_spec((WIDE, OUT_W)),                    # wl (bf16)
        weight_spec((1, OUT_W)),                       # bl
    ]
    return pl.pallas_call(
        _fused_mlp_kernel,
        out_shape=jax.ShapeDtypeStruct((n_pad, OUT_W), jnp.float32),
        grid=grid,
        in_specs=in_specs,
        out_specs=pl.BlockSpec((tile_n, OUT_W), lambda i: (i, 0)),
        compiler_params=pltpu.CompilerParams(
            dimension_semantics=("parallel",),
            vmem_limit_bytes=32 * 1024 * 1024,
        ),
    )


def run_pitlnn_kernel(t, fused_params, *, tile_n=1024):
    """t: (N, 1) float32.  Returns the fused lane-dense output slab (N, OUT_W) f32.

    Note: for tiny N (e.g. N=8) the kernel is launch/latency bound and the MXU is
    ~3% utilized; batch many time points per call whenever possible.
    """
    wf, bf, wm, bm, wl, bl = fused_params
    n = t.shape[0]
    tile, n_pad = _choose_tiling(n, tile_n)
    if n_pad != n:
        t = jnp.pad(t, ((0, n_pad - n), (0, 0)))
    try:
        out = _build_pallas_fn(n_pad, tile, True)(t, wf, bf, wm, bm, wl, bl)
    except Exception:
        # Fallback for jax versions without pipeline_mode / Buffered(1) support:
        # default double-buffering of the (still VMEM-resident) weights.
        out = _build_pallas_fn(n_pad, tile, False)(t, wf, bf, wm, bm, wl, bl)
    return out[:n] if n_pad != n else out


def pitlnn_forward_slab(t, fused_params, *, tile_n=1024):
    """Returns the compact (N, 14) slab: [y1..y8, r1, r2, r3, r5, r6, r10]."""
    return run_pitlnn_kernel(t, fused_params, tile_n=tile_n)[:, :14]


def pitlnn_forward(t, fused_params, *, tile_n=1024):
    """Same 14-tuple of (N, 1) outputs as the torch module's forward()."""
    slab = pitlnn_forward_slab(t, fused_params, tile_n=tile_n)
    ys = tuple(slab[:, i:i + 1] for i in range(8))
    rs = tuple(slab[:, 7 + j:8 + j] for j in range(1, N_NETS))  # r1,r2,r3,r5,r6,r10
    return ys + rs


# ---------------------------------------------------------------------------
# Deterministic parameter construction (mirrors the nn.Module __init__: default
# torch-Linear uniform init for hidden layers, xavier_uniform + zero bias for the
# final layer of each net), plus block-diagonal fusion / padding to WIDE=512.
# All weights are stored transposed vs PyTorch ((in, out)): h = x @ W + b.
# ---------------------------------------------------------------------------
def _init_single_mlp(key, layer_sizes):
    ws, bs = [], []
    n_lin = len(layer_sizes) - 1
    for i in range(n_lin):
        fan_in, fan_out = layer_sizes[i], layer_sizes[i + 1]
        key, kw, kb = jax.random.split(key, 3)
        if i == n_lin - 1:
            lim = math.sqrt(6.0 / (fan_in + fan_out))   # xavier_uniform_
            w = jax.random.uniform(kw, (fan_in, fan_out), jnp.float32, -lim, lim)
            b = jnp.zeros((fan_out,), jnp.float32)      # zeros_
        else:
            lim = 1.0 / math.sqrt(fan_in)               # torch Linear default
            w = jax.random.uniform(kw, (fan_in, fan_out), jnp.float32, -lim, lim)
            b = jax.random.uniform(kb, (fan_out,), jnp.float32, -lim, lim)
        ws.append(w)
        bs.append(b)
    return ws, bs


def build_fused_params(key):
    """Builds zero-padded block-diagonal fused params.  Returns (fused, per_net)."""
    all_layer_specs = [NET_LAYERS] + [R_LAYERS] * 6
    per_net = [
        _init_single_mlp(jax.random.fold_in(key, j), spec)
        for j, spec in enumerate(all_layer_specs)
    ]

    # First layer: (1, 512) / (1, 512), columns 448..511 zero-padded.
    wf = jnp.zeros((1, WIDE), jnp.float32)
    bf = jnp.zeros((1, WIDE), jnp.float32)
    for j in range(N_NETS):
        wf = wf.at[:, j * HID:(j + 1) * HID].set(per_net[j][0][0])
        bf = bf.at[0, j * HID:(j + 1) * HID].set(per_net[j][1][0])

    # Hidden layers 1..6: block-diagonal (512, 512), biases concatenated.
    wm = jnp.zeros((N_MID, WIDE, WIDE), jnp.float32)
    bm = jnp.zeros((N_MID, 1, WIDE), jnp.float32)
    for i in range(N_MID):
        for j in range(N_NETS):
            wm = wm.at[i, j * HID:(j + 1) * HID, j * HID:(j + 1) * HID].set(
                per_net[j][0][1 + i])
            bm = bm.at[i, 0, j * HID:(j + 1) * HID].set(per_net[j][1][1 + i])

    # Output heads: net -> cols 0..7, r-net j -> col 7+j (j = 1..6); zero-pad to 128.
    wl = jnp.zeros((WIDE, OUT_W), jnp.float32)
    bl = jnp.zeros((1, OUT_W), jnp.float32)
    wl = wl.at[0:HID, 0:8].set(per_net[0][0][-1])
    bl = bl.at[0, 0:8].set(per_net[0][1][-1])
    for j in range(1, N_NETS):
        col = 7 + j
        wl = wl.at[j * HID:(j + 1) * HID, col:col + 1].set(per_net[j][0][-1])
        bl = bl.at[0, col].set(per_net[j][1][-1][0])

    # bf16 weights for the MXU matmuls (f32 accumulation stays in the kernel).
    fused = (wf, bf, wm.astype(jnp.bfloat16), bm, wl.astype(jnp.bfloat16), bl)
    return fused, per_net


def mlp_ref_mixed(t, ws, bs):
    """Pure-JAX per-net reference mirroring the kernel numerics (f32 first layer,
    bf16 MXU matmuls with f32 accumulation, same GELU)."""
    h = _gelu(t * ws[0] + bs[0])                        # K=1 first layer, f32
    for i in range(1, len(ws) - 1):
        h = _gelu(jnp.dot(h.astype(jnp.bfloat16), ws[i].astype(jnp.bfloat16),
                          preferred_element_type=jnp.float32) + bs[i])
    return jnp.dot(h.astype(jnp.bfloat16), ws[-1].astype(jnp.bfloat16),
                   preferred_element_type=jnp.float32) + bs[-1]


if __name__ == "__main__":
    key = jax.random.PRNGKey(0)
    fused, per_net = build_fused_params(key)

    for n in (8, 200):   # small single-tile case and a padded multi-tile case
        t = jax.random.uniform(jax.random.fold_in(key, 1000 + n), (n, 1), jnp.float32)

        outs = pitlnn_forward(t, fused)
        outs = jax.block_until_ready(outs)
        assert len(outs) == 14

        # Correctness vs per-net references (same mixed-precision math as the kernel).
        y_ref = mlp_ref_mixed(t, *per_net[0])            # (n, 8)
        for i in range(8):
            assert jnp.allclose(outs[i], y_ref[:, i:i + 1], atol=5e-3, rtol=5e-3), (n, i)
        for j in range(1, N_NETS):
            r_ref = mlp_ref_mixed(t, *per_net[j])        # (n, 1)
            assert jnp.allclose(outs[7 + j], r_ref, atol=5e-3, rtol=5e-3), (n, j)

    print("KERNEL_OK")
</pallas_src>

<mosaic_0001>
module attributes {stable_mosaic.version = 11 : i64} {
  func.func @_fused_mlp_kernel(%arg0: i32, %arg1: memref<8x1xf32, #tpu.memory_space<vmem>>, %arg2: memref<1x512xf32, #tpu.memory_space<vmem>>, %arg3: memref<1x512xf32, #tpu.memory_space<vmem>>, %arg4: memref<6x512x512xbf16, #tpu.memory_space<vmem>>, %arg5: memref<6x1x512xf32, #tpu.memory_space<vmem>>, %arg6: memref<512x128xbf16, #tpu.memory_space<vmem>>, %arg7: memref<1x128xf32, #tpu.memory_space<vmem>>, %arg8: memref<8x128xf32, #tpu.memory_space<vmem>>) attributes {dimension_semantics = [#tpu.dimension_semantics<parallel>], iteration_bounds = array<i64: 1>, scalar_prefetch = 0 : i64, scratch_operands = 0 : i64, tpu.core_type = #tpu.core_type<tc>, window_params = [{transform_indices = @transform_0, window_bounds = array<i64: 8, 1>}, {pipeline_mode = #tpu.pipeline_mode<synchronous>, transform_indices = @transform_1, window_bounds = array<i64: 1, 512>}, {pipeline_mode = #tpu.pipeline_mode<synchronous>, transform_indices = @transform_2, window_bounds = array<i64: 1, 512>}, {pipeline_mode = #tpu.pipeline_mode<synchronous>, transform_indices = @transform_3, window_bounds = array<i64: 6, 512, 512>}, {pipeline_mode = #tpu.pipeline_mode<synchronous>, transform_indices = @transform_4, window_bounds = array<i64: 6, 1, 512>}, {pipeline_mode = #tpu.pipeline_mode<synchronous>, transform_indices = @transform_5, window_bounds = array<i64: 512, 128>}, {pipeline_mode = #tpu.pipeline_mode<synchronous>, transform_indices = @transform_6, window_bounds = array<i64: 1, 128>}, {transform_indices = @transform_7, window_bounds = array<i64: 8, 128>}]} {
    %c0 = arith.constant 0 : index
    %c0_0 = arith.constant 0 : index
    %0 = vector.load %arg1[%c0, %c0_0] : memref<8x1xf32, #tpu.memory_space<vmem>>, vector<8x1xf32>
    %c0_1 = arith.constant 0 : index
    %c0_2 = arith.constant 0 : index
    %1 = vector.load %arg2[%c0_1, %c0_2] : memref<1x512xf32, #tpu.memory_space<vmem>>, vector<1x512xf32>
    %2 = vector.broadcast %0 : vector<8x1xf32> to vector<8x512xf32>
    %3 = vector.broadcast %1 : vector<1x512xf32> to vector<8x512xf32>
    %4 = arith.mulf %2, %3 : vector<8x512xf32>
    %c0_3 = arith.constant 0 : index
    %c0_4 = arith.constant 0 : index
    %5 = vector.load %arg3[%c0_3, %c0_4] : memref<1x512xf32, #tpu.memory_space<vmem>>, vector<1x512xf32>
    %6 = vector.broadcast %5 : vector<1x512xf32> to vector<8x512xf32>
    %7 = arith.addf %4, %6 : vector<8x512xf32>
    %cst = arith.constant 5.000000e-01 : f32
    %8 = vector.broadcast %cst : f32 to vector<8x512xf32>
    %9 = arith.mulf %8, %7 : vector<8x512xf32>
    %10 = arith.mulf %7, %7 : vector<8x512xf32>
    %11 = arith.mulf %10, %7 : vector<8x512xf32>
    %cst_5 = arith.constant 4.471500e-02 : f32
    %12 = vector.broadcast %cst_5 : f32 to vector<8x512xf32>
    %13 = arith.mulf %12, %11 : vector<8x512xf32>
    %14 = arith.addf %7, %13 : vector<8x512xf32>
    %cst_6 = arith.constant 0.797884583 : f32
    %15 = vector.broadcast %cst_6 : f32 to vector<8x512xf32>
    %16 = arith.mulf %15, %14 : vector<8x512xf32>
    %17 = math.tanh %16 : vector<8x512xf32>
    %cst_7 = arith.constant 1.000000e+00 : f32
    %18 = vector.broadcast %cst_7 : f32 to vector<8x512xf32>
    %19 = arith.addf %18, %17 : vector<8x512xf32>
    %20 = arith.mulf %9, %19 : vector<8x512xf32>
    %21 = arith.truncf %20 : vector<8x512xf32> to vector<8x512xbf16>
    %c0_8 = arith.constant 0 : index
    %c0_9 = arith.constant 0 : index
    %c0_10 = arith.constant 0 : index
    %22 = vector.load %arg4[%c0_8, %c0_9, %c0_10] : memref<6x512x512xbf16, #tpu.memory_space<vmem>>, vector<1x512x512xbf16>
    %23 = vector.shape_cast %22 : vector<1x512x512xbf16> to vector<512x512xbf16>
    %cst_11 = arith.constant dense<0.000000e+00> : vector<8x512xf32>
    %24 = tpu.matmul %21, %23, %cst_11 {dimension_numbers = #tpu.dot_dimension_numbers<[1], [0], [0], [1], [0, 0, 1, 1], [], []>} : vector<8x512xbf16>, vector<512x512xbf16>, vector<8x512xf32> -> vector<8x512xf32>
    %c0_12 = arith.constant 0 : index
    %c0_13 = arith.constant 0 : index
    %c0_14 = arith.constant 0 : index
    %25 = vector.load %arg5[%c0_12, %c0_13, %c0_14] : memref<6x1x512xf32, #tpu.memory_space<vmem>>, vector<1x1x512xf32>
    %26 = vector.shape_cast %25 : vector<1x1x512xf32> to vector<1x512xf32>
    %27 = vector.broadcast %26 : vector<1x512xf32> to vector<8x512xf32>
    %28 = arith.addf %24, %27 : vector<8x512xf32>
    %cst_15 = arith.constant 5.000000e-01 : f32
    %29 = vector.broadcast %cst_15 : f32 to vector<8x512xf32>
    %30 = arith.mulf %29, %28 : vector<8x512xf32>
    %31 = arith.mulf %28, %28 : vector<8x512xf32>
    %32 = arith.mulf %31, %28 : vector<8x512xf32>
    %cst_16 = arith.constant 4.471500e-02 : f32
    %33 = vector.broadcast %cst_16 : f32 to vector<8x512xf32>
    %34 = arith.mulf %33, %32 : vector<8x512xf32>
    %35 = arith.addf %28, %34 : vector<8x512xf32>
    %cst_17 = arith.constant 0.797884583 : f32
    %36 = vector.broadcast %cst_17 : f32 to vector<8x512xf32>
    %37 = arith.mulf %36, %35 : vector<8x512xf32>
    %38 = math.tanh %37 : vector<8x512xf32>
    %cst_18 = arith.constant 1.000000e+00 : f32
    %39 = vector.broadcast %cst_18 : f32 to vector<8x512xf32>
    %40 = arith.addf %39, %38 : vector<8x512xf32>
    %41 = arith.mulf %30, %40 : vector<8x512xf32>
    %42 = arith.truncf %41 : vector<8x512xf32> to vector<8x512xbf16>
    %c1 = arith.constant 1 : index
    %c0_19 = arith.constant 0 : index
    %c0_20 = arith.constant 0 : index
    %43 = vector.load %arg4[%c1, %c0_19, %c0_20] : memref<6x512x512xbf16, #tpu.memory_space<vmem>>, vector<1x512x512xbf16>
    %44 = vector.shape_cast %43 : vector<1x512x512xbf16> to vector<512x512xbf16>
    %cst_21 = arith.constant dense<0.000000e+00> : vector<8x512xf32>
    %45 = tpu.matmul %42, %44, %cst_21 {dimension_numbers = #tpu.dot_dimension_numbers<[1], [0], [0], [1], [0, 0, 1, 1], [], []>} : vector<8x512xbf16>, vector<512x512xbf16>, vector<8x512xf32> -> vector<8x512xf32>
    %c1_22 = arith.constant 1 : index
    %c0_23 = arith.constant 0 : index
    %c0_24 = arith.constant 0 : index
    %46 = vector.load %arg5[%c1_22, %c0_23, %c0_24] : memref<6x1x512xf32, #tpu.memory_space<vmem>>, vector<1x1x512xf32>
    %47 = vector.shape_cast %46 : vector<1x1x512xf32> to vector<1x512xf32>
    %48 = vector.broadcast %47 : vector<1x512xf32> to vector<8x512xf32>
    %49 = arith.addf %45, %48 : vector<8x512xf32>
    %cst_25 = arith.constant 5.000000e-01 : f32
    %50 = vector.broadcast %cst_25 : f32 to vector<8x512xf32>
    %51 = arith.mulf %50, %49 : vector<8x512xf32>
    %52 = arith.mulf %49, %49 : vector<8x512xf32>
    %53 = arith.mulf %52, %49 : vector<8x512xf32>
    %cst_26 = arith.constant 4.471500e-02 : f32
    %54 = vector.broadcast %cst_26 : f32 to vector<8x512xf32>
    %55 = arith.mulf %54, %53 : vector<8x512xf32>
    %56 = arith.addf %49, %55 : vector<8x512xf32>
    %cst_27 = arith.constant 0.797884583 : f32
    %57 = vector.broadcast %cst_27 : f32 to vector<8x512xf32>
    %58 = arith.mulf %57, %56 : vector<8x512xf32>
    %59 = math.tanh %58 : vector<8x512xf32>
    %cst_28 = arith.constant 1.000000e+00 : f32
    %60 = vector.broadcast %cst_28 : f32 to vector<8x512xf32>
    %61 = arith.addf %60, %59 : vector<8x512xf32>
    %62 = arith.mulf %51, %61 : vector<8x512xf32>
    %63 = arith.truncf %62 : vector<8x512xf32> to vector<8x512xbf16>
    %c2 = arith.constant 2 : index
    %c0_29 = arith.constant 0 : index
    %c0_30 = arith.constant 0 : index
    %64 = vector.load %arg4[%c2, %c0_29, %c0_30] : memref<6x512x512xbf16, #tpu.memory_space<vmem>>, vector<1x512x512xbf16>
    %65 = vector.shape_cast %64 : vector<1x512x512xbf16> to vector<512x512xbf16>
    %cst_31 = arith.constant dense<0.000000e+00> : vector<8x512xf32>
    %66 = tpu.matmul %63, %65, %cst_31 {dimension_numbers = #tpu.dot_dimension_numbers<[1], [0], [0], [1], [0, 0, 1, 1], [], []>} : vector<8x512xbf16>, vector<512x512xbf16>, vector<8x512xf32> -> vector<8x512xf32>
    %c2_32 = arith.constant 2 : index
    %c0_33 = arith.constant 0 : index
    %c0_34 = arith.constant 0 : index
    %67 = vector.load %arg5[%c2_32, %c0_33, %c0_34] : memref<6x1x512xf32, #tpu.memory_space<vmem>>, vector<1x1x512xf32>
    %68 = vector.shape_cast %67 : vector<1x1x512xf32> to vector<1x512xf32>
    %69 = vector.broadcast %68 : vector<1x512xf32> to vector<8x512xf32>
    %70 = arith.addf %66, %69 : vector<8x512xf32>
    %cst_35 = arith.constant 5.000000e-01 : f32
    %71 = vector.broadcast %cst_35 : f32 to vector<8x512xf32>
    %72 = arith.mulf %71, %70 : vector<8x512xf32>
    %73 = arith.mulf %70, %70 : vector<8x512xf32>
    %74 = arith.mulf %73, %70 : vector<8x512xf32>
    %cst_36 = arith.constant 4.471500e-02 : f32
    %75 = vector.broadcast %cst_36 : f32 to vector<8x512xf32>
    %76 = arith.mulf %75, %74 : vector<8x512xf32>
    %77 = arith.addf %70, %76 : vector<8x512xf32>
    %cst_37 = arith.constant 0.797884583 : f32
    %78 = vector.broadcast %cst_37 : f32 to vector<8x512xf32>
    %79 = arith.mulf %78, %77 : vector<8x512xf32>
    %80 = math.tanh %79 : vector<8x512xf32>
    %cst_38 = arith.constant 1.000000e+00 : f32
    %81 = vector.broadcast %cst_38 : f32 to vector<8x512xf32>
    %82 = arith.addf %81, %80 : vector<8x512xf32>
    %83 = arith.mulf %72, %82 : vector<8x512xf32>
    %84 = arith.truncf %83 : vector<8x512xf32> to vector<8x512xbf16>
    %c3 = arith.constant 3 : index
    %c0_39 = arith.constant 0 : index
    %c0_40 = arith.constant 0 : index
    %85 = vector.load %arg4[%c3, %c0_39, %c0_40] : memref<6x512x512xbf16, #tpu.memory_space<vmem>>, vector<1x512x512xbf16>
    %86 = vector.shape_cast %85 : vector<1x512x512xbf16> to vector<512x512xbf16>
    %cst_41 = arith.constant dense<0.000000e+00> : vector<8x512xf32>
    %87 = tpu.matmul %84, %86, %cst_41 {dimension_numbers = #tpu.dot_dimension_numbers<[1], [0], [0], [1], [0, 0, 1, 1], [], []>} : vector<8x512xbf16>, vector<512x512xbf16>, vector<8x512xf32> -> vector<8x512xf32>
    %c3_42 = arith.constant 3 : index
    %c0_43 = arith.constant 0 : index
    %c0_44 = arith.constant 0 : index
    %88 = vector.load %arg5[%c3_42, %c0_43, %c0_44] : memref<6x1x512xf32, #tpu.memory_space<vmem>>, vector<1x1x512xf32>
    %89 = vector.shape_cast %88 : vector<1x1x512xf32> to vector<1x512xf32>
    %90 = vector.broadcast %89 : vector<1x512xf32> to vector<8x512xf32>
    %91 = arith.addf %87, %90 : vector<8x512xf32>
    %cst_45 = arith.constant 5.000000e-01 : f32
    %92 = vector.broadcast %cst_45 : f32 to vector<8x512xf32>
    %93 = arith.mulf %92, %91 : vector<8x512xf32>
    %94 = arith.mulf %91, %91 : vector<8x512xf32>
    %95 = arith.mulf %94, %91 : vector<8x512xf32>
    %cst_46 = arith.constant 4.471500e-02 : f32
    %96 = vector.broadcast %cst_46 : f32 to vector<8x512xf32>
    %97 = arith.mulf %96, %95 : vector<8x512xf32>
    %98 = arith.addf %91, %97 : vector<8x512xf32>
    %cst_47 = arith.constant 0.797884583 : f32
    %99 = vector.broadcast %cst_47 : f32 to vector<8x512xf32>
    %100 = arith.mulf %99, %98 : vector<8x512xf32>
    %101 = math.tanh %100 : vector<8x512xf32>
    %cst_48 = arith.constant 1.000000e+00 : f32
    %102 = vector.broadcast %cst_48 : f32 to vector<8x512xf32>
    %103 = arith.addf %102, %101 : vector<8x512xf32>
    %104 = arith.mulf %93, %103 : vector<8x512xf32>
    %105 = arith.truncf %104 : vector<8x512xf32> to vector<8x512xbf16>
    %c4 = arith.constant 4 : index
    %c0_49 = arith.constant 0 : index
    %c0_50 = arith.constant 0 : index
    %106 = vector.load %arg4[%c4, %c0_49, %c0_50] : memref<6x512x512xbf16, #tpu.memory_space<vmem>>, vector<1x512x512xbf16>
    %107 = vector.shape_cast %106 : vector<1x512x512xbf16> to vector<512x512xbf16>
    %cst_51 = arith.constant dense<0.000000e+00> : vector<8x512xf32>
    %108 = tpu.matmul %105, %107, %cst_51 {dimension_numbers = #tpu.dot_dimension_numbers<[1], [0], [0], [1], [0, 0, 1, 1], [], []>} : vector<8x512xbf16>, vector<512x512xbf16>, vector<8x512xf32> -> vector<8x512xf32>
    %c4_52 = arith.constant 4 : index
    %c0_53 = arith.constant 0 : index
    %c0_54 = arith.constant 0 : index
    %109 = vector.load %arg5[%c4_52, %c0_53, %c0_54] : memref<6x1x512xf32, #tpu.memory_space<vmem>>, vector<1x1x512xf32>
    %110 = vector.shape_cast %109 : vector<1x1x512xf32> to vector<1x512xf32>
    %111 = vector.broadcast %110 : vector<1x512xf32> to vector<8x512xf32>
    %112 = arith.addf %108, %111 : vector<8x512xf32>
    %cst_55 = arith.constant 5.000000e-01 : f32
    %113 = vector.broadcast %cst_55 : f32 to vector<8x512xf32>
    %114 = arith.mulf %113, %112 : vector<8x512xf32>
    %115 = arith.mulf %112, %112 : vector<8x512xf32>
    %116 = arith.mulf %115, %112 : vector<8x512xf32>
    %cst_56 = arith.constant 4.471500e-02 : f32
    %117 = vector.broadcast %cst_56 : f32 to vector<8x512xf32>
    %118 = arith.mulf %117, %116 : vector<8x512xf32>
    %119 = arith.addf %112, %118 : vector<8x512xf32>
    %cst_57 = arith.constant 0.797884583 : f32
    %120 = vector.broadcast %cst_57 : f32 to vector<8x512xf32>
    %121 = arith.mulf %120, %119 : vector<8x512xf32>
    %122 = math.tanh %121 : vector<8x512xf32>
    %cst_58 = arith.constant 1.000000e+00 : f32
    %123 = vector.broadcast %cst_58 : f32 to vector<8x512xf32>
    %124 = arith.addf %123, %122 : vector<8x512xf32>
    %125 = arith.mulf %114, %124 : vector<8x512xf32>
    %126 = arith.truncf %125 : vector<8x512xf32> to vector<8x512xbf16>
    %c5 = arith.constant 5 : index
    %c0_59 = arith.constant 0 : index
    %c0_60 = arith.constant 0 : index
    %127 = vector.load %arg4[%c5, %c0_59, %c0_60] : memref<6x512x512xbf16, #tpu.memory_space<vmem>>, vector<1x512x512xbf16>
    %128 = vector.shape_cast %127 : vector<1x512x512xbf16> to vector<512x512xbf16>
    %cst_61 = arith.constant dense<0.000000e+00> : vector<8x512xf32>
    %129 = tpu.matmul %126, %128, %cst_61 {dimension_numbers = #tpu.dot_dimension_numbers<[1], [0], [0], [1], [0, 0, 1, 1], [], []>} : vector<8x512xbf16>, vector<512x512xbf16>, vector<8x512xf32> -> vector<8x512xf32>
    %c5_62 = arith.constant 5 : index
    %c0_63 = arith.constant 0 : index
    %c0_64 = arith.constant 0 : index
    %130 = vector.load %arg5[%c5_62, %c0_63, %c0_64] : memref<6x1x512xf32, #tpu.memory_space<vmem>>, vector<1x1x512xf32>
    %131 = vector.shape_cast %130 : vector<1x1x512xf32> to vector<1x512xf32>
    %132 = vector.broadcast %131 : vector<1x512xf32> to vector<8x512xf32>
    %133 = arith.addf %129, %132 : vector<8x512xf32>
    %cst_65 = arith.constant 5.000000e-01 : f32
    %134 = vector.broadcast %cst_65 : f32 to vector<8x512xf32>
    %135 = arith.mulf %134, %133 : vector<8x512xf32>
    %136 = arith.mulf %133, %133 : vector<8x512xf32>
    %137 = arith.mulf %136, %133 : vector<8x512xf32>
    %cst_66 = arith.constant 4.471500e-02 : f32
    %138 = vector.broadcast %cst_66 : f32 to vector<8x512xf32>
    %139 = arith.mulf %138, %137 : vector<8x512xf32>
    %140 = arith.addf %133, %139 : vector<8x512xf32>
    %cst_67 = arith.constant 0.797884583 : f32
    %141 = vector.broadcast %cst_67 : f32 to vector<8x512xf32>
    %142 = arith.mulf %141, %140 : vector<8x512xf32>
    %143 = math.tanh %142 : vector<8x512xf32>
    %cst_68 = arith.constant 1.000000e+00 : f32
    %144 = vector.broadcast %cst_68 : f32 to vector<8x512xf32>
    %145 = arith.addf %144, %143 : vector<8x512xf32>
    %146 = arith.mulf %135, %145 : vector<8x512xf32>
    %147 = arith.truncf %146 : vector<8x512xf32> to vector<8x512xbf16>
    %c0_69 = arith.constant 0 : index
    %c0_70 = arith.constant 0 : index
    %148 = vector.load %arg6[%c0_69, %c0_70] : memref<512x128xbf16, #tpu.memory_space<vmem>>, vector<512x128xbf16>
    %cst_71 = arith.constant dense<0.000000e+00> : vector<8x128xf32>
    %149 = tpu.matmul %147, %148, %cst_71 {dimension_numbers = #tpu.dot_dimension_numbers<[1], [0], [0], [1], [0, 0, 1, 1], [], []>} : vector<8x512xbf16>, vector<512x128xbf16>, vector<8x128xf32> -> vector<8x128xf32>
    %c0_72 = arith.constant 0 : index
    %c0_73 = arith.constant 0 : index
    %150 = vector.load %arg7[%c0_72, %c0_73] : memref<1x128xf32, #tpu.memory_space<vmem>>, vector<1x128xf32>
    %151 = vector.broadcast %150 : vector<1x128xf32> to vector<8x128xf32>
    %152 = arith.addf %149, %151 : vector<8x128xf32>
    %c0_74 = arith.constant 0 : index
    %c0_75 = arith.constant 0 : index
    %153 = vector.load %arg8[%c0_74, %c0_75] : memref<8x128xf32, #tpu.memory_space<vmem>>, vector<8x128xf32>
    tpu.vector_store %arg8[%c0_74, %c0_75], %152 {strides = array<i32>} : memref<8x128xf32, #tpu.memory_space<vmem>>, vector<8x128xf32>,
    return
  }
  func.func @transform_0(%arg0: i32) -> (i32, i32) {
    %c0_i32 = arith.constant 0 : i32
    %c0_i32_0 = arith.constant 0 : i32
    return %arg0, %c0_i32 : i32, i32
  }
  func.func @transform_1(%arg0: i32) -> (i32, i32) {
    %c0_i32 = arith.constant 0 : i32
    %c0_i32_0 = arith.constant 0 : i32
    %c0_i32_1 = arith.constant 0 : i32
    return %c0_i32, %c0_i32_0 : i32, i32
  }
  func.func @transform_2(%arg0: i32) -> (i32, i32) {
    %c0_i32 = arith.constant 0 : i32
    %c0_i32_0 = arith.constant 0 : i32
    %c0_i32_1 = arith.constant 0 : i32
    return %c0_i32, %c0_i32_0 : i32, i32
  }
  func.func @transform_3(%arg0: i32) -> (i32, i32, i32) {
    %c0_i32 = arith.constant 0 : i32
    %c0_i32_0 = arith.constant 0 : i32
    %c0_i32_1 = arith.constant 0 : i32
    %c0_i32_2 = arith.constant 0 : i32
    return %c0_i32, %c0_i32_0, %c0_i32_1 : i32, i32, i32
  }
  func.func @transform_4(%arg0: i32) -> (i32, i32, i32) {
    %c0_i32 = arith.constant 0 : i32
    %c0_i32_0 = arith.constant 0 : i32
    %c0_i32_1 = arith.constant 0 : i32
    %c0_i32_2 = arith.constant 0 : i32
    return %c0_i32, %c0_i32_0, %c0_i32_1 : i32, i32, i32
  }
  func.func @transform_5(%arg0: i32) -> (i32, i32) {
    %c0_i32 = arith.constant 0 : i32
    %c0_i32_0 = arith.constant 0 : i32
    %c0_i32_1 = arith.constant 0 : i32
    return %c0_i32, %c0_i32_0 : i32, i32
  }
  func.func @transform_6(%arg0: i32) -> (i32, i32) {
    %c0_i32 = arith.constant 0 : i32
    %c0_i32_0 = arith.constant 0 : i32
    %c0_i32_1 = arith.constant 0 : i32
    return %c0_i32, %c0_i32_0 : i32, i32
  }
  func.func @transform_7(%arg0: i32) -> (i32, i32) {
    %c0_i32 = arith.constant 0 : i32
    %c0_i32_0 = arith.constant 0 : i32
    return %arg0, %c0_i32 : i32, i32
  }
}

module attributes {stable_mosaic.version = 11 : i64} {
  func.func @_fused_mlp_kernel(%arg0: i32, %arg1: memref<8x1xf32, #tpu.memory_space<vmem>>, %arg2: memref<1x512xf32, #tpu.memory_space<vmem>>, %arg3: memref<1x512xf32, #tpu.memory_space<vmem>>, %arg4: memref<6x512x512xbf16, #tpu.memory_space<vmem>>, %arg5: memref<6x1x512xf32, #tpu.memory_space<vmem>>, %arg6: memref<512x128xbf16, #tpu.memory_space<vmem>>, %arg7: memref<1x128xf32, #tpu.memory_space<vmem>>, %arg8: memref<8x128xf32, #tpu.memory_space<vmem>>) attributes {dimension_semantics = [#tpu.dimension_semantics<parallel>], iteration_bounds = array<i64: 1>, scalar_prefetch = 0 : i64, scratch_operands = 0 : i64, tpu.core_type = #tpu.core_type<tc>, window_params = [{transform_indices = @transform_0, window_bounds = array<i64: 8, 1>}, {pipeline_mode = #tpu.pipeline_mode<synchronous>, transform_indices = @transform_1, window_bounds = array<i64: 1, 512>}, {pipeline_mode = #tpu.pipeline_mode<synchronous>, transform_indices = @transform_2, window_bounds = array<i64: 1, 512>}, {pipeline_mode = #tpu.pipeline_mode<synchronous>, transform_indices = @transform_3, window_bounds = array<i64: 6, 512, 512>}, {pipeline_mode = #tpu.pipeline_mode<synchronous>, transform_indices = @transform_4, window_bounds = array<i64: 6, 1, 512>}, {pipeline_mode = #tpu.pipeline_mode<synchronous>, transform_indices = @transform_5, window_bounds = array<i64: 512, 128>}, {pipeline_mode = #tpu.pipeline_mode<synchronous>, transform_indices = @transform_6, window_bounds = array<i64: 1, 128>}, {transform_indices = @transform_7, window_bounds = array<i64: 8, 128>}]} {
    %c0 = arith.constant 0 : index
    %c0_0 = arith.constant 0 : index
    %0 = vector.load %arg1[%c0, %c0_0] : memref<8x1xf32, #tpu.memory_space<vmem>>, vector<8x1xf32>
    %c0_1 = arith.constant 0 : index
    %c0_2 = arith.constant 0 : index
    %1 = vector.load %arg2[%c0_1, %c0_2] : memref<1x512xf32, #tpu.memory_space<vmem>>, vector<1x512xf32>
    %2 = vector.broadcast %0 : vector<8x1xf32> to vector<8x512xf32>
    %3 = vector.broadcast %1 : vector<1x512xf32> to vector<8x512xf32>
    %4 = arith.mulf %2, %3 : vector<8x512xf32>
    %c0_3 = arith.constant 0 : index
    %c0_4 = arith.constant 0 : index
    %5 = vector.load %arg3[%c0_3, %c0_4] : memref<1x512xf32, #tpu.memory_space<vmem>>, vector<1x512xf32>
    %6 = vector.broadcast %5 : vector<1x512xf32> to vector<8x512xf32>
    %7 = arith.addf %4, %6 : vector<8x512xf32>
    %cst = arith.constant 5.000000e-01 : f32
    %8 = vector.broadcast %cst : f32 to vector<8x512xf32>
    %9 = arith.mulf %8, %7 : vector<8x512xf32>
    %10 = arith.mulf %7, %7 : vector<8x512xf32>
    %11 = arith.mulf %10, %7 : vector<8x512xf32>
    %cst_5 = arith.constant 4.471500e-02 : f32
    %12 = vector.broadcast %cst_5 : f32 to vector<8x512xf32>
    %13 = arith.mulf %12, %11 : vector<8x512xf32>
    %14 = arith.addf %7, %13 : vector<8x512xf32>
    %cst_6 = arith.constant 0.797884583 : f32
    %15 = vector.broadcast %cst_6 : f32 to vector<8x512xf32>
    %16 = arith.mulf %15, %14 : vector<8x512xf32>
    %17 = math.tanh %16 : vector<8x512xf32>
    %cst_7 = arith.constant 1.000000e+00 : f32
    %18 = vector.broadcast %cst_7 : f32 to vector<8x512xf32>
    %19 = arith.addf %18, %17 : vector<8x512xf32>
    %20 = arith.mulf %9, %19 : vector<8x512xf32>
    %21 = arith.truncf %20 : vector<8x512xf32> to vector<8x512xbf16>
    %c0_8 = arith.constant 0 : index
    %c0_9 = arith.constant 0 : index
    %c0_10 = arith.constant 0 : index
    %22 = vector.load %arg4[%c0_8, %c0_9, %c0_10] : memref<6x512x512xbf16, #tpu.memory_space<vmem>>, vector<1x512x512xbf16>
    %23 = vector.shape_cast %22 : vector<1x512x512xbf16> to vector<512x512xbf16>
    %cst_11 = arith.constant dense<0.000000e+00> : vector<8x512xf32>
    %24 = tpu.matmul %21, %23, %cst_11 {dimension_numbers = #tpu.dot_dimension_numbers<[1], [0], [0], [1], [0, 0, 1, 1], [], []>} : vector<8x512xbf16>, vector<512x512xbf16>, vector<8x512xf32> -> vector<8x512xf32>
    %c0_12 = arith.constant 0 : index
    %c0_13 = arith.constant 0 : index
    %c0_14 = arith.constant 0 : index
    %25 = vector.load %arg5[%c0_12, %c0_13, %c0_14] : memref<6x1x512xf32, #tpu.memory_space<vmem>>, vector<1x1x512xf32>
    %26 = vector.shape_cast %25 : vector<1x1x512xf32> to vector<1x512xf32>
    %27 = vector.broadcast %26 : vector<1x512xf32> to vector<8x512xf32>
    %28 = arith.addf %24, %27 : vector<8x512xf32>
    %cst_15 = arith.constant 5.000000e-01 : f32
    %29 = vector.broadcast %cst_15 : f32 to vector<8x512xf32>
    %30 = arith.mulf %29, %28 : vector<8x512xf32>
    %31 = arith.mulf %28, %28 : vector<8x512xf32>
    %32 = arith.mulf %31, %28 : vector<8x512xf32>
    %cst_16 = arith.constant 4.471500e-02 : f32
    %33 = vector.broadcast %cst_16 : f32 to vector<8x512xf32>
    %34 = arith.mulf %33, %32 : vector<8x512xf32>
    %35 = arith.addf %28, %34 : vector<8x512xf32>
    %cst_17 = arith.constant 0.797884583 : f32
    %36 = vector.broadcast %cst_17 : f32 to vector<8x512xf32>
    %37 = arith.mulf %36, %35 : vector<8x512xf32>
    %38 = math.tanh %37 : vector<8x512xf32>
    %cst_18 = arith.constant 1.000000e+00 : f32
    %39 = vector.broadcast %cst_18 : f32 to vector<8x512xf32>
    %40 = arith.addf %39, %38 : vector<8x512xf32>
    %41 = arith.mulf %30, %40 : vector<8x512xf32>
    %42 = arith.truncf %41 : vector<8x512xf32> to vector<8x512xbf16>
    %c1 = arith.constant 1 : index
    %c0_19 = arith.constant 0 : index
    %c0_20 = arith.constant 0 : index
    %43 = vector.load %arg4[%c1, %c0_19, %c0_20] : memref<6x512x512xbf16, #tpu.memory_space<vmem>>, vector<1x512x512xbf16>
    %44 = vector.shape_cast %43 : vector<1x512x512xbf16> to vector<512x512xbf16>
    %cst_21 = arith.constant dense<0.000000e+00> : vector<8x512xf32>
    %45 = tpu.matmul %42, %44, %cst_21 {dimension_numbers = #tpu.dot_dimension_numbers<[1], [0], [0], [1], [0, 0, 1, 1], [], []>} : vector<8x512xbf16>, vector<512x512xbf16>, vector<8x512xf32> -> vector<8x512xf32>
    %c1_22 = arith.constant 1 : index
    %c0_23 = arith.constant 0 : index
    %c0_24 = arith.constant 0 : index
    %46 = vector.load %arg5[%c1_22, %c0_23, %c0_24] : memref<6x1x512xf32, #tpu.memory_space<vmem>>, vector<1x1x512xf32>
    %47 = vector.shape_cast %46 : vector<1x1x512xf32> to vector<1x512xf32>
    %48 = vector.broadcast %47 : vector<1x512xf32> to vector<8x512xf32>
    %49 = arith.addf %45, %48 : vector<8x512xf32>
    %cst_25 = arith.constant 5.000000e-01 : f32
    %50 = vector.broadcast %cst_25 : f32 to vector<8x512xf32>
    %51 = arith.mulf %50, %49 : vector<8x512xf32>
    %52 = arith.mulf %49, %49 : vector<8x512xf32>
    %53 = arith.mulf %52, %49 : vector<8x512xf32>
    %cst_26 = arith.constant 4.471500e-02 : f32
    %54 = vector.broadcast %cst_26 : f32 to vector<8x512xf32>
    %55 = arith.mulf %54, %53 : vector<8x512xf32>
    %56 = arith.addf %49, %55 : vector<8x512xf32>
    %cst_27 = arith.constant 0.797884583 : f32
    %57 = vector.broadcast %cst_27 : f32 to vector<8x512xf32>
    %58 = arith.mulf %57, %56 : vector<8x512xf32>
    %59 = math.tanh %58 : vector<8x512xf32>
    %cst_28 = arith.constant 1.000000e+00 : f32
    %60 = vector.broadcast %cst_28 : f32 to vector<8x512xf32>
    %61 = arith.addf %60, %59 : vector<8x512xf32>
    %62 = arith.mulf %51, %61 : vector<8x512xf32>
    %63 = arith.truncf %62 : vector<8x512xf32> to vector<8x512xbf16>
    %c2 = arith.constant 2 : index
    %c0_29 = arith.constant 0 : index
    %c0_30 = arith.constant 0 : index
    %64 = vector.load %arg4[%c2, %c0_29, %c0_30] : memref<6x512x512xbf16, #tpu.memory_space<vmem>>, vector<1x512x512xbf16>
    %65 = vector.shape_cast %64 : vector<1x512x512xbf16> to vector<512x512xbf16>
    %cst_31 = arith.constant dense<0.000000e+00> : vector<8x512xf32>
    %66 = tpu.matmul %63, %65, %cst_31 {dimension_numbers = #tpu.dot_dimension_numbers<[1], [0], [0], [1], [0, 0, 1, 1], [], []>} : vector<8x512xbf16>, vector<512x512xbf16>, vector<8x512xf32> -> vector<8x512xf32>
    %c2_32 = arith.constant 2 : index
    %c0_33 = arith.constant 0 : index
    %c0_34 = arith.constant 0 : index
    %67 = vector.load %arg5[%c2_32, %c0_33, %c0_34] : memref<6x1x512xf32, #tpu.memory_space<vmem>>, vector<1x1x512xf32>
    %68 = vector.shape_cast %67 : vector<1x1x512xf32> to vector<1x512xf32>
    %69 = vector.broadcast %68 : vector<1x512xf32> to vector<8x512xf32>
    %70 = arith.addf %66, %69 : vector<8x512xf32>
    %cst_35 = arith.constant 5.000000e-01 : f32
    %71 = vector.broadcast %cst_35 : f32 to vector<8x512xf32>
    %72 = arith.mulf %71, %70 : vector<8x512xf32>
    %73 = arith.mulf %70, %70 : vector<8x512xf32>
    %74 = arith.mulf %73, %70 : vector<8x512xf32>
    %cst_36 = arith.constant 4.471500e-02 : f32
    %75 = vector.broadcast %cst_36 : f32 to vector<8x512xf32>
    %76 = arith.mulf %75, %74 : vector<8x512xf32>
    %77 = arith.addf %70, %76 : vector<8x512xf32>
    %cst_37 = arith.constant 0.797884583 : f32
    %78 = vector.broadcast %cst_37 : f32 to vector<8x512xf32>
    %79 = arith.mulf %78, %77 : vector<8x512xf32>
    %80 = math.tanh %79 : vector<8x512xf32>
    %cst_38 = arith.constant 1.000000e+00 : f32
    %81 = vector.broadcast %cst_38 : f32 to vector<8x512xf32>
    %82 = arith.addf %81, %80 : vector<8x512xf32>
    %83 = arith.mulf %72, %82 : vector<8x512xf32>
    %84 = arith.truncf %83 : vector<8x512xf32> to vector<8x512xbf16>
    %c3 = arith.constant 3 : index
    %c0_39 = arith.constant 0 : index
    %c0_40 = arith.constant 0 : index
    %85 = vector.load %arg4[%c3, %c0_39, %c0_40] : memref<6x512x512xbf16, #tpu.memory_space<vmem>>, vector<1x512x512xbf16>
    %86 = vector.shape_cast %85 : vector<1x512x512xbf16> to vector<512x512xbf16>
    %cst_41 = arith.constant dense<0.000000e+00> : vector<8x512xf32>
    %87 = tpu.matmul %84, %86, %cst_41 {dimension_numbers = #tpu.dot_dimension_numbers<[1], [0], [0], [1], [0, 0, 1, 1], [], []>} : vector<8x512xbf16>, vector<512x512xbf16>, vector<8x512xf32> -> vector<8x512xf32>
    %c3_42 = arith.constant 3 : index
    %c0_43 = arith.constant 0 : index
    %c0_44 = arith.constant 0 : index
    %88 = vector.load %arg5[%c3_42, %c0_43, %c0_44] : memref<6x1x512xf32, #tpu.memory_space<vmem>>, vector<1x1x512xf32>
    %89 = vector.shape_cast %88 : vector<1x1x512xf32> to vector<1x512xf32>
    %90 = vector.broadcast %89 : vector<1x512xf32> to vector<8x512xf32>
    %91 = arith.addf %87, %90 : vector<8x512xf32>
    %cst_45 = arith.constant 5.000000e-01 : f32
    %92 = vector.broadcast %cst_45 : f32 to vector<8x512xf32>
    %93 = arith.mulf %92, %91 : vector<8x512xf32>
    %94 = arith.mulf %91, %91 : vector<8x512xf32>
    %95 = arith.mulf %94, %91 : vector<8x512xf32>
    %cst_46 = arith.constant 4.471500e-02 : f32
    %96 = vector.broadcast %cst_46 : f32 to vector<8x512xf32>
    %97 = arith.mulf %96, %95 : vector<8x512xf32>
    %98 = arith.addf %91, %97 : vector<8x512xf32>
    %cst_47 = arith.constant 0.797884583 : f32
    %99 = vector.broadcast %cst_47 : f32 to vector<8x512xf32>
    %100 = arith.mulf %99, %98 : vector<8x512xf32>
    %101 = math.tanh %100 : vector<8x512xf32>
    %cst_48 = arith.constant 1.000000e+00 : f32
    %102 = vector.broadcast %cst_48 : f32 to vector<8x512xf32>
    %103 = arith.addf %102, %101 : vector<8x512xf32>
    %104 = arith.mulf %93, %103 : vector<8x512xf32>
    %105 = arith.truncf %104 : vector<8x512xf32> to vector<8x512xbf16>
    %c4 = arith.constant 4 : index
    %c0_49 = arith.constant 0 : index
    %c0_50 = arith.constant 0 : index
    %106 = vector.load %arg4[%c4, %c0_49, %c0_50] : memref<6x512x512xbf16, #tpu.memory_space<vmem>>, vector<1x512x512xbf16>
    %107 = vector.shape_cast %106 : vector<1x512x512xbf16> to vector<512x512xbf16>
    %cst_51 = arith.constant dense<0.000000e+00> : vector<8x512xf32>
    %108 = tpu.matmul %105, %107, %cst_51 {dimension_numbers = #tpu.dot_dimension_numbers<[1], [0], [0], [1], [0, 0, 1, 1], [], []>} : vector<8x512xbf16>, vector<512x512xbf16>, vector<8x512xf32> -> vector<8x512xf32>
    %c4_52 = arith.constant 4 : index
    %c0_53 = arith.constant 0 : index
    %c0_54 = arith.constant 0 : index
    %109 = vector.load %arg5[%c4_52, %c0_53, %c0_54] : memref<6x1x512xf32, #tpu.memory_space<vmem>>, vector<1x1x512xf32>
    %110 = vector.shape_cast %109 : vector<1x1x512xf32> to vector<1x512xf32>
    %111 = vector.broadcast %110 : vector<1x512xf32> to vector<8x512xf32>
    %112 = arith.addf %108, %111 : vector<8x512xf32>
    %cst_55 = arith.constant 5.000000e-01 : f32
    %113 = vector.broadcast %cst_55 : f32 to vector<8x512xf32>
    %114 = arith.mulf %113, %112 : vector<8x512xf32>
    %115 = arith.mulf %112, %112 : vector<8x512xf32>
    %116 = arith.mulf %115, %112 : vector<8x512xf32>
    %cst_56 = arith.constant 4.471500e-02 : f32
    %117 = vector.broadcast %cst_56 : f32 to vector<8x512xf32>
    %118 = arith.mulf %117, %116 : vector<8x512xf32>
    %119 = arith.addf %112, %118 : vector<8x512xf32>
    %cst_57 = arith.constant 0.797884583 : f32
    %120 = vector.broadcast %cst_57 : f32 to vector<8x512xf32>
    %121 = arith.mulf %120, %119 : vector<8x512xf32>
    %122 = math.tanh %121 : vector<8x512xf32>
    %cst_58 = arith.constant 1.000000e+00 : f32
    %123 = vector.broadcast %cst_58 : f32 to vector<8x512xf32>
    %124 = arith.addf %123, %122 : vector<8x512xf32>
    %125 = arith.mulf %114, %124 : vector<8x512xf32>
    %126 = arith.truncf %125 : vector<8x512xf32> to vector<8x512xbf16>
    %c5 = arith.constant 5 : index
    %c0_59 = arith.constant 0 : index
    %c0_60 = arith.constant 0 : index
    %127 = vector.load %arg4[%c5, %c0_59, %c0_60] : memref<6x512x512xbf16, #tpu.memory_space<vmem>>, vector<1x512x512xbf16>
    %128 = vector.shape_cast %127 : vector<1x512x512xbf16> to vector<512x512xbf16>
    %cst_61 = arith.constant dense<0.000000e+00> : vector<8x512xf32>
    %129 = tpu.matmul %126, %128, %cst_61 {dimension_numbers = #tpu.dot_dimension_numbers<[1], [0], [0], [1], [0, 0, 1, 1], [], []>} : vector<8x512xbf16>, vector<512x512xbf16>, vector<8x512xf32> -> vector<8x512xf32>
    %c5_62 = arith.constant 5 : index
    %c0_63 = arith.constant 0 : index
    %c0_64 = arith.constant 0 : index
    %130 = vector.load %arg5[%c5_62, %c0_63, %c0_64] : memref<6x1x512xf32, #tpu.memory_space<vmem>>, vector<1x1x512xf32>
    %131 = vector.shape_cast %130 : vector<1x1x512xf32> to vector<1x512xf32>
    %132 = vector.broadcast %131 : vector<1x512xf32> to vector<8x512xf32>
    %133 = arith.addf %129, %132 : vector<8x512xf32>
    %cst_65 = arith.constant 5.000000e-01 : f32
    %134 = vector.broadcast %cst_65 : f32 to vector<8x512xf32>
    %135 = arith.mulf %134, %133 : vector<8x512xf32>
    %136 = arith.mulf %133, %133 : vector<8x512xf32>
    %137 = arith.mulf %136, %133 : vector<8x512xf32>
    %cst_66 = arith.constant 4.471500e-02 : f32
    %138 = vector.broadcast %cst_66 : f32 to vector<8x512xf32>
    %139 = arith.mulf %138, %137 : vector<8x512xf32>
    %140 = arith.addf %133, %139 : vector<8x512xf32>
    %cst_67 = arith.constant 0.797884583 : f32
    %141 = vector.broadcast %cst_67 : f32 to vector<8x512xf32>
    %142 = arith.mulf %141, %140 : vector<8x512xf32>
    %143 = math.tanh %142 : vector<8x512xf32>
    %cst_68 = arith.constant 1.000000e+00 : f32
    %144 = vector.broadcast %cst_68 : f32 to vector<8x512xf32>
    %145 = arith.addf %144, %143 : vector<8x512xf32>
    %146 = arith.mulf %135, %145 : vector<8x512xf32>
    %147 = arith.truncf %146 : vector<8x512xf32> to vector<8x512xbf16>
    %c0_69 = arith.constant 0 : index
    %c0_70 = arith.constant 0 : index
    %148 = vector.load %arg6[%c0_69, %c0_70] : memref<512x128xbf16, #tpu.memory_space<vmem>>, vector<512x128xbf16>
    %cst_71 = arith.constant dense<0.000000e+00> : vector<8x128xf32>
    %149 = tpu.matmul %147, %148, %cst_71 {dimension_numbers = #tpu.dot_dimension_numbers<[1], [0], [0], [1], [0, 0, 1, 1], [], []>} : vector<8x512xbf16>, vector<512x128xbf16>, vector<8x128xf32> -> vector<8x128xf32>
    %c0_72 = arith.constant 0 : index
    %c0_73 = arith.constant 0 : index
    %150 = vector.load %arg7[%c0_72, %c0_73] : memref<1x128xf32, #tpu.memory_space<vmem>>, vector<1x128xf32>
    %151 = vector.broadcast %150 : vector<1x128xf32> to vector<8x128xf32>
    %152 = arith.addf %149, %151 : vector<8x128xf32>
    %c0_74 = arith.constant 0 : index
    %c0_75 = arith.constant 0 : index
    %153 = vector.load %arg8[%c0_74, %c0_75] : memref<8x128xf32, #tpu.memory_space<vmem>>, vector<8x128xf32>
    tpu.vector_store %arg8[%c0_74, %c0_75], %152 {strides = array<i32>} : memref<8x128xf32, #tpu.memory_space<vmem>>, vector<8x128xf32>,
    return
  }
  func.func @transform_0(%arg0: i32) -> (i32, i32) {
    %c0_i32 = arith.constant 0 : i32
    %c0_i32_0 = arith.constant 0 : i32
    return %arg0, %c0_i32 : i32, i32
  }
  func.func @transform_1(%arg0: i32) -> (i32, i32) {
    %c0_i32 = arith.constant 0 : i32
    %c0_i32_0 = arith.constant 0 : i32
    %c0_i32_1 = arith.constant 0 : i32
    return %c0_i32, %c0_i32_0 : i32, i32
  }
  func.func @transform_2(%arg0: i32) -> (i32, i32) {
    %c0_i32 = arith.constant 0 : i32
    %c0_i32_0 = arith.constant 0 : i32
    %c0_i32_1 = arith.constant 0 : i32
    return %c0_i32, %c0_i32_0 : i32, i32
  }
  func.func @transform_3(%arg0: i32) -> (i32, i32, i32) {
    %c0_i32 = arith.constant 0 : i32
    %c0_i32_0 = arith.constant 0 : i32
    %c0_i32_1 = arith.constant 0 : i32
    %c0_i32_2 = arith.constant 0 : i32
    return %c0_i32, %c0_i32_0, %c0_i32_1 : i32, i32, i32
  }
  func.func @transform_4(%arg0: i32) -> (i32, i32, i32) {
    %c0_i32 = arith.constant 0 : i32
    %c0_i32_0 = arith.constant 0 : i32
    %c0_i32_1 = arith.constant 0 : i32
    %c0_i32_2 = arith.constant 0 : i32
    return %c0_i32, %c0_i32_0, %c0_i32_1 : i32, i32, i32
  }
  func.func @transform_5(%arg0: i32) -> (i32, i32) {
    %c0_i32 = arith.constant 0 : i32
    %c0_i32_0 = arith.constant 0 : i32
    %c0_i32_1 = arith.constant 0 : i32
    return %c0_i32, %c0_i32_0 : i32, i32
  }
  func.func @transform_6(%arg0: i32) -> (i32, i32) {
    %c0_i32 = arith.constant 0 : i32
    %c0_i32_0 = arith.constant 0 : i32
    %c0_i32_1 = arith.constant 0 : i32
    return %c0_i32, %c0_i32_0 : i32, i32
  }
  func.func @transform_7(%arg0: i32) -> (i32, i32) {
    %c0_i32 = arith.constant 0 : i32
    %c0_i32_0 = arith.constant 0 : i32
    return %arg0, %c0_i32 : i32, i32
  }
}

</mosaic_0001>

<bundles_post_ra>
// kernel: tpu_custom_call.1
= control target key start
LH: loop header
LB: loop body
LE: loop exit
PB: predicated region body
PF: predicated region fallthrough
CT: control target
= control target key end

     0   :  { %12 = vsyncpa [#allocation3], 0  ;;  %s9158_s0 = inlined_call_operand.vmem [shape: f32[8,1], index: 0, kind: input, shape index: {}]   ;;  %s9159_s1 = inlined_call_operand.hbm [shape: f32[1,512], index: 1, kind: input, shape index: {}]   ;;  %s9160_s2 = inlined_call_operand.hbm [shape: f32[1,512], index: 2, kind: input, shape index: {}]   ;;  %s9161_s3 = inlined_call_operand.hbm [shape: bf16[6,512,512], index: 3, kind: input, shape index: {}]   ;;  %s9162_s4 = inlined_call_operand.hbm [shape: f32[6,1,512], index: 4, kind: input, shape index: {}]   ;;  %s9163_s5 = inlined_call_operand.hbm [shape: bf16[512,128], index: 5, kind: input, shape index: {}]   ;;  %s9164_s6 = inlined_call_operand.hbm [shape: f32[1,128], index: 6, kind: input, shape index: {}]   ;;  %s9165_s7 = inlined_call_operand.hbm [shape: f32[8,128], index: 7, kind: output, shape index: {}]  }
   0x1   :  { %13 = vsyncpa [#allocation6], 0 }
   0x2   :  { %14 = vsyncpa [#allocation9], 0 }
   0x3   :  { %15 = vsyncpa [#allocation12], 0 }
   0x4   :  { %16 = vsyncpa [#allocation4], 0  ;;  %s8872_s24 = smov [#allocation5]   ;;  %s8873_s26 = smov [#allocation8]  }
   0x5   :  { %s35_s25 = sshll.u32 %s8872_s24, 4  ;;  %s56_s27 = sshll.u32 %s8873_s26, 4  ;;  %s36_s25 = int_to_ptr.vmem [resolvable:$true] %s35_s25  ;;  %s8924_s27 = int_to_ptr.vmem [resolvable:$true] %s56_s27 }
   0x6   :  { %s8708_s30 = scalar_lea.hbm %s9160_s2, 64 }
   0x7   :  { %p8709_p0 = scmp.ne.s32.totalorder %s9160_s2, %s8708_s30  ;;  %p8712_p1 = scmp.lt.u32.totalorder %s8708_s30, %s9160_s2 }
   0x9   :  { %p8714_p2 = pnand %p8712_p1, %p8709_p0 }
   0xb   :  { %8717 = shalt.err (!%p8714_p2)
}
   0xc   :  { %s8718_s12 = scalar_lea.vmem %s36_s25, 64  ;;  %p8723_p4 = scmp.lt.s32.totalorder %s36_s25, %s36_s25 }
   0xd   :  { %p8719_p3 = scmp.ne.s32.totalorder %s36_s25, %s8718_s12  ;;  %p8724_p5 = scmp.lt.s32.totalorder %s8718_s12, %s8718_s12 }
   0xf   :  { %p8725_p6 = por %p8724_p5, %p8723_p4 }
  0x11   :  { %p8726_p7 = pnand %p8725_p6, %p8719_p3 }
  0x13   :  { %8729 = shalt.err (!%p8726_p7)
}
  0x14   :  { %38 = dma.hbm_to_vmem [thread:$0]  %s9160_s2, 64, %s36_s25, [#allocation6]  }
  0x15   :  { %s8730_s17 = scalar_lea.hbm %s9162_s4, 384 }
  0x16   :  { %p8731_p8 = scmp.ne.s32.totalorder %s9162_s4, %s8730_s17  ;;  %p8734_p9 = scmp.lt.u32.totalorder %s8730_s17, %s9162_s4 }
  0x18   :  { %p8736_p10 = pnand %p8734_p9, %p8731_p8 }
  0x1a   :  { %8739 = shalt.err (!%p8736_p10)
}
  0x1b   :  { %s8740_s22 = scalar_lea.vmem %s8924_s27, 384  ;;  %p8745_p12 = scmp.lt.s32.totalorder %s8924_s27, %s8924_s27 }
  0x1c   :  { %p8741_p11 = scmp.ne.s32.totalorder %s8924_s27, %s8740_s22  ;;  %p8746_p13 = scmp.lt.s32.totalorder %s8740_s22, %s8740_s22 }
  0x1e   :  { %p8747_p0 = por %p8746_p13, %p8745_p12 }
  0x20   :  { %p8748_p1 = pnand %p8747_p0, %p8741_p11 }
  0x22   :  { %8751 = shalt.err (!%p8748_p1)
}
  0x23   :  { %s8874_s2 = smov 64   ;;  %s8875_s23 = smov 4  }
  0x24   :  { %62 = dma.hbm_to_vmem [thread:$0]  %s9162_s4, 384, %s8924_s27, [#allocation9], %s8874_s2, %s8874_s2, %s8875_s23  }
  0x25   :  { %s8876_s26 = smov [#allocation2]   ;;  %s8877_s29 = smov [#allocation7]  }
  0x26   :  { %s25_s28 = sshll.u32 %s8876_s26, 4  ;;  %s44_s30 = sshll.u32 %s8877_s29, 4  ;;  %s26_s28 = int_to_ptr.vmem [resolvable:$true] %s25_s28  ;;  %s8958_s30 = int_to_ptr.vmem [resolvable:$true] %s44_s30 }
  0x27   :  { %s8752_s10 = scalar_lea.hbm %s9159_s1, 64 }
  0x28   :  { %p8753_p2 = scmp.ne.s32.totalorder %s9159_s1, %s8752_s10  ;;  %p8756_p3 = scmp.lt.u32.totalorder %s8752_s10, %s9159_s1 }
  0x2a   :  { %p8758_p4 = pnand %p8756_p3, %p8753_p2 }
  0x2c   :  { %8761 = shalt.err (!%p8758_p4)
}
  0x2d   :  { %s8762_s4 = scalar_lea.vmem %s26_s28, 64  ;;  %p8767_p6 = scmp.lt.s32.totalorder %s26_s28, %s26_s28 }
  0x2e   :  { %p8763_p5 = scmp.ne.s32.totalorder %s26_s28, %s8762_s4  ;;  %p8768_p7 = scmp.lt.s32.totalorder %s8762_s4, %s8762_s4 }
  0x30   :  { %p8769_p8 = por %p8768_p7, %p8767_p6 }
  0x32   :  { %p8770_p9 = pnand %p8769_p8, %p8763_p5 }
  0x34   :  { %8773 = shalt.err (!%p8770_p9)
}
  0x35   :  { %28 = dma.hbm_to_vmem [thread:$0]  %s9159_s1, 64, %s26_s28, [#allocation3]  }
  0x36   :  { %s8774_s18 = scalar_lea.hbm %s9161_s3, 98304 }
  0x37   :  { %p8775_p10 = scmp.ne.s32.totalorder %s9161_s3, %s8774_s18  ;;  %p8778_p11 = scmp.lt.u32.totalorder %s8774_s18, %s9161_s3 }
  0x39   :  { %p8780_p12 = pnand %p8778_p11, %p8775_p10 }
  0x3b   :  { %8783 = shalt.err (!%p8780_p12)
}
  0x3c   :  { %s8784_s24 = scalar_lea.vmem %s8958_s30, 98304  ;;  %p8789_p0 = scmp.lt.s32.totalorder %s8958_s30, %s8958_s30 }
  0x3d   :  { %p8785_p13 = scmp.ne.s32.totalorder %s8958_s30, %s8784_s24  ;;  %p8790_p1 = scmp.lt.s32.totalorder %s8784_s24, %s8784_s24 }
  0x3f   :  { %p8791_p2 = por %p8790_p1, %p8789_p0 }
  0x41   :  { %p8792_p3 = pnand %p8791_p2, %p8785_p13 }
  0x43   :  { %8795 = shalt.err (!%p8792_p3)
}
  0x44   :  { %s8878_s1 = smov 256   ;;  %s8879_s25 = smov 16  }
  0x45   :  { %50 = dma.hbm_to_vmem [thread:$0]  %s9161_s3, 98304, %s8958_s30, [#allocation6], %s8878_s1, %s8878_s1, %s8879_s25  }
  0x46   :  { %s8880_s29 = smov [#allocation10]   ;;  %s8881_s9 = smov [#allocation11]  }
  0x47   :  { %s68_s8 = sshll.u32 %s8880_s29, 4  ;;  %s81_s10 = sshll.u32 %s8881_s9, 4  ;;  %s69_s8 = int_to_ptr.vmem [resolvable:$true] %s68_s8  ;;  %s82_s10 = int_to_ptr.vmem [resolvable:$true] %s81_s10 }
  0x48   :  { %s8796_s13 = scalar_lea.hbm %s9163_s5, 4096 }
  0x49   :  { %p8797_p4 = scmp.ne.s32.totalorder %s9163_s5, %s8796_s13  ;;  %p8800_p5 = scmp.lt.u32.totalorder %s8796_s13, %s9163_s5 }
  0x4b   :  { %p8802_p6 = pnand %p8800_p5, %p8797_p4 }
  0x4d   :  { %8805 = shalt.err (!%p8802_p6)
}
  0x4e   :  { %s8806_s3 = scalar_lea.vmem %s69_s8, 4096  ;;  %p8811_p8 = scmp.lt.s32.totalorder %s69_s8, %s69_s8 }
  0x4f   :  { %p8807_p7 = scmp.ne.s32.totalorder %s69_s8, %s8806_s3  ;;  %p8812_p9 = scmp.lt.s32.totalorder %s8806_s3, %s8806_s3 }
  0x51   :  { %p8813_p10 = por %p8812_p9, %p8811_p8 }
  0x53   :  { %p8814_p11 = pnand %p8813_p10, %p8807_p7 }
  0x55   :  { %8817 = shalt.err (!%p8814_p11)
}
  0x56   :  { %74 = dma.hbm_to_vmem [thread:$0]  %s9163_s5, 4096, %s69_s8, [#allocation9], %s8874_s2, %s8874_s2, %s8875_s23  }
  0x57   :  { %s8818_s19 = scalar_lea.hbm %s9164_s6, 16 }
  0x58   :  { %p8819_p12 = scmp.ne.s32.totalorder %s9164_s6, %s8818_s19  ;;  %p8822_p13 = scmp.lt.u32.totalorder %s8818_s19, %s9164_s6 }
  0x5a   :  { %p8824_p0 = pnand %p8822_p13, %p8819_p12 }
  0x5c   :  { %8827 = shalt.err (!%p8824_p0)
}
  0x5d   :  { %s8828_s1 = scalar_lea.vmem %s82_s10, 16  ;;  %s8832_s25 = scalar_lea.vmem %s82_s10, 32 }
  0x5e   :  { %p8829_p1 = scmp.ne.s32.totalorder %s82_s10, %s8828_s1  ;;  %p8833_p2 = scmp.lt.s32.totalorder %s82_s10, %s82_s10 }
  0x5f   :  { %p8834_p3 = scmp.lt.s32.totalorder %s8832_s25, %s8828_s1 }
  0x61   :  { %p8835_p4 = por %p8834_p3, %p8833_p2 }
  0x63   :  { %p8836_p5 = pnand %p8835_p4, %p8829_p1 }
  0x65   :  { %8839 = shalt.err (!%p8836_p5)
}
  0x66   :  { %84 = dma.hbm_to_vmem [thread:$0]  %s9164_s6, 16, %s82_s10, [#allocation12]  }
  0x67   :  { %8862 = dma.done.wait [#allocation3], 64  }
  0x68   :  { %8863 = vsyncadd [#allocation3], 4294967232 }
  0x69   :  { %8864 = dma.done.wait [#allocation6], 98368  }
  0x6a   :  { %8865 = vsyncadd [#allocation6], 4294868928 }
  0x6b   :  { %8866 = dma.done.wait [#allocation9], 4480  }
  0x6c   :  { %8867 = vsyncadd [#allocation9], 4294962816 }
  0x6d   :  { %8868 = dma.done.wait [#allocation12], 16  }
  0x6e   :  { %8869 = vsyncadd [#allocation12], 4294967280  ;;  %v8882_v0 = vmov 0   ;;  %v104_v1 = vld [vmem:[%s9158_s0] sm:$0xff]  ;;  %v7468_v2 = vld [vmem:[#allocation7 + $0x4] ss:$16 sps:$4 sm:$0xff]  }
  0x6f   :  { %7467 = vset.pattern.permute.xlu0 %v8882_v0  ;;  %v7470_v3 = vld [vmem:[#allocation7 + $0xc] ss:$16 sps:$4 sm:$0xff]   ;;  %v7472_v4 = vld [vmem:[#allocation7] ss:$16 sps:$4 sm:$0xff]   ;;  %v7473_v5 = vld [vmem:[#allocation7 + $0x8] ss:$16 sps:$4 sm:$0xff]   ;;  %992 = vmatprep.subr.bf16.mxu0 %v7468_v2 }
  0x70   :  { %108 = vperm.xlu0 %7467, %v104_v1   ;;  %v7474_v6 = vld [vmem:[#allocation7 + $0x24] ss:$16 sps:$4 sm:$0xff]   ;;  %1074 = vmatprep.subr.bf16.mxu1 %v7470_v3  ;;  %v7476_v7 = vld [vmem:[#allocation7 + $0x2c] ss:$16 sps:$4 sm:$0xff]   ;;  %v7478_v8 = vld [vmem:[#allocation7 + $0x20] ss:$16 sps:$4 sm:$0xff]  }
  0x71   :  { %993 = vmatpush1.bf16.msra.mxu0 %v7472_v4  ;;  %1075 = vmatpush1.bf16.msra.mxu1 %v7473_v5  ;;  %v7479_v9 = vld [vmem:[#allocation7 + $0x28] ss:$16 sps:$4 sm:$0xff]   ;;  %v7480_v10 = vld [vmem:[#allocation7 + $0x44] ss:$16 sps:$4 sm:$0xff]   ;;  %v7482_v11 = vld [vmem:[#allocation7 + $0x4c] ss:$16 sps:$4 sm:$0xff]   ;;  %v112_v4 = vlaneseq }
  0x72   :  { %994 = vmatprep.subr.bf16.mxu0 %v7474_v6  ;;  %1076 = vmatprep.subr.bf16.mxu1 %v7476_v7  ;;  %v7484_v12 = vld [vmem:[#allocation7 + $0x40] ss:$16 sps:$4 sm:$0xff]   ;;  %v7485_v13 = vld [vmem:[#allocation7 + $0x48] ss:$16 sps:$4 sm:$0xff]   ;;  %v7486_v14 = vld [vmem:[#allocation7 + $0x64] ss:$16 sps:$4 sm:$0xff]  }
  0x73   :  { %v7488_v15 = vld [vmem:[#allocation7 + $0x6c] ss:$16 sps:$4 sm:$0xff]   ;;  %v7490_v16 = vld [vmem:[#allocation7 + $0x60] ss:$16 sps:$4 sm:$0xff]   ;;  %v7491_v17 = vld [vmem:[#allocation7 + $0x68] ss:$16 sps:$4 sm:$0xff]  }
  0x74   :  { %v7492_v18 = vld [vmem:[#allocation7 + $0x84] ss:$16 sps:$4 sm:$0xff]   ;;  %v7494_v19 = vld [vmem:[#allocation7 + $0x8c] ss:$16 sps:$4 sm:$0xff]   ;;  %v7496_v20 = vld [vmem:[#allocation7 + $0x80] ss:$16 sps:$4 sm:$0xff]  }
  0x75   :  { %995 = vmatpush1.bf16.msra.mxu0 %v7478_v8  ;;  %1077 = vmatpush1.bf16.msra.mxu1 %v7479_v9  ;;  %v7497_v21 = vld [vmem:[#allocation7 + $0x88] ss:$16 sps:$4 sm:$0xff]   ;;  %v7498_v22 = vld [vmem:[#allocation7 + $0xa4] ss:$16 sps:$4 sm:$0xff]   ;;  %v7500_v23 = vld [vmem:[#allocation7 + $0xac] ss:$16 sps:$4 sm:$0xff]  }
  0x76   :  { %996 = vmatprep.subr.bf16.mxu0 %v7480_v10  ;;  %1078 = vmatprep.subr.bf16.mxu1 %v7482_v11  ;;  %v7502_v24 = vld [vmem:[#allocation7 + $0xa0] ss:$16 sps:$4 sm:$0xff]   ;;  %v7503_v25 = vld [vmem:[#allocation7 + $0xa8] ss:$16 sps:$4 sm:$0xff]   ;;  %v7504_v26 = vld [vmem:[#allocation7 + $0xc4] ss:$16 sps:$4 sm:$0xff]  }
  0x77   :  { %v7506_v27 = vld [vmem:[#allocation7 + $0xcc] ss:$16 sps:$4 sm:$0xff]   ;;  %v7508_v28 = vld [vmem:[#allocation7 + $0xc0] ss:$16 sps:$4 sm:$0xff]   ;;  %v7509_v29 = vld [vmem:[#allocation7 + $0xc8] ss:$16 sps:$4 sm:$0xff]  }
  0x78   :  { %v7510_v30 = vld [vmem:[#allocation7 + $0xe4] ss:$16 sps:$4 sm:$0xff]   ;;  %v7512_v31 = vld [vmem:[#allocation7 + $0xec] ss:$16 sps:$4 sm:$0xff]   ;;  %v7514_v32 = vld [vmem:[#allocation7 + $0xe0] ss:$16 sps:$4 sm:$0xff]  }
  0x79   :  { %997 = vmatpush1.bf16.msra.mxu0 %v7484_v12  ;;  %1079 = vmatpush1.bf16.msra.mxu1 %v7485_v13  ;;  %v7515_v33 = vld [vmem:[#allocation7 + $0xe8] ss:$16 sps:$4 sm:$0xff]   ;;  %v7516_v34 = vld [vmem:[#allocation7 + $0x104] ss:$16 sps:$4 sm:$0xff]   ;;  %v7518_v35 = vld [vmem:[#allocation7 + $0x10c] ss:$16 sps:$4 sm:$0xff]  }
  0x7a   :  { %998 = vmatprep.subr.bf16.mxu0 %v7486_v14  ;;  %1080 = vmatprep.subr.bf16.mxu1 %v7488_v15  ;;  %v7520_v36 = vld [vmem:[#allocation7 + $0x100] ss:$16 sps:$4 sm:$0xff]   ;;  %v7521_v37 = vld [vmem:[#allocation7 + $0x108] ss:$16 sps:$4 sm:$0xff]   ;;  %v7522_v38 = vld [vmem:[#allocation7 + $0x124] ss:$16 sps:$4 sm:$0xff]  }
  0x7b   :  { %v7524_v39 = vld [vmem:[#allocation7 + $0x12c] ss:$16 sps:$4 sm:$0xff]   ;;  %v7526_v40 = vld [vmem:[#allocation7 + $0x120] ss:$16 sps:$4 sm:$0xff]   ;;  %v7527_v41 = vld [vmem:[#allocation7 + $0x128] ss:$16 sps:$4 sm:$0xff]  }
  0x7c   :  { %v7528_v42 = vld [vmem:[#allocation7 + $0x144] ss:$16 sps:$4 sm:$0xff]   ;;  %v7530_v43 = vld [vmem:[#allocation7 + $0x14c] ss:$16 sps:$4 sm:$0xff]   ;;  %v7532_v44 = vld [vmem:[#allocation7 + $0x140] ss:$16 sps:$4 sm:$0xff]  }
  0x7d   :  { %999 = vmatpush1.bf16.msra.mxu0 %v7490_v16  ;;  %1081 = vmatpush1.bf16.msra.mxu1 %v7491_v17  ;;  %v7533_v45 = vld [vmem:[#allocation7 + $0x148] ss:$16 sps:$4 sm:$0xff]   ;;  %v7534_v46 = vld [vmem:[#allocation7 + $0x164] ss:$16 sps:$4 sm:$0xff]   ;;  %v7536_v47 = vld [vmem:[#allocation7 + $0x16c] ss:$16 sps:$4 sm:$0xff]  }
  0x7e   :  { %1000 = vmatprep.subr.bf16.mxu0 %v7492_v18  ;;  %1082 = vmatprep.subr.bf16.mxu1 %v7494_v19  ;;  %v7538_v48 = vld [vmem:[#allocation7 + $0x160] ss:$16 sps:$4 sm:$0xff]   ;;  %v7539_v49 = vld [vmem:[#allocation7 + $0x168] ss:$16 sps:$4 sm:$0xff]   ;;  %v7540_v50 = vld [vmem:[#allocation7 + $0x184] ss:$16 sps:$4 sm:$0xff]  }
  0x7f   :  { %v7542_v51 = vld [vmem:[#allocation7 + $0x18c] ss:$16 sps:$4 sm:$0xff]   ;;  %v7544_v52 = vld [vmem:[#allocation7 + $0x180] ss:$16 sps:$4 sm:$0xff]   ;;  %v7545_v53 = vld [vmem:[#allocation7 + $0x188] ss:$16 sps:$4 sm:$0xff]  }
  0x80   :  { %v7546_v54 = vld [vmem:[#allocation7 + $0x1a4] ss:$16 sps:$4 sm:$0xff]   ;;  %v7548_v55 = vld [vmem:[#allocation7 + $0x1ac] ss:$16 sps:$4 sm:$0xff]   ;;  %v7550_v56 = vld [vmem:[#allocation7 + $0x1a0] ss:$16 sps:$4 sm:$0xff]  }
  0x81   :  { %1001 = vmatpush1.bf16.msra.mxu0 %v7496_v20  ;;  %1083 = vmatpush1.bf16.msra.mxu1 %v7497_v21  ;;  %v7551_v57 = vld [vmem:[#allocation7 + $0x1a8] ss:$16 sps:$4 sm:$0xff]   ;;  %v7552_v58 = vld [vmem:[#allocation7 + $0x1c4] ss:$16 sps:$4 sm:$0xff]   ;;  %v7554_v59 = vld [vmem:[#allocation7 + $0x1cc] ss:$16 sps:$4 sm:$0xff]  }
  0x82   :  { %1002 = vmatprep.subr.bf16.mxu0 %v7498_v22  ;;  %1084 = vmatprep.subr.bf16.mxu1 %v7500_v23  ;;  %v7556_v60 = vld [vmem:[#allocation7 + $0x1c0] ss:$16 sps:$4 sm:$0xff]   ;;  %v7557_v61 = vld [vmem:[#allocation7 + $0x1c8] ss:$16 sps:$4 sm:$0xff]   ;;  %v7558_v62 = vld [vmem:[#allocation7 + $0x1e4] ss:$16 sps:$4 sm:$0xff]  }
  0x83   :  { %v7560_v63 = vld [vmem:[#allocation7 + $0x1ec] ss:$16 sps:$4 sm:$0xff]   ;;  %v7562_v0 = vld [vmem:[#allocation7 + $0x1e0] ss:$16 sps:$4 sm:$0xff]   ;;  %v7563_v1 = vld [vmem:[#allocation7 + $0x1e8] ss:$16 sps:$4 sm:$0xff]  }
  0x84   :  { %v7566_v2 = vld [vmem:[#allocation7 + $0x204] ss:$16 sps:$4 sm:$0xff]   ;;  %v7569_v3 = vld [vmem:[#allocation7 + $0x20c] ss:$16 sps:$4 sm:$0xff]   ;;  %v113_v5 = vshrl.u32 %v112_v4, 7  ;;  %s8883_s0 = smov [#allocation13]  }
  0x85   :  { %1003 = vmatpush1.bf16.msra.mxu0 %v7502_v24  ;;  %1085 = vmatpush1.bf16.msra.mxu1 %v7503_v25  ;;  %v105_v6 = vld [vmem:[#allocation2] sm:$0xf]  ;;  %v136_v11 = vld [vmem:[#allocation5] sm:$0xf]  ;;  %s6526_s6 = sshll.u32 %s8883_s0, 4  ;;  %s6527_s6 = int_to_ptr.vmem [resolvable:$true] %s6526_s6 }
  0x86   :  { %1004 = vmatprep.subr.bf16.mxu0 %v7504_v26  ;;  %1086 = vmatprep.subr.bf16.mxu1 %v7506_v27  ;;  %v9019_v7 = vsub.s32 0, %v113_v5  ;;  %v9021_v8 = vsub.s32 1, %v113_v5  ;;  %v9023_v9 = vsub.s32 2, %v113_v5  ;;  %v9025_v10 = vsub.s32 3, %v113_v5  ;;  %v7579_v4 = vld [vmem:[#allocation7 + $0x248] ss:$16 sps:$4 sm:$0xff]   ;;  %p8845_p7 = scmp.lt.s32.totalorder %s6527_s6, %s6527_s6 }
  0x87   :  { %v7584_v5 = vld [vmem:[#allocation7 + $0x264] ss:$16 sps:$4 sm:$0xff]   ;;  %s8840_s28 = scalar_lea.vmem %s6527_s6, 128 }
  0x88   :  { %v115_v12 = vrot.slane %v105_v6, %v9019_v7  ;;  %v119_v13 = vrot.slane %v105_v6, %v9021_v8  ;;  %v123_v14 = vrot.slane %v105_v6, %v9023_v9  ;;  %v127_v15 = vrot.slane %v105_v6, %v9025_v10  ;;  %v7587_v6 = vld [vmem:[#allocation7 + $0x26c] ss:$16 sps:$4 sm:$0xff]   ;;  %p8841_p6 = scmp.ne.s32.totalorder %s6527_s6, %s8840_s28  ;;  %p8846_p8 = scmp.lt.s32.totalorder %s8840_s28, %s8840_s28 }
  0x89   :  { %1005 = vmatpush1.bf16.msra.mxu0 %v7508_v28  ;;  %1087 = vmatpush1.bf16.msra.mxu1 %v7509_v29  ;;  %v141_v16 = vrot.slane %v136_v11, %v9019_v7  ;;  %v145_v17 = vrot.slane %v136_v11, %v9021_v8  ;;  %v149_v18 = vrot.slane %v136_v11, %v9023_v9 }
  0x8a   :  { %1006 = vmatprep.subr.bf16.mxu0 %v7510_v30  ;;  %1088 = vmatprep.subr.bf16.mxu1 %v7512_v31  ;;  %v153_v19 = vrot.slane %v136_v11, %v9025_v10  ;;  %v7582_v11 = vld [vmem:[#allocation7 + $0x260] ss:$16 sps:$4 sm:$0xff]   ;;  %p8847_p9 = por %p8846_p8, %p8845_p7 }
  0x8c   :  { %p8848_p10 = pnand %p8847_p9, %p8841_p6 }
  0x8d   :  { %1007 = vmatpush1.bf16.msra.mxu0 %v7514_v32  ;;  %1089 = vmatpush1.bf16.msra.mxu1 %v7515_v33 }
  0x8e   :  { %1008 = vmatprep.subr.bf16.mxu0 %v7516_v34  ;;  %1090 = vmatprep.subr.bf16.mxu1 %v7518_v35 }
  0x91   :  { %1009 = vmatpush1.bf16.msra.mxu0 %v7520_v36  ;;  %1091 = vmatpush1.bf16.msra.mxu1 %v7521_v37 }
  0x92   :  { %1010 = vmatprep.subr.bf16.mxu0 %v7522_v38  ;;  %1092 = vmatprep.subr.bf16.mxu1 %v7524_v39 }
  0x95   :  { %1011 = vmatpush1.bf16.msra.mxu0 %v7526_v40  ;;  %1093 = vmatpush1.bf16.msra.mxu1 %v7527_v41 }
  0x96   :  { %1012 = vmatprep.subr.bf16.mxu0 %v7528_v42  ;;  %1094 = vmatprep.subr.bf16.mxu1 %v7530_v43 }
  0x99   :  { %1013 = vmatpush1.bf16.msra.mxu0 %v7532_v44  ;;  %1095 = vmatpush1.bf16.msra.mxu1 %v7533_v45 }
  0x9a   :  { %1014 = vmatprep.subr.bf16.mxu0 %v7534_v46  ;;  %1096 = vmatprep.subr.bf16.mxu1 %v7536_v47 }
  0x9d   :  { %1015 = vmatpush1.bf16.msra.mxu0 %v7538_v48  ;;  %1097 = vmatpush1.bf16.msra.mxu1 %v7539_v49 }
  0x9e   :  { %1016 = vmatprep.subr.bf16.mxu0 %v7540_v50  ;;  %1098 = vmatprep.subr.bf16.mxu1 %v7542_v51 }
  0xa1   :  { %1017 = vmatpush1.bf16.msra.mxu0 %v7544_v52  ;;  %1099 = vmatpush1.bf16.msra.mxu1 %v7545_v53 }
  0xa2   :  { %1018 = vmatprep.subr.bf16.mxu0 %v7546_v54  ;;  %1100 = vmatprep.subr.bf16.mxu1 %v7548_v55  ;;  %v7564_v55 = vld [vmem:[#allocation7 + $0x200] ss:$16 sps:$4 sm:$0xff]  }
  0xa5   :  { %1019 = vmatpush1.bf16.msra.mxu0 %v7550_v56  ;;  %1101 = vmatpush1.bf16.msra.mxu1 %v7551_v57  ;;  %v7567_v56 = vld [vmem:[#allocation7 + $0x208] ss:$16 sps:$4 sm:$0xff]  }
  0xa6   :  { %1020 = vmatprep.subr.bf16.mxu0 %v7552_v58  ;;  %1102 = vmatprep.subr.bf16.mxu1 %v7554_v59 }
  0xa9   :  { %1021 = vmatpush1.bf16.msra.mxu0 %v7556_v60  ;;  %1103 = vmatpush1.bf16.msra.mxu1 %v7557_v61  ;;  %v7572_v60 = vld [vmem:[#allocation7 + $0x224] ss:$16 sps:$4 sm:$0xff]   ;;  %v7575_v61 = vld [vmem:[#allocation7 + $0x22c] ss:$16 sps:$4 sm:$0xff]  }
  0xaa   :  { %1022 = vmatprep.subr.bf16.mxu0 %v7558_v62  ;;  %1104 = vmatprep.subr.bf16.mxu1 %v7560_v63  ;;  %v7570_v62 = vld [vmem:[#allocation7 + $0x220] ss:$16 sps:$4 sm:$0xff]   ;;  %v7573_v63 = vld [vmem:[#allocation7 + $0x228] ss:$16 sps:$4 sm:$0xff]  }
  0xad   :  { %1023 = vmatpush1.bf16.msra.mxu0 %v7562_v0  ;;  %1105 = vmatpush1.bf16.msra.mxu1 %v7563_v1  ;;  %v7578_v1 = vld [vmem:[#allocation7 + $0x244] ss:$16 sps:$4 sm:$0xff]  }
  0xae   :  { %1033 = vmatprep.subr.bf16.mxu0 %v7566_v2  ;;  %1115 = vmatprep.subr.bf16.mxu1 %v7569_v3  ;;  %v7581_v2 = vld [vmem:[#allocation7 + $0x24c] ss:$16 sps:$4 sm:$0xff]   ;;  %v7576_v3 = vld [vmem:[#allocation7 + $0x240] ss:$16 sps:$4 sm:$0xff]  }
  0xef   :  { %v109_v20 = vpop.permute.xlu0 %108 }
  0xf0   :  { %v132_v21 = vmul.f32 %v115_v12, %v109_v20  ;;  %v133_v22 = vmul.f32 %v119_v13, %v109_v20  ;;  %v134_v23 = vmul.f32 %v123_v14, %v109_v20  ;;  %v135_v24 = vmul.f32 %v127_v15, %v109_v20  ;;  %v7585_v12 = vld [vmem:[#allocation7 + $0x268] ss:$16 sps:$4 sm:$0xff]   ;;  %v7590_v13 = vld [vmem:[#allocation7 + $0x284] ss:$16 sps:$4 sm:$0xff]   ;;  %v7593_v14 = vld [vmem:[#allocation7 + $0x28c] ss:$16 sps:$4 sm:$0xff]  }
  0xf1   :  { %v7588_v15 = vld [vmem:[#allocation7 + $0x280] ss:$16 sps:$4 sm:$0xff]   ;;  %v7597_v20 = vld [vmem:[#allocation7 + $0x2a8] ss:$16 sps:$4 sm:$0xff]  }
  0xf2   :  { %v158_v25 = vadd.f32 %v141_v16, %v132_v21  ;;  %v159_v26 = vadd.f32 %v145_v17, %v133_v22  ;;  %v9035_v27 = vadd.f32 %v149_v18, %v134_v23  ;;  %v161_v28 = vadd.f32 %v153_v19, %v135_v24  ;;  %v7591_v16 = vld [vmem:[#allocation7 + $0x288] ss:$16 sps:$4 sm:$0xff]   ;;  %v7596_v17 = vld [vmem:[#allocation7 + $0x2a4] ss:$16 sps:$4 sm:$0xff]   ;;  %v7599_v18 = vld [vmem:[#allocation7 + $0x2ac] ss:$16 sps:$4 sm:$0xff]  }
  0xf3   :  { %v7594_v19 = vld [vmem:[#allocation7 + $0x2a0] ss:$16 sps:$4 sm:$0xff]   ;;  %v7602_v21 = vld [vmem:[#allocation7 + $0x2c4] ss:$16 sps:$4 sm:$0xff]   ;;  %v7605_v22 = vld [vmem:[#allocation7 + $0x2cc] ss:$16 sps:$4 sm:$0xff]  }
  0xf4   :  { %v166_v29 = vmul.f32 %v158_v25, %v158_v25  ;;  %v169_v30 = vmul.f32 %v161_v28, %v161_v28  ;;  %v167_v31 = vmul.f32 %v159_v26, %v159_v26  ;;  %v162_v46 = vmul.f32 0.5, %v158_v25  ;;  %v7600_v23 = vld [vmem:[#allocation7 + $0x2c0] ss:$16 sps:$4 sm:$0xff]   ;;  %v7603_v24 = vld [vmem:[#allocation7 + $0x2c8] ss:$16 sps:$4 sm:$0xff]  }
  0xf5   :  { %v163_v49 = vmul.f32 0.5, %v159_v26  ;;  %v165_v52 = vmul.f32 0.5, %v161_v28 }
  0xf6   :  { %v170_v32 = vmul.f32 %v166_v29, %v158_v25  ;;  %v173_v33 = vmul.f32 %v169_v30, %v161_v28  ;;  %v171_v34 = vmul.f32 %v167_v31, %v159_v26  ;;  %v7606_v29 = vld [vmem:[#allocation7 + $0x2e0] ss:$16 sps:$4 sm:$0xff]   ;;  %v7609_v30 = vld [vmem:[#allocation7 + $0x2e8] ss:$16 sps:$4 sm:$0xff]   ;;  %v7614_v31 = vld [vmem:[#allocation7 + $0x304] ss:$16 sps:$4 sm:$0xff]  }
  0xf8   :  { %v174_v35 = vmul.f32 0.044715, %v170_v32  ;;  %v177_v36 = vmul.f32 0.044715, %v173_v33  ;;  %v175_v37 = vmul.f32 0.044715, %v171_v34 }
  0xf9   :  { %v7617_v32 = vld [vmem:[#allocation7 + $0x30c] ss:$16 sps:$4 sm:$0xff]   ;;  %v7612_v34 = vld [vmem:[#allocation7 + $0x300] ss:$16 sps:$4 sm:$0xff]  }
  0xfa   :  { %v178_v38 = vadd.f32 %v174_v35, %v158_v25  ;;  %v181_v39 = vadd.f32 %v177_v36, %v161_v28  ;;  %v179_v40 = vadd.f32 %v175_v37, %v159_v26  ;;  %v7608_v25 = vld [vmem:[#allocation7 + $0x2e4] ss:$16 sps:$4 sm:$0xff]   ;;  %v7611_v26 = vld [vmem:[#allocation7 + $0x2ec] ss:$16 sps:$4 sm:$0xff]   ;;  %v168_v28 = vmul.f32 %v9035_v27, %v9035_v27  ;;  %v7615_v35 = vld [vmem:[#allocation7 + $0x308] ss:$16 sps:$4 sm:$0xff]  }
  0xfb   :  { %v7620_v36 = vld [vmem:[#allocation7 + $0x324] ss:$16 sps:$4 sm:$0xff]   ;;  %v7623_v37 = vld [vmem:[#allocation7 + $0x32c] ss:$16 sps:$4 sm:$0xff]  }
  0xfc   :  { %v182_v41 = vmul.f32 0.7978846, %v178_v38  ;;  %v185_v42 = vmul.f32 0.7978846, %v181_v39  ;;  %v183_v43 = vmul.f32 0.7978846, %v179_v40  ;;  %v172_v33 = vmul.f32 %v168_v28, %v9035_v27 }
  0xfd   :  { %v7618_v39 = vld [vmem:[#allocation7 + $0x320] ss:$16 sps:$4 sm:$0xff]   ;;  %v7621_v40 = vld [vmem:[#allocation7 + $0x328] ss:$16 sps:$4 sm:$0xff]   ;;  %v7686_v28 = vld [vmem:[#allocation7 + $0x484] ss:$16 sps:$4 sm:$0xff]  }
  0xfe   :  { %8652 = vtanh.f32 %v182_v41  ;;  %v176_v38 = vmul.f32 0.044715, %v172_v33  ;;  %v7626_v41 = vld [vmem:[#allocation7 + $0x344] ss:$16 sps:$4 sm:$0xff]   ;;  %v7695_v33 = vld [vmem:[#allocation7 + $0x4ac] ss:$16 sps:$4 sm:$0xff]  }
  0xff   :  { %8654 = vtanh.f32 %v183_v43 }
 0x100   :  { %8656 = vtanh.f32 %v185_v42  ;;  %v7629_v42 = vld [vmem:[#allocation7 + $0x34c] ss:$16 sps:$4 sm:$0xff]   ;;  %v180_v43 = vadd.f32 %v176_v38, %v9035_v27  ;;  %v7696_v38 = vld [vmem:[#allocation7 + $0x4c0] ss:$16 sps:$4 sm:$0xff]  }
 0x108   :  { %v8653_v44 = vpop.eup %8652 }
 0x109   :  { %v8655_v45 = vpop.eup %8654  ;;  %v190_v47 = vadd.f32 1.0, %v8653_v44  ;;  %v7624_v44 = vld [vmem:[#allocation7 + $0x340] ss:$16 sps:$4 sm:$0xff]  }
 0x10a   :  { %v8657_v48 = vpop.eup %8656  ;;  %v191_v50 = vadd.f32 1.0, %v8655_v45  ;;  %v7627_v45 = vld [vmem:[#allocation7 + $0x348] ss:$16 sps:$4 sm:$0xff]  }
 0x10b   :  { %v194_v51 = vmul.f32 %v190_v47, %v162_v46  ;;  %v193_v53 = vadd.f32 1.0, %v8657_v48  ;;  %v7632_v46 = vld [vmem:[#allocation7 + $0x364] ss:$16 sps:$4 sm:$0xff]   ;;  %v7635_v47 = vld [vmem:[#allocation7 + $0x36c] ss:$16 sps:$4 sm:$0xff]  }
 0x10c   :  { %v195_v54 = vmul.f32 %v191_v50, %v163_v49  ;;  %v184_v48 = vmul.f32 0.7978846, %v180_v43  ;;  %v7630_v49 = vld [vmem:[#allocation7 + $0x360] ss:$16 sps:$4 sm:$0xff]   ;;  %v7633_v50 = vld [vmem:[#allocation7 + $0x368] ss:$16 sps:$4 sm:$0xff]  }
 0x10d   :  { %v198_v57 = vpack.c.bf16 %v194_v51, %v194_v51  ;;  %v197_v58 = vmul.f32 %v193_v53, %v165_v52  ;;  %v7638_v51 = vld [vmem:[#allocation7 + $0x384] ss:$16 sps:$4 sm:$0xff]   ;;  %v7641_v52 = vld [vmem:[#allocation7 + $0x38c] ss:$16 sps:$4 sm:$0xff]   ;;  %v7636_v53 = vld [vmem:[#allocation7 + $0x380] ss:$16 sps:$4 sm:$0xff]  }
 0x10e   :  { %v199_v59 = vpack.c.bf16 %v195_v54, %v195_v54  ;;  %8658 = vtanh.f32 %v184_v48  ;;  %v7639_v54 = vld [vmem:[#allocation7 + $0x388] ss:$16 sps:$4 sm:$0xff]   ;;  %v7716_v48 = vld [vmem:[#allocation7 + $0x524] ss:$16 sps:$4 sm:$0xff]  }
 0x10f   :  { %v201_v0 = vpack.c.bf16 %v197_v58, %v197_v58  ;;  %v7645_v58 = vld [vmem:[#allocation7 + $0x3a8] ss:$16 sps:$4 sm:$0xff]  }
 0x110   :  { %1024 = vmatprep.mubr.bf16.mxu0 %v199_v59  ;;  %1106 = vmatprep.mubr.bf16.mxu1 %v199_v59  ;;  %v7650_v59 = vld [vmem:[#allocation7 + $0x3c4] ss:$16 sps:$4 sm:$0xff]   ;;  %v7705_v43 = vld [vmem:[#allocation7 + $0x4e8] ss:$16 sps:$4 sm:$0xff]  }
 0x111   :  { %1025 = vmatmul.mubr.bf16.vlgmr.msra.gmra.mrb[0].mxu0 %v198_v57  ;;  %1107 = vmatmul.mubr.bf16.vlgmr.msra.gmra.mrb[0].mxu1 %v198_v57  ;;  %v7642_v57 = vld [vmem:[#allocation7 + $0x3a0] ss:$16 sps:$4 sm:$0xff]  }
 0x112   :  { %1034 = vmatpush1.bf16.msra.mxu0 %v7564_v55  ;;  %1116 = vmatpush1.bf16.msra.mxu1 %v7567_v56  ;;  %v7644_v55 = vld [vmem:[#allocation7 + $0x3a4] ss:$16 sps:$4 sm:$0xff]   ;;  %v7647_v56 = vld [vmem:[#allocation7 + $0x3ac] ss:$16 sps:$4 sm:$0xff]  }
 0x113   :  { %1065 = vmatprep.mubr.bf16.mxu0 %v201_v0  ;;  %1147 = vmatprep.mubr.bf16.mxu1 %v201_v0  ;;  %v7656_v0 = vld [vmem:[#allocation7 + $0x3e4] ss:$16 sps:$4 sm:$0xff]  }
 0x114   :  { %1035 = vmatprep.subr.bf16.mxu0 %v7572_v60  ;;  %1117 = vmatprep.subr.bf16.mxu1 %v7575_v61  ;;  %v7653_v60 = vld [vmem:[#allocation7 + $0x3cc] ss:$16 sps:$4 sm:$0xff]  }
 0x116   :  { %1036 = vmatpush1.bf16.msra.mxu0 %v7570_v62  ;;  %1118 = vmatpush1.bf16.msra.mxu1 %v7573_v63  ;;  %v7648_v62 = vld [vmem:[#allocation7 + $0x3c0] ss:$16 sps:$4 sm:$0xff]   ;;  %v7651_v63 = vld [vmem:[#allocation7 + $0x3c8] ss:$16 sps:$4 sm:$0xff]  }
 0x117   :  { %1037 = vmatprep.subr.bf16.mxu0 %v7578_v1  ;;  %1119 = vmatprep.subr.bf16.mxu1 %v7581_v2  ;;  %v7659_v1 = vld [vmem:[#allocation7 + $0x3ec] ss:$16 sps:$4 sm:$0xff]  }
 0x118   :  { %v8659_v61 = vpop.eup %8658 }
 0x119   :  { %v192_v2 = vadd.f32 1.0, %v8659_v61  ;;  %v7734_v61 = vld [vmem:[#allocation7 + $0x584] ss:$16 sps:$4 sm:$0xff]  }
 0x11a   :  { %1038 = vmatpush1.bf16.msra.mxu0 %v7576_v3  ;;  %1120 = vmatpush1.bf16.msra.mxu1 %v7579_v4  ;;  %v7654_v3 = vld [vmem:[#allocation7 + $0x3e0] ss:$16 sps:$4 sm:$0xff]   ;;  %v7657_v4 = vld [vmem:[#allocation7 + $0x3e8] ss:$16 sps:$4 sm:$0xff]  }
 0x11b   :  { %1039 = vmatprep.subr.bf16.mxu0 %v7584_v5  ;;  %1121 = vmatprep.subr.bf16.mxu1 %v7587_v6  ;;  %v164_v5 = vmul.f32 0.5, %v9035_v27  ;;  %v7662_v6 = vld [vmem:[#allocation7 + $0x404] ss:$16 sps:$4 sm:$0xff]  }
 0x11c   :  { %v7674_v27 = vld [vmem:[#allocation7 + $0x444] ss:$16 sps:$4 sm:$0xff]  }
 0x11e   :  { %1040 = vmatpush1.bf16.msra.mxu0 %v7582_v11  ;;  %1122 = vmatpush1.bf16.msra.mxu1 %v7585_v12  ;;  %v7665_v11 = vld [vmem:[#allocation7 + $0x40c] ss:$16 sps:$4 sm:$0xff]   ;;  %v196_v12 = vmul.f32 %v192_v2, %v164_v5  ;;  %v7738_v2 = vld [vmem:[#allocation7 + $0x5a0] ss:$16 sps:$4 sm:$0xff]  }
 0x11f   :  { %1041 = vmatprep.subr.bf16.mxu0 %v7590_v13  ;;  %1123 = vmatprep.subr.bf16.mxu1 %v7593_v14  ;;  %v7660_v13 = vld [vmem:[#allocation7 + $0x400] ss:$16 sps:$4 sm:$0xff]   ;;  %v7663_v14 = vld [vmem:[#allocation7 + $0x408] ss:$16 sps:$4 sm:$0xff]  }
 0x120   :  { %v7744_v5 = vld [vmem:[#allocation7 + $0x5c0] ss:$16 sps:$4 sm:$0xff]  }
 0x122   :  { %1042 = vmatpush1.bf16.msra.mxu0 %v7588_v15  ;;  %1124 = vmatpush1.bf16.msra.mxu1 %v7591_v16  ;;  %v7668_v15 = vld [vmem:[#allocation7 + $0x424] ss:$16 sps:$4 sm:$0xff]   ;;  %v7671_v16 = vld [vmem:[#allocation7 + $0x42c] ss:$16 sps:$4 sm:$0xff]  }
 0x123   :  { %1043 = vmatprep.subr.bf16.mxu0 %v7596_v17  ;;  %1125 = vmatprep.subr.bf16.mxu1 %v7599_v18  ;;  %v200_v17 = vpack.c.bf16 %v196_v12, %v196_v12  ;;  %v7666_v18 = vld [vmem:[#allocation7 + $0x420] ss:$16 sps:$4 sm:$0xff]   ;;  %v7752_v12 = vld [vmem:[#allocation7 + $0x5e4] ss:$16 sps:$4 sm:$0xff]  }
 0x126   :  { %1044 = vmatpush1.bf16.msra.mxu0 %v7594_v19  ;;  %1126 = vmatpush1.bf16.msra.mxu1 %v7597_v20  ;;  %v7669_v19 = vld [vmem:[#allocation7 + $0x428] ss:$16 sps:$4 sm:$0xff]   ;;  %v7677_v20 = vld [vmem:[#allocation7 + $0x44c] ss:$16 sps:$4 sm:$0xff]  }
 0x127   :  { %1045 = vmatprep.subr.bf16.mxu0 %v7602_v21  ;;  %1127 = vmatprep.subr.bf16.mxu1 %v7605_v22  ;;  %v7672_v21 = vld [vmem:[#allocation7 + $0x440] ss:$16 sps:$4 sm:$0xff]   ;;  %v7675_v22 = vld [vmem:[#allocation7 + $0x448] ss:$16 sps:$4 sm:$0xff]  }
 0x12a   :  { %1046 = vmatpush1.bf16.msra.mxu0 %v7600_v23  ;;  %1128 = vmatpush1.bf16.msra.mxu1 %v7603_v24  ;;  %v7680_v23 = vld [vmem:[#allocation7 + $0x464] ss:$16 sps:$4 sm:$0xff]   ;;  %v7683_v24 = vld [vmem:[#allocation7 + $0x46c] ss:$16 sps:$4 sm:$0xff]  }
 0x12b   :  { %1047 = vmatprep.subr.bf16.mxu0 %v7608_v25  ;;  %1129 = vmatprep.subr.bf16.mxu1 %v7611_v26  ;;  %v7678_v25 = vld [vmem:[#allocation7 + $0x460] ss:$16 sps:$4 sm:$0xff]   ;;  %v7681_v26 = vld [vmem:[#allocation7 + $0x468] ss:$16 sps:$4 sm:$0xff]  }
 0x12e   :  { %1048 = vmatpush1.bf16.msra.mxu0 %v7606_v29  ;;  %1130 = vmatpush1.bf16.msra.mxu1 %v7609_v30  ;;  %v7689_v29 = vld [vmem:[#allocation7 + $0x48c] ss:$16 sps:$4 sm:$0xff]   ;;  %v7684_v30 = vld [vmem:[#allocation7 + $0x480] ss:$16 sps:$4 sm:$0xff]  }
 0x12f   :  { %1049 = vmatprep.subr.bf16.mxu0 %v7614_v31  ;;  %1131 = vmatprep.subr.bf16.mxu1 %v7617_v32  ;;  %v7687_v31 = vld [vmem:[#allocation7 + $0x488] ss:$16 sps:$4 sm:$0xff]   ;;  %v7692_v32 = vld [vmem:[#allocation7 + $0x4a4] ss:$16 sps:$4 sm:$0xff]  }
 0x132   :  { %1050 = vmatpush1.bf16.msra.mxu0 %v7612_v34  ;;  %1132 = vmatpush1.bf16.msra.mxu1 %v7615_v35  ;;  %v7690_v34 = vld [vmem:[#allocation7 + $0x4a0] ss:$16 sps:$4 sm:$0xff]   ;;  %v7693_v35 = vld [vmem:[#allocation7 + $0x4a8] ss:$16 sps:$4 sm:$0xff]  }
 0x133   :  { %1051 = vmatprep.subr.bf16.mxu0 %v7620_v36  ;;  %1133 = vmatprep.subr.bf16.mxu1 %v7623_v37  ;;  %v7698_v36 = vld [vmem:[#allocation7 + $0x4c4] ss:$16 sps:$4 sm:$0xff]   ;;  %v7701_v37 = vld [vmem:[#allocation7 + $0x4cc] ss:$16 sps:$4 sm:$0xff]  }
 0x136   :  { %1052 = vmatpush1.bf16.msra.mxu0 %v7618_v39  ;;  %1134 = vmatpush1.bf16.msra.mxu1 %v7621_v40  ;;  %v7699_v39 = vld [vmem:[#allocation7 + $0x4c8] ss:$16 sps:$4 sm:$0xff]   ;;  %v7704_v40 = vld [vmem:[#allocation7 + $0x4e4] ss:$16 sps:$4 sm:$0xff]  }
 0x137   :  { %1053 = vmatprep.subr.bf16.mxu0 %v7626_v41  ;;  %1135 = vmatprep.subr.bf16.mxu1 %v7629_v42  ;;  %v7707_v41 = vld [vmem:[#allocation7 + $0x4ec] ss:$16 sps:$4 sm:$0xff]   ;;  %v7702_v42 = vld [vmem:[#allocation7 + $0x4e0] ss:$16 sps:$4 sm:$0xff]  }
 0x13a   :  { %1054 = vmatpush1.bf16.msra.mxu0 %v7624_v44  ;;  %1136 = vmatpush1.bf16.msra.mxu1 %v7627_v45  ;;  %v7710_v44 = vld [vmem:[#allocation7 + $0x504] ss:$16 sps:$4 sm:$0xff]   ;;  %v7713_v45 = vld [vmem:[#allocation7 + $0x50c] ss:$16 sps:$4 sm:$0xff]  }
 0x13b   :  { %1055 = vmatprep.subr.bf16.mxu0 %v7632_v46  ;;  %1137 = vmatprep.subr.bf16.mxu1 %v7635_v47  ;;  %v7708_v46 = vld [vmem:[#allocation7 + $0x500] ss:$16 sps:$4 sm:$0xff]   ;;  %v7711_v47 = vld [vmem:[#allocation7 + $0x508] ss:$16 sps:$4 sm:$0xff]  }
 0x13e   :  { %1056 = vmatpush1.bf16.msra.mxu0 %v7630_v49  ;;  %1138 = vmatpush1.bf16.msra.mxu1 %v7633_v50  ;;  %v7719_v49 = vld [vmem:[#allocation7 + $0x52c] ss:$16 sps:$4 sm:$0xff]   ;;  %v7714_v50 = vld [vmem:[#allocation7 + $0x520] ss:$16 sps:$4 sm:$0xff]  }
 0x13f   :  { %1057 = vmatprep.subr.bf16.mxu0 %v7638_v51  ;;  %1139 = vmatprep.subr.bf16.mxu1 %v7641_v52  ;;  %v7717_v51 = vld [vmem:[#allocation7 + $0x528] ss:$16 sps:$4 sm:$0xff]   ;;  %v7722_v52 = vld [vmem:[#allocation7 + $0x544] ss:$16 sps:$4 sm:$0xff]  }
 0x142   :  { %1058 = vmatpush1.bf16.msra.mxu0 %v7636_v53  ;;  %1140 = vmatpush1.bf16.msra.mxu1 %v7639_v54  ;;  %v7725_v53 = vld [vmem:[#allocation7 + $0x54c] ss:$16 sps:$4 sm:$0xff]   ;;  %v7720_v54 = vld [vmem:[#allocation7 + $0x540] ss:$16 sps:$4 sm:$0xff]  }
 0x143   :  { %1059 = vmatprep.subr.bf16.mxu0 %v7644_v55  ;;  %1141 = vmatprep.subr.bf16.mxu1 %v7647_v56  ;;  %v7723_v55 = vld [vmem:[#allocation7 + $0x548] ss:$16 sps:$4 sm:$0xff]   ;;  %v7728_v56 = vld [vmem:[#allocation7 + $0x564] ss:$16 sps:$4 sm:$0xff]  }
 0x146   :  { %1060 = vmatpush1.bf16.msra.mxu0 %v7642_v57  ;;  %1142 = vmatpush1.bf16.msra.mxu1 %v7645_v58  ;;  %v7731_v57 = vld [vmem:[#allocation7 + $0x56c] ss:$16 sps:$4 sm:$0xff]   ;;  %v7726_v58 = vld [vmem:[#allocation7 + $0x560] ss:$16 sps:$4 sm:$0xff]  }
 0x147   :  { %1061 = vmatprep.subr.bf16.mxu0 %v7650_v59  ;;  %1143 = vmatprep.subr.bf16.mxu1 %v7653_v60  ;;  %v7729_v59 = vld [vmem:[#allocation7 + $0x568] ss:$16 sps:$4 sm:$0xff]   ;;  %v7732_v60 = vld [vmem:[#allocation7 + $0x580] ss:$16 sps:$4 sm:$0xff]  }
 0x14a   :  { %1062 = vmatpush1.bf16.msra.mxu0 %v7648_v62  ;;  %1144 = vmatpush1.bf16.msra.mxu1 %v7651_v63  ;;  %v7735_v62 = vld [vmem:[#allocation7 + $0x588] ss:$16 sps:$4 sm:$0xff]   ;;  %v7737_v63 = vld [vmem:[#allocation7 + $0x58c] ss:$16 sps:$4 sm:$0xff]  }
 0x14b   :  { %1063 = vmatprep.subr.bf16.mxu0 %v7656_v0  ;;  %1145 = vmatprep.subr.bf16.mxu1 %v7659_v1  ;;  %v7740_v0 = vld [vmem:[#allocation7 + $0x5a4] ss:$16 sps:$4 sm:$0xff]   ;;  %v7743_v1 = vld [vmem:[#allocation7 + $0x5ac] ss:$16 sps:$4 sm:$0xff]  }
 0x14e   :  { %1064 = vmatpush1.bf16.msra.mxu0 %v7654_v3  ;;  %1146 = vmatpush1.bf16.msra.mxu1 %v7657_v4  ;;  %v7741_v3 = vld [vmem:[#allocation7 + $0x5a8] ss:$16 sps:$4 sm:$0xff]   ;;  %v7746_v4 = vld [vmem:[#allocation7 + $0x5c4] ss:$16 sps:$4 sm:$0xff]  }
 0x14f   :  { %1988 = vmatprep.subr.bf16.mxu0 %v7662_v6  ;;  %2070 = vmatprep.subr.bf16.mxu1 %v7665_v11  ;;  %v7749_v6 = vld [vmem:[#allocation7 + $0x5cc] ss:$16 sps:$4 sm:$0xff]   ;;  %v7747_v11 = vld [vmem:[#allocation7 + $0x5c8] ss:$16 sps:$4 sm:$0xff]  }
 0x151   :  { %1066 = vmatmul.mubr.bf16.vlgmr.msra.gmra.mrb[0].mxu0 %v200_v17  ;;  %1148 = vmatmul.mubr.bf16.vlgmr.msra.gmra.mrb[0].mxu1 %v200_v17  ;;  %v7761_v17 = vld [vmem:[#allocation7 + $0x60c] ss:$16 sps:$4 sm:$0xff]  }
 0x152   :  { %1989 = vmatpush1.bf16.msra.mxu0 %v7660_v13  ;;  %2071 = vmatpush1.bf16.msra.mxu1 %v7663_v14  ;;  %v7755_v13 = vld [vmem:[#allocation7 + $0x5ec] ss:$16 sps:$4 sm:$0xff]   ;;  %v7750_v14 = vld [vmem:[#allocation7 + $0x5e0] ss:$16 sps:$4 sm:$0xff]  }
 0x153   :  { %1990 = vmatprep.subr.bf16.mxu0 %v7668_v15  ;;  %2072 = vmatprep.subr.bf16.mxu1 %v7671_v16  ;;  %v7753_v15 = vld [vmem:[#allocation7 + $0x5e8] ss:$16 sps:$4 sm:$0xff]   ;;  %v7758_v16 = vld [vmem:[#allocation7 + $0x604] ss:$16 sps:$4 sm:$0xff]  }
 0x156   :  { %1991 = vmatpush1.bf16.msra.mxu0 %v7666_v18  ;;  %2073 = vmatpush1.bf16.msra.mxu1 %v7669_v19  ;;  %v9042_v18 = vld [vmem:[#allocation8] sm:$0xf] }
 0x157   :  { %1992 = vmatprep.subr.bf16.mxu0 %v7674_v27  ;;  %2074 = vmatprep.subr.bf16.mxu1 %v7677_v20  ;;  %v335_v19 = vrot.slane %v9042_v18, %v9019_v7  ;;  %v339_v27 = vrot.slane %v9042_v18, %v9021_v8  ;;  %v347_v20 = vrot.slane %v9042_v18, %v9025_v10 }
 0x15a   :  { %1993 = vmatpush1.bf16.msra.mxu0 %v7672_v21  ;;  %2075 = vmatpush1.bf16.msra.mxu1 %v7675_v22 }
 0x15b   :  { %1994 = vmatprep.subr.bf16.mxu0 %v7680_v23  ;;  %2076 = vmatprep.subr.bf16.mxu1 %v7683_v24 }
 0x15e   :  { %1995 = vmatpush1.bf16.msra.mxu0 %v7678_v25  ;;  %2077 = vmatpush1.bf16.msra.mxu1 %v7681_v26 }
 0x15f   :  { %1996 = vmatprep.subr.bf16.mxu0 %v7686_v28  ;;  %2078 = vmatprep.subr.bf16.mxu1 %v7689_v29 }
 0x162   :  { %1997 = vmatpush1.bf16.msra.mxu0 %v7684_v30  ;;  %2079 = vmatpush1.bf16.msra.mxu1 %v7687_v31 }
 0x163   :  { %1998 = vmatprep.subr.bf16.mxu0 %v7692_v32  ;;  %2080 = vmatprep.subr.bf16.mxu1 %v7695_v33 }
 0x166   :  { %1999 = vmatpush1.bf16.msra.mxu0 %v7690_v34  ;;  %2081 = vmatpush1.bf16.msra.mxu1 %v7693_v35 }
 0x167   :  { %2000 = vmatprep.subr.bf16.mxu0 %v7698_v36  ;;  %2082 = vmatprep.subr.bf16.mxu1 %v7701_v37 }
 0x16a   :  { %2001 = vmatpush1.bf16.msra.mxu0 %v7696_v38  ;;  %2083 = vmatpush1.bf16.msra.mxu1 %v7699_v39 }
 0x16b   :  { %2002 = vmatprep.subr.bf16.mxu0 %v7704_v40  ;;  %2084 = vmatprep.subr.bf16.mxu1 %v7707_v41 }
 0x16e   :  { %2003 = vmatpush1.bf16.msra.mxu0 %v7702_v42  ;;  %2085 = vmatpush1.bf16.msra.mxu1 %v7705_v43 }
 0x16f   :  { %2004 = vmatprep.subr.bf16.mxu0 %v7710_v44  ;;  %2086 = vmatprep.subr.bf16.mxu1 %v7713_v45 }
 0x172   :  { %2005 = vmatpush1.bf16.msra.mxu0 %v7708_v46  ;;  %2087 = vmatpush1.bf16.msra.mxu1 %v7711_v47 }
 0x173   :  { %2006 = vmatprep.subr.bf16.mxu0 %v7716_v48  ;;  %2088 = vmatprep.subr.bf16.mxu1 %v7719_v49 }
 0x176   :  { %2007 = vmatpush1.bf16.msra.mxu0 %v7714_v50  ;;  %2089 = vmatpush1.bf16.msra.mxu1 %v7717_v51 }
 0x177   :  { %2008 = vmatprep.subr.bf16.mxu0 %v7722_v52  ;;  %2090 = vmatprep.subr.bf16.mxu1 %v7725_v53 }
 0x17a   :  { %2009 = vmatpush1.bf16.msra.mxu0 %v7720_v54  ;;  %2091 = vmatpush1.bf16.msra.mxu1 %v7723_v55 }
 0x17b   :  { %2010 = vmatprep.subr.bf16.mxu0 %v7728_v56  ;;  %2092 = vmatprep.subr.bf16.mxu1 %v7731_v57 }
 0x17e   :  { %2011 = vmatpush1.bf16.msra.mxu0 %v7726_v58  ;;  %2093 = vmatpush1.bf16.msra.mxu1 %v7729_v59 }
 0x17f   :  { %2012 = vmatprep.subr.bf16.mxu0 %v7734_v61  ;;  %2094 = vmatprep.subr.bf16.mxu1 %v7737_v63  ;;  %v7756_v61 = vld [vmem:[#allocation7 + $0x600] ss:$16 sps:$4 sm:$0xff]  }
 0x182   :  { %2013 = vmatpush1.bf16.msra.mxu0 %v7732_v60  ;;  %2095 = vmatpush1.bf16.msra.mxu1 %v7735_v62  ;;  %v7759_v62 = vld [vmem:[#allocation7 + $0x608] ss:$16 sps:$4 sm:$0xff]  }
 0x183   :  { %2014 = vmatprep.subr.bf16.mxu0 %v7740_v0  ;;  %2096 = vmatprep.subr.bf16.mxu1 %v7743_v1  ;;  %v7764_v0 = vld [vmem:[#allocation7 + $0x624] ss:$16 sps:$4 sm:$0xff]   ;;  %v7767_v1 = vld [vmem:[#allocation7 + $0x62c] ss:$16 sps:$4 sm:$0xff]  }
 0x186   :  { %2015 = vmatpush1.bf16.msra.mxu0 %v7738_v2  ;;  %2097 = vmatpush1.bf16.msra.mxu1 %v7741_v3  ;;  %v7762_v3 = vld [vmem:[#allocation7 + $0x620] ss:$16 sps:$4 sm:$0xff]  }
 0x187   :  { %2016 = vmatprep.subr.bf16.mxu0 %v7746_v4  ;;  %2098 = vmatprep.subr.bf16.mxu1 %v7749_v6  ;;  %v7765_v4 = vld [vmem:[#allocation7 + $0x628] ss:$16 sps:$4 sm:$0xff]   ;;  %v7773_v6 = vld [vmem:[#allocation7 + $0x64c] ss:$16 sps:$4 sm:$0xff]  }
 0x18a   :  { %2017 = vmatpush1.bf16.msra.mxu0 %v7744_v5  ;;  %2099 = vmatpush1.bf16.msra.mxu1 %v7747_v11  ;;  %v7770_v5 = vld [vmem:[#allocation7 + $0x644] ss:$16 sps:$4 sm:$0xff]   ;;  %v7768_v11 = vld [vmem:[#allocation7 + $0x640] ss:$16 sps:$4 sm:$0xff]  }
 0x18b   :  { %2018 = vmatprep.subr.bf16.mxu0 %v7752_v12  ;;  %2100 = vmatprep.subr.bf16.mxu1 %v7755_v13  ;;  %v7771_v12 = vld [vmem:[#allocation7 + $0x648] ss:$16 sps:$4 sm:$0xff]   ;;  %v7776_v13 = vld [vmem:[#allocation7 + $0x664] ss:$16 sps:$4 sm:$0xff]  }
 0x18e   :  { %2019 = vmatpush1.bf16.msra.mxu0 %v7750_v14  ;;  %2101 = vmatpush1.bf16.msra.mxu1 %v7753_v15  ;;  %v7779_v14 = vld [vmem:[#allocation7 + $0x66c] ss:$16 sps:$4 sm:$0xff]   ;;  %v7774_v15 = vld [vmem:[#allocation7 + $0x660] ss:$16 sps:$4 sm:$0xff]  }
 0x18f   :  { %2029 = vmatprep.subr.bf16.mxu0 %v7758_v16  ;;  %2111 = vmatprep.subr.bf16.mxu1 %v7761_v17  ;;  %v7777_v16 = vld [vmem:[#allocation7 + $0x668] ss:$16 sps:$4 sm:$0xff]   ;;  %v7782_v17 = vld [vmem:[#allocation7 + $0x684] ss:$16 sps:$4 sm:$0xff]  }
 0x224   :  { %v1067_v21 = vpop.f32.mrb[0].mxu0  ;;  %v9050_v22 = vpop.f32.mrb[0].mxu1 }
 0x225   :  { %v7383_v23 = vadd.f32 %v1067_v21, %v335_v19  ;;  %v1069_v24 = vpop.f32.mrb[1].mxu0  ;;  %v1151_v25 = vpop.f32.mrb[1].mxu1  ;;  %v7785_v19 = vld [vmem:[#allocation7 + $0x68c] ss:$16 sps:$4 sm:$0xff]   ;;  %v7783_v21 = vld [vmem:[#allocation7 + $0x688] ss:$16 sps:$4 sm:$0xff]  }
 0x226   :  { %v7384_v26 = vadd.f32 %v1069_v24, %v339_v27  ;;  %v7386_v28 = vadd.f32 %v1151_v25, %v347_v20  ;;  %v1071_v29 = vpop.f32.mrb[2].mxu0  ;;  %v1153_v30 = vpop.f32.mrb[2].mxu1  ;;  %v343_v27 = vrot.slane %v9042_v18, %v9023_v9  ;;  %v7780_v20 = vld [vmem:[#allocation7 + $0x680] ss:$16 sps:$4 sm:$0xff]   ;;  %v7791_v24 = vld [vmem:[#allocation7 + $0x6ac] ss:$16 sps:$4 sm:$0xff]  }
 0x227   :  { %v1160_v31 = vmul.f32 %v7383_v23, %v7383_v23  ;;  %v1072_v32 = vpop.f32.mrb[3].mxu0  ;;  %v1154_v33 = vpop.f32.mrb[3].mxu1  ;;  %v1156_v51 = vmul.f32 0.5, %v7383_v23  ;;  %v7794_v29 = vld [vmem:[#allocation7 + $0x6c4] ss:$16 sps:$4 sm:$0xff]  }
 0x228   :  { %v1161_v34 = vmul.f32 %v7384_v26, %v7384_v26  ;;  %v1163_v35 = vmul.f32 %v7386_v28, %v7386_v28  ;;  %v1157_v53 = vmul.f32 0.5, %v7384_v26  ;;  %v1159_v56 = vmul.f32 0.5, %v7386_v28  ;;  %v7797_v30 = vld [vmem:[#allocation7 + $0x6cc] ss:$16 sps:$4 sm:$0xff]   ;;  %v7795_v32 = vld [vmem:[#allocation7 + $0x6c8] ss:$16 sps:$4 sm:$0xff]  }
 0x229   :  { %v1164_v36 = vmul.f32 %v7383_v23, %v1160_v31  ;;  %v9055_v25 = vadd.f32 %v9050_v22, %v343_v27  ;;  %v7792_v31 = vld [vmem:[#allocation7 + $0x6c0] ss:$16 sps:$4 sm:$0xff]   ;;  %v7800_v33 = vld [vmem:[#allocation7 + $0x6e4] ss:$16 sps:$4 sm:$0xff]   ;;  %v7803_v22 = vld [vmem:[#allocation7 + $0x6ec] ss:$16 sps:$4 sm:$0xff]  }
 0x22a   :  { %v1165_v37 = vmul.f32 %v7384_v26, %v1161_v34  ;;  %v1167_v38 = vmul.f32 %v7386_v28, %v1163_v35  ;;  %v7798_v35 = vld [vmem:[#allocation7 + $0x6e0] ss:$16 sps:$4 sm:$0xff]   ;;  %v7855_v27 = vld [vmem:[#allocation7 + $0x808] ss:$16 sps:$4 sm:$0xff]  }
 0x22b   :  { %v1168_v39 = vmul.f32 0.044715, %v1164_v36  ;;  %v1162_v18 = vmul.f32 %v9055_v25, %v9055_v25  ;;  %v7801_v36 = vld [vmem:[#allocation7 + $0x6e8] ss:$16 sps:$4 sm:$0xff]  }
 0x22c   :  { %v1169_v40 = vmul.f32 0.044715, %v1165_v37  ;;  %v1171_v41 = vmul.f32 0.044715, %v1167_v38  ;;  %v7806_v37 = vld [vmem:[#allocation7 + $0x704] ss:$16 sps:$4 sm:$0xff]  }
 0x22d   :  { %v1172_v42 = vadd.f32 %v7383_v23, %v1168_v39  ;;  %v7788_v23 = vld [vmem:[#allocation7 + $0x6a4] ss:$16 sps:$4 sm:$0xff]   ;;  %v1166_v34 = vmul.f32 %v9055_v25, %v1162_v18  ;;  %v7809_v38 = vld [vmem:[#allocation7 + $0x70c] ss:$16 sps:$4 sm:$0xff]  }
 0x22e   :  { %v1173_v43 = vadd.f32 %v7384_v26, %v1169_v40  ;;  %v1175_v44 = vadd.f32 %v7386_v28, %v1171_v41  ;;  %v7786_v26 = vld [vmem:[#allocation7 + $0x6a0] ss:$16 sps:$4 sm:$0xff]   ;;  %v7789_v28 = vld [vmem:[#allocation7 + $0x6a8] ss:$16 sps:$4 sm:$0xff]   ;;  %v7872_v18 = vld [vmem:[#allocation7 + $0x864] ss:$16 sps:$4 sm:$0xff]  }
 0x22f   :  { %v1176_v45 = vmul.f32 0.7978846, %v1172_v42  ;;  %v1170_v39 = vmul.f32 0.044715, %v1166_v34  ;;  %v7804_v40 = vld [vmem:[#allocation7 + $0x700] ss:$16 sps:$4 sm:$0xff]  }
 0x230   :  { %v1177_v46 = vmul.f32 0.7978846, %v1173_v43  ;;  %v1179_v47 = vmul.f32 0.7978846, %v1175_v44  ;;  %v7807_v41 = vld [vmem:[#allocation7 + $0x708] ss:$16 sps:$4 sm:$0xff]  }
 0x231   :  { %8660 = vtanh.f32 %v1176_v45  ;;  %v7812_v42 = vld [vmem:[#allocation7 + $0x724] ss:$16 sps:$4 sm:$0xff]   ;;  %v7815_v43 = vld [vmem:[#allocation7 + $0x72c] ss:$16 sps:$4 sm:$0xff]   ;;  %v1174_v44 = vadd.f32 %v9055_v25, %v1170_v39  ;;  %v7810_v45 = vld [vmem:[#allocation7 + $0x720] ss:$16 sps:$4 sm:$0xff]  }
 0x232   :  { %8662 = vtanh.f32 %v1177_v46  ;;  %v7813_v46 = vld [vmem:[#allocation7 + $0x728] ss:$16 sps:$4 sm:$0xff]   ;;  %v7881_v34 = vld [vmem:[#allocation7 + $0x88c] ss:$16 sps:$4 sm:$0xff]   ;;  %v7882_v39 = vld [vmem:[#allocation7 + $0x8a0] ss:$16 sps:$4 sm:$0xff]  }
 0x233   :  { %8664 = vtanh.f32 %v1179_v47  ;;  %v7818_v47 = vld [vmem:[#allocation7 + $0x744] ss:$16 sps:$4 sm:$0xff]  }
 0x23b   :  { %v8661_v48 = vpop.eup %8660 }
 0x23c   :  { %v1184_v49 = vadd.f32 1.0, %v8661_v48  ;;  %v8663_v50 = vpop.eup %8662  ;;  %v7821_v48 = vld [vmem:[#allocation7 + $0x74c] ss:$16 sps:$4 sm:$0xff]  }
 0x23d   :  { %v8665_v52 = vpop.eup %8664  ;;  %v1185_v54 = vadd.f32 1.0, %v8663_v50  ;;  %v7816_v50 = vld [vmem:[#allocation7 + $0x740] ss:$16 sps:$4 sm:$0xff]  }
 0x23e   :  { %v1188_v55 = vmul.f32 %v1184_v49, %v1156_v51  ;;  %v1187_v57 = vadd.f32 1.0, %v8665_v52  ;;  %v1178_v49 = vmul.f32 0.7978846, %v1174_v44  ;;  %v7819_v51 = vld [vmem:[#allocation7 + $0x748] ss:$16 sps:$4 sm:$0xff]  }
 0x23f   :  { %v1189_v58 = vmul.f32 %v1185_v54, %v1157_v53  ;;  %v7824_v52 = vld [vmem:[#allocation7 + $0x764] ss:$16 sps:$4 sm:$0xff]   ;;  %v7827_v53 = vld [vmem:[#allocation7 + $0x76c] ss:$16 sps:$4 sm:$0xff]   ;;  %v7822_v54 = vld [vmem:[#allocation7 + $0x760] ss:$16 sps:$4 sm:$0xff]  }
 0x240   :  { %v1191_v59 = vmul.f32 %v1187_v57, %v1159_v56  ;;  %v1192_v63 = vpack.c.bf16 %v1188_v55, %v1188_v55  ;;  %8666 = vtanh.f32 %v1178_v49  ;;  %v7825_v55 = vld [vmem:[#allocation7 + $0x768] ss:$16 sps:$4 sm:$0xff]   ;;  %v7830_v56 = vld [vmem:[#allocation7 + $0x784] ss:$16 sps:$4 sm:$0xff]   ;;  %v7833_v57 = vld [vmem:[#allocation7 + $0x78c] ss:$16 sps:$4 sm:$0xff]  }
 0x241   :  { %v1193_v60 = vpack.c.bf16 %v1189_v58, %v1189_v58  ;;  %v7828_v58 = vld [vmem:[#allocation7 + $0x780] ss:$16 sps:$4 sm:$0xff]   ;;  %v7891_v44 = vld [vmem:[#allocation7 + $0x8c8] ss:$16 sps:$4 sm:$0xff]   ;;  %v7902_v49 = vld [vmem:[#allocation7 + $0x904] ss:$16 sps:$4 sm:$0xff]  }
 0x242   :  { %v1195_v2 = vpack.c.bf16 %v1191_v59, %v1191_v59  ;;  %v7831_v59 = vld [vmem:[#allocation7 + $0x788] ss:$16 sps:$4 sm:$0xff]  }
 0x243   :  { %2020 = vmatprep.mubr.bf16.mxu0 %v1193_v60  ;;  %2102 = vmatprep.mubr.bf16.mxu1 %v1193_v60  ;;  %v7836_v60 = vld [vmem:[#allocation7 + $0x7a4] ss:$16 sps:$4 sm:$0xff]  }
 0x244   :  { %2021 = vmatmul.mubr.bf16.vlgmr.msra.gmra.mrb[4].mxu0 %v1192_v63  ;;  %2103 = vmatmul.mubr.bf16.vlgmr.msra.gmra.mrb[4].mxu1 %v1192_v63  ;;  %v7837_v63 = vld [vmem:[#allocation7 + $0x7a8] ss:$16 sps:$4 sm:$0xff]  }
 0x245   :  { %2030 = vmatpush1.bf16.msra.mxu0 %v7756_v61  ;;  %2112 = vmatpush1.bf16.msra.mxu1 %v7759_v62  ;;  %v7839_v61 = vld [vmem:[#allocation7 + $0x7ac] ss:$16 sps:$4 sm:$0xff]   ;;  %v7834_v62 = vld [vmem:[#allocation7 + $0x7a0] ss:$16 sps:$4 sm:$0xff]  }
 0x246   :  { %2061 = vmatprep.mubr.bf16.mxu0 %v1195_v2  ;;  %2143 = vmatprep.mubr.bf16.mxu1 %v1195_v2 }
 0x247   :  { %2031 = vmatprep.subr.bf16.mxu0 %v7764_v0  ;;  %2113 = vmatprep.subr.bf16.mxu1 %v7767_v1  ;;  %v7842_v0 = vld [vmem:[#allocation7 + $0x7c4] ss:$16 sps:$4 sm:$0xff]   ;;  %v7845_v1 = vld [vmem:[#allocation7 + $0x7cc] ss:$16 sps:$4 sm:$0xff]  }
 0x249   :  { %2032 = vmatpush1.bf16.msra.mxu0 %v7762_v3  ;;  %2114 = vmatpush1.bf16.msra.mxu1 %v7765_v4  ;;  %v7840_v3 = vld [vmem:[#allocation7 + $0x7c0] ss:$16 sps:$4 sm:$0xff]   ;;  %v7843_v4 = vld [vmem:[#allocation7 + $0x7c8] ss:$16 sps:$4 sm:$0xff]  }
 0x24a   :  { %2033 = vmatprep.subr.bf16.mxu0 %v7770_v5  ;;  %2115 = vmatprep.subr.bf16.mxu1 %v7773_v6  ;;  %v8667_v2 = vpop.eup %8666  ;;  %v7848_v5 = vld [vmem:[#allocation7 + $0x7e4] ss:$16 sps:$4 sm:$0xff]   ;;  %v7851_v6 = vld [vmem:[#allocation7 + $0x7ec] ss:$16 sps:$4 sm:$0xff]  }
 0x24d   :  { %2034 = vmatpush1.bf16.msra.mxu0 %v7768_v11  ;;  %2116 = vmatpush1.bf16.msra.mxu1 %v7771_v12  ;;  %v1186_v11 = vadd.f32 1.0, %v8667_v2  ;;  %v1158_v12 = vmul.f32 0.5, %v9055_v25  ;;  %v7861_v25 = vld [vmem:[#allocation7 + $0x828] ss:$16 sps:$4 sm:$0xff]   ;;  %v7926_v2 = vld [vmem:[#allocation7 + $0x984] ss:$16 sps:$4 sm:$0xff]  }
 0x24e   :  { %2035 = vmatprep.subr.bf16.mxu0 %v7776_v13  ;;  %2117 = vmatprep.subr.bf16.mxu1 %v7779_v14  ;;  %v7846_v13 = vld [vmem:[#allocation7 + $0x7e0] ss:$16 sps:$4 sm:$0xff]   ;;  %v7849_v14 = vld [vmem:[#allocation7 + $0x7e8] ss:$16 sps:$4 sm:$0xff]  }
 0x251   :  { %2036 = vmatpush1.bf16.msra.mxu0 %v7774_v15  ;;  %2118 = vmatpush1.bf16.msra.mxu1 %v7777_v16  ;;  %v1190_v15 = vmul.f32 %v1186_v11, %v1158_v12  ;;  %v7854_v16 = vld [vmem:[#allocation7 + $0x804] ss:$16 sps:$4 sm:$0xff]   ;;  %v7930_v11 = vld [vmem:[#allocation7 + $0x9a0] ss:$16 sps:$4 sm:$0xff]   ;;  %v7933_v12 = vld [vmem:[#allocation7 + $0x9a8] ss:$16 sps:$4 sm:$0xff]  }
 0x252   :  { %2037 = vmatprep.subr.bf16.mxu0 %v7782_v17  ;;  %2119 = vmatprep.subr.bf16.mxu1 %v7785_v19  ;;  %v7857_v17 = vld [vmem:[#allocation7 + $0x80c] ss:$16 sps:$4 sm:$0xff]   ;;  %v7852_v19 = vld [vmem:[#allocation7 + $0x800] ss:$16 sps:$4 sm:$0xff]  }
 0x255   :  { %2038 = vmatpush1.bf16.msra.mxu0 %v7780_v20  ;;  %2120 = vmatpush1.bf16.msra.mxu1 %v7783_v21  ;;  %v1194_v20 = vpack.c.bf16 %v1190_v15, %v1190_v15  ;;  %v7860_v21 = vld [vmem:[#allocation7 + $0x824] ss:$16 sps:$4 sm:$0xff]   ;;  %v7936_v15 = vld [vmem:[#allocation7 + $0x9c0] ss:$16 sps:$4 sm:$0xff]  }
 0x256   :  { %2039 = vmatprep.subr.bf16.mxu0 %v7788_v23  ;;  %2121 = vmatprep.subr.bf16.mxu1 %v7791_v24  ;;  %v7863_v23 = vld [vmem:[#allocation7 + $0x82c] ss:$16 sps:$4 sm:$0xff]   ;;  %v7858_v24 = vld [vmem:[#allocation7 + $0x820] ss:$16 sps:$4 sm:$0xff]  }
 0x259   :  { %2040 = vmatpush1.bf16.msra.mxu0 %v7786_v26  ;;  %2122 = vmatpush1.bf16.msra.mxu1 %v7789_v28  ;;  %v7866_v26 = vld [vmem:[#allocation7 + $0x844] ss:$16 sps:$4 sm:$0xff]   ;;  %v7869_v28 = vld [vmem:[#allocation7 + $0x84c] ss:$16 sps:$4 sm:$0xff]  }
 0x25a   :  { %2041 = vmatprep.subr.bf16.mxu0 %v7794_v29  ;;  %2123 = vmatprep.subr.bf16.mxu1 %v7797_v30  ;;  %v7864_v29 = vld [vmem:[#allocation7 + $0x840] ss:$16 sps:$4 sm:$0xff]   ;;  %v7867_v30 = vld [vmem:[#allocation7 + $0x848] ss:$16 sps:$4 sm:$0xff]  }
 0x25d   :  { %2042 = vmatpush1.bf16.msra.mxu0 %v7792_v31  ;;  %2124 = vmatpush1.bf16.msra.mxu1 %v7795_v32  ;;  %v7875_v31 = vld [vmem:[#allocation7 + $0x86c] ss:$16 sps:$4 sm:$0xff]   ;;  %v7870_v32 = vld [vmem:[#allocation7 + $0x860] ss:$16 sps:$4 sm:$0xff]  }
 0x25e   :  { %2043 = vmatprep.subr.bf16.mxu0 %v7800_v33  ;;  %2125 = vmatprep.subr.bf16.mxu1 %v7803_v22  ;;  %v7873_v33 = vld [vmem:[#allocation7 + $0x868] ss:$16 sps:$4 sm:$0xff]   ;;  %v7878_v22 = vld [vmem:[#allocation7 + $0x884] ss:$16 sps:$4 sm:$0xff]  }
 0x261   :  { %2044 = vmatpush1.bf16.msra.mxu0 %v7798_v35  ;;  %2126 = vmatpush1.bf16.msra.mxu1 %v7801_v36  ;;  %v7876_v35 = vld [vmem:[#allocation7 + $0x880] ss:$16 sps:$4 sm:$0xff]   ;;  %v7879_v36 = vld [vmem:[#allocation7 + $0x888] ss:$16 sps:$4 sm:$0xff]  }
 0x262   :  { %2045 = vmatprep.subr.bf16.mxu0 %v7806_v37  ;;  %2127 = vmatprep.subr.bf16.mxu1 %v7809_v38  ;;  %v7884_v37 = vld [vmem:[#allocation7 + $0x8a4] ss:$16 sps:$4 sm:$0xff]   ;;  %v7887_v38 = vld [vmem:[#allocation7 + $0x8ac] ss:$16 sps:$4 sm:$0xff]  }
 0x265   :  { %2046 = vmatpush1.bf16.msra.mxu0 %v7804_v40  ;;  %2128 = vmatpush1.bf16.msra.mxu1 %v7807_v41  ;;  %v7885_v40 = vld [vmem:[#allocation7 + $0x8a8] ss:$16 sps:$4 sm:$0xff]   ;;  %v7890_v41 = vld [vmem:[#allocation7 + $0x8c4] ss:$16 sps:$4 sm:$0xff]  }
 0x266   :  { %2047 = vmatprep.subr.bf16.mxu0 %v7812_v42  ;;  %2129 = vmatprep.subr.bf16.mxu1 %v7815_v43  ;;  %v7893_v42 = vld [vmem:[#allocation7 + $0x8cc] ss:$16 sps:$4 sm:$0xff]   ;;  %v7888_v43 = vld [vmem:[#allocation7 + $0x8c0] ss:$16 sps:$4 sm:$0xff]  }
 0x269   :  { %2048 = vmatpush1.bf16.msra.mxu0 %v7810_v45  ;;  %2130 = vmatpush1.bf16.msra.mxu1 %v7813_v46  ;;  %v7896_v45 = vld [vmem:[#allocation7 + $0x8e4] ss:$16 sps:$4 sm:$0xff]   ;;  %v7899_v46 = vld [vmem:[#allocation7 + $0x8ec] ss:$16 sps:$4 sm:$0xff]  }
 0x26a   :  { %2049 = vmatprep.subr.bf16.mxu0 %v7818_v47  ;;  %2131 = vmatprep.subr.bf16.mxu1 %v7821_v48  ;;  %v7894_v47 = vld [vmem:[#allocation7 + $0x8e0] ss:$16 sps:$4 sm:$0xff]   ;;  %v7897_v48 = vld [vmem:[#allocation7 + $0x8e8] ss:$16 sps:$4 sm:$0xff]  }
 0x26d   :  { %2050 = vmatpush1.bf16.msra.mxu0 %v7816_v50  ;;  %2132 = vmatpush1.bf16.msra.mxu1 %v7819_v51  ;;  %v7905_v50 = vld [vmem:[#allocation7 + $0x90c] ss:$16 sps:$4 sm:$0xff]   ;;  %v7900_v51 = vld [vmem:[#allocation7 + $0x900] ss:$16 sps:$4 sm:$0xff]  }
 0x26e   :  { %2051 = vmatprep.subr.bf16.mxu0 %v7824_v52  ;;  %2133 = vmatprep.subr.bf16.mxu1 %v7827_v53  ;;  %v7903_v52 = vld [vmem:[#allocation7 + $0x908] ss:$16 sps:$4 sm:$0xff]   ;;  %v7908_v53 = vld [vmem:[#allocation7 + $0x924] ss:$16 sps:$4 sm:$0xff]  }
 0x271   :  { %2052 = vmatpush1.bf16.msra.mxu0 %v7822_v54  ;;  %2134 = vmatpush1.bf16.msra.mxu1 %v7825_v55  ;;  %v7911_v54 = vld [vmem:[#allocation7 + $0x92c] ss:$16 sps:$4 sm:$0xff]   ;;  %v7906_v55 = vld [vmem:[#allocation7 + $0x920] ss:$16 sps:$4 sm:$0xff]  }
 0x272   :  { %2053 = vmatprep.subr.bf16.mxu0 %v7830_v56  ;;  %2135 = vmatprep.subr.bf16.mxu1 %v7833_v57  ;;  %v7909_v56 = vld [vmem:[#allocation7 + $0x928] ss:$16 sps:$4 sm:$0xff]   ;;  %v7914_v57 = vld [vmem:[#allocation7 + $0x944] ss:$16 sps:$4 sm:$0xff]  }
 0x275   :  { %2054 = vmatpush1.bf16.msra.mxu0 %v7828_v58  ;;  %2136 = vmatpush1.bf16.msra.mxu1 %v7831_v59  ;;  %v7917_v58 = vld [vmem:[#allocation7 + $0x94c] ss:$16 sps:$4 sm:$0xff]   ;;  %v7912_v59 = vld [vmem:[#allocation7 + $0x940] ss:$16 sps:$4 sm:$0xff]  }
 0x276   :  { %2055 = vmatprep.subr.bf16.mxu0 %v7836_v60  ;;  %2137 = vmatprep.subr.bf16.mxu1 %v7839_v61  ;;  %v7915_v60 = vld [vmem:[#allocation7 + $0x948] ss:$16 sps:$4 sm:$0xff]   ;;  %v7920_v61 = vld [vmem:[#allocation7 + $0x964] ss:$16 sps:$4 sm:$0xff]  }
 0x279   :  { %2056 = vmatpush1.bf16.msra.mxu0 %v7834_v62  ;;  %2138 = vmatpush1.bf16.msra.mxu1 %v7837_v63  ;;  %v7923_v62 = vld [vmem:[#allocation7 + $0x96c] ss:$16 sps:$4 sm:$0xff]   ;;  %v7918_v63 = vld [vmem:[#allocation7 + $0x960] ss:$16 sps:$4 sm:$0xff]  }
 0x27a   :  { %2057 = vmatprep.subr.bf16.mxu0 %v7842_v0  ;;  %2139 = vmatprep.subr.bf16.mxu1 %v7845_v1  ;;  %v7921_v0 = vld [vmem:[#allocation7 + $0x968] ss:$16 sps:$4 sm:$0xff]   ;;  %v7924_v1 = vld [vmem:[#allocation7 + $0x980] ss:$16 sps:$4 sm:$0xff]  }
 0x27d   :  { %2058 = vmatpush1.bf16.msra.mxu0 %v7840_v3  ;;  %2140 = vmatpush1.bf16.msra.mxu1 %v7843_v4  ;;  %v7927_v3 = vld [vmem:[#allocation7 + $0x988] ss:$16 sps:$4 sm:$0xff]   ;;  %v7929_v4 = vld [vmem:[#allocation7 + $0x98c] ss:$16 sps:$4 sm:$0xff]  }
 0x27e   :  { %2059 = vmatprep.subr.bf16.mxu0 %v7848_v5  ;;  %2141 = vmatprep.subr.bf16.mxu1 %v7851_v6  ;;  %v7932_v5 = vld [vmem:[#allocation7 + $0x9a4] ss:$16 sps:$4 sm:$0xff]   ;;  %v7935_v6 = vld [vmem:[#allocation7 + $0x9ac] ss:$16 sps:$4 sm:$0xff]  }
 0x281   :  { %2060 = vmatpush1.bf16.msra.mxu0 %v7846_v13  ;;  %2142 = vmatpush1.bf16.msra.mxu1 %v7849_v14  ;;  %v7938_v13 = vld [vmem:[#allocation7 + $0x9c4] ss:$16 sps:$4 sm:$0xff]   ;;  %v7941_v14 = vld [vmem:[#allocation7 + $0x9cc] ss:$16 sps:$4 sm:$0xff]  }
 0x282   :  { %2984 = vmatprep.subr.bf16.mxu0 %v7854_v16  ;;  %3066 = vmatprep.subr.bf16.mxu1 %v7857_v17  ;;  %v7939_v16 = vld [vmem:[#allocation7 + $0x9c8] ss:$16 sps:$4 sm:$0xff]   ;;  %v7944_v17 = vld [vmem:[#allocation7 + $0x9e4] ss:$16 sps:$4 sm:$0xff]  }
 0x284   :  { %2062 = vmatmul.mubr.bf16.vlgmr.msra.gmra.mrb[4].mxu0 %v1194_v20  ;;  %2144 = vmatmul.mubr.bf16.vlgmr.msra.gmra.mrb[4].mxu1 %v1194_v20  ;;  %v7945_v20 = vld [vmem:[#allocation7 + $0x9e8] ss:$16 sps:$4 sm:$0xff]  }
 0x285   :  { %2985 = vmatpush1.bf16.msra.mxu0 %v7852_v19  ;;  %3067 = vmatpush1.bf16.msra.mxu1 %v7855_v27  ;;  %v7947_v19 = vld [vmem:[#allocation7 + $0x9ec] ss:$16 sps:$4 sm:$0xff]   ;;  %v7942_v27 = vld [vmem:[#allocation7 + $0x9e0] ss:$16 sps:$4 sm:$0xff]  }
 0x286   :  { %2986 = vmatprep.subr.bf16.mxu0 %v7860_v21  ;;  %3068 = vmatprep.subr.bf16.mxu1 %v7863_v23  ;;  %v7950_v21 = vld [vmem:[#allocation7 + $0xa04] ss:$16 sps:$4 sm:$0xff]   ;;  %v7953_v23 = vld [vmem:[#allocation7 + $0xa0c] ss:$16 sps:$4 sm:$0xff]  }
 0x289   :  { %2987 = vmatpush1.bf16.msra.mxu0 %v7858_v24  ;;  %3069 = vmatpush1.bf16.msra.mxu1 %v7861_v25  ;;  %v9062_v24 = vld [vmem:[#allocation8 + $0x4] sm:$0xf] }
 0x28a   :  { %2988 = vmatprep.subr.bf16.mxu0 %v7866_v26  ;;  %3070 = vmatprep.subr.bf16.mxu1 %v7869_v28  ;;  %v1331_v25 = vrot.slane %v9062_v24, %v9019_v7  ;;  %v1335_v26 = vrot.slane %v9062_v24, %v9021_v8  ;;  %v1343_v28 = vrot.slane %v9062_v24, %v9025_v10 }
 0x28d   :  { %2989 = vmatpush1.bf16.msra.mxu0 %v7864_v29  ;;  %3071 = vmatpush1.bf16.msra.mxu1 %v7867_v30 }
 0x28e   :  { %2990 = vmatprep.subr.bf16.mxu0 %v7872_v18  ;;  %3072 = vmatprep.subr.bf16.mxu1 %v7875_v31 }
 0x291   :  { %2991 = vmatpush1.bf16.msra.mxu0 %v7870_v32  ;;  %3073 = vmatpush1.bf16.msra.mxu1 %v7873_v33 }
 0x292   :  { %2992 = vmatprep.subr.bf16.mxu0 %v7878_v22  ;;  %3074 = vmatprep.subr.bf16.mxu1 %v7881_v34 }
 0x295   :  { %2993 = vmatpush1.bf16.msra.mxu0 %v7876_v35  ;;  %3075 = vmatpush1.bf16.msra.mxu1 %v7879_v36 }
 0x296   :  { %2994 = vmatprep.subr.bf16.mxu0 %v7884_v37  ;;  %3076 = vmatprep.subr.bf16.mxu1 %v7887_v38 }
 0x299   :  { %2995 = vmatpush1.bf16.msra.mxu0 %v7882_v39  ;;  %3077 = vmatpush1.bf16.msra.mxu1 %v7885_v40 }
 0x29a   :  { %2996 = vmatprep.subr.bf16.mxu0 %v7890_v41  ;;  %3078 = vmatprep.subr.bf16.mxu1 %v7893_v42 }
 0x29d   :  { %2997 = vmatpush1.bf16.msra.mxu0 %v7888_v43  ;;  %3079 = vmatpush1.bf16.msra.mxu1 %v7891_v44 }
 0x29e   :  { %2998 = vmatprep.subr.bf16.mxu0 %v7896_v45  ;;  %3080 = vmatprep.subr.bf16.mxu1 %v7899_v46 }
 0x2a1   :  { %2999 = vmatpush1.bf16.msra.mxu0 %v7894_v47  ;;  %3081 = vmatpush1.bf16.msra.mxu1 %v7897_v48 }
 0x2a2   :  { %3000 = vmatprep.subr.bf16.mxu0 %v7902_v49  ;;  %3082 = vmatprep.subr.bf16.mxu1 %v7905_v50 }
 0x2a5   :  { %3001 = vmatpush1.bf16.msra.mxu0 %v7900_v51  ;;  %3083 = vmatpush1.bf16.msra.mxu1 %v7903_v52 }
 0x2a6   :  { %3002 = vmatprep.subr.bf16.mxu0 %v7908_v53  ;;  %3084 = vmatprep.subr.bf16.mxu1 %v7911_v54 }
 0x2a9   :  { %3003 = vmatpush1.bf16.msra.mxu0 %v7906_v55  ;;  %3085 = vmatpush1.bf16.msra.mxu1 %v7909_v56 }
 0x2aa   :  { %3004 = vmatprep.subr.bf16.mxu0 %v7914_v57  ;;  %3086 = vmatprep.subr.bf16.mxu1 %v7917_v58 }
 0x2ad   :  { %3005 = vmatpush1.bf16.msra.mxu0 %v7912_v59  ;;  %3087 = vmatpush1.bf16.msra.mxu1 %v7915_v60 }
 0x2ae   :  { %3006 = vmatprep.subr.bf16.mxu0 %v7920_v61  ;;  %3088 = vmatprep.subr.bf16.mxu1 %v7923_v62 }
 0x2b1   :  { %3007 = vmatpush1.bf16.msra.mxu0 %v7918_v63  ;;  %3089 = vmatpush1.bf16.msra.mxu1 %v7921_v0 }
 0x2b2   :  { %3008 = vmatprep.subr.bf16.mxu0 %v7926_v2  ;;  %3090 = vmatprep.subr.bf16.mxu1 %v7929_v4  ;;  %v7948_v2 = vld [vmem:[#allocation7 + $0xa00] ss:$16 sps:$4 sm:$0xff]  }
 0x2b5   :  { %3009 = vmatpush1.bf16.msra.mxu0 %v7924_v1  ;;  %3091 = vmatpush1.bf16.msra.mxu1 %v7927_v3  ;;  %v7951_v3 = vld [vmem:[#allocation7 + $0xa08] ss:$16 sps:$4 sm:$0xff]  }
 0x2b6   :  { %3010 = vmatprep.subr.bf16.mxu0 %v7932_v5  ;;  %3092 = vmatprep.subr.bf16.mxu1 %v7935_v6  ;;  %v7956_v5 = vld [vmem:[#allocation7 + $0xa24] ss:$16 sps:$4 sm:$0xff]   ;;  %v7959_v6 = vld [vmem:[#allocation7 + $0xa2c] ss:$16 sps:$4 sm:$0xff]  }
 0x2b9   :  { %3011 = vmatpush1.bf16.msra.mxu0 %v7930_v11  ;;  %3093 = vmatpush1.bf16.msra.mxu1 %v7933_v12  ;;  %v7954_v12 = vld [vmem:[#allocation7 + $0xa20] ss:$16 sps:$4 sm:$0xff]  }
 0x2ba   :  { %3012 = vmatprep.subr.bf16.mxu0 %v7938_v13  ;;  %3094 = vmatprep.subr.bf16.mxu1 %v7941_v14  ;;  %v7957_v13 = vld [vmem:[#allocation7 + $0xa28] ss:$16 sps:$4 sm:$0xff]   ;;  %v7962_v14 = vld [vmem:[#allocation7 + $0xa44] ss:$16 sps:$4 sm:$0xff]  }
 0x2bd   :  { %3013 = vmatpush1.bf16.msra.mxu0 %v7936_v15  ;;  %3095 = vmatpush1.bf16.msra.mxu1 %v7939_v16  ;;  %v7965_v15 = vld [vmem:[#allocation7 + $0xa4c] ss:$16 sps:$4 sm:$0xff]   ;;  %v7960_v16 = vld [vmem:[#allocation7 + $0xa40] ss:$16 sps:$4 sm:$0xff]  }
 0x2be   :  { %3014 = vmatprep.subr.bf16.mxu0 %v7944_v17  ;;  %3096 = vmatprep.subr.bf16.mxu1 %v7947_v19  ;;  %v7963_v17 = vld [vmem:[#allocation7 + $0xa48] ss:$16 sps:$4 sm:$0xff]   ;;  %v7968_v19 = vld [vmem:[#allocation7 + $0xa64] ss:$16 sps:$4 sm:$0xff]  }
 0x2c1   :  { %3015 = vmatpush1.bf16.msra.mxu0 %v7942_v27  ;;  %3097 = vmatpush1.bf16.msra.mxu1 %v7945_v20  ;;  %v7971_v27 = vld [vmem:[#allocation7 + $0xa6c] ss:$16 sps:$4 sm:$0xff]   ;;  %v7966_v20 = vld [vmem:[#allocation7 + $0xa60] ss:$16 sps:$4 sm:$0xff]  }
 0x2c2   :  { %3025 = vmatprep.subr.bf16.mxu0 %v7950_v21  ;;  %3107 = vmatprep.subr.bf16.mxu1 %v7953_v23  ;;  %v7969_v21 = vld [vmem:[#allocation7 + $0xa68] ss:$16 sps:$4 sm:$0xff]   ;;  %v7974_v23 = vld [vmem:[#allocation7 + $0xa84] ss:$16 sps:$4 sm:$0xff]  }
 0x357   :  { %v2063_v29 = vpop.f32.mrb[4].mxu0  ;;  %v9070_v30 = vpop.f32.mrb[4].mxu1 }
 0x358   :  { %v7387_v18 = vadd.f32 %v2063_v29, %v1331_v25  ;;  %v2065_v31 = vpop.f32.mrb[5].mxu0  ;;  %v2147_v32 = vpop.f32.mrb[5].mxu1  ;;  %v7977_v25 = vld [vmem:[#allocation7 + $0xa8c] ss:$16 sps:$4 sm:$0xff]   ;;  %v7975_v29 = vld [vmem:[#allocation7 + $0xa88] ss:$16 sps:$4 sm:$0xff]  }
 0x359   :  { %v7388_v33 = vadd.f32 %v2065_v31, %v1335_v26  ;;  %v7390_v22 = vadd.f32 %v2147_v32, %v1343_v28  ;;  %v2067_v34 = vpop.f32.mrb[6].mxu0  ;;  %v2149_v35 = vpop.f32.mrb[6].mxu1  ;;  %v1339_v26 = vrot.slane %v9062_v24, %v9023_v9  ;;  %v7972_v28 = vld [vmem:[#allocation7 + $0xa80] ss:$16 sps:$4 sm:$0xff]   ;;  %v7983_v31 = vld [vmem:[#allocation7 + $0xaac] ss:$16 sps:$4 sm:$0xff]  }
 0x35a   :  { %v2156_v36 = vmul.f32 %v7387_v18, %v7387_v18  ;;  %v2068_v37 = vpop.f32.mrb[7].mxu0  ;;  %v2150_v38 = vpop.f32.mrb[7].mxu1  ;;  %v2152_v56 = vmul.f32 0.5, %v7387_v18  ;;  %v7986_v34 = vld [vmem:[#allocation7 + $0xac4] ss:$16 sps:$4 sm:$0xff]  }
 0x35b   :  { %v2157_v39 = vmul.f32 %v7388_v33, %v7388_v33  ;;  %v2159_v40 = vmul.f32 %v7390_v22, %v7390_v22  ;;  %v2153_v58 = vmul.f32 0.5, %v7388_v33  ;;  %v2155_v61 = vmul.f32 0.5, %v7390_v22  ;;  %v7989_v35 = vld [vmem:[#allocation7 + $0xacc] ss:$16 sps:$4 sm:$0xff]   ;;  %v7987_v37 = vld [vmem:[#allocation7 + $0xac8] ss:$16 sps:$4 sm:$0xff]  }
 0x35c   :  { %v2160_v41 = vmul.f32 %v7387_v18, %v2156_v36  ;;  %v9075_v32 = vadd.f32 %v9070_v30, %v1339_v26  ;;  %v7984_v36 = vld [vmem:[#allocation7 + $0xac0] ss:$16 sps:$4 sm:$0xff]   ;;  %v7992_v38 = vld [vmem:[#allocation7 + $0xae4] ss:$16 sps:$4 sm:$0xff]   ;;  %v7995_v30 = vld [vmem:[#allocation7 + $0xaec] ss:$16 sps:$4 sm:$0xff]  }
 0x35d   :  { %v2161_v42 = vmul.f32 %v7388_v33, %v2157_v39  ;;  %v2163_v43 = vmul.f32 %v7390_v22, %v2159_v40  ;;  %v7990_v40 = vld [vmem:[#allocation7 + $0xae0] ss:$16 sps:$4 sm:$0xff]   ;;  %v8047_v26 = vld [vmem:[#allocation7 + $0xc08] ss:$16 sps:$4 sm:$0xff]  }
 0x35e   :  { %v2164_v44 = vmul.f32 0.044715, %v2160_v41  ;;  %v2158_v24 = vmul.f32 %v9075_v32, %v9075_v32  ;;  %v7993_v41 = vld [vmem:[#allocation7 + $0xae8] ss:$16 sps:$4 sm:$0xff]  }
 0x35f   :  { %v2165_v45 = vmul.f32 0.044715, %v2161_v42  ;;  %v2167_v46 = vmul.f32 0.044715, %v2163_v43  ;;  %v7998_v42 = vld [vmem:[#allocation7 + $0xb04] ss:$16 sps:$4 sm:$0xff]  }
 0x360   :  { %v2168_v47 = vadd.f32 %v7387_v18, %v2164_v44  ;;  %v7980_v18 = vld [vmem:[#allocation7 + $0xaa4] ss:$16 sps:$4 sm:$0xff]   ;;  %v2162_v39 = vmul.f32 %v9075_v32, %v2158_v24  ;;  %v8001_v43 = vld [vmem:[#allocation7 + $0xb0c] ss:$16 sps:$4 sm:$0xff]  }
 0x361   :  { %v2169_v48 = vadd.f32 %v7388_v33, %v2165_v45  ;;  %v2171_v49 = vadd.f32 %v7390_v22, %v2167_v46  ;;  %v7978_v33 = vld [vmem:[#allocation7 + $0xaa0] ss:$16 sps:$4 sm:$0xff]   ;;  %v7981_v22 = vld [vmem:[#allocation7 + $0xaa8] ss:$16 sps:$4 sm:$0xff]   ;;  %v8064_v24 = vld [vmem:[#allocation7 + $0xc64] ss:$16 sps:$4 sm:$0xff]  }
 0x362   :  { %v2172_v50 = vmul.f32 0.7978846, %v2168_v47  ;;  %v2166_v44 = vmul.f32 0.044715, %v2162_v39  ;;  %v7996_v45 = vld [vmem:[#allocation7 + $0xb00] ss:$16 sps:$4 sm:$0xff]  }
 0x363   :  { %v2173_v51 = vmul.f32 0.7978846, %v2169_v48  ;;  %v2175_v52 = vmul.f32 0.7978846, %v2171_v49  ;;  %v7999_v46 = vld [vmem:[#allocation7 + $0xb08] ss:$16 sps:$4 sm:$0xff]  }
 0x364   :  { %8668 = vtanh.f32 %v2172_v50  ;;  %v8004_v47 = vld [vmem:[#allocation7 + $0xb24] ss:$16 sps:$4 sm:$0xff]   ;;  %v8007_v48 = vld [vmem:[#allocation7 + $0xb2c] ss:$16 sps:$4 sm:$0xff]   ;;  %v2170_v49 = vadd.f32 %v9075_v32, %v2166_v44  ;;  %v8002_v50 = vld [vmem:[#allocation7 + $0xb20] ss:$16 sps:$4 sm:$0xff]  }
 0x365   :  { %8670 = vtanh.f32 %v2173_v51  ;;  %v8005_v51 = vld [vmem:[#allocation7 + $0xb28] ss:$16 sps:$4 sm:$0xff]   ;;  %v8073_v39 = vld [vmem:[#allocation7 + $0xc8c] ss:$16 sps:$4 sm:$0xff]   ;;  %v8074_v44 = vld [vmem:[#allocation7 + $0xca0] ss:$16 sps:$4 sm:$0xff]  }
 0x366   :  { %8672 = vtanh.f32 %v2175_v52  ;;  %v8010_v52 = vld [vmem:[#allocation7 + $0xb44] ss:$16 sps:$4 sm:$0xff]  }
 0x36e   :  { %v8669_v53 = vpop.eup %8668 }
 0x36f   :  { %v2180_v54 = vadd.f32 1.0, %v8669_v53  ;;  %v8671_v55 = vpop.eup %8670  ;;  %v8013_v53 = vld [vmem:[#allocation7 + $0xb4c] ss:$16 sps:$4 sm:$0xff]  }
 0x370   :  { %v8673_v57 = vpop.eup %8672  ;;  %v2181_v59 = vadd.f32 1.0, %v8671_v55  ;;  %v8008_v55 = vld [vmem:[#allocation7 + $0xb40] ss:$16 sps:$4 sm:$0xff]  }
 0x371   :  { %v2184_v60 = vmul.f32 %v2180_v54, %v2152_v56  ;;  %v2183_v62 = vadd.f32 1.0, %v8673_v57  ;;  %v2174_v54 = vmul.f32 0.7978846, %v2170_v49  ;;  %v8011_v56 = vld [vmem:[#allocation7 + $0xb48] ss:$16 sps:$4 sm:$0xff]  }
 0x372   :  { %v2185_v63 = vmul.f32 %v2181_v59, %v2153_v58  ;;  %v8016_v57 = vld [vmem:[#allocation7 + $0xb64] ss:$16 sps:$4 sm:$0xff]   ;;  %v8019_v58 = vld [vmem:[#allocation7 + $0xb6c] ss:$16 sps:$4 sm:$0xff]   ;;  %v8014_v59 = vld [vmem:[#allocation7 + $0xb60] ss:$16 sps:$4 sm:$0xff]  }
 0x373   :  { %v2187_v0 = vmul.f32 %v2183_v62, %v2155_v61  ;;  %v2188_v4 = vpack.c.bf16 %v2184_v60, %v2184_v60  ;;  %8674 = vtanh.f32 %v2174_v54  ;;  %v8017_v60 = vld [vmem:[#allocation7 + $0xb68] ss:$16 sps:$4 sm:$0xff]   ;;  %v8022_v61 = vld [vmem:[#allocation7 + $0xb84] ss:$16 sps:$4 sm:$0xff]   ;;  %v8025_v62 = vld [vmem:[#allocation7 + $0xb8c] ss:$16 sps:$4 sm:$0xff]  }
 0x374   :  { %v2189_v1 = vpack.c.bf16 %v2185_v63, %v2185_v63  ;;  %v8020_v63 = vld [vmem:[#allocation7 + $0xb80] ss:$16 sps:$4 sm:$0xff]   ;;  %v8083_v49 = vld [vmem:[#allocation7 + $0xcc8] ss:$16 sps:$4 sm:$0xff]   ;;  %v8094_v54 = vld [vmem:[#allocation7 + $0xd04] ss:$16 sps:$4 sm:$0xff]  }
 0x375   :  { %v2191_v11 = vpack.c.bf16 %v2187_v0, %v2187_v0  ;;  %v8023_v0 = vld [vmem:[#allocation7 + $0xb88] ss:$16 sps:$4 sm:$0xff]  }
 0x376   :  { %3016 = vmatprep.mubr.bf16.mxu0 %v2189_v1  ;;  %3098 = vmatprep.mubr.bf16.mxu1 %v2189_v1  ;;  %v8028_v1 = vld [vmem:[#allocation7 + $0xba4] ss:$16 sps:$4 sm:$0xff]  }
 0x377   :  { %3017 = vmatmul.mubr.bf16.vlgmr.msra.gmra.mrb[8].mxu0 %v2188_v4  ;;  %3099 = vmatmul.mubr.bf16.vlgmr.msra.gmra.mrb[8].mxu1 %v2188_v4  ;;  %v8029_v4 = vld [vmem:[#allocation7 + $0xba8] ss:$16 sps:$4 sm:$0xff]  }
 0x378   :  { %3026 = vmatpush1.bf16.msra.mxu0 %v7948_v2  ;;  %3108 = vmatpush1.bf16.msra.mxu1 %v7951_v3  ;;  %v8031_v2 = vld [vmem:[#allocation7 + $0xbac] ss:$16 sps:$4 sm:$0xff]   ;;  %v8026_v3 = vld [vmem:[#allocation7 + $0xba0] ss:$16 sps:$4 sm:$0xff]  }
 0x379   :  { %3057 = vmatprep.mubr.bf16.mxu0 %v2191_v11  ;;  %3139 = vmatprep.mubr.bf16.mxu1 %v2191_v11 }
 0x37a   :  { %3027 = vmatprep.subr.bf16.mxu0 %v7956_v5  ;;  %3109 = vmatprep.subr.bf16.mxu1 %v7959_v6  ;;  %v8034_v5 = vld [vmem:[#allocation7 + $0xbc4] ss:$16 sps:$4 sm:$0xff]   ;;  %v8037_v6 = vld [vmem:[#allocation7 + $0xbcc] ss:$16 sps:$4 sm:$0xff]  }
 0x37c   :  { %3028 = vmatpush1.bf16.msra.mxu0 %v7954_v12  ;;  %3110 = vmatpush1.bf16.msra.mxu1 %v7957_v13  ;;  %v8032_v12 = vld [vmem:[#allocation7 + $0xbc0] ss:$16 sps:$4 sm:$0xff]   ;;  %v8035_v13 = vld [vmem:[#allocation7 + $0xbc8] ss:$16 sps:$4 sm:$0xff]  }
 0x37d   :  { %3029 = vmatprep.subr.bf16.mxu0 %v7962_v14  ;;  %3111 = vmatprep.subr.bf16.mxu1 %v7965_v15  ;;  %v8675_v11 = vpop.eup %8674  ;;  %v8040_v14 = vld [vmem:[#allocation7 + $0xbe4] ss:$16 sps:$4 sm:$0xff]   ;;  %v8043_v15 = vld [vmem:[#allocation7 + $0xbec] ss:$16 sps:$4 sm:$0xff]  }
 0x380   :  { %3030 = vmatpush1.bf16.msra.mxu0 %v7960_v16  ;;  %3112 = vmatpush1.bf16.msra.mxu1 %v7963_v17  ;;  %v2182_v16 = vadd.f32 1.0, %v8675_v11  ;;  %v2154_v17 = vmul.f32 0.5, %v9075_v32  ;;  %v8053_v32 = vld [vmem:[#allocation7 + $0xc28] ss:$16 sps:$4 sm:$0xff]   ;;  %v8118_v11 = vld [vmem:[#allocation7 + $0xd84] ss:$16 sps:$4 sm:$0xff]  }
 0x381   :  { %3031 = vmatprep.subr.bf16.mxu0 %v7968_v19  ;;  %3113 = vmatprep.subr.bf16.mxu1 %v7971_v27  ;;  %v8038_v19 = vld [vmem:[#allocation7 + $0xbe0] ss:$16 sps:$4 sm:$0xff]   ;;  %v8041_v27 = vld [vmem:[#allocation7 + $0xbe8] ss:$16 sps:$4 sm:$0xff]  }
 0x384   :  { %3032 = vmatpush1.bf16.msra.mxu0 %v7966_v20  ;;  %3114 = vmatpush1.bf16.msra.mxu1 %v7969_v21  ;;  %v2186_v20 = vmul.f32 %v2182_v16, %v2154_v17  ;;  %v8046_v21 = vld [vmem:[#allocation7 + $0xc04] ss:$16 sps:$4 sm:$0xff]   ;;  %v8122_v16 = vld [vmem:[#allocation7 + $0xda0] ss:$16 sps:$4 sm:$0xff]   ;;  %v8125_v17 = vld [vmem:[#allocation7 + $0xda8] ss:$16 sps:$4 sm:$0xff]  }
 0x385   :  { %3033 = vmatprep.subr.bf16.mxu0 %v7974_v23  ;;  %3115 = vmatprep.subr.bf16.mxu1 %v7977_v25  ;;  %v8049_v23 = vld [vmem:[#allocation7 + $0xc0c] ss:$16 sps:$4 sm:$0xff]   ;;  %v8044_v25 = vld [vmem:[#allocation7 + $0xc00] ss:$16 sps:$4 sm:$0xff]  }
 0x388   :  { %3034 = vmatpush1.bf16.msra.mxu0 %v7972_v28  ;;  %3116 = vmatpush1.bf16.msra.mxu1 %v7975_v29  ;;  %v2190_v28 = vpack.c.bf16 %v2186_v20, %v2186_v20  ;;  %v8052_v29 = vld [vmem:[#allocation7 + $0xc24] ss:$16 sps:$4 sm:$0xff]   ;;  %v8128_v20 = vld [vmem:[#allocation7 + $0xdc0] ss:$16 sps:$4 sm:$0xff]  }
 0x389   :  { %3035 = vmatprep.subr.bf16.mxu0 %v7980_v18  ;;  %3117 = vmatprep.subr.bf16.mxu1 %v7983_v31  ;;  %v8055_v18 = vld [vmem:[#allocation7 + $0xc2c] ss:$16 sps:$4 sm:$0xff]   ;;  %v8050_v31 = vld [vmem:[#allocation7 + $0xc20] ss:$16 sps:$4 sm:$0xff]  }
 0x38c   :  { %3036 = vmatpush1.bf16.msra.mxu0 %v7978_v33  ;;  %3118 = vmatpush1.bf16.msra.mxu1 %v7981_v22  ;;  %v8058_v33 = vld [vmem:[#allocation7 + $0xc44] ss:$16 sps:$4 sm:$0xff]   ;;  %v8061_v22 = vld [vmem:[#allocation7 + $0xc4c] ss:$16 sps:$4 sm:$0xff]  }
 0x38d   :  { %3037 = vmatprep.subr.bf16.mxu0 %v7986_v34  ;;  %3119 = vmatprep.subr.bf16.mxu1 %v7989_v35  ;;  %v8056_v34 = vld [vmem:[#allocation7 + $0xc40] ss:$16 sps:$4 sm:$0xff]   ;;  %v8059_v35 = vld [vmem:[#allocation7 + $0xc48] ss:$16 sps:$4 sm:$0xff]  }
 0x390   :  { %3038 = vmatpush1.bf16.msra.mxu0 %v7984_v36  ;;  %3120 = vmatpush1.bf16.msra.mxu1 %v7987_v37  ;;  %v8067_v36 = vld [vmem:[#allocation7 + $0xc6c] ss:$16 sps:$4 sm:$0xff]   ;;  %v8062_v37 = vld [vmem:[#allocation7 + $0xc60] ss:$16 sps:$4 sm:$0xff]  }
 0x391   :  { %3039 = vmatprep.subr.bf16.mxu0 %v7992_v38  ;;  %3121 = vmatprep.subr.bf16.mxu1 %v7995_v30  ;;  %v8065_v38 = vld [vmem:[#allocation7 + $0xc68] ss:$16 sps:$4 sm:$0xff]   ;;  %v8070_v30 = vld [vmem:[#allocation7 + $0xc84] ss:$16 sps:$4 sm:$0xff]  }
 0x394   :  { %3040 = vmatpush1.bf16.msra.mxu0 %v7990_v40  ;;  %3122 = vmatpush1.bf16.msra.mxu1 %v7993_v41  ;;  %v8068_v40 = vld [vmem:[#allocation7 + $0xc80] ss:$16 sps:$4 sm:$0xff]   ;;  %v8071_v41 = vld [vmem:[#allocation7 + $0xc88] ss:$16 sps:$4 sm:$0xff]  }
 0x395   :  { %3041 = vmatprep.subr.bf16.mxu0 %v7998_v42  ;;  %3123 = vmatprep.subr.bf16.mxu1 %v8001_v43  ;;  %v8076_v42 = vld [vmem:[#allocation7 + $0xca4] ss:$16 sps:$4 sm:$0xff]   ;;  %v8079_v43 = vld [vmem:[#allocation7 + $0xcac] ss:$16 sps:$4 sm:$0xff]  }
 0x398   :  { %3042 = vmatpush1.bf16.msra.mxu0 %v7996_v45  ;;  %3124 = vmatpush1.bf16.msra.mxu1 %v7999_v46  ;;  %v8077_v45 = vld [vmem:[#allocation7 + $0xca8] ss:$16 sps:$4 sm:$0xff]   ;;  %v8082_v46 = vld [vmem:[#allocation7 + $0xcc4] ss:$16 sps:$4 sm:$0xff]  }
 0x399   :  { %3043 = vmatprep.subr.bf16.mxu0 %v8004_v47  ;;  %3125 = vmatprep.subr.bf16.mxu1 %v8007_v48  ;;  %v8085_v47 = vld [vmem:[#allocation7 + $0xccc] ss:$16 sps:$4 sm:$0xff]   ;;  %v8080_v48 = vld [vmem:[#allocation7 + $0xcc0] ss:$16 sps:$4 sm:$0xff]  }
 0x39c   :  { %3044 = vmatpush1.bf16.msra.mxu0 %v8002_v50  ;;  %3126 = vmatpush1.bf16.msra.mxu1 %v8005_v51  ;;  %v8088_v50 = vld [vmem:[#allocation7 + $0xce4] ss:$16 sps:$4 sm:$0xff]   ;;  %v8091_v51 = vld [vmem:[#allocation7 + $0xcec] ss:$16 sps:$4 sm:$0xff]  }
 0x39d   :  { %3045 = vmatprep.subr.bf16.mxu0 %v8010_v52  ;;  %3127 = vmatprep.subr.bf16.mxu1 %v8013_v53  ;;  %v8086_v52 = vld [vmem:[#allocation7 + $0xce0] ss:$16 sps:$4 sm:$0xff]   ;;  %v8089_v53 = vld [vmem:[#allocation7 + $0xce8] ss:$16 sps:$4 sm:$0xff]  }
 0x3a0   :  { %3046 = vmatpush1.bf16.msra.mxu0 %v8008_v55  ;;  %3128 = vmatpush1.bf16.msra.mxu1 %v8011_v56  ;;  %v8097_v55 = vld [vmem:[#allocation7 + $0xd0c] ss:$16 sps:$4 sm:$0xff]   ;;  %v8092_v56 = vld [vmem:[#allocation7 + $0xd00] ss:$16 sps:$4 sm:$0xff]  }
 0x3a1   :  { %3047 = vmatprep.subr.bf16.mxu0 %v8016_v57  ;;  %3129 = vmatprep.subr.bf16.mxu1 %v8019_v58  ;;  %v8095_v57 = vld [vmem:[#allocation7 + $0xd08] ss:$16 sps:$4 sm:$0xff]   ;;  %v8100_v58 = vld [vmem:[#allocation7 + $0xd24] ss:$16 sps:$4 sm:$0xff]  }
 0x3a4   :  { %3048 = vmatpush1.bf16.msra.mxu0 %v8014_v59  ;;  %3130 = vmatpush1.bf16.msra.mxu1 %v8017_v60  ;;  %v8103_v59 = vld [vmem:[#allocation7 + $0xd2c] ss:$16 sps:$4 sm:$0xff]   ;;  %v8098_v60 = vld [vmem:[#allocation7 + $0xd20] ss:$16 sps:$4 sm:$0xff]  }
 0x3a5   :  { %3049 = vmatprep.subr.bf16.mxu0 %v8022_v61  ;;  %3131 = vmatprep.subr.bf16.mxu1 %v8025_v62  ;;  %v8101_v61 = vld [vmem:[#allocation7 + $0xd28] ss:$16 sps:$4 sm:$0xff]   ;;  %v8106_v62 = vld [vmem:[#allocation7 + $0xd44] ss:$16 sps:$4 sm:$0xff]  }
 0x3a8   :  { %3050 = vmatpush1.bf16.msra.mxu0 %v8020_v63  ;;  %3132 = vmatpush1.bf16.msra.mxu1 %v8023_v0  ;;  %v8109_v63 = vld [vmem:[#allocation7 + $0xd4c] ss:$16 sps:$4 sm:$0xff]   ;;  %v8104_v0 = vld [vmem:[#allocation7 + $0xd40] ss:$16 sps:$4 sm:$0xff]  }
 0x3a9   :  { %3051 = vmatprep.subr.bf16.mxu0 %v8028_v1  ;;  %3133 = vmatprep.subr.bf16.mxu1 %v8031_v2  ;;  %v8107_v1 = vld [vmem:[#allocation7 + $0xd48] ss:$16 sps:$4 sm:$0xff]   ;;  %v8112_v2 = vld [vmem:[#allocation7 + $0xd64] ss:$16 sps:$4 sm:$0xff]  }
 0x3ac   :  { %3052 = vmatpush1.bf16.msra.mxu0 %v8026_v3  ;;  %3134 = vmatpush1.bf16.msra.mxu1 %v8029_v4  ;;  %v8115_v3 = vld [vmem:[#allocation7 + $0xd6c] ss:$16 sps:$4 sm:$0xff]   ;;  %v8110_v4 = vld [vmem:[#allocation7 + $0xd60] ss:$16 sps:$4 sm:$0xff]  }
 0x3ad   :  { %3053 = vmatprep.subr.bf16.mxu0 %v8034_v5  ;;  %3135 = vmatprep.subr.bf16.mxu1 %v8037_v6  ;;  %v8113_v5 = vld [vmem:[#allocation7 + $0xd68] ss:$16 sps:$4 sm:$0xff]   ;;  %v8116_v6 = vld [vmem:[#allocation7 + $0xd80] ss:$16 sps:$4 sm:$0xff]  }
 0x3b0   :  { %3054 = vmatpush1.bf16.msra.mxu0 %v8032_v12  ;;  %3136 = vmatpush1.bf16.msra.mxu1 %v8035_v13  ;;  %v8119_v12 = vld [vmem:[#allocation7 + $0xd88] ss:$16 sps:$4 sm:$0xff]   ;;  %v8121_v13 = vld [vmem:[#allocation7 + $0xd8c] ss:$16 sps:$4 sm:$0xff]  }
 0x3b1   :  { %3055 = vmatprep.subr.bf16.mxu0 %v8040_v14  ;;  %3137 = vmatprep.subr.bf16.mxu1 %v8043_v15  ;;  %v8124_v14 = vld [vmem:[#allocation7 + $0xda4] ss:$16 sps:$4 sm:$0xff]   ;;  %v8127_v15 = vld [vmem:[#allocation7 + $0xdac] ss:$16 sps:$4 sm:$0xff]  }
 0x3b4   :  { %3056 = vmatpush1.bf16.msra.mxu0 %v8038_v19  ;;  %3138 = vmatpush1.bf16.msra.mxu1 %v8041_v27  ;;  %v8130_v19 = vld [vmem:[#allocation7 + $0xdc4] ss:$16 sps:$4 sm:$0xff]   ;;  %v8133_v27 = vld [vmem:[#allocation7 + $0xdcc] ss:$16 sps:$4 sm:$0xff]  }
 0x3b5   :  { %3980 = vmatprep.subr.bf16.mxu0 %v8046_v21  ;;  %4062 = vmatprep.subr.bf16.mxu1 %v8049_v23  ;;  %v8131_v21 = vld [vmem:[#allocation7 + $0xdc8] ss:$16 sps:$4 sm:$0xff]   ;;  %v8136_v23 = vld [vmem:[#allocation7 + $0xde4] ss:$16 sps:$4 sm:$0xff]  }
 0x3b7   :  { %3058 = vmatmul.mubr.bf16.vlgmr.msra.gmra.mrb[8].mxu0 %v2190_v28  ;;  %3140 = vmatmul.mubr.bf16.vlgmr.msra.gmra.mrb[8].mxu1 %v2190_v28  ;;  %v8137_v28 = vld [vmem:[#allocation7 + $0xde8] ss:$16 sps:$4 sm:$0xff]  }
 0x3b8   :  { %3981 = vmatpush1.bf16.msra.mxu0 %v8044_v25  ;;  %4063 = vmatpush1.bf16.msra.mxu1 %v8047_v26  ;;  %v8139_v25 = vld [vmem:[#allocation7 + $0xdec] ss:$16 sps:$4 sm:$0xff]   ;;  %v8134_v26 = vld [vmem:[#allocation7 + $0xde0] ss:$16 sps:$4 sm:$0xff]  }
 0x3b9   :  { %3982 = vmatprep.subr.bf16.mxu0 %v8052_v29  ;;  %4064 = vmatprep.subr.bf16.mxu1 %v8055_v18  ;;  %v8142_v29 = vld [vmem:[#allocation7 + $0xe04] ss:$16 sps:$4 sm:$0xff]   ;;  %v8145_v18 = vld [vmem:[#allocation7 + $0xe0c] ss:$16 sps:$4 sm:$0xff]  }
 0x3bc   :  { %3983 = vmatpush1.bf16.msra.mxu0 %v8050_v31  ;;  %4065 = vmatpush1.bf16.msra.mxu1 %v8053_v32  ;;  %v9082_v31 = vld [vmem:[#allocation8 + $0x8] sm:$0xf] }
 0x3bd   :  { %3984 = vmatprep.subr.bf16.mxu0 %v8058_v33  ;;  %4066 = vmatprep.subr.bf16.mxu1 %v8061_v22  ;;  %v2327_v32 = vrot.slane %v9082_v31, %v9019_v7  ;;  %v2331_v33 = vrot.slane %v9082_v31, %v9021_v8  ;;  %v2339_v22 = vrot.slane %v9082_v31, %v9025_v10 }
 0x3c0   :  { %3985 = vmatpush1.bf16.msra.mxu0 %v8056_v34  ;;  %4067 = vmatpush1.bf16.msra.mxu1 %v8059_v35 }
 0x3c1   :  { %3986 = vmatprep.subr.bf16.mxu0 %v8064_v24  ;;  %4068 = vmatprep.subr.bf16.mxu1 %v8067_v36 }
 0x3c4   :  { %3987 = vmatpush1.bf16.msra.mxu0 %v8062_v37  ;;  %4069 = vmatpush1.bf16.msra.mxu1 %v8065_v38 }
 0x3c5   :  { %3988 = vmatprep.subr.bf16.mxu0 %v8070_v30  ;;  %4070 = vmatprep.subr.bf16.mxu1 %v8073_v39 }
 0x3c8   :  { %3989 = vmatpush1.bf16.msra.mxu0 %v8068_v40  ;;  %4071 = vmatpush1.bf16.msra.mxu1 %v8071_v41 }
 0x3c9   :  { %3990 = vmatprep.subr.bf16.mxu0 %v8076_v42  ;;  %4072 = vmatprep.subr.bf16.mxu1 %v8079_v43 }
 0x3cc   :  { %3991 = vmatpush1.bf16.msra.mxu0 %v8074_v44  ;;  %4073 = vmatpush1.bf16.msra.mxu1 %v8077_v45 }
 0x3cd   :  { %3992 = vmatprep.subr.bf16.mxu0 %v8082_v46  ;;  %4074 = vmatprep.subr.bf16.mxu1 %v8085_v47 }
 0x3d0   :  { %3993 = vmatpush1.bf16.msra.mxu0 %v8080_v48  ;;  %4075 = vmatpush1.bf16.msra.mxu1 %v8083_v49 }
 0x3d1   :  { %3994 = vmatprep.subr.bf16.mxu0 %v8088_v50  ;;  %4076 = vmatprep.subr.bf16.mxu1 %v8091_v51 }
 0x3d4   :  { %3995 = vmatpush1.bf16.msra.mxu0 %v8086_v52  ;;  %4077 = vmatpush1.bf16.msra.mxu1 %v8089_v53 }
 0x3d5   :  { %3996 = vmatprep.subr.bf16.mxu0 %v8094_v54  ;;  %4078 = vmatprep.subr.bf16.mxu1 %v8097_v55 }
 0x3d8   :  { %3997 = vmatpush1.bf16.msra.mxu0 %v8092_v56  ;;  %4079 = vmatpush1.bf16.msra.mxu1 %v8095_v57 }
 0x3d9   :  { %3998 = vmatprep.subr.bf16.mxu0 %v8100_v58  ;;  %4080 = vmatprep.subr.bf16.mxu1 %v8103_v59 }
 0x3dc   :  { %3999 = vmatpush1.bf16.msra.mxu0 %v8098_v60  ;;  %4081 = vmatpush1.bf16.msra.mxu1 %v8101_v61 }
 0x3dd   :  { %4000 = vmatprep.subr.bf16.mxu0 %v8106_v62  ;;  %4082 = vmatprep.subr.bf16.mxu1 %v8109_v63 }
 0x3e0   :  { %4001 = vmatpush1.bf16.msra.mxu0 %v8104_v0  ;;  %4083 = vmatpush1.bf16.msra.mxu1 %v8107_v1 }
 0x3e1   :  { %4002 = vmatprep.subr.bf16.mxu0 %v8112_v2  ;;  %4084 = vmatprep.subr.bf16.mxu1 %v8115_v3 }
 0x3e4   :  { %4003 = vmatpush1.bf16.msra.mxu0 %v8110_v4  ;;  %4085 = vmatpush1.bf16.msra.mxu1 %v8113_v5 }
 0x3e5   :  { %4004 = vmatprep.subr.bf16.mxu0 %v8118_v11  ;;  %4086 = vmatprep.subr.bf16.mxu1 %v8121_v13  ;;  %v8140_v11 = vld [vmem:[#allocation7 + $0xe00] ss:$16 sps:$4 sm:$0xff]  }
 0x3e8   :  { %4005 = vmatpush1.bf16.msra.mxu0 %v8116_v6  ;;  %4087 = vmatpush1.bf16.msra.mxu1 %v8119_v12  ;;  %v8143_v12 = vld [vmem:[#allocation7 + $0xe08] ss:$16 sps:$4 sm:$0xff]  }
 0x3e9   :  { %4006 = vmatprep.subr.bf16.mxu0 %v8124_v14  ;;  %4088 = vmatprep.subr.bf16.mxu1 %v8127_v15  ;;  %v8148_v14 = vld [vmem:[#allocation7 + $0xe24] ss:$16 sps:$4 sm:$0xff]   ;;  %v8151_v15 = vld [vmem:[#allocation7 + $0xe2c] ss:$16 sps:$4 sm:$0xff]  }
 0x3ec   :  { %4007 = vmatpush1.bf16.msra.mxu0 %v8122_v16  ;;  %4089 = vmatpush1.bf16.msra.mxu1 %v8125_v17  ;;  %v8146_v17 = vld [vmem:[#allocation7 + $0xe20] ss:$16 sps:$4 sm:$0xff]  }
 0x3ed   :  { %4008 = vmatprep.subr.bf16.mxu0 %v8130_v19  ;;  %4090 = vmatprep.subr.bf16.mxu1 %v8133_v27  ;;  %v8149_v19 = vld [vmem:[#allocation7 + $0xe28] ss:$16 sps:$4 sm:$0xff]   ;;  %v8154_v27 = vld [vmem:[#allocation7 + $0xe44] ss:$16 sps:$4 sm:$0xff]  }
 0x3f0   :  { %4009 = vmatpush1.bf16.msra.mxu0 %v8128_v20  ;;  %4091 = vmatpush1.bf16.msra.mxu1 %v8131_v21  ;;  %v8157_v20 = vld [vmem:[#allocation7 + $0xe4c] ss:$16 sps:$4 sm:$0xff]   ;;  %v8152_v21 = vld [vmem:[#allocation7 + $0xe40] ss:$16 sps:$4 sm:$0xff]  }
 0x3f1   :  { %4010 = vmatprep.subr.bf16.mxu0 %v8136_v23  ;;  %4092 = vmatprep.subr.bf16.mxu1 %v8139_v25  ;;  %v8155_v23 = vld [vmem:[#allocation7 + $0xe48] ss:$16 sps:$4 sm:$0xff]   ;;  %v8160_v25 = vld [vmem:[#allocation7 + $0xe64] ss:$16 sps:$4 sm:$0xff]  }
 0x3f4   :  { %4011 = vmatpush1.bf16.msra.mxu0 %v8134_v26  ;;  %4093 = vmatpush1.bf16.msra.mxu1 %v8137_v28  ;;  %v8163_v26 = vld [vmem:[#allocation7 + $0xe6c] ss:$16 sps:$4 sm:$0xff]   ;;  %v8158_v28 = vld [vmem:[#allocation7 + $0xe60] ss:$16 sps:$4 sm:$0xff]  }
 0x3f5   :  { %4021 = vmatprep.subr.bf16.mxu0 %v8142_v29  ;;  %4103 = vmatprep.subr.bf16.mxu1 %v8145_v18  ;;  %v8161_v29 = vld [vmem:[#allocation7 + $0xe68] ss:$16 sps:$4 sm:$0xff]   ;;  %v8166_v18 = vld [vmem:[#allocation7 + $0xe84] ss:$16 sps:$4 sm:$0xff]  }
 0x48a   :  { %v3059_v34 = vpop.f32.mrb[8].mxu0  ;;  %v9090_v35 = vpop.f32.mrb[8].mxu1 }
 0x48b   :  { %v7391_v24 = vadd.f32 %v3059_v34, %v2327_v32  ;;  %v3061_v36 = vpop.f32.mrb[9].mxu0  ;;  %v3143_v37 = vpop.f32.mrb[9].mxu1  ;;  %v8169_v32 = vld [vmem:[#allocation7 + $0xe8c] ss:$16 sps:$4 sm:$0xff]   ;;  %v8167_v34 = vld [vmem:[#allocation7 + $0xe88] ss:$16 sps:$4 sm:$0xff]  }
 0x48c   :  { %v7392_v38 = vadd.f32 %v3061_v36, %v2331_v33  ;;  %v7394_v30 = vadd.f32 %v3143_v37, %v2339_v22  ;;  %v3063_v39 = vpop.f32.mrb[10].mxu0  ;;  %v3145_v40 = vpop.f32.mrb[10].mxu1  ;;  %v2335_v33 = vrot.slane %v9082_v31, %v9023_v9  ;;  %v8164_v22 = vld [vmem:[#allocation7 + $0xe80] ss:$16 sps:$4 sm:$0xff]   ;;  %v8175_v36 = vld [vmem:[#allocation7 + $0xeac] ss:$16 sps:$4 sm:$0xff]  }
 0x48d   :  { %v3152_v41 = vmul.f32 %v7391_v24, %v7391_v24  ;;  %v3064_v42 = vpop.f32.mrb[11].mxu0  ;;  %v3146_v43 = vpop.f32.mrb[11].mxu1  ;;  %v3148_v61 = vmul.f32 0.5, %v7391_v24  ;;  %v8178_v39 = vld [vmem:[#allocation7 + $0xec4] ss:$16 sps:$4 sm:$0xff]  }
 0x48e   :  { %v3153_v44 = vmul.f32 %v7392_v38, %v7392_v38  ;;  %v3155_v45 = vmul.f32 %v7394_v30, %v7394_v30  ;;  %v3149_v63 = vmul.f32 0.5, %v7392_v38  ;;  %v3151_v2 = vmul.f32 0.5, %v7394_v30  ;;  %v8181_v40 = vld [vmem:[#allocation7 + $0xecc] ss:$16 sps:$4 sm:$0xff]   ;;  %v8179_v42 = vld [vmem:[#allocation7 + $0xec8] ss:$16 sps:$4 sm:$0xff]  }
 0x48f   :  { %v3156_v46 = vmul.f32 %v7391_v24, %v3152_v41  ;;  %v9095_v37 = vadd.f32 %v9090_v35, %v2335_v33  ;;  %v8176_v41 = vld [vmem:[#allocation7 + $0xec0] ss:$16 sps:$4 sm:$0xff]   ;;  %v8184_v43 = vld [vmem:[#allocation7 + $0xee4] ss:$16 sps:$4 sm:$0xff]   ;;  %v8187_v35 = vld [vmem:[#allocation7 + $0xeec] ss:$16 sps:$4 sm:$0xff]  }
 0x490   :  { %v3157_v47 = vmul.f32 %v7392_v38, %v3153_v44  ;;  %v3159_v48 = vmul.f32 %v7394_v30, %v3155_v45  ;;  %v8182_v45 = vld [vmem:[#allocation7 + $0xee0] ss:$16 sps:$4 sm:$0xff]   ;;  %v8239_v33 = vld [vmem:[#allocation7 + $0x1008] ss:$16 sps:$4 sm:$0xff]  }
 0x491   :  { %v3160_v49 = vmul.f32 0.044715, %v3156_v46  ;;  %v3154_v31 = vmul.f32 %v9095_v37, %v9095_v37  ;;  %v8185_v46 = vld [vmem:[#allocation7 + $0xee8] ss:$16 sps:$4 sm:$0xff]  }
 0x492   :  { %v3161_v50 = vmul.f32 0.044715, %v3157_v47  ;;  %v3163_v51 = vmul.f32 0.044715, %v3159_v48  ;;  %v8190_v47 = vld [vmem:[#allocation7 + $0xf04] ss:$16 sps:$4 sm:$0xff]  }
 0x493   :  { %v3164_v52 = vadd.f32 %v7391_v24, %v3160_v49  ;;  %v8172_v24 = vld [vmem:[#allocation7 + $0xea4] ss:$16 sps:$4 sm:$0xff]   ;;  %v3158_v44 = vmul.f32 %v9095_v37, %v3154_v31  ;;  %v8193_v48 = vld [vmem:[#allocation7 + $0xf0c] ss:$16 sps:$4 sm:$0xff]  }
 0x494   :  { %v3165_v53 = vadd.f32 %v7392_v38, %v3161_v50  ;;  %v3167_v54 = vadd.f32 %v7394_v30, %v3163_v51  ;;  %v8170_v38 = vld [vmem:[#allocation7 + $0xea0] ss:$16 sps:$4 sm:$0xff]   ;;  %v8173_v30 = vld [vmem:[#allocation7 + $0xea8] ss:$16 sps:$4 sm:$0xff]   ;;  %v8256_v31 = vld [vmem:[#allocation7 + $0x1064] ss:$16 sps:$4 sm:$0xff]  }
 0x495   :  { %v3168_v55 = vmul.f32 0.7978846, %v3164_v52  ;;  %v3162_v49 = vmul.f32 0.044715, %v3158_v44  ;;  %v8188_v50 = vld [vmem:[#allocation7 + $0xf00] ss:$16 sps:$4 sm:$0xff]  }
 0x496   :  { %v3169_v56 = vmul.f32 0.7978846, %v3165_v53  ;;  %v3171_v57 = vmul.f32 0.7978846, %v3167_v54  ;;  %v8191_v51 = vld [vmem:[#allocation7 + $0xf08] ss:$16 sps:$4 sm:$0xff]  }
 0x497   :  { %8676 = vtanh.f32 %v3168_v55  ;;  %v8196_v52 = vld [vmem:[#allocation7 + $0xf24] ss:$16 sps:$4 sm:$0xff]   ;;  %v8199_v53 = vld [vmem:[#allocation7 + $0xf2c] ss:$16 sps:$4 sm:$0xff]   ;;  %v3166_v54 = vadd.f32 %v9095_v37, %v3162_v49  ;;  %v8194_v55 = vld [vmem:[#allocation7 + $0xf20] ss:$16 sps:$4 sm:$0xff]  }
 0x498   :  { %8678 = vtanh.f32 %v3169_v56  ;;  %v8197_v56 = vld [vmem:[#allocation7 + $0xf28] ss:$16 sps:$4 sm:$0xff]   ;;  %v8265_v44 = vld [vmem:[#allocation7 + $0x108c] ss:$16 sps:$4 sm:$0xff]   ;;  %v8266_v49 = vld [vmem:[#allocation7 + $0x10a0] ss:$16 sps:$4 sm:$0xff]  }
 0x499   :  { %8680 = vtanh.f32 %v3171_v57  ;;  %v8202_v57 = vld [vmem:[#allocation7 + $0xf44] ss:$16 sps:$4 sm:$0xff]  }
 0x4a1   :  { %v8677_v58 = vpop.eup %8676 }
 0x4a2   :  { %v3176_v59 = vadd.f32 1.0, %v8677_v58  ;;  %v8679_v60 = vpop.eup %8678  ;;  %v8205_v58 = vld [vmem:[#allocation7 + $0xf4c] ss:$16 sps:$4 sm:$0xff]  }
 0x4a3   :  { %v8681_v62 = vpop.eup %8680  ;;  %v3177_v0 = vadd.f32 1.0, %v8679_v60  ;;  %v8200_v60 = vld [vmem:[#allocation7 + $0xf40] ss:$16 sps:$4 sm:$0xff]  }
 0x4a4   :  { %v3180_v1 = vmul.f32 %v3176_v59, %v3148_v61  ;;  %v3179_v3 = vadd.f32 1.0, %v8681_v62  ;;  %v3170_v59 = vmul.f32 0.7978846, %v3166_v54  ;;  %v8203_v61 = vld [vmem:[#allocation7 + $0xf48] ss:$16 sps:$4 sm:$0xff]  }
 0x4a5   :  { %v3181_v4 = vmul.f32 %v3177_v0, %v3149_v63  ;;  %v8208_v62 = vld [vmem:[#allocation7 + $0xf64] ss:$16 sps:$4 sm:$0xff]   ;;  %v8211_v63 = vld [vmem:[#allocation7 + $0xf6c] ss:$16 sps:$4 sm:$0xff]   ;;  %v8206_v0 = vld [vmem:[#allocation7 + $0xf60] ss:$16 sps:$4 sm:$0xff]  }
 0x4a6   :  { %v3183_v5 = vmul.f32 %v3179_v3, %v3151_v2  ;;  %v3184_v13 = vpack.c.bf16 %v3180_v1, %v3180_v1  ;;  %8682 = vtanh.f32 %v3170_v59  ;;  %v8209_v1 = vld [vmem:[#allocation7 + $0xf68] ss:$16 sps:$4 sm:$0xff]   ;;  %v8214_v2 = vld [vmem:[#allocation7 + $0xf84] ss:$16 sps:$4 sm:$0xff]   ;;  %v8217_v3 = vld [vmem:[#allocation7 + $0xf8c] ss:$16 sps:$4 sm:$0xff]  }
 0x4a7   :  { %v3185_v6 = vpack.c.bf16 %v3181_v4, %v3181_v4  ;;  %v8212_v4 = vld [vmem:[#allocation7 + $0xf80] ss:$16 sps:$4 sm:$0xff]   ;;  %v8275_v54 = vld [vmem:[#allocation7 + $0x10c8] ss:$16 sps:$4 sm:$0xff]   ;;  %v8286_v59 = vld [vmem:[#allocation7 + $0x1104] ss:$16 sps:$4 sm:$0xff]  }
 0x4a8   :  { %v3187_v16 = vpack.c.bf16 %v3183_v5, %v3183_v5  ;;  %v8215_v5 = vld [vmem:[#allocation7 + $0xf88] ss:$16 sps:$4 sm:$0xff]  }
 0x4a9   :  { %4012 = vmatprep.mubr.bf16.mxu0 %v3185_v6  ;;  %4094 = vmatprep.mubr.bf16.mxu1 %v3185_v6  ;;  %v8220_v6 = vld [vmem:[#allocation7 + $0xfa4] ss:$16 sps:$4 sm:$0xff]  }
 0x4aa   :  { %4013 = vmatmul.mubr.bf16.vlgmr.msra.gmra.mrb[12].mxu0 %v3184_v13  ;;  %4095 = vmatmul.mubr.bf16.vlgmr.msra.gmra.mrb[12].mxu1 %v3184_v13  ;;  %v8221_v13 = vld [vmem:[#allocation7 + $0xfa8] ss:$16 sps:$4 sm:$0xff]  }
 0x4ab   :  { %4022 = vmatpush1.bf16.msra.mxu0 %v8140_v11  ;;  %4104 = vmatpush1.bf16.msra.mxu1 %v8143_v12  ;;  %v8223_v11 = vld [vmem:[#allocation7 + $0xfac] ss:$16 sps:$4 sm:$0xff]   ;;  %v8218_v12 = vld [vmem:[#allocation7 + $0xfa0] ss:$16 sps:$4 sm:$0xff]  }
 0x4ac   :  { %4053 = vmatprep.mubr.bf16.mxu0 %v3187_v16  ;;  %4135 = vmatprep.mubr.bf16.mxu1 %v3187_v16 }
 0x4ad   :  { %4023 = vmatprep.subr.bf16.mxu0 %v8148_v14  ;;  %4105 = vmatprep.subr.bf16.mxu1 %v8151_v15  ;;  %v8226_v14 = vld [vmem:[#allocation7 + $0xfc4] ss:$16 sps:$4 sm:$0xff]   ;;  %v8229_v15 = vld [vmem:[#allocation7 + $0xfcc] ss:$16 sps:$4 sm:$0xff]  }
 0x4af   :  { %4024 = vmatpush1.bf16.msra.mxu0 %v8146_v17  ;;  %4106 = vmatpush1.bf16.msra.mxu1 %v8149_v19  ;;  %v8224_v17 = vld [vmem:[#allocation7 + $0xfc0] ss:$16 sps:$4 sm:$0xff]   ;;  %v8227_v19 = vld [vmem:[#allocation7 + $0xfc8] ss:$16 sps:$4 sm:$0xff]  }
 0x4b0   :  { %4025 = vmatprep.subr.bf16.mxu0 %v8154_v27  ;;  %4107 = vmatprep.subr.bf16.mxu1 %v8157_v20  ;;  %v8683_v16 = vpop.eup %8682  ;;  %v8232_v27 = vld [vmem:[#allocation7 + $0xfe4] ss:$16 sps:$4 sm:$0xff]   ;;  %v8235_v20 = vld [vmem:[#allocation7 + $0xfec] ss:$16 sps:$4 sm:$0xff]  }
 0x4b3   :  { %4026 = vmatpush1.bf16.msra.mxu0 %v8152_v21  ;;  %4108 = vmatpush1.bf16.msra.mxu1 %v8155_v23  ;;  %v3178_v21 = vadd.f32 1.0, %v8683_v16  ;;  %v3150_v23 = vmul.f32 0.5, %v9095_v37  ;;  %v8245_v37 = vld [vmem:[#allocation7 + $0x1028] ss:$16 sps:$4 sm:$0xff]   ;;  %v8310_v16 = vld [vmem:[#allocation7 + $0x1184] ss:$16 sps:$4 sm:$0xff]  }
 0x4b4   :  { %4027 = vmatprep.subr.bf16.mxu0 %v8160_v25  ;;  %4109 = vmatprep.subr.bf16.mxu1 %v8163_v26  ;;  %v8230_v25 = vld [vmem:[#allocation7 + $0xfe0] ss:$16 sps:$4 sm:$0xff]   ;;  %v8233_v26 = vld [vmem:[#allocation7 + $0xfe8] ss:$16 sps:$4 sm:$0xff]  }
 0x4b7   :  { %4028 = vmatpush1.bf16.msra.mxu0 %v8158_v28  ;;  %4110 = vmatpush1.bf16.msra.mxu1 %v8161_v29  ;;  %v3182_v28 = vmul.f32 %v3178_v21, %v3150_v23  ;;  %v8238_v29 = vld [vmem:[#allocation7 + $0x1004] ss:$16 sps:$4 sm:$0xff]   ;;  %v8314_v21 = vld [vmem:[#allocation7 + $0x11a0] ss:$16 sps:$4 sm:$0xff]   ;;  %v8317_v23 = vld [vmem:[#allocation7 + $0x11a8] ss:$16 sps:$4 sm:$0xff]  }
 0x4b8   :  { %4029 = vmatprep.subr.bf16.mxu0 %v8166_v18  ;;  %4111 = vmatprep.subr.bf16.mxu1 %v8169_v32  ;;  %v8241_v18 = vld [vmem:[#allocation7 + $0x100c] ss:$16 sps:$4 sm:$0xff]   ;;  %v8236_v32 = vld [vmem:[#allocation7 + $0x1000] ss:$16 sps:$4 sm:$0xff]  }
 0x4bb   :  { %4030 = vmatpush1.bf16.msra.mxu0 %v8164_v22  ;;  %4112 = vmatpush1.bf16.msra.mxu1 %v8167_v34  ;;  %v3186_v22 = vpack.c.bf16 %v3182_v28, %v3182_v28  ;;  %v8244_v34 = vld [vmem:[#allocation7 + $0x1024] ss:$16 sps:$4 sm:$0xff]   ;;  %v8320_v28 = vld [vmem:[#allocation7 + $0x11c0] ss:$16 sps:$4 sm:$0xff]  }
 0x4bc   :  { %4031 = vmatprep.subr.bf16.mxu0 %v8172_v24  ;;  %4113 = vmatprep.subr.bf16.mxu1 %v8175_v36  ;;  %v8247_v24 = vld [vmem:[#allocation7 + $0x102c] ss:$16 sps:$4 sm:$0xff]   ;;  %v8242_v36 = vld [vmem:[#allocation7 + $0x1020] ss:$16 sps:$4 sm:$0xff]  }
 0x4bf   :  { %4032 = vmatpush1.bf16.msra.mxu0 %v8170_v38  ;;  %4114 = vmatpush1.bf16.msra.mxu1 %v8173_v30  ;;  %v8250_v38 = vld [vmem:[#allocation7 + $0x1044] ss:$16 sps:$4 sm:$0xff]   ;;  %v8253_v30 = vld [vmem:[#allocation7 + $0x104c] ss:$16 sps:$4 sm:$0xff]  }
 0x4c0   :  { %4033 = vmatprep.subr.bf16.mxu0 %v8178_v39  ;;  %4115 = vmatprep.subr.bf16.mxu1 %v8181_v40  ;;  %v8248_v39 = vld [vmem:[#allocation7 + $0x1040] ss:$16 sps:$4 sm:$0xff]   ;;  %v8251_v40 = vld [vmem:[#allocation7 + $0x1048] ss:$16 sps:$4 sm:$0xff]  }
 0x4c3   :  { %4034 = vmatpush1.bf16.msra.mxu0 %v8176_v41  ;;  %4116 = vmatpush1.bf16.msra.mxu1 %v8179_v42  ;;  %v8259_v41 = vld [vmem:[#allocation7 + $0x106c] ss:$16 sps:$4 sm:$0xff]   ;;  %v8254_v42 = vld [vmem:[#allocation7 + $0x1060] ss:$16 sps:$4 sm:$0xff]  }
 0x4c4   :  { %4035 = vmatprep.subr.bf16.mxu0 %v8184_v43  ;;  %4117 = vmatprep.subr.bf16.mxu1 %v8187_v35  ;;  %v8257_v43 = vld [vmem:[#allocation7 + $0x1068] ss:$16 sps:$4 sm:$0xff]   ;;  %v8262_v35 = vld [vmem:[#allocation7 + $0x1084] ss:$16 sps:$4 sm:$0xff]  }
 0x4c7   :  { %4036 = vmatpush1.bf16.msra.mxu0 %v8182_v45  ;;  %4118 = vmatpush1.bf16.msra.mxu1 %v8185_v46  ;;  %v8260_v45 = vld [vmem:[#allocation7 + $0x1080] ss:$16 sps:$4 sm:$0xff]   ;;  %v8263_v46 = vld [vmem:[#allocation7 + $0x1088] ss:$16 sps:$4 sm:$0xff]  }
 0x4c8   :  { %4037 = vmatprep.subr.bf16.mxu0 %v8190_v47  ;;  %4119 = vmatprep.subr.bf16.mxu1 %v8193_v48  ;;  %v8268_v47 = vld [vmem:[#allocation7 + $0x10a4] ss:$16 sps:$4 sm:$0xff]   ;;  %v8271_v48 = vld [vmem:[#allocation7 + $0x10ac] ss:$16 sps:$4 sm:$0xff]  }
 0x4cb   :  { %4038 = vmatpush1.bf16.msra.mxu0 %v8188_v50  ;;  %4120 = vmatpush1.bf16.msra.mxu1 %v8191_v51  ;;  %v8269_v50 = vld [vmem:[#allocation7 + $0x10a8] ss:$16 sps:$4 sm:$0xff]   ;;  %v8274_v51 = vld [vmem:[#allocation7 + $0x10c4] ss:$16 sps:$4 sm:$0xff]  }
 0x4cc   :  { %4039 = vmatprep.subr.bf16.mxu0 %v8196_v52  ;;  %4121 = vmatprep.subr.bf16.mxu1 %v8199_v53  ;;  %v8277_v52 = vld [vmem:[#allocation7 + $0x10cc] ss:$16 sps:$4 sm:$0xff]   ;;  %v8272_v53 = vld [vmem:[#allocation7 + $0x10c0] ss:$16 sps:$4 sm:$0xff]  }
 0x4cf   :  { %4040 = vmatpush1.bf16.msra.mxu0 %v8194_v55  ;;  %4122 = vmatpush1.bf16.msra.mxu1 %v8197_v56  ;;  %v8280_v55 = vld [vmem:[#allocation7 + $0x10e4] ss:$16 sps:$4 sm:$0xff]   ;;  %v8283_v56 = vld [vmem:[#allocation7 + $0x10ec] ss:$16 sps:$4 sm:$0xff]  }
 0x4d0   :  { %4041 = vmatprep.subr.bf16.mxu0 %v8202_v57  ;;  %4123 = vmatprep.subr.bf16.mxu1 %v8205_v58  ;;  %v8278_v57 = vld [vmem:[#allocation7 + $0x10e0] ss:$16 sps:$4 sm:$0xff]   ;;  %v8281_v58 = vld [vmem:[#allocation7 + $0x10e8] ss:$16 sps:$4 sm:$0xff]  }
 0x4d3   :  { %4042 = vmatpush1.bf16.msra.mxu0 %v8200_v60  ;;  %4124 = vmatpush1.bf16.msra.mxu1 %v8203_v61  ;;  %v8289_v60 = vld [vmem:[#allocation7 + $0x110c] ss:$16 sps:$4 sm:$0xff]   ;;  %v8284_v61 = vld [vmem:[#allocation7 + $0x1100] ss:$16 sps:$4 sm:$0xff]  }
 0x4d4   :  { %4043 = vmatprep.subr.bf16.mxu0 %v8208_v62  ;;  %4125 = vmatprep.subr.bf16.mxu1 %v8211_v63  ;;  %v8287_v62 = vld [vmem:[#allocation7 + $0x1108] ss:$16 sps:$4 sm:$0xff]   ;;  %v8292_v63 = vld [vmem:[#allocation7 + $0x1124] ss:$16 sps:$4 sm:$0xff]  }
 0x4d7   :  { %4044 = vmatpush1.bf16.msra.mxu0 %v8206_v0  ;;  %4126 = vmatpush1.bf16.msra.mxu1 %v8209_v1  ;;  %v8295_v0 = vld [vmem:[#allocation7 + $0x112c] ss:$16 sps:$4 sm:$0xff]   ;;  %v8290_v1 = vld [vmem:[#allocation7 + $0x1120] ss:$16 sps:$4 sm:$0xff]  }
 0x4d8   :  { %4045 = vmatprep.subr.bf16.mxu0 %v8214_v2  ;;  %4127 = vmatprep.subr.bf16.mxu1 %v8217_v3  ;;  %v8293_v2 = vld [vmem:[#allocation7 + $0x1128] ss:$16 sps:$4 sm:$0xff]   ;;  %v8298_v3 = vld [vmem:[#allocation7 + $0x1144] ss:$16 sps:$4 sm:$0xff]  }
 0x4db   :  { %4046 = vmatpush1.bf16.msra.mxu0 %v8212_v4  ;;  %4128 = vmatpush1.bf16.msra.mxu1 %v8215_v5  ;;  %v8301_v4 = vld [vmem:[#allocation7 + $0x114c] ss:$16 sps:$4 sm:$0xff]   ;;  %v8296_v5 = vld [vmem:[#allocation7 + $0x1140] ss:$16 sps:$4 sm:$0xff]  }
 0x4dc   :  { %4047 = vmatprep.subr.bf16.mxu0 %v8220_v6  ;;  %4129 = vmatprep.subr.bf16.mxu1 %v8223_v11  ;;  %v8299_v6 = vld [vmem:[#allocation7 + $0x1148] ss:$16 sps:$4 sm:$0xff]   ;;  %v8304_v11 = vld [vmem:[#allocation7 + $0x1164] ss:$16 sps:$4 sm:$0xff]  }
 0x4df   :  { %4048 = vmatpush1.bf16.msra.mxu0 %v8218_v12  ;;  %4130 = vmatpush1.bf16.msra.mxu1 %v8221_v13  ;;  %v8307_v12 = vld [vmem:[#allocation7 + $0x116c] ss:$16 sps:$4 sm:$0xff]   ;;  %v8302_v13 = vld [vmem:[#allocation7 + $0x1160] ss:$16 sps:$4 sm:$0xff]  }
 0x4e0   :  { %4049 = vmatprep.subr.bf16.mxu0 %v8226_v14  ;;  %4131 = vmatprep.subr.bf16.mxu1 %v8229_v15  ;;  %v8305_v14 = vld [vmem:[#allocation7 + $0x1168] ss:$16 sps:$4 sm:$0xff]   ;;  %v8308_v15 = vld [vmem:[#allocation7 + $0x1180] ss:$16 sps:$4 sm:$0xff]  }
 0x4e3   :  { %4050 = vmatpush1.bf16.msra.mxu0 %v8224_v17  ;;  %4132 = vmatpush1.bf16.msra.mxu1 %v8227_v19  ;;  %v8311_v17 = vld [vmem:[#allocation7 + $0x1188] ss:$16 sps:$4 sm:$0xff]   ;;  %v8313_v19 = vld [vmem:[#allocation7 + $0x118c] ss:$16 sps:$4 sm:$0xff]  }
 0x4e4   :  { %4051 = vmatprep.subr.bf16.mxu0 %v8232_v27  ;;  %4133 = vmatprep.subr.bf16.mxu1 %v8235_v20  ;;  %v8316_v27 = vld [vmem:[#allocation7 + $0x11a4] ss:$16 sps:$4 sm:$0xff]   ;;  %v8319_v20 = vld [vmem:[#allocation7 + $0x11ac] ss:$16 sps:$4 sm:$0xff]  }
 0x4e7   :  { %4052 = vmatpush1.bf16.msra.mxu0 %v8230_v25  ;;  %4134 = vmatpush1.bf16.msra.mxu1 %v8233_v26  ;;  %v8322_v25 = vld [vmem:[#allocation7 + $0x11c4] ss:$16 sps:$4 sm:$0xff]   ;;  %v8325_v26 = vld [vmem:[#allocation7 + $0x11cc] ss:$16 sps:$4 sm:$0xff]  }
 0x4e8   :  { %4976 = vmatprep.subr.bf16.mxu0 %v8238_v29  ;;  %5058 = vmatprep.subr.bf16.mxu1 %v8241_v18  ;;  %v8323_v29 = vld [vmem:[#allocation7 + $0x11c8] ss:$16 sps:$4 sm:$0xff]   ;;  %v8328_v18 = vld [vmem:[#allocation7 + $0x11e4] ss:$16 sps:$4 sm:$0xff]  }
 0x4ea   :  { %4054 = vmatmul.mubr.bf16.vlgmr.msra.gmra.mrb[12].mxu0 %v3186_v22  ;;  %4136 = vmatmul.mubr.bf16.vlgmr.msra.gmra.mrb[12].mxu1 %v3186_v22  ;;  %v8329_v22 = vld [vmem:[#allocation7 + $0x11e8] ss:$16 sps:$4 sm:$0xff]  }
 0x4eb   :  { %4977 = vmatpush1.bf16.msra.mxu0 %v8236_v32  ;;  %5059 = vmatpush1.bf16.msra.mxu1 %v8239_v33  ;;  %v8331_v32 = vld [vmem:[#allocation7 + $0x11ec] ss:$16 sps:$4 sm:$0xff]   ;;  %v8326_v33 = vld [vmem:[#allocation7 + $0x11e0] ss:$16 sps:$4 sm:$0xff]  }
 0x4ec   :  { %4978 = vmatprep.subr.bf16.mxu0 %v8244_v34  ;;  %5060 = vmatprep.subr.bf16.mxu1 %v8247_v24  ;;  %v8334_v34 = vld [vmem:[#allocation7 + $0x1204] ss:$16 sps:$4 sm:$0xff]   ;;  %v8337_v24 = vld [vmem:[#allocation7 + $0x120c] ss:$16 sps:$4 sm:$0xff]  }
 0x4ef   :  { %4979 = vmatpush1.bf16.msra.mxu0 %v8242_v36  ;;  %5061 = vmatpush1.bf16.msra.mxu1 %v8245_v37  ;;  %v9102_v36 = vld [vmem:[#allocation8 + $0xc] sm:$0xf] }
 0x4f0   :  { %4980 = vmatprep.subr.bf16.mxu0 %v8250_v38  ;;  %5062 = vmatprep.subr.bf16.mxu1 %v8253_v30  ;;  %v3323_v37 = vrot.slane %v9102_v36, %v9019_v7  ;;  %v3327_v38 = vrot.slane %v9102_v36, %v9021_v8  ;;  %v3335_v30 = vrot.slane %v9102_v36, %v9025_v10 }
 0x4f3   :  { %4981 = vmatpush1.bf16.msra.mxu0 %v8248_v39  ;;  %5063 = vmatpush1.bf16.msra.mxu1 %v8251_v40 }
 0x4f4   :  { %4982 = vmatprep.subr.bf16.mxu0 %v8256_v31  ;;  %5064 = vmatprep.subr.bf16.mxu1 %v8259_v41 }
 0x4f7   :  { %4983 = vmatpush1.bf16.msra.mxu0 %v8254_v42  ;;  %5065 = vmatpush1.bf16.msra.mxu1 %v8257_v43 }
 0x4f8   :  { %4984 = vmatprep.subr.bf16.mxu0 %v8262_v35  ;;  %5066 = vmatprep.subr.bf16.mxu1 %v8265_v44 }
 0x4fb   :  { %4985 = vmatpush1.bf16.msra.mxu0 %v8260_v45  ;;  %5067 = vmatpush1.bf16.msra.mxu1 %v8263_v46 }
 0x4fc   :  { %4986 = vmatprep.subr.bf16.mxu0 %v8268_v47  ;;  %5068 = vmatprep.subr.bf16.mxu1 %v8271_v48 }
 0x4ff   :  { %4987 = vmatpush1.bf16.msra.mxu0 %v8266_v49  ;;  %5069 = vmatpush1.bf16.msra.mxu1 %v8269_v50 }
 0x500   :  { %4988 = vmatprep.subr.bf16.mxu0 %v8274_v51  ;;  %5070 = vmatprep.subr.bf16.mxu1 %v8277_v52 }
 0x503   :  { %4989 = vmatpush1.bf16.msra.mxu0 %v8272_v53  ;;  %5071 = vmatpush1.bf16.msra.mxu1 %v8275_v54 }
 0x504   :  { %4990 = vmatprep.subr.bf16.mxu0 %v8280_v55  ;;  %5072 = vmatprep.subr.bf16.mxu1 %v8283_v56 }
 0x507   :  { %4991 = vmatpush1.bf16.msra.mxu0 %v8278_v57  ;;  %5073 = vmatpush1.bf16.msra.mxu1 %v8281_v58 }
 0x508   :  { %4992 = vmatprep.subr.bf16.mxu0 %v8286_v59  ;;  %5074 = vmatprep.subr.bf16.mxu1 %v8289_v60 }
 0x50b   :  { %4993 = vmatpush1.bf16.msra.mxu0 %v8284_v61  ;;  %5075 = vmatpush1.bf16.msra.mxu1 %v8287_v62 }
 0x50c   :  { %4994 = vmatprep.subr.bf16.mxu0 %v8292_v63  ;;  %5076 = vmatprep.subr.bf16.mxu1 %v8295_v0 }
 0x50f   :  { %4995 = vmatpush1.bf16.msra.mxu0 %v8290_v1  ;;  %5077 = vmatpush1.bf16.msra.mxu1 %v8293_v2 }
 0x510   :  { %4996 = vmatprep.subr.bf16.mxu0 %v8298_v3  ;;  %5078 = vmatprep.subr.bf16.mxu1 %v8301_v4 }
 0x513   :  { %4997 = vmatpush1.bf16.msra.mxu0 %v8296_v5  ;;  %5079 = vmatpush1.bf16.msra.mxu1 %v8299_v6 }
 0x514   :  { %4998 = vmatprep.subr.bf16.mxu0 %v8304_v11  ;;  %5080 = vmatprep.subr.bf16.mxu1 %v8307_v12 }
 0x517   :  { %4999 = vmatpush1.bf16.msra.mxu0 %v8302_v13  ;;  %5081 = vmatpush1.bf16.msra.mxu1 %v8305_v14 }
 0x518   :  { %5000 = vmatprep.subr.bf16.mxu0 %v8310_v16  ;;  %5082 = vmatprep.subr.bf16.mxu1 %v8313_v19  ;;  %v8332_v16 = vld [vmem:[#allocation7 + $0x1200] ss:$16 sps:$4 sm:$0xff]  }
 0x51b   :  { %5001 = vmatpush1.bf16.msra.mxu0 %v8308_v15  ;;  %5083 = vmatpush1.bf16.msra.mxu1 %v8311_v17  ;;  %v8335_v17 = vld [vmem:[#allocation7 + $0x1208] ss:$16 sps:$4 sm:$0xff]  }
 0x51c   :  { %5002 = vmatprep.subr.bf16.mxu0 %v8316_v27  ;;  %5084 = vmatprep.subr.bf16.mxu1 %v8319_v20  ;;  %v8340_v27 = vld [vmem:[#allocation7 + $0x1224] ss:$16 sps:$4 sm:$0xff]   ;;  %v8343_v20 = vld [vmem:[#allocation7 + $0x122c] ss:$16 sps:$4 sm:$0xff]  }
 0x51f   :  { %5003 = vmatpush1.bf16.msra.mxu0 %v8314_v21  ;;  %5085 = vmatpush1.bf16.msra.mxu1 %v8317_v23  ;;  %v8338_v23 = vld [vmem:[#allocation7 + $0x1220] ss:$16 sps:$4 sm:$0xff]  }
 0x520   :  { %5004 = vmatprep.subr.bf16.mxu0 %v8322_v25  ;;  %5086 = vmatprep.subr.bf16.mxu1 %v8325_v26  ;;  %v8341_v25 = vld [vmem:[#allocation7 + $0x1228] ss:$16 sps:$4 sm:$0xff]   ;;  %v8346_v26 = vld [vmem:[#allocation7 + $0x1244] ss:$16 sps:$4 sm:$0xff]  }
 0x523   :  { %5005 = vmatpush1.bf16.msra.mxu0 %v8320_v28  ;;  %5087 = vmatpush1.bf16.msra.mxu1 %v8323_v29  ;;  %v8349_v28 = vld [vmem:[#allocation7 + $0x124c] ss:$16 sps:$4 sm:$0xff]   ;;  %v8344_v29 = vld [vmem:[#allocation7 + $0x1240] ss:$16 sps:$4 sm:$0xff]  }
 0x524   :  { %5006 = vmatprep.subr.bf16.mxu0 %v8328_v18  ;;  %5088 = vmatprep.subr.bf16.mxu1 %v8331_v32  ;;  %v8347_v18 = vld [vmem:[#allocation7 + $0x1248] ss:$16 sps:$4 sm:$0xff]   ;;  %v8352_v32 = vld [vmem:[#allocation7 + $0x1264] ss:$16 sps:$4 sm:$0xff]  }
 0x527   :  { %5007 = vmatpush1.bf16.msra.mxu0 %v8326_v33  ;;  %5089 = vmatpush1.bf16.msra.mxu1 %v8329_v22  ;;  %v8355_v33 = vld [vmem:[#allocation7 + $0x126c] ss:$16 sps:$4 sm:$0xff]   ;;  %v8350_v22 = vld [vmem:[#allocation7 + $0x1260] ss:$16 sps:$4 sm:$0xff]  }
 0x528   :  { %5017 = vmatprep.subr.bf16.mxu0 %v8334_v34  ;;  %5099 = vmatprep.subr.bf16.mxu1 %v8337_v24  ;;  %v8353_v34 = vld [vmem:[#allocation7 + $0x1268] ss:$16 sps:$4 sm:$0xff]   ;;  %v8358_v24 = vld [vmem:[#allocation7 + $0x1284] ss:$16 sps:$4 sm:$0xff]  }
 0x5bd   :  { %v4055_v39 = vpop.f32.mrb[12].mxu0  ;;  %v9110_v40 = vpop.f32.mrb[12].mxu1 }
 0x5be   :  { %v7395_v31 = vadd.f32 %v4055_v39, %v3323_v37  ;;  %v4057_v41 = vpop.f32.mrb[13].mxu0  ;;  %v4139_v42 = vpop.f32.mrb[13].mxu1  ;;  %v8361_v37 = vld [vmem:[#allocation7 + $0x128c] ss:$16 sps:$4 sm:$0xff]   ;;  %v8359_v39 = vld [vmem:[#allocation7 + $0x1288] ss:$16 sps:$4 sm:$0xff]  }
 0x5bf   :  { %v7396_v43 = vadd.f32 %v4057_v41, %v3327_v38  ;;  %v7398_v35 = vadd.f32 %v4139_v42, %v3335_v30  ;;  %v4059_v44 = vpop.f32.mrb[14].mxu0  ;;  %v4141_v45 = vpop.f32.mrb[14].mxu1  ;;  %v3331_v38 = vrot.slane %v9102_v36, %v9023_v9  ;;  %v8356_v30 = vld [vmem:[#allocation7 + $0x1280] ss:$16 sps:$4 sm:$0xff]   ;;  %v8367_v41 = vld [vmem:[#allocation7 + $0x12ac] ss:$16 sps:$4 sm:$0xff]  }
 0x5c0   :  { %v4148_v46 = vmul.f32 %v7395_v31, %v7395_v31  ;;  %v4060_v47 = vpop.f32.mrb[15].mxu0  ;;  %v4142_v48 = vpop.f32.mrb[15].mxu1  ;;  %v4144_v2 = vmul.f32 0.5, %v7395_v31  ;;  %v8370_v44 = vld [vmem:[#allocation7 + $0x12c4] ss:$16 sps:$4 sm:$0xff]  }
 0x5c1   :  { %v4149_v49 = vmul.f32 %v7396_v43, %v7396_v43  ;;  %v4151_v50 = vmul.f32 %v7398_v35, %v7398_v35  ;;  %v4145_v4 = vmul.f32 0.5, %v7396_v43  ;;  %v4147_v11 = vmul.f32 0.5, %v7398_v35  ;;  %v8373_v45 = vld [vmem:[#allocation7 + $0x12cc] ss:$16 sps:$4 sm:$0xff]   ;;  %v8371_v47 = vld [vmem:[#allocation7 + $0x12c8] ss:$16 sps:$4 sm:$0xff]  }
 0x5c2   :  { %v4152_v51 = vmul.f32 %v7395_v31, %v4148_v46  ;;  %v9115_v42 = vadd.f32 %v9110_v40, %v3331_v38  ;;  %v8368_v46 = vld [vmem:[#allocation7 + $0x12c0] ss:$16 sps:$4 sm:$0xff]   ;;  %v8376_v48 = vld [vmem:[#allocation7 + $0x12e4] ss:$16 sps:$4 sm:$0xff]   ;;  %v8379_v40 = vld [vmem:[#allocation7 + $0x12ec] ss:$16 sps:$4 sm:$0xff]  }
 0x5c3   :  { %v4153_v52 = vmul.f32 %v7396_v43, %v4149_v49  ;;  %v4155_v53 = vmul.f32 %v7398_v35, %v4151_v50  ;;  %v8374_v50 = vld [vmem:[#allocation7 + $0x12e0] ss:$16 sps:$4 sm:$0xff]   ;;  %v8431_v38 = vld [vmem:[#allocation7 + $0x1408] ss:$16 sps:$4 sm:$0xff]  }
 0x5c4   :  { %v4156_v54 = vmul.f32 0.044715, %v4152_v51  ;;  %v4150_v36 = vmul.f32 %v9115_v42, %v9115_v42  ;;  %v8377_v51 = vld [vmem:[#allocation7 + $0x12e8] ss:$16 sps:$4 sm:$0xff]  }
 0x5c5   :  { %v4157_v55 = vmul.f32 0.044715, %v4153_v52  ;;  %v4159_v56 = vmul.f32 0.044715, %v4155_v53  ;;  %v8382_v52 = vld [vmem:[#allocation7 + $0x1304] ss:$16 sps:$4 sm:$0xff]  }
 0x5c6   :  { %v4160_v57 = vadd.f32 %v7395_v31, %v4156_v54  ;;  %v8364_v31 = vld [vmem:[#allocation7 + $0x12a4] ss:$16 sps:$4 sm:$0xff]   ;;  %v4154_v49 = vmul.f32 %v9115_v42, %v4150_v36  ;;  %v8385_v53 = vld [vmem:[#allocation7 + $0x130c] ss:$16 sps:$4 sm:$0xff]  }
 0x5c7   :  { %v4161_v58 = vadd.f32 %v7396_v43, %v4157_v55  ;;  %v4163_v59 = vadd.f32 %v7398_v35, %v4159_v56  ;;  %v8362_v43 = vld [vmem:[#allocation7 + $0x12a0] ss:$16 sps:$4 sm:$0xff]   ;;  %v8365_v35 = vld [vmem:[#allocation7 + $0x12a8] ss:$16 sps:$4 sm:$0xff]   ;;  %v8448_v36 = vld [vmem:[#allocation7 + $0x1464] ss:$16 sps:$4 sm:$0xff]  }
 0x5c8   :  { %v4164_v60 = vmul.f32 0.7978846, %v4160_v57  ;;  %v4158_v54 = vmul.f32 0.044715, %v4154_v49  ;;  %v8380_v55 = vld [vmem:[#allocation7 + $0x1300] ss:$16 sps:$4 sm:$0xff]  }
 0x5c9   :  { %v4165_v61 = vmul.f32 0.7978846, %v4161_v58  ;;  %v4167_v62 = vmul.f32 0.7978846, %v4163_v59  ;;  %v8383_v56 = vld [vmem:[#allocation7 + $0x1308] ss:$16 sps:$4 sm:$0xff]  }
 0x5ca   :  { %8684 = vtanh.f32 %v4164_v60  ;;  %v8388_v57 = vld [vmem:[#allocation7 + $0x1324] ss:$16 sps:$4 sm:$0xff]   ;;  %v8391_v58 = vld [vmem:[#allocation7 + $0x132c] ss:$16 sps:$4 sm:$0xff]   ;;  %v4162_v59 = vadd.f32 %v9115_v42, %v4158_v54  ;;  %v8386_v60 = vld [vmem:[#allocation7 + $0x1320] ss:$16 sps:$4 sm:$0xff]  }
 0x5cb   :  { %8686 = vtanh.f32 %v4165_v61  ;;  %v8389_v61 = vld [vmem:[#allocation7 + $0x1328] ss:$16 sps:$4 sm:$0xff]   ;;  %v8457_v49 = vld [vmem:[#allocation7 + $0x148c] ss:$16 sps:$4 sm:$0xff]   ;;  %v8458_v54 = vld [vmem:[#allocation7 + $0x14a0] ss:$16 sps:$4 sm:$0xff]  }
 0x5cc   :  { %8688 = vtanh.f32 %v4167_v62  ;;  %v8394_v62 = vld [vmem:[#allocation7 + $0x1344] ss:$16 sps:$4 sm:$0xff]  }
 0x5d4   :  { %v8685_v63 = vpop.eup %8684 }
 0x5d5   :  { %v4172_v0 = vadd.f32 1.0, %v8685_v63  ;;  %v8687_v1 = vpop.eup %8686  ;;  %v8397_v63 = vld [vmem:[#allocation7 + $0x134c] ss:$16 sps:$4 sm:$0xff]  }
 0x5d6   :  { %v8689_v3 = vpop.eup %8688  ;;  %v4173_v5 = vadd.f32 1.0, %v8687_v1  ;;  %v8392_v1 = vld [vmem:[#allocation7 + $0x1340] ss:$16 sps:$4 sm:$0xff]  }
 0x5d7   :  { %v4176_v6 = vmul.f32 %v4172_v0, %v4144_v2  ;;  %v4175_v12 = vadd.f32 1.0, %v8689_v3  ;;  %v4166_v0 = vmul.f32 0.7978846, %v4162_v59  ;;  %v8395_v2 = vld [vmem:[#allocation7 + $0x1348] ss:$16 sps:$4 sm:$0xff]  }
 0x5d8   :  { %v4177_v13 = vmul.f32 %v4173_v5, %v4145_v4  ;;  %v8400_v3 = vld [vmem:[#allocation7 + $0x1364] ss:$16 sps:$4 sm:$0xff]   ;;  %v8403_v4 = vld [vmem:[#allocation7 + $0x136c] ss:$16 sps:$4 sm:$0xff]   ;;  %v8398_v5 = vld [vmem:[#allocation7 + $0x1360] ss:$16 sps:$4 sm:$0xff]  }
 0x5d9   :  { %v4179_v14 = vmul.f32 %v4175_v12, %v4147_v11  ;;  %v4180_v19 = vpack.c.bf16 %v4176_v6, %v4176_v6  ;;  %8690 = vtanh.f32 %v4166_v0  ;;  %v8401_v6 = vld [vmem:[#allocation7 + $0x1368] ss:$16 sps:$4 sm:$0xff]   ;;  %v8406_v11 = vld [vmem:[#allocation7 + $0x1384] ss:$16 sps:$4 sm:$0xff]   ;;  %v8409_v12 = vld [vmem:[#allocation7 + $0x138c] ss:$16 sps:$4 sm:$0xff]  }
 0x5da   :  { %v4181_v15 = vpack.c.bf16 %v4177_v13, %v4177_v13  ;;  %v8404_v13 = vld [vmem:[#allocation7 + $0x1380] ss:$16 sps:$4 sm:$0xff]   ;;  %v8467_v59 = vld [vmem:[#allocation7 + $0x14c8] ss:$16 sps:$4 sm:$0xff]   ;;  %v8478_v0 = vld [vmem:[#allocation7 + $0x1504] ss:$16 sps:$4 sm:$0xff]  }
 0x5db   :  { %v4183_v21 = vpack.c.bf16 %v4179_v14, %v4179_v14  ;;  %v8407_v14 = vld [vmem:[#allocation7 + $0x1388] ss:$16 sps:$4 sm:$0xff]  }
 0x5dc   :  { %5008 = vmatprep.mubr.bf16.mxu0 %v4181_v15  ;;  %5090 = vmatprep.mubr.bf16.mxu1 %v4181_v15  ;;  %v8412_v15 = vld [vmem:[#allocation7 + $0x13a4] ss:$16 sps:$4 sm:$0xff]  }
 0x5dd   :  { %5009 = vmatmul.mubr.bf16.vlgmr.msra.gmra.mrb[16].mxu0 %v4180_v19  ;;  %5091 = vmatmul.mubr.bf16.vlgmr.msra.gmra.mrb[16].mxu1 %v4180_v19  ;;  %v8413_v19 = vld [vmem:[#allocation7 + $0x13a8] ss:$16 sps:$4 sm:$0xff]  }
 0x5de   :  { %5018 = vmatpush1.bf16.msra.mxu0 %v8332_v16  ;;  %5100 = vmatpush1.bf16.msra.mxu1 %v8335_v17  ;;  %v8415_v16 = vld [vmem:[#allocation7 + $0x13ac] ss:$16 sps:$4 sm:$0xff]   ;;  %v8410_v17 = vld [vmem:[#allocation7 + $0x13a0] ss:$16 sps:$4 sm:$0xff]  }
 0x5df   :  { %5049 = vmatprep.mubr.bf16.mxu0 %v4183_v21  ;;  %5131 = vmatprep.mubr.bf16.mxu1 %v4183_v21 }
 0x5e0   :  { %5019 = vmatprep.subr.bf16.mxu0 %v8340_v27  ;;  %5101 = vmatprep.subr.bf16.mxu1 %v8343_v20  ;;  %v8418_v27 = vld [vmem:[#allocation7 + $0x13c4] ss:$16 sps:$4 sm:$0xff]   ;;  %v8421_v20 = vld [vmem:[#allocation7 + $0x13cc] ss:$16 sps:$4 sm:$0xff]  }
 0x5e2   :  { %5020 = vmatpush1.bf16.msra.mxu0 %v8338_v23  ;;  %5102 = vmatpush1.bf16.msra.mxu1 %v8341_v25  ;;  %v8416_v23 = vld [vmem:[#allocation7 + $0x13c0] ss:$16 sps:$4 sm:$0xff]   ;;  %v8419_v25 = vld [vmem:[#allocation7 + $0x13c8] ss:$16 sps:$4 sm:$0xff]  }
 0x5e3   :  { %5021 = vmatprep.subr.bf16.mxu0 %v8346_v26  ;;  %5103 = vmatprep.subr.bf16.mxu1 %v8349_v28  ;;  %v8691_v21 = vpop.eup %8690  ;;  %v8424_v26 = vld [vmem:[#allocation7 + $0x13e4] ss:$16 sps:$4 sm:$0xff]   ;;  %v8427_v28 = vld [vmem:[#allocation7 + $0x13ec] ss:$16 sps:$4 sm:$0xff]  }
 0x5e6   :  { %5022 = vmatpush1.bf16.msra.mxu0 %v8344_v29  ;;  %5104 = vmatpush1.bf16.msra.mxu1 %v8347_v18  ;;  %v4174_v29 = vadd.f32 1.0, %v8691_v21  ;;  %v4146_v18 = vmul.f32 0.5, %v9115_v42  ;;  %v8437_v42 = vld [vmem:[#allocation7 + $0x1428] ss:$16 sps:$4 sm:$0xff]   ;;  %v8502_v21 = vld [vmem:[#allocation7 + $0x1584] ss:$16 sps:$4 sm:$0xff]  }
 0x5e7   :  { %5023 = vmatprep.subr.bf16.mxu0 %v8352_v32  ;;  %5105 = vmatprep.subr.bf16.mxu1 %v8355_v33  ;;  %v8422_v32 = vld [vmem:[#allocation7 + $0x13e0] ss:$16 sps:$4 sm:$0xff]   ;;  %v8425_v33 = vld [vmem:[#allocation7 + $0x13e8] ss:$16 sps:$4 sm:$0xff]  }
 0x5ea   :  { %5024 = vmatpush1.bf16.msra.mxu0 %v8350_v22  ;;  %5106 = vmatpush1.bf16.msra.mxu1 %v8353_v34  ;;  %v4178_v22 = vmul.f32 %v4174_v29, %v4146_v18  ;;  %v8430_v34 = vld [vmem:[#allocation7 + $0x1404] ss:$16 sps:$4 sm:$0xff]   ;;  %v8506_v29 = vld [vmem:[#allocation7 + $0x15a0] ss:$16 sps:$4 sm:$0xff]   ;;  %v8509_v18 = vld [vmem:[#allocation7 + $0x15a8] ss:$16 sps:$4 sm:$0xff]  }
 0x5eb   :  { %5025 = vmatprep.subr.bf16.mxu0 %v8358_v24  ;;  %5107 = vmatprep.subr.bf16.mxu1 %v8361_v37  ;;  %v8433_v24 = vld [vmem:[#allocation7 + $0x140c] ss:$16 sps:$4 sm:$0xff]   ;;  %v8428_v37 = vld [vmem:[#allocation7 + $0x1400] ss:$16 sps:$4 sm:$0xff]  }
 0x5ee   :  { %5026 = vmatpush1.bf16.msra.mxu0 %v8356_v30  ;;  %5108 = vmatpush1.bf16.msra.mxu1 %v8359_v39  ;;  %v4182_v30 = vpack.c.bf16 %v4178_v22, %v4178_v22  ;;  %v8436_v39 = vld [vmem:[#allocation7 + $0x1424] ss:$16 sps:$4 sm:$0xff]   ;;  %v8512_v22 = vld [vmem:[#allocation7 + $0x15c0] ss:$16 sps:$4 sm:$0xff]  }
 0x5ef   :  { %5027 = vmatprep.subr.bf16.mxu0 %v8364_v31  ;;  %5109 = vmatprep.subr.bf16.mxu1 %v8367_v41  ;;  %v8439_v31 = vld [vmem:[#allocation7 + $0x142c] ss:$16 sps:$4 sm:$0xff]   ;;  %v8434_v41 = vld [vmem:[#allocation7 + $0x1420] ss:$16 sps:$4 sm:$0xff]  }
 0x5f2   :  { %5028 = vmatpush1.bf16.msra.mxu0 %v8362_v43  ;;  %5110 = vmatpush1.bf16.msra.mxu1 %v8365_v35  ;;  %v8442_v43 = vld [vmem:[#allocation7 + $0x1444] ss:$16 sps:$4 sm:$0xff]   ;;  %v8445_v35 = vld [vmem:[#allocation7 + $0x144c] ss:$16 sps:$4 sm:$0xff]  }
 0x5f3   :  { %5029 = vmatprep.subr.bf16.mxu0 %v8370_v44  ;;  %5111 = vmatprep.subr.bf16.mxu1 %v8373_v45  ;;  %v8440_v44 = vld [vmem:[#allocation7 + $0x1440] ss:$16 sps:$4 sm:$0xff]   ;;  %v8443_v45 = vld [vmem:[#allocation7 + $0x1448] ss:$16 sps:$4 sm:$0xff]  }
 0x5f6   :  { %5030 = vmatpush1.bf16.msra.mxu0 %v8368_v46  ;;  %5112 = vmatpush1.bf16.msra.mxu1 %v8371_v47  ;;  %v8451_v46 = vld [vmem:[#allocation7 + $0x146c] ss:$16 sps:$4 sm:$0xff]   ;;  %v8446_v47 = vld [vmem:[#allocation7 + $0x1460] ss:$16 sps:$4 sm:$0xff]  }
 0x5f7   :  { %5031 = vmatprep.subr.bf16.mxu0 %v8376_v48  ;;  %5113 = vmatprep.subr.bf16.mxu1 %v8379_v40  ;;  %v8449_v48 = vld [vmem:[#allocation7 + $0x1468] ss:$16 sps:$4 sm:$0xff]   ;;  %v8454_v40 = vld [vmem:[#allocation7 + $0x1484] ss:$16 sps:$4 sm:$0xff]  }
 0x5fa   :  { %5032 = vmatpush1.bf16.msra.mxu0 %v8374_v50  ;;  %5114 = vmatpush1.bf16.msra.mxu1 %v8377_v51  ;;  %v8452_v50 = vld [vmem:[#allocation7 + $0x1480] ss:$16 sps:$4 sm:$0xff]   ;;  %v8455_v51 = vld [vmem:[#allocation7 + $0x1488] ss:$16 sps:$4 sm:$0xff]  }
 0x5fb   :  { %5033 = vmatprep.subr.bf16.mxu0 %v8382_v52  ;;  %5115 = vmatprep.subr.bf16.mxu1 %v8385_v53  ;;  %v8460_v52 = vld [vmem:[#allocation7 + $0x14a4] ss:$16 sps:$4 sm:$0xff]   ;;  %v8463_v53 = vld [vmem:[#allocation7 + $0x14ac] ss:$16 sps:$4 sm:$0xff]  }
 0x5fe   :  { %5034 = vmatpush1.bf16.msra.mxu0 %v8380_v55  ;;  %5116 = vmatpush1.bf16.msra.mxu1 %v8383_v56  ;;  %v8461_v55 = vld [vmem:[#allocation7 + $0x14a8] ss:$16 sps:$4 sm:$0xff]   ;;  %v8466_v56 = vld [vmem:[#allocation7 + $0x14c4] ss:$16 sps:$4 sm:$0xff]  }
 0x5ff   :  { %5035 = vmatprep.subr.bf16.mxu0 %v8388_v57  ;;  %5117 = vmatprep.subr.bf16.mxu1 %v8391_v58  ;;  %v8469_v57 = vld [vmem:[#allocation7 + $0x14cc] ss:$16 sps:$4 sm:$0xff]   ;;  %v8464_v58 = vld [vmem:[#allocation7 + $0x14c0] ss:$16 sps:$4 sm:$0xff]  }
 0x602   :  { %5036 = vmatpush1.bf16.msra.mxu0 %v8386_v60  ;;  %5118 = vmatpush1.bf16.msra.mxu1 %v8389_v61  ;;  %v8472_v60 = vld [vmem:[#allocation7 + $0x14e4] ss:$16 sps:$4 sm:$0xff]   ;;  %v8475_v61 = vld [vmem:[#allocation7 + $0x14ec] ss:$16 sps:$4 sm:$0xff]  }
 0x603   :  { %5037 = vmatprep.subr.bf16.mxu0 %v8394_v62  ;;  %5119 = vmatprep.subr.bf16.mxu1 %v8397_v63  ;;  %v8470_v62 = vld [vmem:[#allocation7 + $0x14e0] ss:$16 sps:$4 sm:$0xff]   ;;  %v8473_v63 = vld [vmem:[#allocation7 + $0x14e8] ss:$16 sps:$4 sm:$0xff]  }
 0x606   :  { %5038 = vmatpush1.bf16.msra.mxu0 %v8392_v1  ;;  %5120 = vmatpush1.bf16.msra.mxu1 %v8395_v2  ;;  %v8481_v1 = vld [vmem:[#allocation7 + $0x150c] ss:$16 sps:$4 sm:$0xff]   ;;  %v8476_v2 = vld [vmem:[#allocation7 + $0x1500] ss:$16 sps:$4 sm:$0xff]  }
 0x607   :  { %5039 = vmatprep.subr.bf16.mxu0 %v8400_v3  ;;  %5121 = vmatprep.subr.bf16.mxu1 %v8403_v4  ;;  %v8479_v3 = vld [vmem:[#allocation7 + $0x1508] ss:$16 sps:$4 sm:$0xff]   ;;  %v8484_v4 = vld [vmem:[#allocation7 + $0x1524] ss:$16 sps:$4 sm:$0xff]  }
 0x60a   :  { %5040 = vmatpush1.bf16.msra.mxu0 %v8398_v5  ;;  %5122 = vmatpush1.bf16.msra.mxu1 %v8401_v6  ;;  %v8487_v5 = vld [vmem:[#allocation7 + $0x152c] ss:$16 sps:$4 sm:$0xff]   ;;  %v8482_v6 = vld [vmem:[#allocation7 + $0x1520] ss:$16 sps:$4 sm:$0xff]  }
 0x60b   :  { %5041 = vmatprep.subr.bf16.mxu0 %v8406_v11  ;;  %5123 = vmatprep.subr.bf16.mxu1 %v8409_v12  ;;  %v8485_v11 = vld [vmem:[#allocation7 + $0x1528] ss:$16 sps:$4 sm:$0xff]   ;;  %v8490_v12 = vld [vmem:[#allocation7 + $0x1544] ss:$16 sps:$4 sm:$0xff]  }
 0x60e   :  { %5042 = vmatpush1.bf16.msra.mxu0 %v8404_v13  ;;  %5124 = vmatpush1.bf16.msra.mxu1 %v8407_v14  ;;  %v8493_v13 = vld [vmem:[#allocation7 + $0x154c] ss:$16 sps:$4 sm:$0xff]   ;;  %v8488_v14 = vld [vmem:[#allocation7 + $0x1540] ss:$16 sps:$4 sm:$0xff]  }
 0x60f   :  { %5043 = vmatprep.subr.bf16.mxu0 %v8412_v15  ;;  %5125 = vmatprep.subr.bf16.mxu1 %v8415_v16  ;;  %v8491_v15 = vld [vmem:[#allocation7 + $0x1548] ss:$16 sps:$4 sm:$0xff]   ;;  %v8496_v16 = vld [vmem:[#allocation7 + $0x1564] ss:$16 sps:$4 sm:$0xff]  }
 0x612   :  { %5044 = vmatpush1.bf16.msra.mxu0 %v8410_v17  ;;  %5126 = vmatpush1.bf16.msra.mxu1 %v8413_v19  ;;  %v8499_v17 = vld [vmem:[#allocation7 + $0x156c] ss:$16 sps:$4 sm:$0xff]   ;;  %v8494_v19 = vld [vmem:[#allocation7 + $0x1560] ss:$16 sps:$4 sm:$0xff]  }
 0x613   :  { %5045 = vmatprep.subr.bf16.mxu0 %v8418_v27  ;;  %5127 = vmatprep.subr.bf16.mxu1 %v8421_v20  ;;  %v8497_v27 = vld [vmem:[#allocation7 + $0x1568] ss:$16 sps:$4 sm:$0xff]   ;;  %v8500_v20 = vld [vmem:[#allocation7 + $0x1580] ss:$16 sps:$4 sm:$0xff]  }
 0x616   :  { %5046 = vmatpush1.bf16.msra.mxu0 %v8416_v23  ;;  %5128 = vmatpush1.bf16.msra.mxu1 %v8419_v25  ;;  %v8503_v23 = vld [vmem:[#allocation7 + $0x1588] ss:$16 sps:$4 sm:$0xff]   ;;  %v8505_v25 = vld [vmem:[#allocation7 + $0x158c] ss:$16 sps:$4 sm:$0xff]  }
 0x617   :  { %5047 = vmatprep.subr.bf16.mxu0 %v8424_v26  ;;  %5129 = vmatprep.subr.bf16.mxu1 %v8427_v28  ;;  %v8508_v26 = vld [vmem:[#allocation7 + $0x15a4] ss:$16 sps:$4 sm:$0xff]   ;;  %v8511_v28 = vld [vmem:[#allocation7 + $0x15ac] ss:$16 sps:$4 sm:$0xff]  }
 0x61a   :  { %5048 = vmatpush1.bf16.msra.mxu0 %v8422_v32  ;;  %5130 = vmatpush1.bf16.msra.mxu1 %v8425_v33  ;;  %v8514_v32 = vld [vmem:[#allocation7 + $0x15c4] ss:$16 sps:$4 sm:$0xff]   ;;  %v8517_v33 = vld [vmem:[#allocation7 + $0x15cc] ss:$16 sps:$4 sm:$0xff]  }
 0x61b   :  { %5972 = vmatprep.subr.bf16.mxu0 %v8430_v34  ;;  %6054 = vmatprep.subr.bf16.mxu1 %v8433_v24  ;;  %v8515_v34 = vld [vmem:[#allocation7 + $0x15c8] ss:$16 sps:$4 sm:$0xff]   ;;  %v8520_v24 = vld [vmem:[#allocation7 + $0x15e4] ss:$16 sps:$4 sm:$0xff]  }
 0x61d   :  { %5050 = vmatmul.mubr.bf16.vlgmr.msra.gmra.mrb[16].mxu0 %v4182_v30  ;;  %5132 = vmatmul.mubr.bf16.vlgmr.msra.gmra.mrb[16].mxu1 %v4182_v30  ;;  %v8521_v30 = vld [vmem:[#allocation7 + $0x15e8] ss:$16 sps:$4 sm:$0xff]  }
 0x61e   :  { %5973 = vmatpush1.bf16.msra.mxu0 %v8428_v37  ;;  %6055 = vmatpush1.bf16.msra.mxu1 %v8431_v38  ;;  %v8523_v37 = vld [vmem:[#allocation7 + $0x15ec] ss:$16 sps:$4 sm:$0xff]   ;;  %v8518_v38 = vld [vmem:[#allocation7 + $0x15e0] ss:$16 sps:$4 sm:$0xff]  }
 0x61f   :  { %5974 = vmatprep.subr.bf16.mxu0 %v8436_v39  ;;  %6056 = vmatprep.subr.bf16.mxu1 %v8439_v31  ;;  %v8526_v39 = vld [vmem:[#allocation7 + $0x1604] ss:$16 sps:$4 sm:$0xff]   ;;  %v8529_v31 = vld [vmem:[#allocation7 + $0x160c] ss:$16 sps:$4 sm:$0xff]  }
 0x622   :  { %5975 = vmatpush1.bf16.msra.mxu0 %v8434_v41  ;;  %6057 = vmatpush1.bf16.msra.mxu1 %v8437_v42  ;;  %v9122_v41 = vld [vmem:[#allocation8 + $0x10] sm:$0xf] }
 0x623   :  { %5976 = vmatprep.subr.bf16.mxu0 %v8442_v43  ;;  %6058 = vmatprep.subr.bf16.mxu1 %v8445_v35  ;;  %v4319_v42 = vrot.slane %v9122_v41, %v9019_v7  ;;  %v4323_v43 = vrot.slane %v9122_v41, %v9021_v8  ;;  %v4331_v35 = vrot.slane %v9122_v41, %v9025_v10 }
 0x626   :  { %5977 = vmatpush1.bf16.msra.mxu0 %v8440_v44  ;;  %6059 = vmatpush1.bf16.msra.mxu1 %v8443_v45 }
 0x627   :  { %5978 = vmatprep.subr.bf16.mxu0 %v8448_v36  ;;  %6060 = vmatprep.subr.bf16.mxu1 %v8451_v46 }
 0x62a   :  { %5979 = vmatpush1.bf16.msra.mxu0 %v8446_v47  ;;  %6061 = vmatpush1.bf16.msra.mxu1 %v8449_v48 }
 0x62b   :  { %5980 = vmatprep.subr.bf16.mxu0 %v8454_v40  ;;  %6062 = vmatprep.subr.bf16.mxu1 %v8457_v49 }
 0x62e   :  { %5981 = vmatpush1.bf16.msra.mxu0 %v8452_v50  ;;  %6063 = vmatpush1.bf16.msra.mxu1 %v8455_v51 }
 0x62f   :  { %5982 = vmatprep.subr.bf16.mxu0 %v8460_v52  ;;  %6064 = vmatprep.subr.bf16.mxu1 %v8463_v53 }
 0x632   :  { %5983 = vmatpush1.bf16.msra.mxu0 %v8458_v54  ;;  %6065 = vmatpush1.bf16.msra.mxu1 %v8461_v55 }
 0x633   :  { %5984 = vmatprep.subr.bf16.mxu0 %v8466_v56  ;;  %6066 = vmatprep.subr.bf16.mxu1 %v8469_v57 }
 0x636   :  { %5985 = vmatpush1.bf16.msra.mxu0 %v8464_v58  ;;  %6067 = vmatpush1.bf16.msra.mxu1 %v8467_v59 }
 0x637   :  { %5986 = vmatprep.subr.bf16.mxu0 %v8472_v60  ;;  %6068 = vmatprep.subr.bf16.mxu1 %v8475_v61 }
 0x63a   :  { %5987 = vmatpush1.bf16.msra.mxu0 %v8470_v62  ;;  %6069 = vmatpush1.bf16.msra.mxu1 %v8473_v63 }
 0x63b   :  { %5988 = vmatprep.subr.bf16.mxu0 %v8478_v0  ;;  %6070 = vmatprep.subr.bf16.mxu1 %v8481_v1 }
 0x63e   :  { %5989 = vmatpush1.bf16.msra.mxu0 %v8476_v2  ;;  %6071 = vmatpush1.bf16.msra.mxu1 %v8479_v3 }
 0x63f   :  { %5990 = vmatprep.subr.bf16.mxu0 %v8484_v4  ;;  %6072 = vmatprep.subr.bf16.mxu1 %v8487_v5 }
 0x642   :  { %5991 = vmatpush1.bf16.msra.mxu0 %v8482_v6  ;;  %6073 = vmatpush1.bf16.msra.mxu1 %v8485_v11 }
 0x643   :  { %5992 = vmatprep.subr.bf16.mxu0 %v8490_v12  ;;  %6074 = vmatprep.subr.bf16.mxu1 %v8493_v13 }
 0x646   :  { %5993 = vmatpush1.bf16.msra.mxu0 %v8488_v14  ;;  %6075 = vmatpush1.bf16.msra.mxu1 %v8491_v15 }
 0x647   :  { %5994 = vmatprep.subr.bf16.mxu0 %v8496_v16  ;;  %6076 = vmatprep.subr.bf16.mxu1 %v8499_v17 }
 0x64a   :  { %5995 = vmatpush1.bf16.msra.mxu0 %v8494_v19  ;;  %6077 = vmatpush1.bf16.msra.mxu1 %v8497_v27 }
 0x64b   :  { %5996 = vmatprep.subr.bf16.mxu0 %v8502_v21  ;;  %6078 = vmatprep.subr.bf16.mxu1 %v8505_v25  ;;  %v8524_v21 = vld [vmem:[#allocation7 + $0x1600] ss:$16 sps:$4 sm:$0xff]  }
 0x64e   :  { %5997 = vmatpush1.bf16.msra.mxu0 %v8500_v20  ;;  %6079 = vmatpush1.bf16.msra.mxu1 %v8503_v23  ;;  %v8527_v23 = vld [vmem:[#allocation7 + $0x1608] ss:$16 sps:$4 sm:$0xff]  }
 0x64f   :  { %5998 = vmatprep.subr.bf16.mxu0 %v8508_v26  ;;  %6080 = vmatprep.subr.bf16.mxu1 %v8511_v28  ;;  %v8532_v26 = vld [vmem:[#allocation7 + $0x1624] ss:$16 sps:$4 sm:$0xff]   ;;  %v8535_v28 = vld [vmem:[#allocation7 + $0x162c] ss:$16 sps:$4 sm:$0xff]  }
 0x652   :  { %5999 = vmatpush1.bf16.msra.mxu0 %v8506_v29  ;;  %6081 = vmatpush1.bf16.msra.mxu1 %v8509_v18  ;;  %v8530_v18 = vld [vmem:[#allocation7 + $0x1620] ss:$16 sps:$4 sm:$0xff]  }
 0x653   :  { %6000 = vmatprep.subr.bf16.mxu0 %v8514_v32  ;;  %6082 = vmatprep.subr.bf16.mxu1 %v8517_v33  ;;  %v8533_v32 = vld [vmem:[#allocation7 + $0x1628] ss:$16 sps:$4 sm:$0xff]   ;;  %v8538_v33 = vld [vmem:[#allocation7 + $0x1644] ss:$16 sps:$4 sm:$0xff]  }
 0x656   :  { %6001 = vmatpush1.bf16.msra.mxu0 %v8512_v22  ;;  %6083 = vmatpush1.bf16.msra.mxu1 %v8515_v34  ;;  %v8541_v22 = vld [vmem:[#allocation7 + $0x164c] ss:$16 sps:$4 sm:$0xff]   ;;  %v8536_v34 = vld [vmem:[#allocation7 + $0x1640] ss:$16 sps:$4 sm:$0xff]  }
 0x657   :  { %6002 = vmatprep.subr.bf16.mxu0 %v8520_v24  ;;  %6084 = vmatprep.subr.bf16.mxu1 %v8523_v37  ;;  %v8539_v24 = vld [vmem:[#allocation7 + $0x1648] ss:$16 sps:$4 sm:$0xff]   ;;  %v8544_v37 = vld [vmem:[#allocation7 + $0x1664] ss:$16 sps:$4 sm:$0xff]  }
 0x65a   :  { %6003 = vmatpush1.bf16.msra.mxu0 %v8518_v38  ;;  %6085 = vmatpush1.bf16.msra.mxu1 %v8521_v30  ;;  %v8547_v38 = vld [vmem:[#allocation7 + $0x166c] ss:$16 sps:$4 sm:$0xff]   ;;  %v8542_v30 = vld [vmem:[#allocation7 + $0x1660] ss:$16 sps:$4 sm:$0xff]  }
 0x65b   :  { %6013 = vmatprep.subr.bf16.mxu0 %v8526_v39  ;;  %6095 = vmatprep.subr.bf16.mxu1 %v8529_v31  ;;  %v8545_v39 = vld [vmem:[#allocation7 + $0x1668] ss:$16 sps:$4 sm:$0xff]   ;;  %v8550_v31 = vld [vmem:[#allocation7 + $0x1684] ss:$16 sps:$4 sm:$0xff]  }
 0x6f0   :  { %v5051_v44 = vpop.f32.mrb[16].mxu0  ;;  %v9130_v45 = vpop.f32.mrb[16].mxu1 }
 0x6f1   :  { %v7399_v36 = vadd.f32 %v5051_v44, %v4319_v42  ;;  %v5053_v46 = vpop.f32.mrb[17].mxu0  ;;  %v5135_v47 = vpop.f32.mrb[17].mxu1  ;;  %v8553_v42 = vld [vmem:[#allocation7 + $0x168c] ss:$16 sps:$4 sm:$0xff]   ;;  %v8551_v44 = vld [vmem:[#allocation7 + $0x1688] ss:$16 sps:$4 sm:$0xff]  }
 0x6f2   :  { %v7400_v48 = vadd.f32 %v5053_v46, %v4323_v43  ;;  %v7402_v40 = vadd.f32 %v5135_v47, %v4331_v35  ;;  %v5055_v49 = vpop.f32.mrb[18].mxu0  ;;  %v5137_v50 = vpop.f32.mrb[18].mxu1  ;;  %v4327_v43 = vrot.slane %v9122_v41, %v9023_v9  ;;  %v8548_v35 = vld [vmem:[#allocation7 + $0x1680] ss:$16 sps:$4 sm:$0xff]   ;;  %v8559_v46 = vld [vmem:[#allocation7 + $0x16ac] ss:$16 sps:$4 sm:$0xff]  }
 0x6f3   :  { %v5144_v51 = vmul.f32 %v7399_v36, %v7399_v36  ;;  %v5056_v52 = vpop.f32.mrb[19].mxu0  ;;  %v5138_v53 = vpop.f32.mrb[19].mxu1  ;;  %v5140_v11 = vmul.f32 0.5, %v7399_v36  ;;  %v8562_v49 = vld [vmem:[#allocation7 + $0x16c4] ss:$16 sps:$4 sm:$0xff]  }
 0x6f4   :  { %v5145_v54 = vmul.f32 %v7400_v48, %v7400_v48  ;;  %v5147_v55 = vmul.f32 %v7402_v40, %v7402_v40  ;;  %v5141_v13 = vmul.f32 0.5, %v7400_v48  ;;  %v5143_v16 = vmul.f32 0.5, %v7402_v40  ;;  %v8565_v50 = vld [vmem:[#allocation7 + $0x16cc] ss:$16 sps:$4 sm:$0xff]   ;;  %v8563_v52 = vld [vmem:[#allocation7 + $0x16c8] ss:$16 sps:$4 sm:$0xff]  }
 0x6f5   :  { %v5148_v56 = vmul.f32 %v7399_v36, %v5144_v51  ;;  %v9135_v47 = vadd.f32 %v9130_v45, %v4327_v43  ;;  %v8560_v51 = vld [vmem:[#allocation7 + $0x16c0] ss:$16 sps:$4 sm:$0xff]   ;;  %v8568_v53 = vld [vmem:[#allocation7 + $0x16e4] ss:$16 sps:$4 sm:$0xff]   ;;  %v8571_v45 = vld [vmem:[#allocation7 + $0x16ec] ss:$16 sps:$4 sm:$0xff]  }
 0x6f6   :  { %v5149_v57 = vmul.f32 %v7400_v48, %v5145_v54  ;;  %v5151_v58 = vmul.f32 %v7402_v40, %v5147_v55  ;;  %v8566_v55 = vld [vmem:[#allocation7 + $0x16e0] ss:$16 sps:$4 sm:$0xff]   ;;  %v8622_v43 = vld [vmem:[#allocation10] sm:$0xff]  }
 0x6f7   :  { %v5152_v59 = vmul.f32 0.044715, %v5148_v56  ;;  %v5146_v41 = vmul.f32 %v9135_v47, %v9135_v47  ;;  %v8569_v56 = vld [vmem:[#allocation7 + $0x16e8] ss:$16 sps:$4 sm:$0xff]  }
 0x6f8   :  { %v5153_v60 = vmul.f32 0.044715, %v5149_v57  ;;  %v5155_v61 = vmul.f32 0.044715, %v5151_v58  ;;  %v8574_v57 = vld [vmem:[#allocation7 + $0x1704] ss:$16 sps:$4 sm:$0xff]  }
 0x6f9   :  { %v5156_v62 = vadd.f32 %v7399_v36, %v5152_v59  ;;  %v8556_v36 = vld [vmem:[#allocation7 + $0x16a4] ss:$16 sps:$4 sm:$0xff]   ;;  %v5150_v54 = vmul.f32 %v9135_v47, %v5146_v41  ;;  %v8577_v58 = vld [vmem:[#allocation7 + $0x170c] ss:$16 sps:$4 sm:$0xff]  }
 0x6fa   :  { %v5157_v63 = vadd.f32 %v7400_v48, %v5153_v60  ;;  %v5159_v0 = vadd.f32 %v7402_v40, %v5155_v61  ;;  %v8554_v48 = vld [vmem:[#allocation7 + $0x16a0] ss:$16 sps:$4 sm:$0xff]   ;;  %v8557_v40 = vld [vmem:[#allocation7 + $0x16a8] ss:$16 sps:$4 sm:$0xff]  }
 0x6fb   :  { %v5160_v1 = vmul.f32 0.7978846, %v5156_v62  ;;  %v5154_v59 = vmul.f32 0.044715, %v5150_v54  ;;  %v8572_v60 = vld [vmem:[#allocation7 + $0x1700] ss:$16 sps:$4 sm:$0xff]  }
 0x6fc   :  { %v5161_v2 = vmul.f32 0.7978846, %v5157_v63  ;;  %v5163_v3 = vmul.f32 0.7978846, %v5159_v0  ;;  %v8575_v61 = vld [vmem:[#allocation7 + $0x1708] ss:$16 sps:$4 sm:$0xff]  }
 0x6fd   :  { %8692 = vtanh.f32 %v5160_v1  ;;  %v8580_v62 = vld [vmem:[#allocation7 + $0x1724] ss:$16 sps:$4 sm:$0xff]   ;;  %v8583_v63 = vld [vmem:[#allocation7 + $0x172c] ss:$16 sps:$4 sm:$0xff]   ;;  %v5158_v0 = vadd.f32 %v9135_v47, %v5154_v59  ;;  %v8578_v1 = vld [vmem:[#allocation7 + $0x1720] ss:$16 sps:$4 sm:$0xff]  }
 0x6fe   :  { %8694 = vtanh.f32 %v5161_v2  ;;  %v8581_v2 = vld [vmem:[#allocation7 + $0x1728] ss:$16 sps:$4 sm:$0xff]   ;;  %v8632_v41 = vld [vmem:[#allocation10 + $0x58] sm:$0xff]   ;;  %v8642_v59 = vld [vmem:[#allocation10 + $0x28] sm:$0xff]  }
 0x6ff   :  { %8696 = vtanh.f32 %v5163_v3  ;;  %v8586_v3 = vld [vmem:[#allocation7 + $0x1744] ss:$16 sps:$4 sm:$0xff]   ;;  %v8637_v54 = vld [vmem:[#allocation10 + $0xe0] sm:$0xff]  }
 0x707   :  { %v8693_v4 = vpop.eup %8692 }
 0x708   :  { %v5168_v5 = vadd.f32 1.0, %v8693_v4  ;;  %v8695_v6 = vpop.eup %8694  ;;  %v8589_v4 = vld [vmem:[#allocation7 + $0x174c] ss:$16 sps:$4 sm:$0xff]  }
 0x709   :  { %v8697_v12 = vpop.eup %8696  ;;  %v5169_v14 = vadd.f32 1.0, %v8695_v6  ;;  %v8584_v6 = vld [vmem:[#allocation7 + $0x1740] ss:$16 sps:$4 sm:$0xff]  }
 0x70a   :  { %v5172_v15 = vmul.f32 %v5168_v5, %v5140_v11  ;;  %v5171_v17 = vadd.f32 1.0, %v8697_v12  ;;  %v5162_v5 = vmul.f32 0.7978846, %v5158_v0  ;;  %v8587_v11 = vld [vmem:[#allocation7 + $0x1748] ss:$16 sps:$4 sm:$0xff]  }
 0x70b   :  { %v5173_v19 = vmul.f32 %v5169_v14, %v5141_v13  ;;  %v8592_v12 = vld [vmem:[#allocation7 + $0x1764] ss:$16 sps:$4 sm:$0xff]   ;;  %v8595_v13 = vld [vmem:[#allocation7 + $0x176c] ss:$16 sps:$4 sm:$0xff]   ;;  %v8590_v14 = vld [vmem:[#allocation7 + $0x1760] ss:$16 sps:$4 sm:$0xff]  }
 0x70c   :  { %v5175_v27 = vmul.f32 %v5171_v17, %v5143_v16  ;;  %v5176_v25 = vpack.c.bf16 %v5172_v15, %v5172_v15  ;;  %8698 = vtanh.f32 %v5162_v5  ;;  %v8593_v15 = vld [vmem:[#allocation7 + $0x1768] ss:$16 sps:$4 sm:$0xff]   ;;  %v8598_v16 = vld [vmem:[#allocation7 + $0x1784] ss:$16 sps:$4 sm:$0xff]   ;;  %v8601_v17 = vld [vmem:[#allocation7 + $0x178c] ss:$16 sps:$4 sm:$0xff]  }
 0x70d   :  { %v5177_v20 = vpack.c.bf16 %v5173_v19, %v5173_v19  ;;  %v8596_v19 = vld [vmem:[#allocation7 + $0x1780] ss:$16 sps:$4 sm:$0xff]   ;;  %v8647_v0 = vld [vmem:[#allocation10 + $0xb0] sm:$0xff]   ;;  %v5310_v5 = vld [vmem:[#allocation8 + $0x14] sm:$0xf] }
 0x70e   :  { %v5179_v29 = vpack.c.bf16 %v5175_v27, %v5175_v27  ;;  %v8599_v27 = vld [vmem:[#allocation7 + $0x1788] ss:$16 sps:$4 sm:$0xff]  }
 0x70f   :  { %6004 = vmatprep.mubr.bf16.mxu0 %v5177_v20  ;;  %6086 = vmatprep.mubr.bf16.mxu1 %v5177_v20  ;;  %v8604_v20 = vld [vmem:[#allocation7 + $0x17a4] ss:$16 sps:$4 sm:$0xff]  }
 0x710   :  { %6005 = vmatmul.mubr.bf16.vlgmr.msra.gmra.mrb[20].mxu0 %v5176_v25  ;;  %6087 = vmatmul.mubr.bf16.vlgmr.msra.gmra.mrb[20].mxu1 %v5176_v25  ;;  %v8605_v25 = vld [vmem:[#allocation7 + $0x17a8] ss:$16 sps:$4 sm:$0xff]  }
 0x711   :  { %6014 = vmatpush1.bf16.msra.mxu0 %v8524_v21  ;;  %6096 = vmatpush1.bf16.msra.mxu1 %v8527_v23  ;;  %v8607_v21 = vld [vmem:[#allocation7 + $0x17ac] ss:$16 sps:$4 sm:$0xff]   ;;  %v8602_v23 = vld [vmem:[#allocation7 + $0x17a0] ss:$16 sps:$4 sm:$0xff]  }
 0x712   :  { %6045 = vmatprep.mubr.bf16.mxu0 %v5179_v29  ;;  %6127 = vmatprep.mubr.bf16.mxu1 %v5179_v29 }
 0x713   :  { %6015 = vmatprep.subr.bf16.mxu0 %v8532_v26  ;;  %6097 = vmatprep.subr.bf16.mxu1 %v8535_v28  ;;  %v8610_v26 = vld [vmem:[#allocation7 + $0x17c4] ss:$16 sps:$4 sm:$0xff]   ;;  %v8613_v28 = vld [vmem:[#allocation7 + $0x17cc] ss:$16 sps:$4 sm:$0xff]  }
 0x715   :  { %6016 = vmatpush1.bf16.msra.mxu0 %v8530_v18  ;;  %6098 = vmatpush1.bf16.msra.mxu1 %v8533_v32  ;;  %v8608_v18 = vld [vmem:[#allocation7 + $0x17c0] ss:$16 sps:$4 sm:$0xff]   ;;  %v8611_v32 = vld [vmem:[#allocation7 + $0x17c8] ss:$16 sps:$4 sm:$0xff]  }
 0x716   :  { %6017 = vmatprep.subr.bf16.mxu0 %v8538_v33  ;;  %6099 = vmatprep.subr.bf16.mxu1 %v8541_v22  ;;  %v8699_v29 = vpop.eup %8698  ;;  %v8616_v33 = vld [vmem:[#allocation7 + $0x17e4] ss:$16 sps:$4 sm:$0xff]   ;;  %v8619_v22 = vld [vmem:[#allocation7 + $0x17ec] ss:$16 sps:$4 sm:$0xff]  }
 0x719   :  { %6018 = vmatpush1.bf16.msra.mxu0 %v8536_v34  ;;  %6100 = vmatpush1.bf16.msra.mxu1 %v8539_v24  ;;  %v5170_v34 = vadd.f32 1.0, %v8699_v29  ;;  %v5142_v24 = vmul.f32 0.5, %v9135_v47  ;;  %v8627_v47 = vld [vmem:[#allocation10 + $0x88] sm:$0xff]  }
 0x71a   :  { %6019 = vmatprep.subr.bf16.mxu0 %v8544_v37  ;;  %6101 = vmatprep.subr.bf16.mxu1 %v8547_v38  ;;  %v8614_v37 = vld [vmem:[#allocation7 + $0x17e0] ss:$16 sps:$4 sm:$0xff]   ;;  %v8617_v38 = vld [vmem:[#allocation7 + $0x17e8] ss:$16 sps:$4 sm:$0xff]  }
 0x71d   :  { %6020 = vmatpush1.bf16.msra.mxu0 %v8542_v30  ;;  %6102 = vmatpush1.bf16.msra.mxu1 %v8545_v39  ;;  %v5174_v30 = vmul.f32 %v5170_v34, %v5142_v24 }
 0x71e   :  { %6021 = vmatprep.subr.bf16.mxu0 %v8550_v31  ;;  %6103 = vmatprep.subr.bf16.mxu1 %v8553_v42  ;;  %v8620_v31 = vld [vmem:[#allocation10 + $0x40] sm:$0xff]  }
 0x71f   :  { %v5178_v39 = vpack.c.bf16 %v5174_v30, %v5174_v30  ;;  %v8621_v42 = vld [vmem:[#allocation10 + $0xc0] sm:$0xff]  }
 0x721   :  { %6022 = vmatpush1.bf16.msra.mxu0 %v8548_v35  ;;  %6104 = vmatpush1.bf16.msra.mxu1 %v8551_v44  ;;  %v8623_v35 = vld [vmem:[#allocation10 + $0x80] sm:$0xff]   ;;  %v8624_v44 = vld [vmem:[#allocation10 + $0x48] sm:$0xff]  }
 0x722   :  { %6023 = vmatprep.subr.bf16.mxu0 %v8556_v36  ;;  %6105 = vmatprep.subr.bf16.mxu1 %v8559_v46  ;;  %v8625_v36 = vld [vmem:[#allocation10 + $0xc8] sm:$0xff]  }
 0x723   :  { %v8626_v46 = vld [vmem:[#allocation10 + $0x8] sm:$0xff]  }
 0x725   :  { %6024 = vmatpush1.bf16.msra.mxu0 %v8554_v48  ;;  %6106 = vmatpush1.bf16.msra.mxu1 %v8557_v40  ;;  %v8628_v48 = vld [vmem:[#allocation10 + $0x50] sm:$0xff]  }
 0x726   :  { %6025 = vmatprep.subr.bf16.mxu0 %v8562_v49  ;;  %6107 = vmatprep.subr.bf16.mxu1 %v8565_v50  ;;  %v8629_v40 = vld [vmem:[#allocation10 + $0xd0] sm:$0xff]  }
 0x727   :  { %v8630_v49 = vld [vmem:[#allocation10 + $0x10] sm:$0xff]  }
 0x728   :  { %v8631_v50 = vld [vmem:[#allocation10 + $0x90] sm:$0xff]  }
 0x729   :  { %6026 = vmatpush1.bf16.msra.mxu0 %v8560_v51  ;;  %6108 = vmatpush1.bf16.msra.mxu1 %v8563_v52  ;;  %v8633_v51 = vld [vmem:[#allocation10 + $0xd8] sm:$0xff]  }
 0x72a   :  { %6027 = vmatprep.subr.bf16.mxu0 %v8568_v53  ;;  %6109 = vmatprep.subr.bf16.mxu1 %v8571_v45  ;;  %v8634_v52 = vld [vmem:[#allocation10 + $0x18] sm:$0xff]   ;;  %v8636_v45 = vld [vmem:[#allocation10 + $0x60] sm:$0xff]  }
 0x72b   :  { %v8635_v53 = vld [vmem:[#allocation10 + $0x98] sm:$0xff]  }
 0x72d   :  { %6028 = vmatpush1.bf16.msra.mxu0 %v8566_v55  ;;  %6110 = vmatpush1.bf16.msra.mxu1 %v8569_v56  ;;  %v8638_v55 = vld [vmem:[#allocation10 + $0x20] sm:$0xff]  }
 0x72e   :  { %6029 = vmatprep.subr.bf16.mxu0 %v8574_v57  ;;  %6111 = vmatprep.subr.bf16.mxu1 %v8577_v58  ;;  %v8639_v56 = vld [vmem:[#allocation10 + $0xa0] sm:$0xff]   ;;  %v8640_v57 = vld [vmem:[#allocation10 + $0x68] sm:$0xff]  }
 0x72f   :  { %v8641_v58 = vld [vmem:[#allocation10 + $0xe8] sm:$0xff]  }
 0x731   :  { %6030 = vmatpush1.bf16.msra.mxu0 %v8572_v60  ;;  %6112 = vmatpush1.bf16.msra.mxu1 %v8575_v61  ;;  %v8643_v60 = vld [vmem:[#allocation10 + $0xa8] sm:$0xff]   ;;  %v8644_v61 = vld [vmem:[#allocation10 + $0x70] sm:$0xff]  }
 0x732   :  { %6031 = vmatprep.subr.bf16.mxu0 %v8580_v62  ;;  %6113 = vmatprep.subr.bf16.mxu1 %v8583_v63  ;;  %v8645_v62 = vld [vmem:[#allocation10 + $0xf0] sm:$0xff]  }
 0x733   :  { %v8646_v63 = vld [vmem:[#allocation10 + $0x30] sm:$0xff]  }
 0x735   :  { %6032 = vmatpush1.bf16.msra.mxu0 %v8578_v1  ;;  %6114 = vmatpush1.bf16.msra.mxu1 %v8581_v2  ;;  %v8648_v1 = vld [vmem:[#allocation10 + $0x78] sm:$0xff]  }
 0x736   :  { %6033 = vmatprep.subr.bf16.mxu0 %v8586_v3  ;;  %6115 = vmatprep.subr.bf16.mxu1 %v8589_v4  ;;  %v8649_v2 = vld [vmem:[#allocation10 + $0xf8] sm:$0xff]  }
 0x737   :  { %v8650_v3 = vld [vmem:[#allocation10 + $0x38] sm:$0xff]  }
 0x738   :  { %v8651_v4 = vld [vmem:[#allocation10 + $0xb8] sm:$0xff]  }
 0x739   :  { %6034 = vmatpush1.bf16.msra.mxu0 %v8584_v6  ;;  %6116 = vmatpush1.bf16.msra.mxu1 %v8587_v11  ;;  %v5315_v6 = vrot.slane %v5310_v5, %v9019_v7  ;;  %v5323_v11 = vrot.slane %v5310_v5, %v9023_v9 }
 0x73a   :  { %6035 = vmatprep.subr.bf16.mxu0 %v8592_v12  ;;  %6117 = vmatprep.subr.bf16.mxu1 %v8595_v13  ;;  %v5319_v12 = vrot.slane %v5310_v5, %v9021_v8  ;;  %v5327_v13 = vrot.slane %v5310_v5, %v9025_v10 }
 0x73d   :  { %6036 = vmatpush1.bf16.msra.mxu0 %v8590_v14  ;;  %6118 = vmatpush1.bf16.msra.mxu1 %v8593_v15 }
 0x73e   :  { %6037 = vmatprep.subr.bf16.mxu0 %v8598_v16  ;;  %6119 = vmatprep.subr.bf16.mxu1 %v8601_v17 }
 0x741   :  { %6038 = vmatpush1.bf16.msra.mxu0 %v8596_v19  ;;  %6120 = vmatpush1.bf16.msra.mxu1 %v8599_v27 }
 0x742   :  { %6039 = vmatprep.subr.bf16.mxu0 %v8604_v20  ;;  %6121 = vmatprep.subr.bf16.mxu1 %v8607_v21 }
 0x745   :  { %6040 = vmatpush1.bf16.msra.mxu0 %v8602_v23  ;;  %6122 = vmatpush1.bf16.msra.mxu1 %v8605_v25 }
 0x746   :  { %6041 = vmatprep.subr.bf16.mxu0 %v8610_v26  ;;  %6123 = vmatprep.subr.bf16.mxu1 %v8613_v28 }
 0x749   :  { %6042 = vmatpush1.bf16.msra.mxu0 %v8608_v18  ;;  %6124 = vmatpush1.bf16.msra.mxu1 %v8611_v32 }
 0x74a   :  { %6043 = vmatprep.subr.bf16.mxu0 %v8616_v33  ;;  %6125 = vmatprep.subr.bf16.mxu1 %v8619_v22 }
 0x74d   :  { %6044 = vmatpush1.bf16.msra.mxu0 %v8614_v37  ;;  %6126 = vmatpush1.bf16.msra.mxu1 %v8617_v38 }
 0x74e   :  { %7339 = vmatprep.subr.bf16.mxu0 %v8620_v31  ;;  %7361 = vmatprep.subr.bf16.mxu1 %v8621_v42 }
 0x750   :  { %6046 = vmatmul.mubr.bf16.vlgmr.msra.gmra.mrb[20].mxu0 %v5178_v39  ;;  %6128 = vmatmul.mubr.bf16.vlgmr.msra.gmra.mrb[20].mxu1 %v5178_v39 }
 0x751   :  { %7340 = vmatpush3.bf16.msra.mxu0 %v8622_v43  ;;  %7362 = vmatpush3.bf16.msra.mxu1 %v8623_v35 }
 0x752   :  { %7341 = vmatprep.subr.bf16.mxu0 %v8624_v44  ;;  %7363 = vmatprep.subr.bf16.mxu1 %v8625_v36 }
 0x755   :  { %7342 = vmatpush3.bf16.msra.mxu0 %v8626_v46  ;;  %7364 = vmatpush3.bf16.msra.mxu1 %v8627_v47 }
 0x756   :  { %7343 = vmatprep.subr.bf16.mxu0 %v8628_v48  ;;  %7365 = vmatprep.subr.bf16.mxu1 %v8629_v40 }
 0x759   :  { %7344 = vmatpush3.bf16.msra.mxu0 %v8630_v49  ;;  %7366 = vmatpush3.bf16.msra.mxu1 %v8631_v50 }
 0x75a   :  { %7345 = vmatprep.subr.bf16.mxu0 %v8632_v41  ;;  %7367 = vmatprep.subr.bf16.mxu1 %v8633_v51 }
 0x75d   :  { %7346 = vmatpush3.bf16.msra.mxu0 %v8634_v52  ;;  %7368 = vmatpush3.bf16.msra.mxu1 %v8635_v53 }
 0x75e   :  { %7347 = vmatprep.subr.bf16.mxu0 %v8636_v45  ;;  %7369 = vmatprep.subr.bf16.mxu1 %v8637_v54 }
 0x761   :  { %7348 = vmatpush3.bf16.msra.mxu0 %v8638_v55  ;;  %7370 = vmatpush3.bf16.msra.mxu1 %v8639_v56 }
 0x762   :  { %7349 = vmatprep.subr.bf16.mxu0 %v8640_v57  ;;  %7371 = vmatprep.subr.bf16.mxu1 %v8641_v58 }
 0x765   :  { %7350 = vmatpush3.bf16.msra.mxu0 %v8642_v59  ;;  %7372 = vmatpush3.bf16.msra.mxu1 %v8643_v60 }
 0x766   :  { %7351 = vmatprep.subr.bf16.mxu0 %v8644_v61  ;;  %7373 = vmatprep.subr.bf16.mxu1 %v8645_v62 }
 0x769   :  { %7352 = vmatpush3.bf16.msra.mxu0 %v8646_v63  ;;  %7374 = vmatpush3.bf16.msra.mxu1 %v8647_v0  ;;  %v7306_v0 = vld [vmem:[#allocation11] ss:$0 sm:$0xff] }
 0x76a   :  { %7353 = vmatprep.subr.bf16.mxu0 %v8648_v1  ;;  %7375 = vmatprep.subr.bf16.mxu1 %v8649_v2 }
 0x76d   :  { %7354 = vmatpush3.bf16.msra.mxu0 %v8650_v3  ;;  %7376 = vmatpush3.bf16.msra.mxu1 %v8651_v4 }
 0x823   :  { %v6047_v14 = vpop.f32.mrb[20].mxu0  ;;  %v6129_v15 = vpop.f32.mrb[20].mxu1 }
 0x824   :  { %v7403_v16 = vadd.f32 %v6047_v14, %v5315_v6  ;;  %v7405_v17 = vadd.f32 %v6129_v15, %v5323_v11  ;;  %v6049_v19 = vpop.f32.mrb[21].mxu0  ;;  %v6131_v27 = vpop.f32.mrb[21].mxu1 }
 0x825   :  { %v7404_v20 = vadd.f32 %v6049_v19, %v5319_v12  ;;  %v7406_v21 = vadd.f32 %v6131_v27, %v5327_v13  ;;  %v6051_v23 = vpop.f32.mrb[22].mxu0  ;;  %v6133_v25 = vpop.f32.mrb[22].mxu1 }
 0x826   :  { %v6140_v26 = vmul.f32 %v7403_v16, %v7403_v16  ;;  %v6142_v28 = vmul.f32 %v7405_v17, %v7405_v17  ;;  %v6052_v29 = vpop.f32.mrb[23].mxu0  ;;  %v6134_v7 = vpop.f32.mrb[23].mxu1  ;;  %v6136_v40 = vmul.f32 0.5, %v7403_v16  ;;  %v6138_v41 = vmul.f32 0.5, %v7405_v17 }
 0x827   :  { %v6141_v18 = vmul.f32 %v7404_v20, %v7404_v20  ;;  %v6143_v9 = vmul.f32 %v7406_v21, %v7406_v21  ;;  %v6137_v51 = vmul.f32 0.5, %v7404_v20  ;;  %v6139_v53 = vmul.f32 0.5, %v7406_v21 }
 0x828   :  { %v6144_v32 = vmul.f32 %v7403_v16, %v6140_v26  ;;  %v6146_v8 = vmul.f32 %v7405_v17, %v6142_v28 }
 0x829   :  { %v6145_v33 = vmul.f32 %v7404_v20, %v6141_v18  ;;  %v6147_v10 = vmul.f32 %v7406_v21, %v6143_v9 }
 0x82a   :  { %v6148_v22 = vmul.f32 0.044715, %v6144_v32  ;;  %v6150_v34 = vmul.f32 0.044715, %v6146_v8 }
 0x82b   :  { %v6149_v24 = vmul.f32 0.044715, %v6145_v33  ;;  %v6151_v37 = vmul.f32 0.044715, %v6147_v10 }
 0x82c   :  { %v6152_v38 = vadd.f32 %v7403_v16, %v6148_v22  ;;  %v6154_v30 = vadd.f32 %v7405_v17, %v6150_v34 }
 0x82d   :  { %v6153_v39 = vadd.f32 %v7404_v20, %v6149_v24  ;;  %v6155_v31 = vadd.f32 %v7406_v21, %v6151_v37 }
 0x82e   :  { %v6156_v42 = vmul.f32 0.7978846, %v6152_v38  ;;  %v6158_v43 = vmul.f32 0.7978846, %v6154_v30 }
 0x82f   :  { %v6157_v35 = vmul.f32 0.7978846, %v6153_v39  ;;  %v6159_v44 = vmul.f32 0.7978846, %v6155_v31 }
 0x830   :  { %8700 = vtanh.f32 %v6156_v42 }
 0x831   :  { %8702 = vtanh.f32 %v6158_v43 }
 0x832   :  { %8704 = vtanh.f32 %v6157_v35 }
 0x833   :  { %8706 = vtanh.f32 %v6159_v44 }
 0x83a   :  { %v8701_v36 = vpop.eup %8700 }
 0x83b   :  { %v8703_v46 = vpop.eup %8702  ;;  %v6164_v47 = vadd.f32 1.0, %v8701_v36 }
 0x83c   :  { %v8705_v48 = vpop.eup %8704  ;;  %v6166_v49 = vadd.f32 1.0, %v8703_v46 }
 0x83d   :  { %v8707_v50 = vpop.eup %8706  ;;  %v6165_v52 = vadd.f32 1.0, %v8705_v48  ;;  %v6168_v54 = vmul.f32 %v6164_v47, %v6136_v40 }
 0x83e   :  { %v6167_v45 = vadd.f32 1.0, %v8707_v50  ;;  %v6170_v56 = vmul.f32 %v6166_v49, %v6138_v41 }
 0x83f   :  { %v6169_v55 = vmul.f32 %v6165_v52, %v6137_v51  ;;  %v6172_v60 = vpack.c.bf16 %v6168_v54, %v6168_v54 }
 0x840   :  { %v6171_v57 = vmul.f32 %v6167_v45, %v6139_v53  ;;  %v6174_v61 = vpack.c.bf16 %v6170_v56, %v6170_v56 }
 0x841   :  { %v6173_v58 = vpack.c.bf16 %v6169_v55, %v6169_v55 }
 0x842   :  { %v6175_v59 = vpack.c.bf16 %v6171_v57, %v6171_v57 }
 0x843   :  { %6471 = vmatprep.mubr.bf16.mxu0 %v6173_v58 }
 0x844   :  { %6511 = vmatprep.mubr.bf16.mxu1 %v6175_v59  ;;  %6472 = vmatmul.mubr.bf16.vlgmr.msra.gmra.mrb[24].mxu0 %v6172_v60 }
 0x845   :  { %6512 = vmatmul.mubr.bf16.vlgmr.msra.gmra.mrb[24].mxu1 %v6174_v61 }
 0x917   :  { %v7355_v62 = vpop.f32.mrb[24].mxu0 }
 0x918   :  { %v7377_v63 = vpop.f32.mrb[24].mxu1  ;;  %v7356_v1 = vpop.f32.mrb[25].mxu0 }
 0x919   :  { %v7357_v2 = vadd.f32 %v7356_v1, %v7355_v62  ;;  %v7378_v3 = vpop.f32.mrb[25].mxu1  ;;  %v7358_v4 = vpop.f32.mrb[26].mxu0 }
 0x91a   :  { %v7379_v5 = vadd.f32 %v7378_v3, %v7377_v63  ;;  %v7380_v6 = vpop.f32.mrb[26].mxu1  ;;  %v7359_v11 = vpop.f32.mrb[27].mxu0 }
 0x91b   :  { %v6474_v12 = vadd.f32 %v7357_v2, %v7306_v0  ;;  %v7381_v13 = vpop.f32.mrb[27].mxu1 }
 0x91d   :  { %v6514_v14 = vadd.f32 %v7379_v5, %v6474_v12 }
 0x91f   :  { %6519 = vst [vmem:[#allocation13] sm:$0xff] %v6514_v14 }
 0x920   :  { %8851 = shalt.err (!%p8848_p10)
}
 0x921   :  { %s8852_s9 = scalar_lea.hbm %s9165_s7, 128 }
 0x922   :  { %p8853_p11 = scmp.ne.s32.totalorder %s9165_s7, %s8852_s9  ;;  %p8856_p12 = scmp.lt.u32.totalorder %s8852_s9, %s9165_s7 }
 0x924   :  { %p8858_p13 = pnand %p8856_p12, %p8853_p11 }
 0x926   :  { %8861 = shalt.err (!%p8858_p13)
}
 0x927   :  { %6529 = dma.vmem_to_hbm [thread:$0]  %s6527_s6, 128, %s9165_s7, [#allocation4]  }
 0x928   :  { %8870 = dma.done.wait [#allocation4], 128  }
 0x929   :  { %8871 = vsyncadd [#allocation4], 4294967168 }
 0x92a   :  { %6533 = vsyncpa [#allocation3], 1 }
 0x92b   :  { %6534 = vsyncpa [#allocation6], 1 }
 0x92c   :  { %6535 = vsyncpa [#allocation9], 1 }
 0x92d   :  { %6536 = vsyncpa [#allocation12], 1 }
 0x92e   :  { %6537 = vsyncpa [#allocation4], 1 }

// kernel: tpu_custom_call.1
= control target key start
LH: loop header
LB: loop body
LE: loop exit
PB: predicated region body
PF: predicated region fallthrough
CT: control target
= control target key end

     0   :  { %12 = vsyncpa [#allocation3], 0  ;;  %s9158_s0 = inlined_call_operand.vmem [shape: f32[8,1], index: 0, kind: input, shape index: {}]   ;;  %s9159_s1 = inlined_call_operand.hbm [shape: f32[1,512], index: 1, kind: input, shape index: {}]   ;;  %s9160_s2 = inlined_call_operand.hbm [shape: f32[1,512], index: 2, kind: input, shape index: {}]   ;;  %s9161_s3 = inlined_call_operand.hbm [shape: bf16[6,512,512], index: 3, kind: input, shape index: {}]   ;;  %s9162_s4 = inlined_call_operand.hbm [shape: f32[6,1,512], index: 4, kind: input, shape index: {}]   ;;  %s9163_s5 = inlined_call_operand.hbm [shape: bf16[512,128], index: 5, kind: input, shape index: {}]   ;;  %s9164_s6 = inlined_call_operand.hbm [shape: f32[1,128], index: 6, kind: input, shape index: {}]   ;;  %s9165_s7 = inlined_call_operand.hbm [shape: f32[8,128], index: 7, kind: output, shape index: {}]  }
   0x1   :  { %13 = vsyncpa [#allocation6], 0 }
   0x2   :  { %14 = vsyncpa [#allocation9], 0 }
   0x3   :  { %15 = vsyncpa [#allocation12], 0 }
   0x4   :  { %16 = vsyncpa [#allocation4], 0  ;;  %s8872_s24 = smov [#allocation5]   ;;  %s8873_s26 = smov [#allocation8]  }
   0x5   :  { %s35_s25 = sshll.u32 %s8872_s24, 4  ;;  %s56_s27 = sshll.u32 %s8873_s26, 4  ;;  %s36_s25 = int_to_ptr.vmem [resolvable:$true] %s35_s25  ;;  %s8924_s27 = int_to_ptr.vmem [resolvable:$true] %s56_s27 }
   0x6   :  { %s8708_s30 = scalar_lea.hbm %s9160_s2, 64 }
   0x7   :  { %p8709_p0 = scmp.ne.s32.totalorder %s9160_s2, %s8708_s30  ;;  %p8712_p1 = scmp.lt.u32.totalorder %s8708_s30, %s9160_s2 }
   0x9   :  { %p8714_p2 = pnand %p8712_p1, %p8709_p0 }
   0xb   :  { %8717 = shalt.err (!%p8714_p2)
}
   0xc   :  { %s8718_s12 = scalar_lea.vmem %s36_s25, 64  ;;  %p8723_p4 = scmp.lt.s32.totalorder %s36_s25, %s36_s25 }
   0xd   :  { %p8719_p3 = scmp.ne.s32.totalorder %s36_s25, %s8718_s12  ;;  %p8724_p5 = scmp.lt.s32.totalorder %s8718_s12, %s8718_s12 }
   0xf   :  { %p8725_p6 = por %p8724_p5, %p8723_p4 }
  0x11   :  { %p8726_p7 = pnand %p8725_p6, %p8719_p3 }
  0x13   :  { %8729 = shalt.err (!%p8726_p7)
}
  0x14   :  { %38 = dma.hbm_to_vmem [thread:$0]  %s9160_s2, 64, %s36_s25, [#allocation6]  }
  0x15   :  { %s8730_s17 = scalar_lea.hbm %s9162_s4, 384 }
  0x16   :  { %p8731_p8 = scmp.ne.s32.totalorder %s9162_s4, %s8730_s17  ;;  %p8734_p9 = scmp.lt.u32.totalorder %s8730_s17, %s9162_s4 }
  0x18   :  { %p8736_p10 = pnand %p8734_p9, %p8731_p8 }
  0x1a   :  { %8739 = shalt.err (!%p8736_p10)
}
  0x1b   :  { %s8740_s22 = scalar_lea.vmem %s8924_s27, 384  ;;  %p8745_p12 = scmp.lt.s32.totalorder %s8924_s27, %s8924_s27 }
  0x1c   :  { %p8741_p11 = scmp.ne.s32.totalorder %s8924_s27, %s8740_s22  ;;  %p8746_p13 = scmp.lt.s32.totalorder %s8740_s22, %s8740_s22 }
  0x1e   :  { %p8747_p0 = por %p8746_p13, %p8745_p12 }
  0x20   :  { %p8748_p1 = pnand %p8747_p0, %p8741_p11 }
  0x22   :  { %8751 = shalt.err (!%p8748_p1)
}
  0x23   :  { %s8874_s2 = smov 64   ;;  %s8875_s23 = smov 4  }
  0x24   :  { %62 = dma.hbm_to_vmem [thread:$0]  %s9162_s4, 384, %s8924_s27, [#allocation9], %s8874_s2, %s8874_s2, %s8875_s23  }
  0x25   :  { %s8876_s26 = smov [#allocation2]   ;;  %s8877_s29 = smov [#allocation7]  }
  0x26   :  { %s25_s28 = sshll.u32 %s8876_s26, 4  ;;  %s44_s30 = sshll.u32 %s8877_s29, 4  ;;  %s26_s28 = int_to_ptr.vmem [resolvable:$true] %s25_s28  ;;  %s8958_s30 = int_to_ptr.vmem [resolvable:$true] %s44_s30 }
  0x27   :  { %s8752_s10 = scalar_lea.hbm %s9159_s1, 64 }
  0x28   :  { %p8753_p2 = scmp.ne.s32.totalorder %s9159_s1, %s8752_s10  ;;  %p8756_p3 = scmp.lt.u32.totalorder %s8752_s10, %s9159_s1 }
  0x2a   :  { %p8758_p4 = pnand %p8756_p3, %p8753_p2 }
  0x2c   :  { %8761 = shalt.err (!%p8758_p4)
}
  0x2d   :  { %s8762_s4 = scalar_lea.vmem %s26_s28, 64  ;;  %p8767_p6 = scmp.lt.s32.totalorder %s26_s28, %s26_s28 }
  0x2e   :  { %p8763_p5 = scmp.ne.s32.totalorder %s26_s28, %s8762_s4  ;;  %p8768_p7 = scmp.lt.s32.totalorder %s8762_s4, %s8762_s4 }
  0x30   :  { %p8769_p8 = por %p8768_p7, %p8767_p6 }
  0x32   :  { %p8770_p9 = pnand %p8769_p8, %p8763_p5 }
  0x34   :  { %8773 = shalt.err (!%p8770_p9)
}
  0x35   :  { %28 = dma.hbm_to_vmem [thread:$0]  %s9159_s1, 64, %s26_s28, [#allocation3]  }
  0x36   :  { %s8774_s18 = scalar_lea.hbm %s9161_s3, 98304 }
  0x37   :  { %p8775_p10 = scmp.ne.s32.totalorder %s9161_s3, %s8774_s18  ;;  %p8778_p11 = scmp.lt.u32.totalorder %s8774_s18, %s9161_s3 }
  0x39   :  { %p8780_p12 = pnand %p8778_p11, %p8775_p10 }
  0x3b   :  { %8783 = shalt.err (!%p8780_p12)
}
  0x3c   :  { %s8784_s24 = scalar_lea.vmem %s8958_s30, 98304  ;;  %p8789_p0 = scmp.lt.s32.totalorder %s8958_s30, %s8958_s30 }
  0x3d   :  { %p8785_p13 = scmp.ne.s32.totalorder %s8958_s30, %s8784_s24  ;;  %p8790_p1 = scmp.lt.s32.totalorder %s8784_s24, %s8784_s24 }
  0x3f   :  { %p8791_p2 = por %p8790_p1, %p8789_p0 }
  0x41   :  { %p8792_p3 = pnand %p8791_p2, %p8785_p13 }
  0x43   :  { %8795 = shalt.err (!%p8792_p3)
}
  0x44   :  { %s8878_s1 = smov 256   ;;  %s8879_s25 = smov 16  }
  0x45   :  { %50 = dma.hbm_to_vmem [thread:$0]  %s9161_s3, 98304, %s8958_s30, [#allocation6], %s8878_s1, %s8878_s1, %s8879_s25  }
  0x46   :  { %s8880_s29 = smov [#allocation10]   ;;  %s8881_s9 = smov [#allocation11]  }
  0x47   :  { %s68_s8 = sshll.u32 %s8880_s29, 4  ;;  %s81_s10 = sshll.u32 %s8881_s9, 4  ;;  %s69_s8 = int_to_ptr.vmem [resolvable:$true] %s68_s8  ;;  %s82_s10 = int_to_ptr.vmem [resolvable:$true] %s81_s10 }
  0x48   :  { %s8796_s13 = scalar_lea.hbm %s9163_s5, 4096 }
  0x49   :  { %p8797_p4 = scmp.ne.s32.totalorder %s9163_s5, %s8796_s13  ;;  %p8800_p5 = scmp.lt.u32.totalorder %s8796_s13, %s9163_s5 }
  0x4b   :  { %p8802_p6 = pnand %p8800_p5, %p8797_p4 }
  0x4d   :  { %8805 = shalt.err (!%p8802_p6)
}
  0x4e   :  { %s8806_s3 = scalar_lea.vmem %s69_s8, 4096  ;;  %p8811_p8 = scmp.lt.s32.totalorder %s69_s8, %s69_s8 }
  0x4f   :  { %p8807_p7 = scmp.ne.s32.totalorder %s69_s8, %s8806_s3  ;;  %p8812_p9 = scmp.lt.s32.totalorder %s8806_s3, %s8806_s3 }
  0x51   :  { %p8813_p10 = por %p8812_p9, %p8811_p8 }
  0x53   :  { %p8814_p11 = pnand %p8813_p10, %p8807_p7 }
  0x55   :  { %8817 = shalt.err (!%p8814_p11)
}
  0x56   :  { %74 = dma.hbm_to_vmem [thread:$0]  %s9163_s5, 4096, %s69_s8, [#allocation9], %s8874_s2, %s8874_s2, %s8875_s23  }
  0x57   :  { %s8818_s19 = scalar_lea.hbm %s9164_s6, 16 }
  0x58   :  { %p8819_p12 = scmp.ne.s32.totalorder %s9164_s6, %s8818_s19  ;;  %p8822_p13 = scmp.lt.u32.totalorder %s8818_s19, %s9164_s6 }
  0x5a   :  { %p8824_p0 = pnand %p8822_p13, %p8819_p12 }
  0x5c   :  { %8827 = shalt.err (!%p8824_p0)
}
  0x5d   :  { %s8828_s1 = scalar_lea.vmem %s82_s10, 16  ;;  %s8832_s25 = scalar_lea.vmem %s82_s10, 32 }
  0x5e   :  { %p8829_p1 = scmp.ne.s32.totalorder %s82_s10, %s8828_s1  ;;  %p8833_p2 = scmp.lt.s32.totalorder %s82_s10, %s82_s10 }
  0x5f   :  { %p8834_p3 = scmp.lt.s32.totalorder %s8832_s25, %s8828_s1 }
  0x61   :  { %p8835_p4 = por %p8834_p3, %p8833_p2 }
  0x63   :  { %p8836_p5 = pnand %p8835_p4, %p8829_p1 }
  0x65   :  { %8839 = shalt.err (!%p8836_p5)
}
  0x66   :  { %84 = dma.hbm_to_vmem [thread:$0]  %s9164_s6, 16, %s82_s10, [#allocation12]  }
  0x67   :  { %8862 = dma.done.wait [#allocation3], 64  }
  0x68   :  { %8863 = vsyncadd [#allocation3], 4294967232 }
  0x69   :  { %8864 = dma.done.wait [#allocation6], 98368  }
  0x6a   :  { %8865 = vsyncadd [#allocation6], 4294868928 }
  0x6b   :  { %8866 = dma.done.wait [#allocation9], 4480  }
  0x6c   :  { %8867 = vsyncadd [#allocation9], 4294962816 }
  0x6d   :  { %8868 = dma.done.wait [#allocation12], 16  }
  0x6e   :  { %8869 = vsyncadd [#allocation12], 4294967280  ;;  %v8882_v0 = vmov 0   ;;  %v104_v1 = vld [vmem:[%s9158_s0] sm:$0xff]  ;;  %v7468_v2 = vld [vmem:[#allocation7 + $0x4] ss:$16 sps:$4 sm:$0xff]  }
  0x6f   :  { %7467 = vset.pattern.permute.xlu0 %v8882_v0  ;;  %v7470_v3 = vld [vmem:[#allocation7 + $0xc] ss:$16 sps:$4 sm:$0xff]   ;;  %v7472_v4 = vld [vmem:[#allocation7] ss:$16 sps:$4 sm:$0xff]   ;;  %v7473_v5 = vld [vmem:[#allocation7 + $0x8] ss:$16 sps:$4 sm:$0xff]   ;;  %992 = vmatprep.subr.bf16.mxu0 %v7468_v2 }
  0x70   :  { %108 = vperm.xlu0 %7467, %v104_v1   ;;  %v7474_v6 = vld [vmem:[#allocation7 + $0x24] ss:$16 sps:$4 sm:$0xff]   ;;  %1074 = vmatprep.subr.bf16.mxu1 %v7470_v3  ;;  %v7476_v7 = vld [vmem:[#allocation7 + $0x2c] ss:$16 sps:$4 sm:$0xff]   ;;  %v7478_v8 = vld [vmem:[#allocation7 + $0x20] ss:$16 sps:$4 sm:$0xff]  }
  0x71   :  { %993 = vmatpush1.bf16.msra.mxu0 %v7472_v4  ;;  %1075 = vmatpush1.bf16.msra.mxu1 %v7473_v5  ;;  %v7479_v9 = vld [vmem:[#allocation7 + $0x28] ss:$16 sps:$4 sm:$0xff]   ;;  %v7480_v10 = vld [vmem:[#allocation7 + $0x44] ss:$16 sps:$4 sm:$0xff]   ;;  %v7482_v11 = vld [vmem:[#allocation7 + $0x4c] ss:$16 sps:$4 sm:$0xff]   ;;  %v112_v4 = vlaneseq }
  0x72   :  { %994 = vmatprep.subr.bf16.mxu0 %v7474_v6  ;;  %1076 = vmatprep.subr.bf16.mxu1 %v7476_v7  ;;  %v7484_v12 = vld [vmem:[#allocation7 + $0x40] ss:$16 sps:$4 sm:$0xff]   ;;  %v7485_v13 = vld [vmem:[#allocation7 + $0x48] ss:$16 sps:$4 sm:$0xff]   ;;  %v7486_v14 = vld [vmem:[#allocation7 + $0x64] ss:$16 sps:$4 sm:$0xff]  }
  0x73   :  { %v7488_v15 = vld [vmem:[#allocation7 + $0x6c] ss:$16 sps:$4 sm:$0xff]   ;;  %v7490_v16 = vld [vmem:[#allocation7 + $0x60] ss:$16 sps:$4 sm:$0xff]   ;;  %v7491_v17 = vld [vmem:[#allocation7 + $0x68] ss:$16 sps:$4 sm:$0xff]  }
  0x74   :  { %v7492_v18 = vld [vmem:[#allocation7 + $0x84] ss:$16 sps:$4 sm:$0xff]   ;;  %v7494_v19 = vld [vmem:[#allocation7 + $0x8c] ss:$16 sps:$4 sm:$0xff]   ;;  %v7496_v20 = vld [vmem:[#allocation7 + $0x80] ss:$16 sps:$4 sm:$0xff]  }
  0x75   :  { %995 = vmatpush1.bf16.msra.mxu0 %v7478_v8  ;;  %1077 = vmatpush1.bf16.msra.mxu1 %v7479_v9  ;;  %v7497_v21 = vld [vmem:[#allocation7 + $0x88] ss:$16 sps:$4 sm:$0xff]   ;;  %v7498_v22 = vld [vmem:[#allocation7 + $0xa4] ss:$16 sps:$4 sm:$0xff]   ;;  %v7500_v23 = vld [vmem:[#allocation7 + $0xac] ss:$16 sps:$4 sm:$0xff]  }
  0x76   :  { %996 = vmatprep.subr.bf16.mxu0 %v7480_v10  ;;  %1078 = vmatprep.subr.bf16.mxu1 %v7482_v11  ;;  %v7502_v24 = vld [vmem:[#allocation7 + $0xa0] ss:$16 sps:$4 sm:$0xff]   ;;  %v7503_v25 = vld [vmem:[#allocation7 + $0xa8] ss:$16 sps:$4 sm:$0xff]   ;;  %v7504_v26 = vld [vmem:[#allocation7 + $0xc4] ss:$16 sps:$4 sm:$0xff]  }
  0x77   :  { %v7506_v27 = vld [vmem:[#allocation7 + $0xcc] ss:$16 sps:$4 sm:$0xff]   ;;  %v7508_v28 = vld [vmem:[#allocation7 + $0xc0] ss:$16 sps:$4 sm:$0xff]   ;;  %v7509_v29 = vld [vmem:[#allocation7 + $0xc8] ss:$16 sps:$4 sm:$0xff]  }
  0x78   :  { %v7510_v30 = vld [vmem:[#allocation7 + $0xe4] ss:$16 sps:$4 sm:$0xff]   ;;  %v7512_v31 = vld [vmem:[#allocation7 + $0xec] ss:$16 sps:$4 sm:$0xff]   ;;  %v7514_v32 = vld [vmem:[#allocation7 + $0xe0] ss:$16 sps:$4 sm:$0xff]  }
  0x79   :  { %997 = vmatpush1.bf16.msra.mxu0 %v7484_v12  ;;  %1079 = vmatpush1.bf16.msra.mxu1 %v7485_v13  ;;  %v7515_v33 = vld [vmem:[#allocation7 + $0xe8] ss:$16 sps:$4 sm:$0xff]   ;;  %v7516_v34 = vld [vmem:[#allocation7 + $0x104] ss:$16 sps:$4 sm:$0xff]   ;;  %v7518_v35 = vld [vmem:[#allocation7 + $0x10c] ss:$16 sps:$4 sm:$0xff]  }
  0x7a   :  { %998 = vmatprep.subr.bf16.mxu0 %v7486_v14  ;;  %1080 = vmatprep.subr.bf16.mxu1 %v7488_v15  ;;  %v7520_v36 = vld [vmem:[#allocation7 + $0x100] ss:$16 sps:$4 sm:$0xff]   ;;  %v7521_v37 = vld [vmem:[#allocation7 + $0x108] ss:$16 sps:$4 sm:$0xff]   ;;  %v7522_v38 = vld [vmem:[#allocation7 + $0x124] ss:$16 sps:$4 sm:$0xff]  }
  0x7b   :  { %v7524_v39 = vld [vmem:[#allocation7 + $0x12c] ss:$16 sps:$4 sm:$0xff]   ;;  %v7526_v40 = vld [vmem:[#allocation7 + $0x120] ss:$16 sps:$4 sm:$0xff]   ;;  %v7527_v41 = vld [vmem:[#allocation7 + $0x128] ss:$16 sps:$4 sm:$0xff]  }
  0x7c   :  { %v7528_v42 = vld [vmem:[#allocation7 + $0x144] ss:$16 sps:$4 sm:$0xff]   ;;  %v7530_v43 = vld [vmem:[#allocation7 + $0x14c] ss:$16 sps:$4 sm:$0xff]   ;;  %v7532_v44 = vld [vmem:[#allocation7 + $0x140] ss:$16 sps:$4 sm:$0xff]  }
  0x7d   :  { %999 = vmatpush1.bf16.msra.mxu0 %v7490_v16  ;;  %1081 = vmatpush1.bf16.msra.mxu1 %v7491_v17  ;;  %v7533_v45 = vld [vmem:[#allocation7 + $0x148] ss:$16 sps:$4 sm:$0xff]   ;;  %v7534_v46 = vld [vmem:[#allocation7 + $0x164] ss:$16 sps:$4 sm:$0xff]   ;;  %v7536_v47 = vld [vmem:[#allocation7 + $0x16c] ss:$16 sps:$4 sm:$0xff]  }
  0x7e   :  { %1000 = vmatprep.subr.bf16.mxu0 %v7492_v18  ;;  %1082 = vmatprep.subr.bf16.mxu1 %v7494_v19  ;;  %v7538_v48 = vld [vmem:[#allocation7 + $0x160] ss:$16 sps:$4 sm:$0xff]   ;;  %v7539_v49 = vld [vmem:[#allocation7 + $0x168] ss:$16 sps:$4 sm:$0xff]   ;;  %v7540_v50 = vld [vmem:[#allocation7 + $0x184] ss:$16 sps:$4 sm:$0xff]  }
  0x7f   :  { %v7542_v51 = vld [vmem:[#allocation7 + $0x18c] ss:$16 sps:$4 sm:$0xff]   ;;  %v7544_v52 = vld [vmem:[#allocation7 + $0x180] ss:$16 sps:$4 sm:$0xff]   ;;  %v7545_v53 = vld [vmem:[#allocation7 + $0x188] ss:$16 sps:$4 sm:$0xff]  }
  0x80   :  { %v7546_v54 = vld [vmem:[#allocation7 + $0x1a4] ss:$16 sps:$4 sm:$0xff]   ;;  %v7548_v55 = vld [vmem:[#allocation7 + $0x1ac] ss:$16 sps:$4 sm:$0xff]   ;;  %v7550_v56 = vld [vmem:[#allocation7 + $0x1a0] ss:$16 sps:$4 sm:$0xff]  }
  0x81   :  { %1001 = vmatpush1.bf16.msra.mxu0 %v7496_v20  ;;  %1083 = vmatpush1.bf16.msra.mxu1 %v7497_v21  ;;  %v7551_v57 = vld [vmem:[#allocation7 + $0x1a8] ss:$16 sps:$4 sm:$0xff]   ;;  %v7552_v58 = vld [vmem:[#allocation7 + $0x1c4] ss:$16 sps:$4 sm:$0xff]   ;;  %v7554_v59 = vld [vmem:[#allocation7 + $0x1cc] ss:$16 sps:$4 sm:$0xff]  }
  0x82   :  { %1002 = vmatprep.subr.bf16.mxu0 %v7498_v22  ;;  %1084 = vmatprep.subr.bf16.mxu1 %v7500_v23  ;;  %v7556_v60 = vld [vmem:[#allocation7 + $0x1c0] ss:$16 sps:$4 sm:$0xff]   ;;  %v7557_v61 = vld [vmem:[#allocation7 + $0x1c8] ss:$16 sps:$4 sm:$0xff]   ;;  %v7558_v62 = vld [vmem:[#allocation7 + $0x1e4] ss:$16 sps:$4 sm:$0xff]  }
  0x83   :  { %v7560_v63 = vld [vmem:[#allocation7 + $0x1ec] ss:$16 sps:$4 sm:$0xff]   ;;  %v7562_v0 = vld [vmem:[#allocation7 + $0x1e0] ss:$16 sps:$4 sm:$0xff]   ;;  %v7563_v1 = vld [vmem:[#allocation7 + $0x1e8] ss:$16 sps:$4 sm:$0xff]  }
  0x84   :  { %v7566_v2 = vld [vmem:[#allocation7 + $0x204] ss:$16 sps:$4 sm:$0xff]   ;;  %v7569_v3 = vld [vmem:[#allocation7 + $0x20c] ss:$16 sps:$4 sm:$0xff]   ;;  %v113_v5 = vshrl.u32 %v112_v4, 7  ;;  %s8883_s0 = smov [#allocation13]  }
  0x85   :  { %1003 = vmatpush1.bf16.msra.mxu0 %v7502_v24  ;;  %1085 = vmatpush1.bf16.msra.mxu1 %v7503_v25  ;;  %v105_v6 = vld [vmem:[#allocation2] sm:$0xf]  ;;  %v136_v11 = vld [vmem:[#allocation5] sm:$0xf]  ;;  %s6526_s6 = sshll.u32 %s8883_s0, 4  ;;  %s6527_s6 = int_to_ptr.vmem [resolvable:$true] %s6526_s6 }
  0x86   :  { %1004 = vmatprep.subr.bf16.mxu0 %v7504_v26  ;;  %1086 = vmatprep.subr.bf16.mxu1 %v7506_v27  ;;  %v9019_v7 = vsub.s32 0, %v113_v5  ;;  %v9021_v8 = vsub.s32 1, %v113_v5  ;;  %v9023_v9 = vsub.s32 2, %v113_v5  ;;  %v9025_v10 = vsub.s32 3, %v113_v5  ;;  %v7579_v4 = vld [vmem:[#allocation7 + $0x248] ss:$16 sps:$4 sm:$0xff]   ;;  %p8845_p7 = scmp.lt.s32.totalorder %s6527_s6, %s6527_s6 }
  0x87   :  { %v7584_v5 = vld [vmem:[#allocation7 + $0x264] ss:$16 sps:$4 sm:$0xff]   ;;  %s8840_s28 = scalar_lea.vmem %s6527_s6, 128 }
  0x88   :  { %v115_v12 = vrot.slane %v105_v6, %v9019_v7  ;;  %v119_v13 = vrot.slane %v105_v6, %v9021_v8  ;;  %v123_v14 = vrot.slane %v105_v6, %v9023_v9  ;;  %v127_v15 = vrot.slane %v105_v6, %v9025_v10  ;;  %v7587_v6 = vld [vmem:[#allocation7 + $0x26c] ss:$16 sps:$4 sm:$0xff]   ;;  %p8841_p6 = scmp.ne.s32.totalorder %s6527_s6, %s8840_s28  ;;  %p8846_p8 = scmp.lt.s32.totalorder %s8840_s28, %s8840_s28 }
  0x89   :  { %1005 = vmatpush1.bf16.msra.mxu0 %v7508_v28  ;;  %1087 = vmatpush1.bf16.msra.mxu1 %v7509_v29  ;;  %v141_v16 = vrot.slane %v136_v11, %v9019_v7  ;;  %v145_v17 = vrot.slane %v136_v11, %v9021_v8  ;;  %v149_v18 = vrot.slane %v136_v11, %v9023_v9 }
  0x8a   :  { %1006 = vmatprep.subr.bf16.mxu0 %v7510_v30  ;;  %1088 = vmatprep.subr.bf16.mxu1 %v7512_v31  ;;  %v153_v19 = vrot.slane %v136_v11, %v9025_v10  ;;  %v7582_v11 = vld [vmem:[#allocation7 + $0x260] ss:$16 sps:$4 sm:$0xff]   ;;  %p8847_p9 = por %p8846_p8, %p8845_p7 }
  0x8c   :  { %p8848_p10 = pnand %p8847_p9, %p8841_p6 }
  0x8d   :  { %1007 = vmatpush1.bf16.msra.mxu0 %v7514_v32  ;;  %1089 = vmatpush1.bf16.msra.mxu1 %v7515_v33 }
  0x8e   :  { %1008 = vmatprep.subr.bf16.mxu0 %v7516_v34  ;;  %1090 = vmatprep.subr.bf16.mxu1 %v7518_v35 }
  0x91   :  { %1009 = vmatpush1.bf16.msra.mxu0 %v7520_v36  ;;  %1091 = vmatpush1.bf16.msra.mxu1 %v7521_v37 }
  0x92   :  { %1010 = vmatprep.subr.bf16.mxu0 %v7522_v38  ;;  %1092 = vmatprep.subr.bf16.mxu1 %v7524_v39 }
  0x95   :  { %1011 = vmatpush1.bf16.msra.mxu0 %v7526_v40  ;;  %1093 = vmatpush1.bf16.msra.mxu1 %v7527_v41 }
  0x96   :  { %1012 = vmatprep.subr.bf16.mxu0 %v7528_v42  ;;  %1094 = vmatprep.subr.bf16.mxu1 %v7530_v43 }
  0x99   :  { %1013 = vmatpush1.bf16.msra.mxu0 %v7532_v44  ;;  %1095 = vmatpush1.bf16.msra.mxu1 %v7533_v45 }
  0x9a   :  { %1014 = vmatprep.subr.bf16.mxu0 %v7534_v46  ;;  %1096 = vmatprep.subr.bf16.mxu1 %v7536_v47 }
  0x9d   :  { %1015 = vmatpush1.bf16.msra.mxu0 %v7538_v48  ;;  %1097 = vmatpush1.bf16.msra.mxu1 %v7539_v49 }
  0x9e   :  { %1016 = vmatprep.subr.bf16.mxu0 %v7540_v50  ;;  %1098 = vmatprep.subr.bf16.mxu1 %v7542_v51 }
  0xa1   :  { %1017 = vmatpush1.bf16.msra.mxu0 %v7544_v52  ;;  %1099 = vmatpush1.bf16.msra.mxu1 %v7545_v53 }
  0xa2   :  { %1018 = vmatprep.subr.bf16.mxu0 %v7546_v54  ;;  %1100 = vmatprep.subr.bf16.mxu1 %v7548_v55  ;;  %v7564_v55 = vld [vmem:[#allocation7 + $0x200] ss:$16 sps:$4 sm:$0xff]  }
  0xa5   :  { %1019 = vmatpush1.bf16.msra.mxu0 %v7550_v56  ;;  %1101 = vmatpush1.bf16.msra.mxu1 %v7551_v57  ;;  %v7567_v56 = vld [vmem:[#allocation7 + $0x208] ss:$16 sps:$4 sm:$0xff]  }
  0xa6   :  { %1020 = vmatprep.subr.bf16.mxu0 %v7552_v58  ;;  %1102 = vmatprep.subr.bf16.mxu1 %v7554_v59 }
  0xa9   :  { %1021 = vmatpush1.bf16.msra.mxu0 %v7556_v60  ;;  %1103 = vmatpush1.bf16.msra.mxu1 %v7557_v61  ;;  %v7572_v60 = vld [vmem:[#allocation7 + $0x224] ss:$16 sps:$4 sm:$0xff]   ;;  %v7575_v61 = vld [vmem:[#allocation7 + $0x22c] ss:$16 sps:$4 sm:$0xff]  }
  0xaa   :  { %1022 = vmatprep.subr.bf16.mxu0 %v7558_v62  ;;  %1104 = vmatprep.subr.bf16.mxu1 %v7560_v63  ;;  %v7570_v62 = vld [vmem:[#allocation7 + $0x220] ss:$16 sps:$4 sm:$0xff]   ;;  %v7573_v63 = vld [vmem:[#allocation7 + $0x228] ss:$16 sps:$4 sm:$0xff]  }
  0xad   :  { %1023 = vmatpush1.bf16.msra.mxu0 %v7562_v0  ;;  %1105 = vmatpush1.bf16.msra.mxu1 %v7563_v1  ;;  %v7578_v1 = vld [vmem:[#allocation7 + $0x244] ss:$16 sps:$4 sm:$0xff]  }
  0xae   :  { %1033 = vmatprep.subr.bf16.mxu0 %v7566_v2  ;;  %1115 = vmatprep.subr.bf16.mxu1 %v7569_v3  ;;  %v7581_v2 = vld [vmem:[#allocation7 + $0x24c] ss:$16 sps:$4 sm:$0xff]   ;;  %v7576_v3 = vld [vmem:[#allocation7 + $0x240] ss:$16 sps:$4 sm:$0xff]  }
  0xef   :  { %v109_v20 = vpop.permute.xlu0 %108 }
  0xf0   :  { %v132_v21 = vmul.f32 %v115_v12, %v109_v20  ;;  %v133_v22 = vmul.f32 %v119_v13, %v109_v20  ;;  %v134_v23 = vmul.f32 %v123_v14, %v109_v20  ;;  %v135_v24 = vmul.f32 %v127_v15, %v109_v20  ;;  %v7585_v12 = vld [vmem:[#allocation7 + $0x268] ss:$16 sps:$4 sm:$0xff]   ;;  %v7590_v13 = vld [vmem:[#allocation7 + $0x284] ss:$16 sps:$4 sm:$0xff]   ;;  %v7593_v14 = vld [vmem:[#allocation7 + $0x28c] ss:$16 sps:$4 sm:$0xff]  }
  0xf1   :  { %v7588_v15 = vld [vmem:[#allocation7 + $0x280] ss:$16 sps:$4 sm:$0xff]   ;;  %v7597_v20 = vld [vmem:[#allocation7 + $0x2a8] ss:$16 sps:$4 sm:$0xff]  }
  0xf2   :  { %v158_v25 = vadd.f32 %v141_v16, %v132_v21  ;;  %v159_v26 = vadd.f32 %v145_v17, %v133_v22  ;;  %v9035_v27 = vadd.f32 %v149_v18, %v134_v23  ;;  %v161_v28 = vadd.f32 %v153_v19, %v135_v24  ;;  %v7591_v16 = vld [vmem:[#allocation7 + $0x288] ss:$16 sps:$4 sm:$0xff]   ;;  %v7596_v17 = vld [vmem:[#allocation7 + $0x2a4] ss:$16 sps:$4 sm:$0xff]   ;;  %v7599_v18 = vld [vmem:[#allocation7 + $0x2ac] ss:$16 sps:$4 sm:$0xff]  }
  0xf3   :  { %v7594_v19 = vld [vmem:[#allocation7 + $0x2a0] ss:$16 sps:$4 sm:$0xff]   ;;  %v7602_v21 = vld [vmem:[#allocation7 + $0x2c4] ss:$16 sps:$4 sm:$0xff]   ;;  %v7605_v22 = vld [vmem:[#allocation7 + $0x2cc] ss:$16 sps:$4 sm:$0xff]  }
  0xf4   :  { %v166_v29 = vmul.f32 %v158_v25, %v158_v25  ;;  %v169_v30 = vmul.f32 %v161_v28, %v161_v28  ;;  %v167_v31 = vmul.f32 %v159_v26, %v159_v26  ;;  %v162_v46 = vmul.f32 0.5, %v158_v25  ;;  %v7600_v23 = vld [vmem:[#allocation7 + $0x2c0] ss:$16 sps:$4 sm:$0xff]   ;;  %v7603_v24 = vld [vmem:[#allocation7 + $0x2c8] ss:$16 sps:$4 sm:$0xff]  }
  0xf5   :  { %v163_v49 = vmul.f32 0.5, %v159_v26  ;;  %v165_v52 = vmul.f32 0.5, %v161_v28 }
  0xf6   :  { %v170_v32 = vmul.f32 %v166_v29, %v158_v25  ;;  %v173_v33 = vmul.f32 %v169_v30, %v161_v28  ;;  %v171_v34 = vmul.f32 %v167_v31, %v159_v26  ;;  %v7606_v29 = vld [vmem:[#allocation7 + $0x2e0] ss:$16 sps:$4 sm:$0xff]   ;;  %v7609_v30 = vld [vmem:[#allocation7 + $0x2e8] ss:$16 sps:$4 sm:$0xff]   ;;  %v7614_v31 = vld [vmem:[#allocation7 + $0x304] ss:$16 sps:$4 sm:$0xff]  }
  0xf8   :  { %v174_v35 = vmul.f32 0.044715, %v170_v32  ;;  %v177_v36 = vmul.f32 0.044715, %v173_v33  ;;  %v175_v37 = vmul.f32 0.044715, %v171_v34 }
  0xf9   :  { %v7617_v32 = vld [vmem:[#allocation7 + $0x30c] ss:$16 sps:$4 sm:$0xff]   ;;  %v7612_v34 = vld [vmem:[#allocation7 + $0x300] ss:$16 sps:$4 sm:$0xff]  }
  0xfa   :  { %v178_v38 = vadd.f32 %v174_v35, %v158_v25  ;;  %v181_v39 = vadd.f32 %v177_v36, %v161_v28  ;;  %v179_v40 = vadd.f32 %v175_v37, %v159_v26  ;;  %v7608_v25 = vld [vmem:[#allocation7 + $0x2e4] ss:$16 sps:$4 sm:$0xff]   ;;  %v7611_v26 = vld [vmem:[#allocation7 + $0x2ec] ss:$16 sps:$4 sm:$0xff]   ;;  %v168_v28 = vmul.f32 %v9035_v27, %v9035_v27  ;;  %v7615_v35 = vld [vmem:[#allocation7 + $0x308] ss:$16 sps:$4 sm:$0xff]  }
  0xfb   :  { %v7620_v36 = vld [vmem:[#allocation7 + $0x324] ss:$16 sps:$4 sm:$0xff]   ;;  %v7623_v37 = vld [vmem:[#allocation7 + $0x32c] ss:$16 sps:$4 sm:$0xff]  }
  0xfc   :  { %v182_v41 = vmul.f32 0.7978846, %v178_v38  ;;  %v185_v42 = vmul.f32 0.7978846, %v181_v39  ;;  %v183_v43 = vmul.f32 0.7978846, %v179_v40  ;;  %v172_v33 = vmul.f32 %v168_v28, %v9035_v27 }
  0xfd   :  { %v7618_v39 = vld [vmem:[#allocation7 + $0x320] ss:$16 sps:$4 sm:$0xff]   ;;  %v7621_v40 = vld [vmem:[#allocation7 + $0x328] ss:$16 sps:$4 sm:$0xff]   ;;  %v7686_v28 = vld [vmem:[#allocation7 + $0x484] ss:$16 sps:$4 sm:$0xff]  }
  0xfe   :  { %8652 = vtanh.f32 %v182_v41  ;;  %v176_v38 = vmul.f32 0.044715, %v172_v33  ;;  %v7626_v41 = vld [vmem:[#allocation7 + $0x344] ss:$16 sps:$4 sm:$0xff]   ;;  %v7695_v33 = vld [vmem:[#allocation7 + $0x4ac] ss:$16 sps:$4 sm:$0xff]  }
  0xff   :  { %8654 = vtanh.f32 %v183_v43 }
 0x100   :  { %8656 = vtanh.f32 %v185_v42  ;;  %v7629_v42 = vld [vmem:[#allocation7 + $0x34c] ss:$16 sps:$4 sm:$0xff]   ;;  %v180_v43 = vadd.f32 %v176_v38, %v9035_v27  ;;  %v7696_v38 = vld [vmem:[#allocation7 + $0x4c0] ss:$16 sps:$4 sm:$0xff]  }
 0x108   :  { %v8653_v44 = vpop.eup %8652 }
 0x109   :  { %v8655_v45 = vpop.eup %8654  ;;  %v190_v47 = vadd.f32 1.0, %v8653_v44  ;;  %v7624_v44 = vld [vmem:[#allocation7 + $0x340] ss:$16 sps:$4 sm:$0xff]  }
 0x10a   :  { %v8657_v48 = vpop.eup %8656  ;;  %v191_v50 = vadd.f32 1.0, %v8655_v45  ;;  %v7627_v45 = vld [vmem:[#allocation7 + $0x348] ss:$16 sps:$4 sm:$0xff]  }
 0x10b   :  { %v194_v51 = vmul.f32 %v190_v47, %v162_v46  ;;  %v193_v53 = vadd.f32 1.0, %v8657_v48  ;;  %v7632_v46 = vld [vmem:[#allocation7 + $0x364] ss:$16 sps:$4 sm:$0xff]   ;;  %v7635_v47 = vld [vmem:[#allocation7 + $0x36c] ss:$16 sps:$4 sm:$0xff]  }
 0x10c   :  { %v195_v54 = vmul.f32 %v191_v50, %v163_v49  ;;  %v184_v48 = vmul.f32 0.7978846, %v180_v43  ;;  %v7630_v49 = vld [vmem:[#allocation7 + $0x360] ss:$16 sps:$4 sm:$0xff]   ;;  %v7633_v50 = vld [vmem:[#allocation7 + $0x368] ss:$16 sps:$4 sm:$0xff]  }
 0x10d   :  { %v198_v57 = vpack.c.bf16 %v194_v51, %v194_v51  ;;  %v197_v58 = vmul.f32 %v193_v53, %v165_v52  ;;  %v7638_v51 = vld [vmem:[#allocation7 + $0x384] ss:$16 sps:$4 sm:$0xff]   ;;  %v7641_v52 = vld [vmem:[#allocation7 + $0x38c] ss:$16 sps:$4 sm:$0xff]   ;;  %v7636_v53 = vld [vmem:[#allocation7 + $0x380] ss:$16 sps:$4 sm:$0xff]  }
 0x10e   :  { %v199_v59 = vpack.c.bf16 %v195_v54, %v195_v54  ;;  %8658 = vtanh.f32 %v184_v48  ;;  %v7639_v54 = vld [vmem:[#allocation7 + $0x388] ss:$16 sps:$4 sm:$0xff]   ;;  %v7716_v48 = vld [vmem:[#allocation7 + $0x524] ss:$16 sps:$4 sm:$0xff]  }
 0x10f   :  { %v201_v0 = vpack.c.bf16 %v197_v58, %v197_v58  ;;  %v7645_v58 = vld [vmem:[#allocation7 + $0x3a8] ss:$16 sps:$4 sm:$0xff]  }
 0x110   :  { %1024 = vmatprep.mubr.bf16.mxu0 %v199_v59  ;;  %1106 = vmatprep.mubr.bf16.mxu1 %v199_v59  ;;  %v7650_v59 = vld [vmem:[#allocation7 + $0x3c4] ss:$16 sps:$4 sm:$0xff]   ;;  %v7705_v43 = vld [vmem:[#allocation7 + $0x4e8] ss:$16 sps:$4 sm:$0xff]  }
 0x111   :  { %1025 = vmatmul.mubr.bf16.vlgmr.msra.gmra.mrb[0].mxu0 %v198_v57  ;;  %1107 = vmatmul.mubr.bf16.vlgmr.msra.gmra.mrb[0].mxu1 %v198_v57  ;;  %v7642_v57 = vld [vmem:[#allocation7 + $0x3a0] ss:$16 sps:$4 sm:$0xff]  }
 0x112   :  { %1034 = vmatpush1.bf16.msra.mxu0 %v7564_v55  ;;  %1116 = vmatpush1.bf16.msra.mxu1 %v7567_v56  ;;  %v7644_v55 = vld [vmem:[#allocation7 + $0x3a4] ss:$16 sps:$4 sm:$0xff]   ;;  %v7647_v56 = vld [vmem:[#allocation7 + $0x3ac] ss:$16 sps:$4 sm:$0xff]  }
 0x113   :  { %1065 = vmatprep.mubr.bf16.mxu0 %v201_v0  ;;  %1147 = vmatprep.mubr.bf16.mxu1 %v201_v0  ;;  %v7656_v0 = vld [vmem:[#allocation7 + $0x3e4] ss:$16 sps:$4 sm:$0xff]  }
 0x114   :  { %1035 = vmatprep.subr.bf16.mxu0 %v7572_v60  ;;  %1117 = vmatprep.subr.bf16.mxu1 %v7575_v61  ;;  %v7653_v60 = vld [vmem:[#allocation7 + $0x3cc] ss:$16 sps:$4 sm:$0xff]  }
 0x116   :  { %1036 = vmatpush1.bf16.msra.mxu0 %v7570_v62  ;;  %1118 = vmatpush1.bf16.msra.mxu1 %v7573_v63  ;;  %v7648_v62 = vld [vmem:[#allocation7 + $0x3c0] ss:$16 sps:$4 sm:$0xff]   ;;  %v7651_v63 = vld [vmem:[#allocation7 + $0x3c8] ss:$16 sps:$4 sm:$0xff]  }
 0x117   :  { %1037 = vmatprep.subr.bf16.mxu0 %v7578_v1  ;;  %1119 = vmatprep.subr.bf16.mxu1 %v7581_v2  ;;  %v7659_v1 = vld [vmem:[#allocation7 + $0x3ec] ss:$16 sps:$4 sm:$0xff]  }
 0x118   :  { %v8659_v61 = vpop.eup %8658 }
 0x119   :  { %v192_v2 = vadd.f32 1.0, %v8659_v61  ;;  %v7734_v61 = vld [vmem:[#allocation7 + $0x584] ss:$16 sps:$4 sm:$0xff]  }
 0x11a   :  { %1038 = vmatpush1.bf16.msra.mxu0 %v7576_v3  ;;  %1120 = vmatpush1.bf16.msra.mxu1 %v7579_v4  ;;  %v7654_v3 = vld [vmem:[#allocation7 + $0x3e0] ss:$16 sps:$4 sm:$0xff]   ;;  %v7657_v4 = vld [vmem:[#allocation7 + $0x3e8] ss:$16 sps:$4 sm:$0xff]  }
 0x11b   :  { %1039 = vmatprep.subr.bf16.mxu0 %v7584_v5  ;;  %1121 = vmatprep.subr.bf16.mxu1 %v7587_v6  ;;  %v164_v5 = vmul.f32 0.5, %v9035_v27  ;;  %v7662_v6 = vld [vmem:[#allocation7 + $0x404] ss:$16 sps:$4 sm:$0xff]  }
 0x11c   :  { %v7674_v27 = vld [vmem:[#allocation7 + $0x444] ss:$16 sps:$4 sm:$0xff]  }
 0x11e   :  { %1040 = vmatpush1.bf16.msra.mxu0 %v7582_v11  ;;  %1122 = vmatpush1.bf16.msra.mxu1 %v7585_v12  ;;  %v7665_v11 = vld [vmem:[#allocation7 + $0x40c] ss:$16 sps:$4 sm:$0xff]   ;;  %v196_v12 = vmul.f32 %v192_v2, %v164_v5  ;;  %v7738_v2 = vld [vmem:[#allocation7 + $0x5a0] ss:$16 sps:$4 sm:$0xff]  }
 0x11f   :  { %1041 = vmatprep.subr.bf16.mxu0 %v7590_v13  ;;  %1123 = vmatprep.subr.bf16.mxu1 %v7593_v14  ;;  %v7660_v13 = vld [vmem:[#allocation7 + $0x400] ss:$16 sps:$4 sm:$0xff]   ;;  %v7663_v14 = vld [vmem:[#allocation7 + $0x408] ss:$16 sps:$4 sm:$0xff]  }
 0x120   :  { %v7744_v5 = vld [vmem:[#allocation7 + $0x5c0] ss:$16 sps:$4 sm:$0xff]  }
 0x122   :  { %1042 = vmatpush1.bf16.msra.mxu0 %v7588_v15  ;;  %1124 = vmatpush1.bf16.msra.mxu1 %v7591_v16  ;;  %v7668_v15 = vld [vmem:[#allocation7 + $0x424] ss:$16 sps:$4 sm:$0xff]   ;;  %v7671_v16 = vld [vmem:[#allocation7 + $0x42c] ss:$16 sps:$4 sm:$0xff]  }
 0x123   :  { %1043 = vmatprep.subr.bf16.mxu0 %v7596_v17  ;;  %1125 = vmatprep.subr.bf16.mxu1 %v7599_v18  ;;  %v200_v17 = vpack.c.bf16 %v196_v12, %v196_v12  ;;  %v7666_v18 = vld [vmem:[#allocation7 + $0x420] ss:$16 sps:$4 sm:$0xff]   ;;  %v7752_v12 = vld [vmem:[#allocation7 + $0x5e4] ss:$16 sps:$4 sm:$0xff]  }
 0x126   :  { %1044 = vmatpush1.bf16.msra.mxu0 %v7594_v19  ;;  %1126 = vmatpush1.bf16.msra.mxu1 %v7597_v20  ;;  %v7669_v19 = vld [vmem:[#allocation7 + $0x428] ss:$16 sps:$4 sm:$0xff]   ;;  %v7677_v20 = vld [vmem:[#allocation7 + $0x44c] ss:$16 sps:$4 sm:$0xff]  }
 0x127   :  { %1045 = vmatprep.subr.bf16.mxu0 %v7602_v21  ;;  %1127 = vmatprep.subr.bf16.mxu1 %v7605_v22  ;;  %v7672_v21 = vld [vmem:[#allocation7 + $0x440] ss:$16 sps:$4 sm:$0xff]   ;;  %v7675_v22 = vld [vmem:[#allocation7 + $0x448] ss:$16 sps:$4 sm:$0xff]  }
 0x12a   :  { %1046 = vmatpush1.bf16.msra.mxu0 %v7600_v23  ;;  %1128 = vmatpush1.bf16.msra.mxu1 %v7603_v24  ;;  %v7680_v23 = vld [vmem:[#allocation7 + $0x464] ss:$16 sps:$4 sm:$0xff]   ;;  %v7683_v24 = vld [vmem:[#allocation7 + $0x46c] ss:$16 sps:$4 sm:$0xff]  }
 0x12b   :  { %1047 = vmatprep.subr.bf16.mxu0 %v7608_v25  ;;  %1129 = vmatprep.subr.bf16.mxu1 %v7611_v26  ;;  %v7678_v25 = vld [vmem:[#allocation7 + $0x460] ss:$16 sps:$4 sm:$0xff]   ;;  %v7681_v26 = vld [vmem:[#allocation7 + $0x468] ss:$16 sps:$4 sm:$0xff]  }
 0x12e   :  { %1048 = vmatpush1.bf16.msra.mxu0 %v7606_v29  ;;  %1130 = vmatpush1.bf16.msra.mxu1 %v7609_v30  ;;  %v7689_v29 = vld [vmem:[#allocation7 + $0x48c] ss:$16 sps:$4 sm:$0xff]   ;;  %v7684_v30 = vld [vmem:[#allocation7 + $0x480] ss:$16 sps:$4 sm:$0xff]  }
 0x12f   :  { %1049 = vmatprep.subr.bf16.mxu0 %v7614_v31  ;;  %1131 = vmatprep.subr.bf16.mxu1 %v7617_v32  ;;  %v7687_v31 = vld [vmem:[#allocation7 + $0x488] ss:$16 sps:$4 sm:$0xff]   ;;  %v7692_v32 = vld [vmem:[#allocation7 + $0x4a4] ss:$16 sps:$4 sm:$0xff]  }
 0x132   :  { %1050 = vmatpush1.bf16.msra.mxu0 %v7612_v34  ;;  %1132 = vmatpush1.bf16.msra.mxu1 %v7615_v35  ;;  %v7690_v34 = vld [vmem:[#allocation7 + $0x4a0] ss:$16 sps:$4 sm:$0xff]   ;;  %v7693_v35 = vld [vmem:[#allocation7 + $0x4a8] ss:$16 sps:$4 sm:$0xff]  }
 0x133   :  { %1051 = vmatprep.subr.bf16.mxu0 %v7620_v36  ;;  %1133 = vmatprep.subr.bf16.mxu1 %v7623_v37  ;;  %v7698_v36 = vld [vmem:[#allocation7 + $0x4c4] ss:$16 sps:$4 sm:$0xff]   ;;  %v7701_v37 = vld [vmem:[#allocation7 + $0x4cc] ss:$16 sps:$4 sm:$0xff]  }
 0x136   :  { %1052 = vmatpush1.bf16.msra.mxu0 %v7618_v39  ;;  %1134 = vmatpush1.bf16.msra.mxu1 %v7621_v40  ;;  %v7699_v39 = vld [vmem:[#allocation7 + $0x4c8] ss:$16 sps:$4 sm:$0xff]   ;;  %v7704_v40 = vld [vmem:[#allocation7 + $0x4e4] ss:$16 sps:$4 sm:$0xff]  }
 0x137   :  { %1053 = vmatprep.subr.bf16.mxu0 %v7626_v41  ;;  %1135 = vmatprep.subr.bf16.mxu1 %v7629_v42  ;;  %v7707_v41 = vld [vmem:[#allocation7 + $0x4ec] ss:$16 sps:$4 sm:$0xff]   ;;  %v7702_v42 = vld [vmem:[#allocation7 + $0x4e0] ss:$16 sps:$4 sm:$0xff]  }
 0x13a   :  { %1054 = vmatpush1.bf16.msra.mxu0 %v7624_v44  ;;  %1136 = vmatpush1.bf16.msra.mxu1 %v7627_v45  ;;  %v7710_v44 = vld [vmem:[#allocation7 + $0x504] ss:$16 sps:$4 sm:$0xff]   ;;  %v7713_v45 = vld [vmem:[#allocation7 + $0x50c] ss:$16 sps:$4 sm:$0xff]  }
 0x13b   :  { %1055 = vmatprep.subr.bf16.mxu0 %v7632_v46  ;;  %1137 = vmatprep.subr.bf16.mxu1 %v7635_v47  ;;  %v7708_v46 = vld [vmem:[#allocation7 + $0x500] ss:$16 sps:$4 sm:$0xff]   ;;  %v7711_v47 = vld [vmem:[#allocation7 + $0x508] ss:$16 sps:$4 sm:$0xff]  }
 0x13e   :  { %1056 = vmatpush1.bf16.msra.mxu0 %v7630_v49  ;;  %1138 = vmatpush1.bf16.msra.mxu1 %v7633_v50  ;;  %v7719_v49 = vld [vmem:[#allocation7 + $0x52c] ss:$16 sps:$4 sm:$0xff]   ;;  %v7714_v50 = vld [vmem:[#allocation7 + $0x520] ss:$16 sps:$4 sm:$0xff]  }
 0x13f   :  { %1057 = vmatprep.subr.bf16.mxu0 %v7638_v51  ;;  %1139 = vmatprep.subr.bf16.mxu1 %v7641_v52  ;;  %v7717_v51 = vld [vmem:[#allocation7 + $0x528] ss:$16 sps:$4 sm:$0xff]   ;;  %v7722_v52 = vld [vmem:[#allocation7 + $0x544] ss:$16 sps:$4 sm:$0xff]  }
 0x142   :  { %1058 = vmatpush1.bf16.msra.mxu0 %v7636_v53  ;;  %1140 = vmatpush1.bf16.msra.mxu1 %v7639_v54  ;;  %v7725_v53 = vld [vmem:[#allocation7 + $0x54c] ss:$16 sps:$4 sm:$0xff]   ;;  %v7720_v54 = vld [vmem:[#allocation7 + $0x540] ss:$16 sps:$4 sm:$0xff]  }
 0x143   :  { %1059 = vmatprep.subr.bf16.mxu0 %v7644_v55  ;;  %1141 = vmatprep.subr.bf16.mxu1 %v7647_v56  ;;  %v7723_v55 = vld [vmem:[#allocation7 + $0x548] ss:$16 sps:$4 sm:$0xff]   ;;  %v7728_v56 = vld [vmem:[#allocation7 + $0x564] ss:$16 sps:$4 sm:$0xff]  }
 0x146   :  { %1060 = vmatpush1.bf16.msra.mxu0 %v7642_v57  ;;  %1142 = vmatpush1.bf16.msra.mxu1 %v7645_v58  ;;  %v7731_v57 = vld [vmem:[#allocation7 + $0x56c] ss:$16 sps:$4 sm:$0xff]   ;;  %v7726_v58 = vld [vmem:[#allocation7 + $0x560] ss:$16 sps:$4 sm:$0xff]  }
 0x147   :  { %1061 = vmatprep.subr.bf16.mxu0 %v7650_v59  ;;  %1143 = vmatprep.subr.bf16.mxu1 %v7653_v60  ;;  %v7729_v59 = vld [vmem:[#allocation7 + $0x568] ss:$16 sps:$4 sm:$0xff]   ;;  %v7732_v60 = vld [vmem:[#allocation7 + $0x580] ss:$16 sps:$4 sm:$0xff]  }
 0x14a   :  { %1062 = vmatpush1.bf16.msra.mxu0 %v7648_v62  ;;  %1144 = vmatpush1.bf16.msra.mxu1 %v7651_v63  ;;  %v7735_v62 = vld [vmem:[#allocation7 + $0x588] ss:$16 sps:$4 sm:$0xff]   ;;  %v7737_v63 = vld [vmem:[#allocation7 + $0x58c] ss:$16 sps:$4 sm:$0xff]  }
 0x14b   :  { %1063 = vmatprep.subr.bf16.mxu0 %v7656_v0  ;;  %1145 = vmatprep.subr.bf16.mxu1 %v7659_v1  ;;  %v7740_v0 = vld [vmem:[#allocation7 + $0x5a4] ss:$16 sps:$4 sm:$0xff]   ;;  %v7743_v1 = vld [vmem:[#allocation7 + $0x5ac] ss:$16 sps:$4 sm:$0xff]  }
 0x14e   :  { %1064 = vmatpush1.bf16.msra.mxu0 %v7654_v3  ;;  %1146 = vmatpush1.bf16.msra.mxu1 %v7657_v4  ;;  %v7741_v3 = vld [vmem:[#allocation7 + $0x5a8] ss:$16 sps:$4 sm:$0xff]   ;;  %v7746_v4 = vld [vmem:[#allocation7 + $0x5c4] ss:$16 sps:$4 sm:$0xff]  }
 0x14f   :  { %1988 = vmatprep.subr.bf16.mxu0 %v7662_v6  ;;  %2070 = vmatprep.subr.bf16.mxu1 %v7665_v11  ;;  %v7749_v6 = vld [vmem:[#allocation7 + $0x5cc] ss:$16 sps:$4 sm:$0xff]   ;;  %v7747_v11 = vld [vmem:[#allocation7 + $0x5c8] ss:$16 sps:$4 sm:$0xff]  }
 0x151   :  { %1066 = vmatmul.mubr.bf16.vlgmr.msra.gmra.mrb[0].mxu0 %v200_v17  ;;  %1148 = vmatmul.mubr.bf16.vlgmr.msra.gmra.mrb[0].mxu1 %v200_v17  ;;  %v7761_v17 = vld [vmem:[#allocation7 + $0x60c] ss:$16 sps:$4 sm:$0xff]  }
 0x152   :  { %1989 = vmatpush1.bf16.msra.mxu0 %v7660_v13  ;;  %2071 = vmatpush1.bf16.msra.mxu1 %v7663_v14  ;;  %v7755_v13 = vld [vmem:[#allocation7 + $0x5ec] ss:$16 sps:$4 sm:$0xff]   ;;  %v7750_v14 = vld [vmem:[#allocation7 + $0x5e0] ss:$16 sps:$4 sm:$0xff]  }
 0x153   :  { %1990 = vmatprep.subr.bf16.mxu0 %v7668_v15  ;;  %2072 = vmatprep.subr.bf16.mxu1 %v7671_v16  ;;  %v7753_v15 = vld [vmem:[#allocation7 + $0x5e8] ss:$16 sps:$4 sm:$0xff]   ;;  %v7758_v16 = vld [vmem:[#allocation7 + $0x604] ss:$16 sps:$4 sm:$0xff]  }
 0x156   :  { %1991 = vmatpush1.bf16.msra.mxu0 %v7666_v18  ;;  %2073 = vmatpush1.bf16.msra.mxu1 %v7669_v19  ;;  %v9042_v18 = vld [vmem:[#allocation8] sm:$0xf] }
 0x157   :  { %1992 = vmatprep.subr.bf16.mxu0 %v7674_v27  ;;  %2074 = vmatprep.subr.bf16.mxu1 %v7677_v20  ;;  %v335_v19 = vrot.slane %v9042_v18, %v9019_v7  ;;  %v339_v27 = vrot.slane %v9042_v18, %v9021_v8  ;;  %v347_v20 = vrot.slane %v9042_v18, %v9025_v10 }
 0x15a   :  { %1993 = vmatpush1.bf16.msra.mxu0 %v7672_v21  ;;  %2075 = vmatpush1.bf16.msra.mxu1 %v7675_v22 }
 0x15b   :  { %1994 = vmatprep.subr.bf16.mxu0 %v7680_v23  ;;  %2076 = vmatprep.subr.bf16.mxu1 %v7683_v24 }
 0x15e   :  { %1995 = vmatpush1.bf16.msra.mxu0 %v7678_v25  ;;  %2077 = vmatpush1.bf16.msra.mxu1 %v7681_v26 }
 0x15f   :  { %1996 = vmatprep.subr.bf16.mxu0 %v7686_v28  ;;  %2078 = vmatprep.subr.bf16.mxu1 %v7689_v29 }
 0x162   :  { %1997 = vmatpush1.bf16.msra.mxu0 %v7684_v30  ;;  %2079 = vmatpush1.bf16.msra.mxu1 %v7687_v31 }
 0x163   :  { %1998 = vmatprep.subr.bf16.mxu0 %v7692_v32  ;;  %2080 = vmatprep.subr.bf16.mxu1 %v7695_v33 }
 0x166   :  { %1999 = vmatpush1.bf16.msra.mxu0 %v7690_v34  ;;  %2081 = vmatpush1.bf16.msra.mxu1 %v7693_v35 }
 0x167   :  { %2000 = vmatprep.subr.bf16.mxu0 %v7698_v36  ;;  %2082 = vmatprep.subr.bf16.mxu1 %v7701_v37 }
 0x16a   :  { %2001 = vmatpush1.bf16.msra.mxu0 %v7696_v38  ;;  %2083 = vmatpush1.bf16.msra.mxu1 %v7699_v39 }
 0x16b   :  { %2002 = vmatprep.subr.bf16.mxu0 %v7704_v40  ;;  %2084 = vmatprep.subr.bf16.mxu1 %v7707_v41 }
 0x16e   :  { %2003 = vmatpush1.bf16.msra.mxu0 %v7702_v42  ;;  %2085 = vmatpush1.bf16.msra.mxu1 %v7705_v43 }
 0x16f   :  { %2004 = vmatprep.subr.bf16.mxu0 %v7710_v44  ;;  %2086 = vmatprep.subr.bf16.mxu1 %v7713_v45 }
 0x172   :  { %2005 = vmatpush1.bf16.msra.mxu0 %v7708_v46  ;;  %2087 = vmatpush1.bf16.msra.mxu1 %v7711_v47 }
 0x173   :  { %2006 = vmatprep.subr.bf16.mxu0 %v7716_v48  ;;  %2088 = vmatprep.subr.bf16.mxu1 %v7719_v49 }
 0x176   :  { %2007 = vmatpush1.bf16.msra.mxu0 %v7714_v50  ;;  %2089 = vmatpush1.bf16.msra.mxu1 %v7717_v51 }
 0x177   :  { %2008 = vmatprep.subr.bf16.mxu0 %v7722_v52  ;;  %2090 = vmatprep.subr.bf16.mxu1 %v7725_v53 }
 0x17a   :  { %2009 = vmatpush1.bf16.msra.mxu0 %v7720_v54  ;;  %2091 = vmatpush1.bf16.msra.mxu1 %v7723_v55 }
 0x17b   :  { %2010 = vmatprep.subr.bf16.mxu0 %v7728_v56  ;;  %2092 = vmatprep.subr.bf16.mxu1 %v7731_v57 }
 0x17e   :  { %2011 = vmatpush1.bf16.msra.mxu0 %v7726_v58  ;;  %2093 = vmatpush1.bf16.msra.mxu1 %v7729_v59 }
 0x17f   :  { %2012 = vmatprep.subr.bf16.mxu0 %v7734_v61  ;;  %2094 = vmatprep.subr.bf16.mxu1 %v7737_v63  ;;  %v7756_v61 = vld [vmem:[#allocation7 + $0x600] ss:$16 sps:$4 sm:$0xff]  }
 0x182   :  { %2013 = vmatpush1.bf16.msra.mxu0 %v7732_v60  ;;  %2095 = vmatpush1.bf16.msra.mxu1 %v7735_v62  ;;  %v7759_v62 = vld [vmem:[#allocation7 + $0x608] ss:$16 sps:$4 sm:$0xff]  }
 0x183   :  { %2014 = vmatprep.subr.bf16.mxu0 %v7740_v0  ;;  %2096 = vmatprep.subr.bf16.mxu1 %v7743_v1  ;;  %v7764_v0 = vld [vmem:[#allocation7 + $0x624] ss:$16 sps:$4 sm:$0xff]   ;;  %v7767_v1 = vld [vmem:[#allocation7 + $0x62c] ss:$16 sps:$4 sm:$0xff]  }
 0x186   :  { %2015 = vmatpush1.bf16.msra.mxu0 %v7738_v2  ;;  %2097 = vmatpush1.bf16.msra.mxu1 %v7741_v3  ;;  %v7762_v3 = vld [vmem:[#allocation7 + $0x620] ss:$16 sps:$4 sm:$0xff]  }
 0x187   :  { %2016 = vmatprep.subr.bf16.mxu0 %v7746_v4  ;;  %2098 = vmatprep.subr.bf16.mxu1 %v7749_v6  ;;  %v7765_v4 = vld [vmem:[#allocation7 + $0x628] ss:$16 sps:$4 sm:$0xff]   ;;  %v7773_v6 = vld [vmem:[#allocation7 + $0x64c] ss:$16 sps:$4 sm:$0xff]  }
 0x18a   :  { %2017 = vmatpush1.bf16.msra.mxu0 %v7744_v5  ;;  %2099 = vmatpush1.bf16.msra.mxu1 %v7747_v11  ;;  %v7770_v5 = vld [vmem:[#allocation7 + $0x644] ss:$16 sps:$4 sm:$0xff]   ;;  %v7768_v11 = vld [vmem:[#allocation7 + $0x640] ss:$16 sps:$4 sm:$0xff]  }
 0x18b   :  { %2018 = vmatprep.subr.bf16.mxu0 %v7752_v12  ;;  %2100 = vmatprep.subr.bf16.mxu1 %v7755_v13  ;;  %v7771_v12 = vld [vmem:[#allocation7 + $0x648] ss:$16 sps:$4 sm:$0xff]   ;;  %v7776_v13 = vld [vmem:[#allocation7 + $0x664] ss:$16 sps:$4 sm:$0xff]  }
 0x18e   :  { %2019 = vmatpush1.bf16.msra.mxu0 %v7750_v14  ;;  %2101 = vmatpush1.bf16.msra.mxu1 %v7753_v15  ;;  %v7779_v14 = vld [vmem:[#allocation7 + $0x66c] ss:$16 sps:$4 sm:$0xff]   ;;  %v7774_v15 = vld [vmem:[#allocation7 + $0x660] ss:$16 sps:$4 sm:$0xff]  }
 0x18f   :  { %2029 = vmatprep.subr.bf16.mxu0 %v7758_v16  ;;  %2111 = vmatprep.subr.bf16.mxu1 %v7761_v17  ;;  %v7777_v16 = vld [vmem:[#allocation7 + $0x668] ss:$16 sps:$4 sm:$0xff]   ;;  %v7782_v17 = vld [vmem:[#allocation7 + $0x684] ss:$16 sps:$4 sm:$0xff]  }
 0x224   :  { %v1067_v21 = vpop.f32.mrb[0].mxu0  ;;  %v9050_v22 = vpop.f32.mrb[0].mxu1 }
 0x225   :  { %v7383_v23 = vadd.f32 %v1067_v21, %v335_v19  ;;  %v1069_v24 = vpop.f32.mrb[1].mxu0  ;;  %v1151_v25 = vpop.f32.mrb[1].mxu1  ;;  %v7785_v19 = vld [vmem:[#allocation7 + $0x68c] ss:$16 sps:$4 sm:$0xff]   ;;  %v7783_v21 = vld [vmem:[#allocation7 + $0x688] ss:$16 sps:$4 sm:$0xff]  }
 0x226   :  { %v7384_v26 = vadd.f32 %v1069_v24, %v339_v27  ;;  %v7386_v28 = vadd.f32 %v1151_v25, %v347_v20  ;;  %v1071_v29 = vpop.f32.mrb[2].mxu0  ;;  %v1153_v30 = vpop.f32.mrb[2].mxu1  ;;  %v343_v27 = vrot.slane %v9042_v18, %v9023_v9  ;;  %v7780_v20 = vld [vmem:[#allocation7 + $0x680] ss:$16 sps:$4 sm:$0xff]   ;;  %v7791_v24 = vld [vmem:[#allocation7 + $0x6ac] ss:$16 sps:$4 sm:$0xff]  }
 0x227   :  { %v1160_v31 = vmul.f32 %v7383_v23, %v7383_v23  ;;  %v1072_v32 = vpop.f32.mrb[3].mxu0  ;;  %v1154_v33 = vpop.f32.mrb[3].mxu1  ;;  %v1156_v51 = vmul.f32 0.5, %v7383_v23  ;;  %v7794_v29 = vld [vmem:[#allocation7 + $0x6c4] ss:$16 sps:$4 sm:$0xff]  }
 0x228   :  { %v1161_v34 = vmul.f32 %v7384_v26, %v7384_v26  ;;  %v1163_v35 = vmul.f32 %v7386_v28, %v7386_v28  ;;  %v1157_v53 = vmul.f32 0.5, %v7384_v26  ;;  %v1159_v56 = vmul.f32 0.5, %v7386_v28  ;;  %v7797_v30 = vld [vmem:[#allocation7 + $0x6cc] ss:$16 sps:$4 sm:$0xff]   ;;  %v7795_v32 = vld [vmem:[#allocation7 + $0x6c8] ss:$16 sps:$4 sm:$0xff]  }
 0x229   :  { %v1164_v36 = vmul.f32 %v7383_v23, %v1160_v31  ;;  %v9055_v25 = vadd.f32 %v9050_v22, %v343_v27  ;;  %v7792_v31 = vld [vmem:[#allocation7 + $0x6c0] ss:$16 sps:$4 sm:$0xff]   ;;  %v7800_v33 = vld [vmem:[#allocation7 + $0x6e4] ss:$16 sps:$4 sm:$0xff]   ;;  %v7803_v22 = vld [vmem:[#allocation7 + $0x6ec] ss:$16 sps:$4 sm:$0xff]  }
 0x22a   :  { %v1165_v37 = vmul.f32 %v7384_v26, %v1161_v34  ;;  %v1167_v38 = vmul.f32 %v7386_v28, %v1163_v35  ;;  %v7798_v35 = vld [vmem:[#allocation7 + $0x6e0] ss:$16 sps:$4 sm:$0xff]   ;;  %v7855_v27 = vld [vmem:[#allocation7 + $0x808] ss:$16 sps:$4 sm:$0xff]  }
 0x22b   :  { %v1168_v39 = vmul.f32 0.044715, %v1164_v36  ;;  %v1162_v18 = vmul.f32 %v9055_v25, %v9055_v25  ;;  %v7801_v36 = vld [vmem:[#allocation7 + $0x6e8] ss:$16 sps:$4 sm:$0xff]  }
 0x22c   :  { %v1169_v40 = vmul.f32 0.044715, %v1165_v37  ;;  %v1171_v41 = vmul.f32 0.044715, %v1167_v38  ;;  %v7806_v37 = vld [vmem:[#allocation7 + $0x704] ss:$16 sps:$4 sm:$0xff]  }
 0x22d   :  { %v1172_v42 = vadd.f32 %v7383_v23, %v1168_v39  ;;  %v7788_v23 = vld [vmem:[#allocation7 + $0x6a4] ss:$16 sps:$4 sm:$0xff]   ;;  %v1166_v34 = vmul.f32 %v9055_v25, %v1162_v18  ;;  %v7809_v38 = vld [vmem:[#allocation7 + $0x70c] ss:$16 sps:$4 sm:$0xff]  }
 0x22e   :  { %v1173_v43 = vadd.f32 %v7384_v26, %v1169_v40  ;;  %v1175_v44 = vadd.f32 %v7386_v28, %v1171_v41  ;;  %v7786_v26 = vld [vmem:[#allocation7 + $0x6a0] ss:$16 sps:$4 sm:$0xff]   ;;  %v7789_v28 = vld [vmem:[#allocation7 + $0x6a8] ss:$16 sps:$4 sm:$0xff]   ;;  %v7872_v18 = vld [vmem:[#allocation7 + $0x864] ss:$16 sps:$4 sm:$0xff]  }
 0x22f   :  { %v1176_v45 = vmul.f32 0.7978846, %v1172_v42  ;;  %v1170_v39 = vmul.f32 0.044715, %v1166_v34  ;;  %v7804_v40 = vld [vmem:[#allocation7 + $0x700] ss:$16 sps:$4 sm:$0xff]  }
 0x230   :  { %v1177_v46 = vmul.f32 0.7978846, %v1173_v43  ;;  %v1179_v47 = vmul.f32 0.7978846, %v1175_v44  ;;  %v7807_v41 = vld [vmem:[#allocation7 + $0x708] ss:$16 sps:$4 sm:$0xff]  }
 0x231   :  { %8660 = vtanh.f32 %v1176_v45  ;;  %v7812_v42 = vld [vmem:[#allocation7 + $0x724] ss:$16 sps:$4 sm:$0xff]   ;;  %v7815_v43 = vld [vmem:[#allocation7 + $0x72c] ss:$16 sps:$4 sm:$0xff]   ;;  %v1174_v44 = vadd.f32 %v9055_v25, %v1170_v39  ;;  %v7810_v45 = vld [vmem:[#allocation7 + $0x720] ss:$16 sps:$4 sm:$0xff]  }
 0x232   :  { %8662 = vtanh.f32 %v1177_v46  ;;  %v7813_v46 = vld [vmem:[#allocation7 + $0x728] ss:$16 sps:$4 sm:$0xff]   ;;  %v7881_v34 = vld [vmem:[#allocation7 + $0x88c] ss:$16 sps:$4 sm:$0xff]   ;;  %v7882_v39 = vld [vmem:[#allocation7 + $0x8a0] ss:$16 sps:$4 sm:$0xff]  }
 0x233   :  { %8664 = vtanh.f32 %v1179_v47  ;;  %v7818_v47 = vld [vmem:[#allocation7 + $0x744] ss:$16 sps:$4 sm:$0xff]  }
 0x23b   :  { %v8661_v48 = vpop.eup %8660 }
 0x23c   :  { %v1184_v49 = vadd.f32 1.0, %v8661_v48  ;;  %v8663_v50 = vpop.eup %8662  ;;  %v7821_v48 = vld [vmem:[#allocation7 + $0x74c] ss:$16 sps:$4 sm:$0xff]  }
 0x23d   :  { %v8665_v52 = vpop.eup %8664  ;;  %v1185_v54 = vadd.f32 1.0, %v8663_v50  ;;  %v7816_v50 = vld [vmem:[#allocation7 + $0x740] ss:$16 sps:$4 sm:$0xff]  }
 0x23e   :  { %v1188_v55 = vmul.f32 %v1184_v49, %v1156_v51  ;;  %v1187_v57 = vadd.f32 1.0, %v8665_v52  ;;  %v1178_v49 = vmul.f32 0.7978846, %v1174_v44  ;;  %v7819_v51 = vld [vmem:[#allocation7 + $0x748] ss:$16 sps:$4 sm:$0xff]  }
 0x23f   :  { %v1189_v58 = vmul.f32 %v1185_v54, %v1157_v53  ;;  %v7824_v52 = vld [vmem:[#allocation7 + $0x764] ss:$16 sps:$4 sm:$0xff]   ;;  %v7827_v53 = vld [vmem:[#allocation7 + $0x76c] ss:$16 sps:$4 sm:$0xff]   ;;  %v7822_v54 = vld [vmem:[#allocation7 + $0x760] ss:$16 sps:$4 sm:$0xff]  }
 0x240   :  { %v1191_v59 = vmul.f32 %v1187_v57, %v1159_v56  ;;  %v1192_v63 = vpack.c.bf16 %v1188_v55, %v1188_v55  ;;  %8666 = vtanh.f32 %v1178_v49  ;;  %v7825_v55 = vld [vmem:[#allocation7 + $0x768] ss:$16 sps:$4 sm:$0xff]   ;;  %v7830_v56 = vld [vmem:[#allocation7 + $0x784] ss:$16 sps:$4 sm:$0xff]   ;;  %v7833_v57 = vld [vmem:[#allocation7 + $0x78c] ss:$16 sps:$4 sm:$0xff]  }
 0x241   :  { %v1193_v60 = vpack.c.bf16 %v1189_v58, %v1189_v58  ;;  %v7828_v58 = vld [vmem:[#allocation7 + $0x780] ss:$16 sps:$4 sm:$0xff]   ;;  %v7891_v44 = vld [vmem:[#allocation7 + $0x8c8] ss:$16 sps:$4 sm:$0xff]   ;;  %v7902_v49 = vld [vmem:[#allocation7 + $0x904] ss:$16 sps:$4 sm:$0xff]  }
 0x242   :  { %v1195_v2 = vpack.c.bf16 %v1191_v59, %v1191_v59  ;;  %v7831_v59 = vld [vmem:[#allocation7 + $0x788] ss:$16 sps:$4 sm:$0xff]  }
 0x243   :  { %2020 = vmatprep.mubr.bf16.mxu0 %v1193_v60  ;;  %2102 = vmatprep.mubr.bf16.mxu1 %v1193_v60  ;;  %v7836_v60 = vld [vmem:[#allocation7 + $0x7a4] ss:$16 sps:$4 sm:$0xff]  }
 0x244   :  { %2021 = vmatmul.mubr.bf16.vlgmr.msra.gmra.mrb[4].mxu0 %v1192_v63  ;;  %2103 = vmatmul.mubr.bf16.vlgmr.msra.gmra.mrb[4].mxu1 %v1192_v63  ;;  %v7837_v63 = vld [vmem:[#allocation7 + $0x7a8] ss:$16 sps:$4 sm:$0xff]  }
 0x245   :  { %2030 = vmatpush1.bf16.msra.mxu0 %v7756_v61  ;;  %2112 = vmatpush1.bf16.msra.mxu1 %v7759_v62  ;;  %v7839_v61 = vld [vmem:[#allocation7 + $0x7ac] ss:$16 sps:$4 sm:$0xff]   ;;  %v7834_v62 = vld [vmem:[#allocation7 + $0x7a0] ss:$16 sps:$4 sm:$0xff]  }
 0x246   :  { %2061 = vmatprep.mubr.bf16.mxu0 %v1195_v2  ;;  %2143 = vmatprep.mubr.bf16.mxu1 %v1195_v2 }
 0x247   :  { %2031 = vmatprep.subr.bf16.mxu0 %v7764_v0  ;;  %2113 = vmatprep.subr.bf16.mxu1 %v7767_v1  ;;  %v7842_v0 = vld [vmem:[#allocation7 + $0x7c4] ss:$16 sps:$4 sm:$0xff]   ;;  %v7845_v1 = vld [vmem:[#allocation7 + $0x7cc] ss:$16 sps:$4 sm:$0xff]  }
 0x249   :  { %2032 = vmatpush1.bf16.msra.mxu0 %v7762_v3  ;;  %2114 = vmatpush1.bf16.msra.mxu1 %v7765_v4  ;;  %v7840_v3 = vld [vmem:[#allocation7 + $0x7c0] ss:$16 sps:$4 sm:$0xff]   ;;  %v7843_v4 = vld [vmem:[#allocation7 + $0x7c8] ss:$16 sps:$4 sm:$0xff]  }
 0x24a   :  { %2033 = vmatprep.subr.bf16.mxu0 %v7770_v5  ;;  %2115 = vmatprep.subr.bf16.mxu1 %v7773_v6  ;;  %v8667_v2 = vpop.eup %8666  ;;  %v7848_v5 = vld [vmem:[#allocation7 + $0x7e4] ss:$16 sps:$4 sm:$0xff]   ;;  %v7851_v6 = vld [vmem:[#allocation7 + $0x7ec] ss:$16 sps:$4 sm:$0xff]  }
 0x24d   :  { %2034 = vmatpush1.bf16.msra.mxu0 %v7768_v11  ;;  %2116 = vmatpush1.bf16.msra.mxu1 %v7771_v12  ;;  %v1186_v11 = vadd.f32 1.0, %v8667_v2  ;;  %v1158_v12 = vmul.f32 0.5, %v9055_v25  ;;  %v7861_v25 = vld [vmem:[#allocation7 + $0x828] ss:$16 sps:$4 sm:$0xff]   ;;  %v7926_v2 = vld [vmem:[#allocation7 + $0x984] ss:$16 sps:$4 sm:$0xff]  }
 0x24e   :  { %2035 = vmatprep.subr.bf16.mxu0 %v7776_v13  ;;  %2117 = vmatprep.subr.bf16.mxu1 %v7779_v14  ;;  %v7846_v13 = vld [vmem:[#allocation7 + $0x7e0] ss:$16 sps:$4 sm:$0xff]   ;;  %v7849_v14 = vld [vmem:[#allocation7 + $0x7e8] ss:$16 sps:$4 sm:$0xff]  }
 0x251   :  { %2036 = vmatpush1.bf16.msra.mxu0 %v7774_v15  ;;  %2118 = vmatpush1.bf16.msra.mxu1 %v7777_v16  ;;  %v1190_v15 = vmul.f32 %v1186_v11, %v1158_v12  ;;  %v7854_v16 = vld [vmem:[#allocation7 + $0x804] ss:$16 sps:$4 sm:$0xff]   ;;  %v7930_v11 = vld [vmem:[#allocation7 + $0x9a0] ss:$16 sps:$4 sm:$0xff]   ;;  %v7933_v12 = vld [vmem:[#allocation7 + $0x9a8] ss:$16 sps:$4 sm:$0xff]  }
 0x252   :  { %2037 = vmatprep.subr.bf16.mxu0 %v7782_v17  ;;  %2119 = vmatprep.subr.bf16.mxu1 %v7785_v19  ;;  %v7857_v17 = vld [vmem:[#allocation7 + $0x80c] ss:$16 sps:$4 sm:$0xff]   ;;  %v7852_v19 = vld [vmem:[#allocation7 + $0x800] ss:$16 sps:$4 sm:$0xff]  }
 0x255   :  { %2038 = vmatpush1.bf16.msra.mxu0 %v7780_v20  ;;  %2120 = vmatpush1.bf16.msra.mxu1 %v7783_v21  ;;  %v1194_v20 = vpack.c.bf16 %v1190_v15, %v1190_v15  ;;  %v7860_v21 = vld [vmem:[#allocation7 + $0x824] ss:$16 sps:$4 sm:$0xff]   ;;  %v7936_v15 = vld [vmem:[#allocation7 + $0x9c0] ss:$16 sps:$4 sm:$0xff]  }
 0x256   :  { %2039 = vmatprep.subr.bf16.mxu0 %v7788_v23  ;;  %2121 = vmatprep.subr.bf16.mxu1 %v7791_v24  ;;  %v7863_v23 = vld [vmem:[#allocation7 + $0x82c] ss:$16 sps:$4 sm:$0xff]   ;;  %v7858_v24 = vld [vmem:[#allocation7 + $0x820] ss:$16 sps:$4 sm:$0xff]  }
 0x259   :  { %2040 = vmatpush1.bf16.msra.mxu0 %v7786_v26  ;;  %2122 = vmatpush1.bf16.msra.mxu1 %v7789_v28  ;;  %v7866_v26 = vld [vmem:[#allocation7 + $0x844] ss:$16 sps:$4 sm:$0xff]   ;;  %v7869_v28 = vld [vmem:[#allocation7 + $0x84c] ss:$16 sps:$4 sm:$0xff]  }
 0x25a   :  { %2041 = vmatprep.subr.bf16.mxu0 %v7794_v29  ;;  %2123 = vmatprep.subr.bf16.mxu1 %v7797_v30  ;;  %v7864_v29 = vld [vmem:[#allocation7 + $0x840] ss:$16 sps:$4 sm:$0xff]   ;;  %v7867_v30 = vld [vmem:[#allocation7 + $0x848] ss:$16 sps:$4 sm:$0xff]  }
 0x25d   :  { %2042 = vmatpush1.bf16.msra.mxu0 %v7792_v31  ;;  %2124 = vmatpush1.bf16.msra.mxu1 %v7795_v32  ;;  %v7875_v31 = vld [vmem:[#allocation7 + $0x86c] ss:$16 sps:$4 sm:$0xff]   ;;  %v7870_v32 = vld [vmem:[#allocation7 + $0x860] ss:$16 sps:$4 sm:$0xff]  }
 0x25e   :  { %2043 = vmatprep.subr.bf16.mxu0 %v7800_v33  ;;  %2125 = vmatprep.subr.bf16.mxu1 %v7803_v22  ;;  %v7873_v33 = vld [vmem:[#allocation7 + $0x868] ss:$16 sps:$4 sm:$0xff]   ;;  %v7878_v22 = vld [vmem:[#allocation7 + $0x884] ss:$16 sps:$4 sm:$0xff]  }
 0x261   :  { %2044 = vmatpush1.bf16.msra.mxu0 %v7798_v35  ;;  %2126 = vmatpush1.bf16.msra.mxu1 %v7801_v36  ;;  %v7876_v35 = vld [vmem:[#allocation7 + $0x880] ss:$16 sps:$4 sm:$0xff]   ;;  %v7879_v36 = vld [vmem:[#allocation7 + $0x888] ss:$16 sps:$4 sm:$0xff]  }
 0x262   :  { %2045 = vmatprep.subr.bf16.mxu0 %v7806_v37  ;;  %2127 = vmatprep.subr.bf16.mxu1 %v7809_v38  ;;  %v7884_v37 = vld [vmem:[#allocation7 + $0x8a4] ss:$16 sps:$4 sm:$0xff]   ;;  %v7887_v38 = vld [vmem:[#allocation7 + $0x8ac] ss:$16 sps:$4 sm:$0xff]  }
 0x265   :  { %2046 = vmatpush1.bf16.msra.mxu0 %v7804_v40  ;;  %2128 = vmatpush1.bf16.msra.mxu1 %v7807_v41  ;;  %v7885_v40 = vld [vmem:[#allocation7 + $0x8a8] ss:$16 sps:$4 sm:$0xff]   ;;  %v7890_v41 = vld [vmem:[#allocation7 + $0x8c4] ss:$16 sps:$4 sm:$0xff]  }
 0x266   :  { %2047 = vmatprep.subr.bf16.mxu0 %v7812_v42  ;;  %2129 = vmatprep.subr.bf16.mxu1 %v7815_v43  ;;  %v7893_v42 = vld [vmem:[#allocation7 + $0x8cc] ss:$16 sps:$4 sm:$0xff]   ;;  %v7888_v43 = vld [vmem:[#allocation7 + $0x8c0] ss:$16 sps:$4 sm:$0xff]  }
 0x269   :  { %2048 = vmatpush1.bf16.msra.mxu0 %v7810_v45  ;;  %2130 = vmatpush1.bf16.msra.mxu1 %v7813_v46  ;;  %v7896_v45 = vld [vmem:[#allocation7 + $0x8e4] ss:$16 sps:$4 sm:$0xff]   ;;  %v7899_v46 = vld [vmem:[#allocation7 + $0x8ec] ss:$16 sps:$4 sm:$0xff]  }
 0x26a   :  { %2049 = vmatprep.subr.bf16.mxu0 %v7818_v47  ;;  %2131 = vmatprep.subr.bf16.mxu1 %v7821_v48  ;;  %v7894_v47 = vld [vmem:[#allocation7 + $0x8e0] ss:$16 sps:$4 sm:$0xff]   ;;  %v7897_v48 = vld [vmem:[#allocation7 + $0x8e8] ss:$16 sps:$4 sm:$0xff]  }
 0x26d   :  { %2050 = vmatpush1.bf16.msra.mxu0 %v7816_v50  ;;  %2132 = vmatpush1.bf16.msra.mxu1 %v7819_v51  ;;  %v7905_v50 = vld [vmem:[#allocation7 + $0x90c] ss:$16 sps:$4 sm:$0xff]   ;;  %v7900_v51 = vld [vmem:[#allocation7 + $0x900] ss:$16 sps:$4 sm:$0xff]  }
 0x26e   :  { %2051 = vmatprep.subr.bf16.mxu0 %v7824_v52  ;;  %2133 = vmatprep.subr.bf16.mxu1 %v7827_v53  ;;  %v7903_v52 = vld [vmem:[#allocation7 + $0x908] ss:$16 sps:$4 sm:$0xff]   ;;  %v7908_v53 = vld [vmem:[#allocation7 + $0x924] ss:$16 sps:$4 sm:$0xff]  }
 0x271   :  { %2052 = vmatpush1.bf16.msra.mxu0 %v7822_v54  ;;  %2134 = vmatpush1.bf16.msra.mxu1 %v7825_v55  ;;  %v7911_v54 = vld [vmem:[#allocation7 + $0x92c] ss:$16 sps:$4 sm:$0xff]   ;;  %v7906_v55 = vld [vmem:[#allocation7 + $0x920] ss:$16 sps:$4 sm:$0xff]  }
 0x272   :  { %2053 = vmatprep.subr.bf16.mxu0 %v7830_v56  ;;  %2135 = vmatprep.subr.bf16.mxu1 %v7833_v57  ;;  %v7909_v56 = vld [vmem:[#allocation7 + $0x928] ss:$16 sps:$4 sm:$0xff]   ;;  %v7914_v57 = vld [vmem:[#allocation7 + $0x944] ss:$16 sps:$4 sm:$0xff]  }
 0x275   :  { %2054 = vmatpush1.bf16.msra.mxu0 %v7828_v58  ;;  %2136 = vmatpush1.bf16.msra.mxu1 %v7831_v59  ;;  %v7917_v58 = vld [vmem:[#allocation7 + $0x94c] ss:$16 sps:$4 sm:$0xff]   ;;  %v7912_v59 = vld [vmem:[#allocation7 + $0x940] ss:$16 sps:$4 sm:$0xff]  }
 0x276   :  { %2055 = vmatprep.subr.bf16.mxu0 %v7836_v60  ;;  %2137 = vmatprep.subr.bf16.mxu1 %v7839_v61  ;;  %v7915_v60 = vld [vmem:[#allocation7 + $0x948] ss:$16 sps:$4 sm:$0xff]   ;;  %v7920_v61 = vld [vmem:[#allocation7 + $0x964] ss:$16 sps:$4 sm:$0xff]  }
 0x279   :  { %2056 = vmatpush1.bf16.msra.mxu0 %v7834_v62  ;;  %2138 = vmatpush1.bf16.msra.mxu1 %v7837_v63  ;;  %v7923_v62 = vld [vmem:[#allocation7 + $0x96c] ss:$16 sps:$4 sm:$0xff]   ;;  %v7918_v63 = vld [vmem:[#allocation7 + $0x960] ss:$16 sps:$4 sm:$0xff]  }
 0x27a   :  { %2057 = vmatprep.subr.bf16.mxu0 %v7842_v0  ;;  %2139 = vmatprep.subr.bf16.mxu1 %v7845_v1  ;;  %v7921_v0 = vld [vmem:[#allocation7 + $0x968] ss:$16 sps:$4 sm:$0xff]   ;;  %v7924_v1 = vld [vmem:[#allocation7 + $0x980] ss:$16 sps:$4 sm:$0xff]  }
 0x27d   :  { %2058 = vmatpush1.bf16.msra.mxu0 %v7840_v3  ;;  %2140 = vmatpush1.bf16.msra.mxu1 %v7843_v4  ;;  %v7927_v3 = vld [vmem:[#allocation7 + $0x988] ss:$16 sps:$4 sm:$0xff]   ;;  %v7929_v4 = vld [vmem:[#allocation7 + $0x98c] ss:$16 sps:$4 sm:$0xff]  }
 0x27e   :  { %2059 = vmatprep.subr.bf16.mxu0 %v7848_v5  ;;  %2141 = vmatprep.subr.bf16.mxu1 %v7851_v6  ;;  %v7932_v5 = vld [vmem:[#allocation7 + $0x9a4] ss:$16 sps:$4 sm:$0xff]   ;;  %v7935_v6 = vld [vmem:[#allocation7 + $0x9ac] ss:$16 sps:$4 sm:$0xff]  }
 0x281   :  { %2060 = vmatpush1.bf16.msra.mxu0 %v7846_v13  ;;  %2142 = vmatpush1.bf16.msra.mxu1 %v7849_v14  ;;  %v7938_v13 = vld [vmem:[#allocation7 + $0x9c4] ss:$16 sps:$4 sm:$0xff]   ;;  %v7941_v14 = vld [vmem:[#allocation7 + $0x9cc] ss:$16 sps:$4 sm:$0xff]  }
 0x282   :  { %2984 = vmatprep.subr.bf16.mxu0 %v7854_v16  ;;  %3066 = vmatprep.subr.bf16.mxu1 %v7857_v17  ;;  %v7939_v16 = vld [vmem:[#allocation7 + $0x9c8] ss:$16 sps:$4 sm:$0xff]   ;;  %v7944_v17 = vld [vmem:[#allocation7 + $0x9e4] ss:$16 sps:$4 sm:$0xff]  }
 0x284   :  { %2062 = vmatmul.mubr.bf16.vlgmr.msra.gmra.mrb[4].mxu0 %v1194_v20  ;;  %2144 = vmatmul.mubr.bf16.vlgmr.msra.gmra.mrb[4].mxu1 %v1194_v20  ;;  %v7945_v20 = vld [vmem:[#allocation7 + $0x9e8] ss:$16 sps:$4 sm:$0xff]  }
 0x285   :  { %2985 = vmatpush1.bf16.msra.mxu0 %v7852_v19  ;;  %3067 = vmatpush1.bf16.msra.mxu1 %v7855_v27  ;;  %v7947_v19 = vld [vmem:[#allocation7 + $0x9ec] ss:$16 sps:$4 sm:$0xff]   ;;  %v7942_v27 = vld [vmem:[#allocation7 + $0x9e0] ss:$16 sps:$4 sm:$0xff]  }
 0x286   :  { %2986 = vmatprep.subr.bf16.mxu0 %v7860_v21  ;;  %3068 = vmatprep.subr.bf16.mxu1 %v7863_v23  ;;  %v7950_v21 = vld [vmem:[#allocation7 + $0xa04] ss:$16 sps:$4 sm:$0xff]   ;;  %v7953_v23 = vld [vmem:[#allocation7 + $0xa0c] ss:$16 sps:$4 sm:$0xff]  }
 0x289   :  { %2987 = vmatpush1.bf16.msra.mxu0 %v7858_v24  ;;  %3069 = vmatpush1.bf16.msra.mxu1 %v7861_v25  ;;  %v9062_v24 = vld [vmem:[#allocation8 + $0x4] sm:$0xf] }
 0x28a   :  { %2988 = vmatprep.subr.bf16.mxu0 %v7866_v26  ;;  %3070 = vmatprep.subr.bf16.mxu1 %v7869_v28  ;;  %v1331_v25 = vrot.slane %v9062_v24, %v9019_v7  ;;  %v1335_v26 = vrot.slane %v9062_v24, %v9021_v8  ;;  %v1343_v28 = vrot.slane %v9062_v24, %v9025_v10 }
 0x28d   :  { %2989 = vmatpush1.bf16.msra.mxu0 %v7864_v29  ;;  %3071 = vmatpush1.bf16.msra.mxu1 %v7867_v30 }
 0x28e   :  { %2990 = vmatprep.subr.bf16.mxu0 %v7872_v18  ;;  %3072 = vmatprep.subr.bf16.mxu1 %v7875_v31 }
 0x291   :  { %2991 = vmatpush1.bf16.msra.mxu0 %v7870_v32  ;;  %3073 = vmatpush1.bf16.msra.mxu1 %v7873_v33 }
 0x292   :  { %2992 = vmatprep.subr.bf16.mxu0 %v7878_v22  ;;  %3074 = vmatprep.subr.bf16.mxu1 %v7881_v34 }
 0x295   :  { %2993 = vmatpush1.bf16.msra.mxu0 %v7876_v35  ;;  %3075 = vmatpush1.bf16.msra.mxu1 %v7879_v36 }
 0x296   :  { %2994 = vmatprep.subr.bf16.mxu0 %v7884_v37  ;;  %3076 = vmatprep.subr.bf16.mxu1 %v7887_v38 }
 0x299   :  { %2995 = vmatpush1.bf16.msra.mxu0 %v7882_v39  ;;  %3077 = vmatpush1.bf16.msra.mxu1 %v7885_v40 }
 0x29a   :  { %2996 = vmatprep.subr.bf16.mxu0 %v7890_v41  ;;  %3078 = vmatprep.subr.bf16.mxu1 %v7893_v42 }
 0x29d   :  { %2997 = vmatpush1.bf16.msra.mxu0 %v7888_v43  ;;  %3079 = vmatpush1.bf16.msra.mxu1 %v7891_v44 }
 0x29e   :  { %2998 = vmatprep.subr.bf16.mxu0 %v7896_v45  ;;  %3080 = vmatprep.subr.bf16.mxu1 %v7899_v46 }
 0x2a1   :  { %2999 = vmatpush1.bf16.msra.mxu0 %v7894_v47  ;;  %3081 = vmatpush1.bf16.msra.mxu1 %v7897_v48 }
 0x2a2   :  { %3000 = vmatprep.subr.bf16.mxu0 %v7902_v49  ;;  %3082 = vmatprep.subr.bf16.mxu1 %v7905_v50 }
 0x2a5   :  { %3001 = vmatpush1.bf16.msra.mxu0 %v7900_v51  ;;  %3083 = vmatpush1.bf16.msra.mxu1 %v7903_v52 }
 0x2a6   :  { %3002 = vmatprep.subr.bf16.mxu0 %v7908_v53  ;;  %3084 = vmatprep.subr.bf16.mxu1 %v7911_v54 }
 0x2a9   :  { %3003 = vmatpush1.bf16.msra.mxu0 %v7906_v55  ;;  %3085 = vmatpush1.bf16.msra.mxu1 %v7909_v56 }
 0x2aa   :  { %3004 = vmatprep.subr.bf16.mxu0 %v7914_v57  ;;  %3086 = vmatprep.subr.bf16.mxu1 %v7917_v58 }
 0x2ad   :  { %3005 = vmatpush1.bf16.msra.mxu0 %v7912_v59  ;;  %3087 = vmatpush1.bf16.msra.mxu1 %v7915_v60 }
 0x2ae   :  { %3006 = vmatprep.subr.bf16.mxu0 %v7920_v61  ;;  %3088 = vmatprep.subr.bf16.mxu1 %v7923_v62 }
 0x2b1   :  { %3007 = vmatpush1.bf16.msra.mxu0 %v7918_v63  ;;  %3089 = vmatpush1.bf16.msra.mxu1 %v7921_v0 }
 0x2b2   :  { %3008 = vmatprep.subr.bf16.mxu0 %v7926_v2  ;;  %3090 = vmatprep.subr.bf16.mxu1 %v7929_v4  ;;  %v7948_v2 = vld [vmem:[#allocation7 + $0xa00] ss:$16 sps:$4 sm:$0xff]  }
 0x2b5   :  { %3009 = vmatpush1.bf16.msra.mxu0 %v7924_v1  ;;  %3091 = vmatpush1.bf16.msra.mxu1 %v7927_v3  ;;  %v7951_v3 = vld [vmem:[#allocation7 + $0xa08] ss:$16 sps:$4 sm:$0xff]  }
 0x2b6   :  { %3010 = vmatprep.subr.bf16.mxu0 %v7932_v5  ;;  %3092 = vmatprep.subr.bf16.mxu1 %v7935_v6  ;;  %v7956_v5 = vld [vmem:[#allocation7 + $0xa24] ss:$16 sps:$4 sm:$0xff]   ;;  %v7959_v6 = vld [vmem:[#allocation7 + $0xa2c] ss:$16 sps:$4 sm:$0xff]  }
 0x2b9   :  { %3011 = vmatpush1.bf16.msra.mxu0 %v7930_v11  ;;  %3093 = vmatpush1.bf16.msra.mxu1 %v7933_v12  ;;  %v7954_v12 = vld [vmem:[#allocation7 + $0xa20] ss:$16 sps:$4 sm:$0xff]  }
 0x2ba   :  { %3012 = vmatprep.subr.bf16.mxu0 %v7938_v13  ;;  %3094 = vmatprep.subr.bf16.mxu1 %v7941_v14  ;;  %v7957_v13 = vld [vmem:[#allocation7 + $0xa28] ss:$16 sps:$4 sm:$0xff]   ;;  %v7962_v14 = vld [vmem:[#allocation7 + $0xa44] ss:$16 sps:$4 sm:$0xff]  }
 0x2bd   :  { %3013 = vmatpush1.bf16.msra.mxu0 %v7936_v15  ;;  %3095 = vmatpush1.bf16.msra.mxu1 %v7939_v16  ;;  %v7965_v15 = vld [vmem:[#allocation7 + $0xa4c] ss:$16 sps:$4 sm:$0xff]   ;;  %v7960_v16 = vld [vmem:[#allocation7 + $0xa40] ss:$16 sps:$4 sm:$0xff]  }
 0x2be   :  { %3014 = vmatprep.subr.bf16.mxu0 %v7944_v17  ;;  %3096 = vmatprep.subr.bf16.mxu1 %v7947_v19  ;;  %v7963_v17 = vld [vmem:[#allocation7 + $0xa48] ss:$16 sps:$4 sm:$0xff]   ;;  %v7968_v19 = vld [vmem:[#allocation7 + $0xa64] ss:$16 sps:$4 sm:$0xff]  }
 0x2c1   :  { %3015 = vmatpush1.bf16.msra.mxu0 %v7942_v27  ;;  %3097 = vmatpush1.bf16.msra.mxu1 %v7945_v20  ;;  %v7971_v27 = vld [vmem:[#allocation7 + $0xa6c] ss:$16 sps:$4 sm:$0xff]   ;;  %v7966_v20 = vld [vmem:[#allocation7 + $0xa60] ss:$16 sps:$4 sm:$0xff]  }
 0x2c2   :  { %3025 = vmatprep.subr.bf16.mxu0 %v7950_v21  ;;  %3107 = vmatprep.subr.bf16.mxu1 %v7953_v23  ;;  %v7969_v21 = vld [vmem:[#allocation7 + $0xa68] ss:$16 sps:$4 sm:$0xff]   ;;  %v7974_v23 = vld [vmem:[#allocation7 + $0xa84] ss:$16 sps:$4 sm:$0xff]  }
 0x357   :  { %v2063_v29 = vpop.f32.mrb[4].mxu0  ;;  %v9070_v30 = vpop.f32.mrb[4].mxu1 }
 0x358   :  { %v7387_v18 = vadd.f32 %v2063_v29, %v1331_v25  ;;  %v2065_v31 = vpop.f32.mrb[5].mxu0  ;;  %v2147_v32 = vpop.f32.mrb[5].mxu1  ;;  %v7977_v25 = vld [vmem:[#allocation7 + $0xa8c] ss:$16 sps:$4 sm:$0xff]   ;;  %v7975_v29 = vld [vmem:[#allocation7 + $0xa88] ss:$16 sps:$4 sm:$0xff]  }
 0x359   :  { %v7388_v33 = vadd.f32 %v2065_v31, %v1335_v26  ;;  %v7390_v22 = vadd.f32 %v2147_v32, %v1343_v28  ;;  %v2067_v34 = vpop.f32.mrb[6].mxu0  ;;  %v2149_v35 = vpop.f32.mrb[6].mxu1  ;;  %v1339_v26 = vrot.slane %v9062_v24, %v9023_v9  ;;  %v7972_v28 = vld [vmem:[#allocation7 + $0xa80] ss:$16 sps:$4 sm:$0xff]   ;;  %v7983_v31 = vld [vmem:[#allocation7 + $0xaac] ss:$16 sps:$4 sm:$0xff]  }
 0x35a   :  { %v2156_v36 = vmul.f32 %v7387_v18, %v7387_v18  ;;  %v2068_v37 = vpop.f32.mrb[7].mxu0  ;;  %v2150_v38 = vpop.f32.mrb[7].mxu1  ;;  %v2152_v56 = vmul.f32 0.5, %v7387_v18  ;;  %v7986_v34 = vld [vmem:[#allocation7 + $0xac4] ss:$16 sps:$4 sm:$0xff]  }
 0x35b   :  { %v2157_v39 = vmul.f32 %v7388_v33, %v7388_v33  ;;  %v2159_v40 = vmul.f32 %v7390_v22, %v7390_v22  ;;  %v2153_v58 = vmul.f32 0.5, %v7388_v33  ;;  %v2155_v61 = vmul.f32 0.5, %v7390_v22  ;;  %v7989_v35 = vld [vmem:[#allocation7 + $0xacc] ss:$16 sps:$4 sm:$0xff]   ;;  %v7987_v37 = vld [vmem:[#allocation7 + $0xac8] ss:$16 sps:$4 sm:$0xff]  }
 0x35c   :  { %v2160_v41 = vmul.f32 %v7387_v18, %v2156_v36  ;;  %v9075_v32 = vadd.f32 %v9070_v30, %v1339_v26  ;;  %v7984_v36 = vld [vmem:[#allocation7 + $0xac0] ss:$16 sps:$4 sm:$0xff]   ;;  %v7992_v38 = vld [vmem:[#allocation7 + $0xae4] ss:$16 sps:$4 sm:$0xff]   ;;  %v7995_v30 = vld [vmem:[#allocation7 + $0xaec] ss:$16 sps:$4 sm:$0xff]  }
 0x35d   :  { %v2161_v42 = vmul.f32 %v7388_v33, %v2157_v39  ;;  %v2163_v43 = vmul.f32 %v7390_v22, %v2159_v40  ;;  %v7990_v40 = vld [vmem:[#allocation7 + $0xae0] ss:$16 sps:$4 sm:$0xff]   ;;  %v8047_v26 = vld [vmem:[#allocation7 + $0xc08] ss:$16 sps:$4 sm:$0xff]  }
 0x35e   :  { %v2164_v44 = vmul.f32 0.044715, %v2160_v41  ;;  %v2158_v24 = vmul.f32 %v9075_v32, %v9075_v32  ;;  %v7993_v41 = vld [vmem:[#allocation7 + $0xae8] ss:$16 sps:$4 sm:$0xff]  }
 0x35f   :  { %v2165_v45 = vmul.f32 0.044715, %v2161_v42  ;;  %v2167_v46 = vmul.f32 0.044715, %v2163_v43  ;;  %v7998_v42 = vld [vmem:[#allocation7 + $0xb04] ss:$16 sps:$4 sm:$0xff]  }
 0x360   :  { %v2168_v47 = vadd.f32 %v7387_v18, %v2164_v44  ;;  %v7980_v18 = vld [vmem:[#allocation7 + $0xaa4] ss:$16 sps:$4 sm:$0xff]   ;;  %v2162_v39 = vmul.f32 %v9075_v32, %v2158_v24  ;;  %v8001_v43 = vld [vmem:[#allocation7 + $0xb0c] ss:$16 sps:$4 sm:$0xff]  }
 0x361   :  { %v2169_v48 = vadd.f32 %v7388_v33, %v2165_v45  ;;  %v2171_v49 = vadd.f32 %v7390_v22, %v2167_v46  ;;  %v7978_v33 = vld [vmem:[#allocation7 + $0xaa0] ss:$16 sps:$4 sm:$0xff]   ;;  %v7981_v22 = vld [vmem:[#allocation7 + $0xaa8] ss:$16 sps:$4 sm:$0xff]   ;;  %v8064_v24 = vld [vmem:[#allocation7 + $0xc64] ss:$16 sps:$4 sm:$0xff]  }
 0x362   :  { %v2172_v50 = vmul.f32 0.7978846, %v2168_v47  ;;  %v2166_v44 = vmul.f32 0.044715, %v2162_v39  ;;  %v7996_v45 = vld [vmem:[#allocation7 + $0xb00] ss:$16 sps:$4 sm:$0xff]  }
 0x363   :  { %v2173_v51 = vmul.f32 0.7978846, %v2169_v48  ;;  %v2175_v52 = vmul.f32 0.7978846, %v2171_v49  ;;  %v7999_v46 = vld [vmem:[#allocation7 + $0xb08] ss:$16 sps:$4 sm:$0xff]  }
 0x364   :  { %8668 = vtanh.f32 %v2172_v50  ;;  %v8004_v47 = vld [vmem:[#allocation7 + $0xb24] ss:$16 sps:$4 sm:$0xff]   ;;  %v8007_v48 = vld [vmem:[#allocation7 + $0xb2c] ss:$16 sps:$4 sm:$0xff]   ;;  %v2170_v49 = vadd.f32 %v9075_v32, %v2166_v44  ;;  %v8002_v50 = vld [vmem:[#allocation7 + $0xb20] ss:$16 sps:$4 sm:$0xff]  }
 0x365   :  { %8670 = vtanh.f32 %v2173_v51  ;;  %v8005_v51 = vld [vmem:[#allocation7 + $0xb28] ss:$16 sps:$4 sm:$0xff]   ;;  %v8073_v39 = vld [vmem:[#allocation7 + $0xc8c] ss:$16 sps:$4 sm:$0xff]   ;;  %v8074_v44 = vld [vmem:[#allocation7 + $0xca0] ss:$16 sps:$4 sm:$0xff]  }
 0x366   :  { %8672 = vtanh.f32 %v2175_v52  ;;  %v8010_v52 = vld [vmem:[#allocation7 + $0xb44] ss:$16 sps:$4 sm:$0xff]  }
 0x36e   :  { %v8669_v53 = vpop.eup %8668 }
 0x36f   :  { %v2180_v54 = vadd.f32 1.0, %v8669_v53  ;;  %v8671_v55 = vpop.eup %8670  ;;  %v8013_v53 = vld [vmem:[#allocation7 + $0xb4c] ss:$16 sps:$4 sm:$0xff]  }
 0x370   :  { %v8673_v57 = vpop.eup %8672  ;;  %v2181_v59 = vadd.f32 1.0, %v8671_v55  ;;  %v8008_v55 = vld [vmem:[#allocation7 + $0xb40] ss:$16 sps:$4 sm:$0xff]  }
 0x371   :  { %v2184_v60 = vmul.f32 %v2180_v54, %v2152_v56  ;;  %v2183_v62 = vadd.f32 1.0, %v8673_v57  ;;  %v2174_v54 = vmul.f32 0.7978846, %v2170_v49  ;;  %v8011_v56 = vld [vmem:[#allocation7 + $0xb48] ss:$16 sps:$4 sm:$0xff]  }
 0x372   :  { %v2185_v63 = vmul.f32 %v2181_v59, %v2153_v58  ;;  %v8016_v57 = vld [vmem:[#allocation7 + $0xb64] ss:$16 sps:$4 sm:$0xff]   ;;  %v8019_v58 = vld [vmem:[#allocation7 + $0xb6c] ss:$16 sps:$4 sm:$0xff]   ;;  %v8014_v59 = vld [vmem:[#allocation7 + $0xb60] ss:$16 sps:$4 sm:$0xff]  }
 0x373   :  { %v2187_v0 = vmul.f32 %v2183_v62, %v2155_v61  ;;  %v2188_v4 = vpack.c.bf16 %v2184_v60, %v2184_v60  ;;  %8674 = vtanh.f32 %v2174_v54  ;;  %v8017_v60 = vld [vmem:[#allocation7 + $0xb68] ss:$16 sps:$4 sm:$0xff]   ;;  %v8022_v61 = vld [vmem:[#allocation7 + $0xb84] ss:$16 sps:$4 sm:$0xff]   ;;  %v8025_v62 = vld [vmem:[#allocation7 + $0xb8c] ss:$16 sps:$4 sm:$0xff]  }
 0x374   :  { %v2189_v1 = vpack.c.bf16 %v2185_v63, %v2185_v63  ;;  %v8020_v63 = vld [vmem:[#allocation7 + $0xb80] ss:$16 sps:$4 sm:$0xff]   ;;  %v8083_v49 = vld [vmem:[#allocation7 + $0xcc8] ss:$16 sps:$4 sm:$0xff]   ;;  %v8094_v54 = vld [vmem:[#allocation7 + $0xd04] ss:$16 sps:$4 sm:$0xff]  }
 0x375   :  { %v2191_v11 = vpack.c.bf16 %v2187_v0, %v2187_v0  ;;  %v8023_v0 = vld [vmem:[#allocation7 + $0xb88] ss:$16 sps:$4 sm:$0xff]  }
 0x376   :  { %3016 = vmatprep.mubr.bf16.mxu0 %v2189_v1  ;;  %3098 = vmatprep.mubr.bf16.mxu1 %v2189_v1  ;;  %v8028_v1 = vld [vmem:[#allocation7 + $0xba4] ss:$16 sps:$4 sm:$0xff]  }
 0x377   :  { %3017 = vmatmul.mubr.bf16.vlgmr.msra.gmra.mrb[8].mxu0 %v2188_v4  ;;  %3099 = vmatmul.mubr.bf16.vlgmr.msra.gmra.mrb[8].mxu1 %v2188_v4  ;;  %v8029_v4 = vld [vmem:[#allocation7 + $0xba8] ss:$16 sps:$4 sm:$0xff]  }
 0x378   :  { %3026 = vmatpush1.bf16.msra.mxu0 %v7948_v2  ;;  %3108 = vmatpush1.bf16.msra.mxu1 %v7951_v3  ;;  %v8031_v2 = vld [vmem:[#allocation7 + $0xbac] ss:$16 sps:$4 sm:$0xff]   ;;  %v8026_v3 = vld [vmem:[#allocation7 + $0xba0] ss:$16 sps:$4 sm:$0xff]  }
 0x379   :  { %3057 = vmatprep.mubr.bf16.mxu0 %v2191_v11  ;;  %3139 = vmatprep.mubr.bf16.mxu1 %v2191_v11 }
 0x37a   :  { %3027 = vmatprep.subr.bf16.mxu0 %v7956_v5  ;;  %3109 = vmatprep.subr.bf16.mxu1 %v7959_v6  ;;  %v8034_v5 = vld [vmem:[#allocation7 + $0xbc4] ss:$16 sps:$4 sm:$0xff]   ;;  %v8037_v6 = vld [vmem:[#allocation7 + $0xbcc] ss:$16 sps:$4 sm:$0xff]  }
 0x37c   :  { %3028 = vmatpush1.bf16.msra.mxu0 %v7954_v12  ;;  %3110 = vmatpush1.bf16.msra.mxu1 %v7957_v13  ;;  %v8032_v12 = vld [vmem:[#allocation7 + $0xbc0] ss:$16 sps:$4 sm:$0xff]   ;;  %v8035_v13 = vld [vmem:[#allocation7 + $0xbc8] ss:$16 sps:$4 sm:$0xff]  }
 0x37d   :  { %3029 = vmatprep.subr.bf16.mxu0 %v7962_v14  ;;  %3111 = vmatprep.subr.bf16.mxu1 %v7965_v15  ;;  %v8675_v11 = vpop.eup %8674  ;;  %v8040_v14 = vld [vmem:[#allocation7 + $0xbe4] ss:$16 sps:$4 sm:$0xff]   ;;  %v8043_v15 = vld [vmem:[#allocation7 + $0xbec] ss:$16 sps:$4 sm:$0xff]  }
 0x380   :  { %3030 = vmatpush1.bf16.msra.mxu0 %v7960_v16  ;;  %3112 = vmatpush1.bf16.msra.mxu1 %v7963_v17  ;;  %v2182_v16 = vadd.f32 1.0, %v8675_v11  ;;  %v2154_v17 = vmul.f32 0.5, %v9075_v32  ;;  %v8053_v32 = vld [vmem:[#allocation7 + $0xc28] ss:$16 sps:$4 sm:$0xff]   ;;  %v8118_v11 = vld [vmem:[#allocation7 + $0xd84] ss:$16 sps:$4 sm:$0xff]  }
 0x381   :  { %3031 = vmatprep.subr.bf16.mxu0 %v7968_v19  ;;  %3113 = vmatprep.subr.bf16.mxu1 %v7971_v27  ;;  %v8038_v19 = vld [vmem:[#allocation7 + $0xbe0] ss:$16 sps:$4 sm:$0xff]   ;;  %v8041_v27 = vld [vmem:[#allocation7 + $0xbe8] ss:$16 sps:$4 sm:$0xff]  }
 0x384   :  { %3032 = vmatpush1.bf16.msra.mxu0 %v7966_v20  ;;  %3114 = vmatpush1.bf16.msra.mxu1 %v7969_v21  ;;  %v2186_v20 = vmul.f32 %v2182_v16, %v2154_v17  ;;  %v8046_v21 = vld [vmem:[#allocation7 + $0xc04] ss:$16 sps:$4 sm:$0xff]   ;;  %v8122_v16 = vld [vmem:[#allocation7 + $0xda0] ss:$16 sps:$4 sm:$0xff]   ;;  %v8125_v17 = vld [vmem:[#allocation7 + $0xda8] ss:$16 sps:$4 sm:$0xff]  }
 0x385   :  { %3033 = vmatprep.subr.bf16.mxu0 %v7974_v23  ;;  %3115 = vmatprep.subr.bf16.mxu1 %v7977_v25  ;;  %v8049_v23 = vld [vmem:[#allocation7 + $0xc0c] ss:$16 sps:$4 sm:$0xff]   ;;  %v8044_v25 = vld [vmem:[#allocation7 + $0xc00] ss:$16 sps:$4 sm:$0xff]  }
 0x388   :  { %3034 = vmatpush1.bf16.msra.mxu0 %v7972_v28  ;;  %3116 = vmatpush1.bf16.msra.mxu1 %v7975_v29  ;;  %v2190_v28 = vpack.c.bf16 %v2186_v20, %v2186_v20  ;;  %v8052_v29 = vld [vmem:[#allocation7 + $0xc24] ss:$16 sps:$4 sm:$0xff]   ;;  %v8128_v20 = vld [vmem:[#allocation7 + $0xdc0] ss:$16 sps:$4 sm:$0xff]  }
 0x389   :  { %3035 = vmatprep.subr.bf16.mxu0 %v7980_v18  ;;  %3117 = vmatprep.subr.bf16.mxu1 %v7983_v31  ;;  %v8055_v18 = vld [vmem:[#allocation7 + $0xc2c] ss:$16 sps:$4 sm:$0xff]   ;;  %v8050_v31 = vld [vmem:[#allocation7 + $0xc20] ss:$16 sps:$4 sm:$0xff]  }
 0x38c   :  { %3036 = vmatpush1.bf16.msra.mxu0 %v7978_v33  ;;  %3118 = vmatpush1.bf16.msra.mxu1 %v7981_v22  ;;  %v8058_v33 = vld [vmem:[#allocation7 + $0xc44] ss:$16 sps:$4 sm:$0xff]   ;;  %v8061_v22 = vld [vmem:[#allocation7 + $0xc4c] ss:$16 sps:$4 sm:$0xff]  }
 0x38d   :  { %3037 = vmatprep.subr.bf16.mxu0 %v7986_v34  ;;  %3119 = vmatprep.subr.bf16.mxu1 %v7989_v35  ;;  %v8056_v34 = vld [vmem:[#allocation7 + $0xc40] ss:$16 sps:$4 sm:$0xff]   ;;  %v8059_v35 = vld [vmem:[#allocation7 + $0xc48] ss:$16 sps:$4 sm:$0xff]  }
 0x390   :  { %3038 = vmatpush1.bf16.msra.mxu0 %v7984_v36  ;;  %3120 = vmatpush1.bf16.msra.mxu1 %v7987_v37  ;;  %v8067_v36 = vld [vmem:[#allocation7 + $0xc6c] ss:$16 sps:$4 sm:$0xff]   ;;  %v8062_v37 = vld [vmem:[#allocation7 + $0xc60] ss:$16 sps:$4 sm:$0xff]  }
 0x391   :  { %3039 = vmatprep.subr.bf16.mxu0 %v7992_v38  ;;  %3121 = vmatprep.subr.bf16.mxu1 %v7995_v30  ;;  %v8065_v38 = vld [vmem:[#allocation7 + $0xc68] ss:$16 sps:$4 sm:$0xff]   ;;  %v8070_v30 = vld [vmem:[#allocation7 + $0xc84] ss:$16 sps:$4 sm:$0xff]  }
 0x394   :  { %3040 = vmatpush1.bf16.msra.mxu0 %v7990_v40  ;;  %3122 = vmatpush1.bf16.msra.mxu1 %v7993_v41  ;;  %v8068_v40 = vld [vmem:[#allocation7 + $0xc80] ss:$16 sps:$4 sm:$0xff]   ;;  %v8071_v41 = vld [vmem:[#allocation7 + $0xc88] ss:$16 sps:$4 sm:$0xff]  }
 0x395   :  { %3041 = vmatprep.subr.bf16.mxu0 %v7998_v42  ;;  %3123 = vmatprep.subr.bf16.mxu1 %v8001_v43  ;;  %v8076_v42 = vld [vmem:[#allocation7 + $0xca4] ss:$16 sps:$4 sm:$0xff]   ;;  %v8079_v43 = vld [vmem:[#allocation7 + $0xcac] ss:$16 sps:$4 sm:$0xff]  }
 0x398   :  { %3042 = vmatpush1.bf16.msra.mxu0 %v7996_v45  ;;  %3124 = vmatpush1.bf16.msra.mxu1 %v7999_v46  ;;  %v8077_v45 = vld [vmem:[#allocation7 + $0xca8] ss:$16 sps:$4 sm:$0xff]   ;;  %v8082_v46 = vld [vmem:[#allocation7 + $0xcc4] ss:$16 sps:$4 sm:$0xff]  }
 0x399   :  { %3043 = vmatprep.subr.bf16.mxu0 %v8004_v47  ;;  %3125 = vmatprep.subr.bf16.mxu1 %v8007_v48  ;;  %v8085_v47 = vld [vmem:[#allocation7 + $0xccc] ss:$16 sps:$4 sm:$0xff]   ;;  %v8080_v48 = vld [vmem:[#allocation7 + $0xcc0] ss:$16 sps:$4 sm:$0xff]  }
 0x39c   :  { %3044 = vmatpush1.bf16.msra.mxu0 %v8002_v50  ;;  %3126 = vmatpush1.bf16.msra.mxu1 %v8005_v51  ;;  %v8088_v50 = vld [vmem:[#allocation7 + $0xce4] ss:$16 sps:$4 sm:$0xff]   ;;  %v8091_v51 = vld [vmem:[#allocation7 + $0xcec] ss:$16 sps:$4 sm:$0xff]  }
 0x39d   :  { %3045 = vmatprep.subr.bf16.mxu0 %v8010_v52  ;;  %3127 = vmatprep.subr.bf16.mxu1 %v8013_v53  ;;  %v8086_v52 = vld [vmem:[#allocation7 + $0xce0] ss:$16 sps:$4 sm:$0xff]   ;;  %v8089_v53 = vld [vmem:[#allocation7 + $0xce8] ss:$16 sps:$4 sm:$0xff]  }
 0x3a0   :  { %3046 = vmatpush1.bf16.msra.mxu0 %v8008_v55  ;;  %3128 = vmatpush1.bf16.msra.mxu1 %v8011_v56  ;;  %v8097_v55 = vld [vmem:[#allocation7 + $0xd0c] ss:$16 sps:$4 sm:$0xff]   ;;  %v8092_v56 = vld [vmem:[#allocation7 + $0xd00] ss:$16 sps:$4 sm:$0xff]  }
 0x3a1   :  { %3047 = vmatprep.subr.bf16.mxu0 %v8016_v57  ;;  %3129 = vmatprep.subr.bf16.mxu1 %v8019_v58  ;;  %v8095_v57 = vld [vmem:[#allocation7 + $0xd08] ss:$16 sps:$4 sm:$0xff]   ;;  %v8100_v58 = vld [vmem:[#allocation7 + $0xd24] ss:$16 sps:$4 sm:$0xff]  }
 0x3a4   :  { %3048 = vmatpush1.bf16.msra.mxu0 %v8014_v59  ;;  %3130 = vmatpush1.bf16.msra.mxu1 %v8017_v60  ;;  %v8103_v59 = vld [vmem:[#allocation7 + $0xd2c] ss:$16 sps:$4 sm:$0xff]   ;;  %v8098_v60 = vld [vmem:[#allocation7 + $0xd20] ss:$16 sps:$4 sm:$0xff]  }
 0x3a5   :  { %3049 = vmatprep.subr.bf16.mxu0 %v8022_v61  ;;  %3131 = vmatprep.subr.bf16.mxu1 %v8025_v62  ;;  %v8101_v61 = vld [vmem:[#allocation7 + $0xd28] ss:$16 sps:$4 sm:$0xff]   ;;  %v8106_v62 = vld [vmem:[#allocation7 + $0xd44] ss:$16 sps:$4 sm:$0xff]  }
 0x3a8   :  { %3050 = vmatpush1.bf16.msra.mxu0 %v8020_v63  ;;  %3132 = vmatpush1.bf16.msra.mxu1 %v8023_v0  ;;  %v8109_v63 = vld [vmem:[#allocation7 + $0xd4c] ss:$16 sps:$4 sm:$0xff]   ;;  %v8104_v0 = vld [vmem:[#allocation7 + $0xd40] ss:$16 sps:$4 sm:$0xff]  }
 0x3a9   :  { %3051 = vmatprep.subr.bf16.mxu0 %v8028_v1  ;;  %3133 = vmatprep.subr.bf16.mxu1 %v8031_v2  ;;  %v8107_v1 = vld [vmem:[#allocation7 + $0xd48] ss:$16 sps:$4 sm:$0xff]   ;;  %v8112_v2 = vld [vmem:[#allocation7 + $0xd64] ss:$16 sps:$4 sm:$0xff]  }
 0x3ac   :  { %3052 = vmatpush1.bf16.msra.mxu0 %v8026_v3  ;;  %3134 = vmatpush1.bf16.msra.mxu1 %v8029_v4  ;;  %v8115_v3 = vld [vmem:[#allocation7 + $0xd6c] ss:$16 sps:$4 sm:$0xff]   ;;  %v8110_v4 = vld [vmem:[#allocation7 + $0xd60] ss:$16 sps:$4 sm:$0xff]  }
 0x3ad   :  { %3053 = vmatprep.subr.bf16.mxu0 %v8034_v5  ;;  %3135 = vmatprep.subr.bf16.mxu1 %v8037_v6  ;;  %v8113_v5 = vld [vmem:[#allocation7 + $0xd68] ss:$16 sps:$4 sm:$0xff]   ;;  %v8116_v6 = vld [vmem:[#allocation7 + $0xd80] ss:$16 sps:$4 sm:$0xff]  }
 0x3b0   :  { %3054 = vmatpush1.bf16.msra.mxu0 %v8032_v12  ;;  %3136 = vmatpush1.bf16.msra.mxu1 %v8035_v13  ;;  %v8119_v12 = vld [vmem:[#allocation7 + $0xd88] ss:$16 sps:$4 sm:$0xff]   ;;  %v8121_v13 = vld [vmem:[#allocation7 + $0xd8c] ss:$16 sps:$4 sm:$0xff]  }
 0x3b1   :  { %3055 = vmatprep.subr.bf16.mxu0 %v8040_v14  ;;  %3137 = vmatprep.subr.bf16.mxu1 %v8043_v15  ;;  %v8124_v14 = vld [vmem:[#allocation7 + $0xda4] ss:$16 sps:$4 sm:$0xff]   ;;  %v8127_v15 = vld [vmem:[#allocation7 + $0xdac] ss:$16 sps:$4 sm:$0xff]  }
 0x3b4   :  { %3056 = vmatpush1.bf16.msra.mxu0 %v8038_v19  ;;  %3138 = vmatpush1.bf16.msra.mxu1 %v8041_v27  ;;  %v8130_v19 = vld [vmem:[#allocation7 + $0xdc4] ss:$16 sps:$4 sm:$0xff]   ;;  %v8133_v27 = vld [vmem:[#allocation7 + $0xdcc] ss:$16 sps:$4 sm:$0xff]  }
 0x3b5   :  { %3980 = vmatprep.subr.bf16.mxu0 %v8046_v21  ;;  %4062 = vmatprep.subr.bf16.mxu1 %v8049_v23  ;;  %v8131_v21 = vld [vmem:[#allocation7 + $0xdc8] ss:$16 sps:$4 sm:$0xff]   ;;  %v8136_v23 = vld [vmem:[#allocation7 + $0xde4] ss:$16 sps:$4 sm:$0xff]  }
 0x3b7   :  { %3058 = vmatmul.mubr.bf16.vlgmr.msra.gmra.mrb[8].mxu0 %v2190_v28  ;;  %3140 = vmatmul.mubr.bf16.vlgmr.msra.gmra.mrb[8].mxu1 %v2190_v28  ;;  %v8137_v28 = vld [vmem:[#allocation7 + $0xde8] ss:$16 sps:$4 sm:$0xff]  }
 0x3b8   :  { %3981 = vmatpush1.bf16.msra.mxu0 %v8044_v25  ;;  %4063 = vmatpush1.bf16.msra.mxu1 %v8047_v26  ;;  %v8139_v25 = vld [vmem:[#allocation7 + $0xdec] ss:$16 sps:$4 sm:$0xff]   ;;  %v8134_v26 = vld [vmem:[#allocation7 + $0xde0] ss:$16 sps:$4 sm:$0xff]  }
 0x3b9   :  { %3982 = vmatprep.subr.bf16.mxu0 %v8052_v29  ;;  %4064 = vmatprep.subr.bf16.mxu1 %v8055_v18  ;;  %v8142_v29 = vld [vmem:[#allocation7 + $0xe04] ss:$16 sps:$4 sm:$0xff]   ;;  %v8145_v18 = vld [vmem:[#allocation7 + $0xe0c] ss:$16 sps:$4 sm:$0xff]  }
 0x3bc   :  { %3983 = vmatpush1.bf16.msra.mxu0 %v8050_v31  ;;  %4065 = vmatpush1.bf16.msra.mxu1 %v8053_v32  ;;  %v9082_v31 = vld [vmem:[#allocation8 + $0x8] sm:$0xf] }
 0x3bd   :  { %3984 = vmatprep.subr.bf16.mxu0 %v8058_v33  ;;  %4066 = vmatprep.subr.bf16.mxu1 %v8061_v22  ;;  %v2327_v32 = vrot.slane %v9082_v31, %v9019_v7  ;;  %v2331_v33 = vrot.slane %v9082_v31, %v9021_v8  ;;  %v2339_v22 = vrot.slane %v9082_v31, %v9025_v10 }
 0x3c0   :  { %3985 = vmatpush1.bf16.msra.mxu0 %v8056_v34  ;;  %4067 = vmatpush1.bf16.msra.mxu1 %v8059_v35 }
 0x3c1   :  { %3986 = vmatprep.subr.bf16.mxu0 %v8064_v24  ;;  %4068 = vmatprep.subr.bf16.mxu1 %v8067_v36 }
 0x3c4   :  { %3987 = vmatpush1.bf16.msra.mxu0 %v8062_v37  ;;  %4069 = vmatpush1.bf16.msra.mxu1 %v8065_v38 }
 0x3c5   :  { %3988 = vmatprep.subr.bf16.mxu0 %v8070_v30  ;;  %4070 = vmatprep.subr.bf16.mxu1 %v8073_v39 }
 0x3c8   :  { %3989 = vmatpush1.bf16.msra.mxu0 %v8068_v40  ;;  %4071 = vmatpush1.bf16.msra.mxu1 %v8071_v41 }
 0x3c9   :  { %3990 = vmatprep.subr.bf16.mxu0 %v8076_v42  ;;  %4072 = vmatprep.subr.bf16.mxu1 %v8079_v43 }
 0x3cc   :  { %3991 = vmatpush1.bf16.msra.mxu0 %v8074_v44  ;;  %4073 = vmatpush1.bf16.msra.mxu1 %v8077_v45 }
 0x3cd   :  { %3992 = vmatprep.subr.bf16.mxu0 %v8082_v46  ;;  %4074 = vmatprep.subr.bf16.mxu1 %v8085_v47 }
 0x3d0   :  { %3993 = vmatpush1.bf16.msra.mxu0 %v8080_v48  ;;  %4075 = vmatpush1.bf16.msra.mxu1 %v8083_v49 }
 0x3d1   :  { %3994 = vmatprep.subr.bf16.mxu0 %v8088_v50  ;;  %4076 = vmatprep.subr.bf16.mxu1 %v8091_v51 }
 0x3d4   :  { %3995 = vmatpush1.bf16.msra.mxu0 %v8086_v52  ;;  %4077 = vmatpush1.bf16.msra.mxu1 %v8089_v53 }
 0x3d5   :  { %3996 = vmatprep.subr.bf16.mxu0 %v8094_v54  ;;  %4078 = vmatprep.subr.bf16.mxu1 %v8097_v55 }
 0x3d8   :  { %3997 = vmatpush1.bf16.msra.mxu0 %v8092_v56  ;;  %4079 = vmatpush1.bf16.msra.mxu1 %v8095_v57 }
 0x3d9   :  { %3998 = vmatprep.subr.bf16.mxu0 %v8100_v58  ;;  %4080 = vmatprep.subr.bf16.mxu1 %v8103_v59 }
 0x3dc   :  { %3999 = vmatpush1.bf16.msra.mxu0 %v8098_v60  ;;  %4081 = vmatpush1.bf16.msra.mxu1 %v8101_v61 }
 0x3dd   :  { %4000 = vmatprep.subr.bf16.mxu0 %v8106_v62  ;;  %4082 = vmatprep.subr.bf16.mxu1 %v8109_v63 }
 0x3e0   :  { %4001 = vmatpush1.bf16.msra.mxu0 %v8104_v0  ;;  %4083 = vmatpush1.bf16.msra.mxu1 %v8107_v1 }
 0x3e1   :  { %4002 = vmatprep.subr.bf16.mxu0 %v8112_v2  ;;  %4084 = vmatprep.subr.bf16.mxu1 %v8115_v3 }
 0x3e4   :  { %4003 = vmatpush1.bf16.msra.mxu0 %v8110_v4  ;;  %4085 = vmatpush1.bf16.msra.mxu1 %v8113_v5 }
 0x3e5   :  { %4004 = vmatprep.subr.bf16.mxu0 %v8118_v11  ;;  %4086 = vmatprep.subr.bf16.mxu1 %v8121_v13  ;;  %v8140_v11 = vld [vmem:[#allocation7 + $0xe00] ss:$16 sps:$4 sm:$0xff]  }
 0x3e8   :  { %4005 = vmatpush1.bf16.msra.mxu0 %v8116_v6  ;;  %4087 = vmatpush1.bf16.msra.mxu1 %v8119_v12  ;;  %v8143_v12 = vld [vmem:[#allocation7 + $0xe08] ss:$16 sps:$4 sm:$0xff]  }
 0x3e9   :  { %4006 = vmatprep.subr.bf16.mxu0 %v8124_v14  ;;  %4088 = vmatprep.subr.bf16.mxu1 %v8127_v15  ;;  %v8148_v14 = vld [vmem:[#allocation7 + $0xe24] ss:$16 sps:$4 sm:$0xff]   ;;  %v8151_v15 = vld [vmem:[#allocation7 + $0xe2c] ss:$16 sps:$4 sm:$0xff]  }
 0x3ec   :  { %4007 = vmatpush1.bf16.msra.mxu0 %v8122_v16  ;;  %4089 = vmatpush1.bf16.msra.mxu1 %v8125_v17  ;;  %v8146_v17 = vld [vmem:[#allocation7 + $0xe20] ss:$16 sps:$4 sm:$0xff]  }
 0x3ed   :  { %4008 = vmatprep.subr.bf16.mxu0 %v8130_v19  ;;  %4090 = vmatprep.subr.bf16.mxu1 %v8133_v27  ;;  %v8149_v19 = vld [vmem:[#allocation7 + $0xe28] ss:$16 sps:$4 sm:$0xff]   ;;  %v8154_v27 = vld [vmem:[#allocation7 + $0xe44] ss:$16 sps:$4 sm:$0xff]  }
 0x3f0   :  { %4009 = vmatpush1.bf16.msra.mxu0 %v8128_v20  ;;  %4091 = vmatpush1.bf16.msra.mxu1 %v8131_v21  ;;  %v8157_v20 = vld [vmem:[#allocation7 + $0xe4c] ss:$16 sps:$4 sm:$0xff]   ;;  %v8152_v21 = vld [vmem:[#allocation7 + $0xe40] ss:$16 sps:$4 sm:$0xff]  }
 0x3f1   :  { %4010 = vmatprep.subr.bf16.mxu0 %v8136_v23  ;;  %4092 = vmatprep.subr.bf16.mxu1 %v8139_v25  ;;  %v8155_v23 = vld [vmem:[#allocation7 + $0xe48] ss:$16 sps:$4 sm:$0xff]   ;;  %v8160_v25 = vld [vmem:[#allocation7 + $0xe64] ss:$16 sps:$4 sm:$0xff]  }
 0x3f4   :  { %4011 = vmatpush1.bf16.msra.mxu0 %v8134_v26  ;;  %4093 = vmatpush1.bf16.msra.mxu1 %v8137_v28  ;;  %v8163_v26 = vld [vmem:[#allocation7 + $0xe6c] ss:$16 sps:$4 sm:$0xff]   ;;  %v8158_v28 = vld [vmem:[#allocation7 + $0xe60] ss:$16 sps:$4 sm:$0xff]  }
 0x3f5   :  { %4021 = vmatprep.subr.bf16.mxu0 %v8142_v29  ;;  %4103 = vmatprep.subr.bf16.mxu1 %v8145_v18  ;;  %v8161_v29 = vld [vmem:[#allocation7 + $0xe68] ss:$16 sps:$4 sm:$0xff]   ;;  %v8166_v18 = vld [vmem:[#allocation7 + $0xe84] ss:$16 sps:$4 sm:$0xff]  }
 0x48a   :  { %v3059_v34 = vpop.f32.mrb[8].mxu0  ;;  %v9090_v35 = vpop.f32.mrb[8].mxu1 }
 0x48b   :  { %v7391_v24 = vadd.f32 %v3059_v34, %v2327_v32  ;;  %v3061_v36 = vpop.f32.mrb[9].mxu0  ;;  %v3143_v37 = vpop.f32.mrb[9].mxu1  ;;  %v8169_v32 = vld [vmem:[#allocation7 + $0xe8c] ss:$16 sps:$4 sm:$0xff]   ;;  %v8167_v34 = vld [vmem:[#allocation7 + $0xe88] ss:$16 sps:$4 sm:$0xff]  }
 0x48c   :  { %v7392_v38 = vadd.f32 %v3061_v36, %v2331_v33  ;;  %v7394_v30 = vadd.f32 %v3143_v37, %v2339_v22  ;;  %v3063_v39 = vpop.f32.mrb[10].mxu0  ;;  %v3145_v40 = vpop.f32.mrb[10].mxu1  ;;  %v2335_v33 = vrot.slane %v9082_v31, %v9023_v9  ;;  %v8164_v22 = vld [vmem:[#allocation7 + $0xe80] ss:$16 sps:$4 sm:$0xff]   ;;  %v8175_v36 = vld [vmem:[#allocation7 + $0xeac] ss:$16 sps:$4 sm:$0xff]  }
 0x48d   :  { %v3152_v41 = vmul.f32 %v7391_v24, %v7391_v24  ;;  %v3064_v42 = vpop.f32.mrb[11].mxu0  ;;  %v3146_v43 = vpop.f32.mrb[11].mxu1  ;;  %v3148_v61 = vmul.f32 0.5, %v7391_v24  ;;  %v8178_v39 = vld [vmem:[#allocation7 + $0xec4] ss:$16 sps:$4 sm:$0xff]  }
 0x48e   :  { %v3153_v44 = vmul.f32 %v7392_v38, %v7392_v38  ;;  %v3155_v45 = vmul.f32 %v7394_v30, %v7394_v30  ;;  %v3149_v63 = vmul.f32 0.5, %v7392_v38  ;;  %v3151_v2 = vmul.f32 0.5, %v7394_v30  ;;  %v8181_v40 = vld [vmem:[#allocation7 + $0xecc] ss:$16 sps:$4 sm:$0xff]   ;;  %v8179_v42 = vld [vmem:[#allocation7 + $0xec8] ss:$16 sps:$4 sm:$0xff]  }
 0x48f   :  { %v3156_v46 = vmul.f32 %v7391_v24, %v3152_v41  ;;  %v9095_v37 = vadd.f32 %v9090_v35, %v2335_v33  ;;  %v8176_v41 = vld [vmem:[#allocation7 + $0xec0] ss:$16 sps:$4 sm:$0xff]   ;;  %v8184_v43 = vld [vmem:[#allocation7 + $0xee4] ss:$16 sps:$4 sm:$0xff]   ;;  %v8187_v35 = vld [vmem:[#allocation7 + $0xeec] ss:$16 sps:$4 sm:$0xff]  }
 0x490   :  { %v3157_v47 = vmul.f32 %v7392_v38, %v3153_v44  ;;  %v3159_v48 = vmul.f32 %v7394_v30, %v3155_v45  ;;  %v8182_v45 = vld [vmem:[#allocation7 + $0xee0] ss:$16 sps:$4 sm:$0xff]   ;;  %v8239_v33 = vld [vmem:[#allocation7 + $0x1008] ss:$16 sps:$4 sm:$0xff]  }
 0x491   :  { %v3160_v49 = vmul.f32 0.044715, %v3156_v46  ;;  %v3154_v31 = vmul.f32 %v9095_v37, %v9095_v37  ;;  %v8185_v46 = vld [vmem:[#allocation7 + $0xee8] ss:$16 sps:$4 sm:$0xff]  }
 0x492   :  { %v3161_v50 = vmul.f32 0.044715, %v3157_v47  ;;  %v3163_v51 = vmul.f32 0.044715, %v3159_v48  ;;  %v8190_v47 = vld [vmem:[#allocation7 + $0xf04] ss:$16 sps:$4 sm:$0xff]  }
 0x493   :  { %v3164_v52 = vadd.f32 %v7391_v24, %v3160_v49  ;;  %v8172_v24 = vld [vmem:[#allocation7 + $0xea4] ss:$16 sps:$4 sm:$0xff]   ;;  %v3158_v44 = vmul.f32 %v9095_v37, %v3154_v31  ;;  %v8193_v48 = vld [vmem:[#allocation7 + $0xf0c] ss:$16 sps:$4 sm:$0xff]  }
 0x494   :  { %v3165_v53 = vadd.f32 %v7392_v38, %v3161_v50  ;;  %v3167_v54 = vadd.f32 %v7394_v30, %v3163_v51  ;;  %v8170_v38 = vld [vmem:[#allocation7 + $0xea0] ss:$16 sps:$4 sm:$0xff]   ;;  %v8173_v30 = vld [vmem:[#allocation7 + $0xea8] ss:$16 sps:$4 sm:$0xff]   ;;  %v8256_v31 = vld [vmem:[#allocation7 + $0x1064] ss:$16 sps:$4 sm:$0xff]  }
 0x495   :  { %v3168_v55 = vmul.f32 0.7978846, %v3164_v52  ;;  %v3162_v49 = vmul.f32 0.044715, %v3158_v44  ;;  %v8188_v50 = vld [vmem:[#allocation7 + $0xf00] ss:$16 sps:$4 sm:$0xff]  }
 0x496   :  { %v3169_v56 = vmul.f32 0.7978846, %v3165_v53  ;;  %v3171_v57 = vmul.f32 0.7978846, %v3167_v54  ;;  %v8191_v51 = vld [vmem:[#allocation7 + $0xf08] ss:$16 sps:$4 sm:$0xff]  }
 0x497   :  { %8676 = vtanh.f32 %v3168_v55  ;;  %v8196_v52 = vld [vmem:[#allocation7 + $0xf24] ss:$16 sps:$4 sm:$0xff]   ;;  %v8199_v53 = vld [vmem:[#allocation7 + $0xf2c] ss:$16 sps:$4 sm:$0xff]   ;;  %v3166_v54 = vadd.f32 %v9095_v37, %v3162_v49  ;;  %v8194_v55 = vld [vmem:[#allocation7 + $0xf20] ss:$16 sps:$4 sm:$0xff]  }
 0x498   :  { %8678 = vtanh.f32 %v3169_v56  ;;  %v8197_v56 = vld [vmem:[#allocation7 + $0xf28] ss:$16 sps:$4 sm:$0xff]   ;;  %v8265_v44 = vld [vmem:[#allocation7 + $0x108c] ss:$16 sps:$4 sm:$0xff]   ;;  %v8266_v49 = vld [vmem:[#allocation7 + $0x10a0] ss:$16 sps:$4 sm:$0xff]  }
 0x499   :  { %8680 = vtanh.f32 %v3171_v57  ;;  %v8202_v57 = vld [vmem:[#allocation7 + $0xf44] ss:$16 sps:$4 sm:$0xff]  }
 0x4a1   :  { %v8677_v58 = vpop.eup %8676 }
 0x4a2   :  { %v3176_v59 = vadd.f32 1.0, %v8677_v58  ;;  %v8679_v60 = vpop.eup %8678  ;;  %v8205_v58 = vld [vmem:[#allocation7 + $0xf4c] ss:$16 sps:$4 sm:$0xff]  }
 0x4a3   :  { %v8681_v62 = vpop.eup %8680  ;;  %v3177_v0 = vadd.f32 1.0, %v8679_v60  ;;  %v8200_v60 = vld [vmem:[#allocation7 + $0xf40] ss:$16 sps:$4 sm:$0xff]  }
 0x4a4   :  { %v3180_v1 = vmul.f32 %v3176_v59, %v3148_v61  ;;  %v3179_v3 = vadd.f32 1.0, %v8681_v62  ;;  %v3170_v59 = vmul.f32 0.7978846, %v3166_v54  ;;  %v8203_v61 = vld [vmem:[#allocation7 + $0xf48] ss:$16 sps:$4 sm:$0xff]  }
 0x4a5   :  { %v3181_v4 = vmul.f32 %v3177_v0, %v3149_v63  ;;  %v8208_v62 = vld [vmem:[#allocation7 + $0xf64] ss:$16 sps:$4 sm:$0xff]   ;;  %v8211_v63 = vld [vmem:[#allocation7 + $0xf6c] ss:$16 sps:$4 sm:$0xff]   ;;  %v8206_v0 = vld [vmem:[#allocation7 + $0xf60] ss:$16 sps:$4 sm:$0xff]  }
 0x4a6   :  { %v3183_v5 = vmul.f32 %v3179_v3, %v3151_v2  ;;  %v3184_v13 = vpack.c.bf16 %v3180_v1, %v3180_v1  ;;  %8682 = vtanh.f32 %v3170_v59  ;;  %v8209_v1 = vld [vmem:[#allocation7 + $0xf68] ss:$16 sps:$4 sm:$0xff]   ;;  %v8214_v2 = vld [vmem:[#allocation7 + $0xf84] ss:$16 sps:$4 sm:$0xff]   ;;  %v8217_v3 = vld [vmem:[#allocation7 + $0xf8c] ss:$16 sps:$4 sm:$0xff]  }
 0x4a7   :  { %v3185_v6 = vpack.c.bf16 %v3181_v4, %v3181_v4  ;;  %v8212_v4 = vld [vmem:[#allocation7 + $0xf80] ss:$16 sps:$4 sm:$0xff]   ;;  %v8275_v54 = vld [vmem:[#allocation7 + $0x10c8] ss:$16 sps:$4 sm:$0xff]   ;;  %v8286_v59 = vld [vmem:[#allocation7 + $0x1104] ss:$16 sps:$4 sm:$0xff]  }
 0x4a8   :  { %v3187_v16 = vpack.c.bf16 %v3183_v5, %v3183_v5  ;;  %v8215_v5 = vld [vmem:[#allocation7 + $0xf88] ss:$16 sps:$4 sm:$0xff]  }
 0x4a9   :  { %4012 = vmatprep.mubr.bf16.mxu0 %v3185_v6  ;;  %4094 = vmatprep.mubr.bf16.mxu1 %v3185_v6  ;;  %v8220_v6 = vld [vmem:[#allocation7 + $0xfa4] ss:$16 sps:$4 sm:$0xff]  }
 0x4aa   :  { %4013 = vmatmul.mubr.bf16.vlgmr.msra.gmra.mrb[12].mxu0 %v3184_v13  ;;  %4095 = vmatmul.mubr.bf16.vlgmr.msra.gmra.mrb[12].mxu1 %v3184_v13  ;;  %v8221_v13 = vld [vmem:[#allocation7 + $0xfa8] ss:$16 sps:$4 sm:$0xff]  }
 0x4ab   :  { %4022 = vmatpush1.bf16.msra.mxu0 %v8140_v11  ;;  %4104 = vmatpush1.bf16.msra.mxu1 %v8143_v12  ;;  %v8223_v11 = vld [vmem:[#allocation7 + $0xfac] ss:$16 sps:$4 sm:$0xff]   ;;  %v8218_v12 = vld [vmem:[#allocation7 + $0xfa0] ss:$16 sps:$4 sm:$0xff]  }
 0x4ac   :  { %4053 = vmatprep.mubr.bf16.mxu0 %v3187_v16  ;;  %4135 = vmatprep.mubr.bf16.mxu1 %v3187_v16 }
 0x4ad   :  { %4023 = vmatprep.subr.bf16.mxu0 %v8148_v14  ;;  %4105 = vmatprep.subr.bf16.mxu1 %v8151_v15  ;;  %v8226_v14 = vld [vmem:[#allocation7 + $0xfc4] ss:$16 sps:$4 sm:$0xff]   ;;  %v8229_v15 = vld [vmem:[#allocation7 + $0xfcc] ss:$16 sps:$4 sm:$0xff]  }
 0x4af   :  { %4024 = vmatpush1.bf16.msra.mxu0 %v8146_v17  ;;  %4106 = vmatpush1.bf16.msra.mxu1 %v8149_v19  ;;  %v8224_v17 = vld [vmem:[#allocation7 + $0xfc0] ss:$16 sps:$4 sm:$0xff]   ;;  %v8227_v19 = vld [vmem:[#allocation7 + $0xfc8] ss:$16 sps:$4 sm:$0xff]  }
 0x4b0   :  { %4025 = vmatprep.subr.bf16.mxu0 %v8154_v27  ;;  %4107 = vmatprep.subr.bf16.mxu1 %v8157_v20  ;;  %v8683_v16 = vpop.eup %8682  ;;  %v8232_v27 = vld [vmem:[#allocation7 + $0xfe4] ss:$16 sps:$4 sm:$0xff]   ;;  %v8235_v20 = vld [vmem:[#allocation7 + $0xfec] ss:$16 sps:$4 sm:$0xff]  }
 0x4b3   :  { %4026 = vmatpush1.bf16.msra.mxu0 %v8152_v21  ;;  %4108 = vmatpush1.bf16.msra.mxu1 %v8155_v23  ;;  %v3178_v21 = vadd.f32 1.0, %v8683_v16  ;;  %v3150_v23 = vmul.f32 0.5, %v9095_v37  ;;  %v8245_v37 = vld [vmem:[#allocation7 + $0x1028] ss:$16 sps:$4 sm:$0xff]   ;;  %v8310_v16 = vld [vmem:[#allocation7 + $0x1184] ss:$16 sps:$4 sm:$0xff]  }
 0x4b4   :  { %4027 = vmatprep.subr.bf16.mxu0 %v8160_v25  ;;  %4109 = vmatprep.subr.bf16.mxu1 %v8163_v26  ;;  %v8230_v25 = vld [vmem:[#allocation7 + $0xfe0] ss:$16 sps:$4 sm:$0xff]   ;;  %v8233_v26 = vld [vmem:[#allocation7 + $0xfe8] ss:$16 sps:$4 sm:$0xff]  }
 0x4b7   :  { %4028 = vmatpush1.bf16.msra.mxu0 %v8158_v28  ;;  %4110 = vmatpush1.bf16.msra.mxu1 %v8161_v29  ;;  %v3182_v28 = vmul.f32 %v3178_v21, %v3150_v23  ;;  %v8238_v29 = vld [vmem:[#allocation7 + $0x1004] ss:$16 sps:$4 sm:$0xff]   ;;  %v8314_v21 = vld [vmem:[#allocation7 + $0x11a0] ss:$16 sps:$4 sm:$0xff]   ;;  %v8317_v23 = vld [vmem:[#allocation7 + $0x11a8] ss:$16 sps:$4 sm:$0xff]  }
 0x4b8   :  { %4029 = vmatprep.subr.bf16.mxu0 %v8166_v18  ;;  %4111 = vmatprep.subr.bf16.mxu1 %v8169_v32  ;;  %v8241_v18 = vld [vmem:[#allocation7 + $0x100c] ss:$16 sps:$4 sm:$0xff]   ;;  %v8236_v32 = vld [vmem:[#allocation7 + $0x1000] ss:$16 sps:$4 sm:$0xff]  }
 0x4bb   :  { %4030 = vmatpush1.bf16.msra.mxu0 %v8164_v22  ;;  %4112 = vmatpush1.bf16.msra.mxu1 %v8167_v34  ;;  %v3186_v22 = vpack.c.bf16 %v3182_v28, %v3182_v28  ;;  %v8244_v34 = vld [vmem:[#allocation7 + $0x1024] ss:$16 sps:$4 sm:$0xff]   ;;  %v8320_v28 = vld [vmem:[#allocation7 + $0x11c0] ss:$16 sps:$4 sm:$0xff]  }
 0x4bc   :  { %4031 = vmatprep.subr.bf16.mxu0 %v8172_v24  ;;  %4113 = vmatprep.subr.bf16.mxu1 %v8175_v36  ;;  %v8247_v24 = vld [vmem:[#allocation7 + $0x102c] ss:$16 sps:$4 sm:$0xff]   ;;  %v8242_v36 = vld [vmem:[#allocation7 + $0x1020] ss:$16 sps:$4 sm:$0xff]  }
 0x4bf   :  { %4032 = vmatpush1.bf16.msra.mxu0 %v8170_v38  ;;  %4114 = vmatpush1.bf16.msra.mxu1 %v8173_v30  ;;  %v8250_v38 = vld [vmem:[#allocation7 + $0x1044] ss:$16 sps:$4 sm:$0xff]   ;;  %v8253_v30 = vld [vmem:[#allocation7 + $0x104c] ss:$16 sps:$4 sm:$0xff]  }
 0x4c0   :  { %4033 = vmatprep.subr.bf16.mxu0 %v8178_v39  ;;  %4115 = vmatprep.subr.bf16.mxu1 %v8181_v40  ;;  %v8248_v39 = vld [vmem:[#allocation7 + $0x1040] ss:$16 sps:$4 sm:$0xff]   ;;  %v8251_v40 = vld [vmem:[#allocation7 + $0x1048] ss:$16 sps:$4 sm:$0xff]  }
 0x4c3   :  { %4034 = vmatpush1.bf16.msra.mxu0 %v8176_v41  ;;  %4116 = vmatpush1.bf16.msra.mxu1 %v8179_v42  ;;  %v8259_v41 = vld [vmem:[#allocation7 + $0x106c] ss:$16 sps:$4 sm:$0xff]   ;;  %v8254_v42 = vld [vmem:[#allocation7 + $0x1060] ss:$16 sps:$4 sm:$0xff]  }
 0x4c4   :  { %4035 = vmatprep.subr.bf16.mxu0 %v8184_v43  ;;  %4117 = vmatprep.subr.bf16.mxu1 %v8187_v35  ;;  %v8257_v43 = vld [vmem:[#allocation7 + $0x1068] ss:$16 sps:$4 sm:$0xff]   ;;  %v8262_v35 = vld [vmem:[#allocation7 + $0x1084] ss:$16 sps:$4 sm:$0xff]  }
 0x4c7   :  { %4036 = vmatpush1.bf16.msra.mxu0 %v8182_v45  ;;  %4118 = vmatpush1.bf16.msra.mxu1 %v8185_v46  ;;  %v8260_v45 = vld [vmem:[#allocation7 + $0x1080] ss:$16 sps:$4 sm:$0xff]   ;;  %v8263_v46 = vld [vmem:[#allocation7 + $0x1088] ss:$16 sps:$4 sm:$0xff]  }
 0x4c8   :  { %4037 = vmatprep.subr.bf16.mxu0 %v8190_v47  ;;  %4119 = vmatprep.subr.bf16.mxu1 %v8193_v48  ;;  %v8268_v47 = vld [vmem:[#allocation7 + $0x10a4] ss:$16 sps:$4 sm:$0xff]   ;;  %v8271_v48 = vld [vmem:[#allocation7 + $0x10ac] ss:$16 sps:$4 sm:$0xff]  }
 0x4cb   :  { %4038 = vmatpush1.bf16.msra.mxu0 %v8188_v50  ;;  %4120 = vmatpush1.bf16.msra.mxu1 %v8191_v51  ;;  %v8269_v50 = vld [vmem:[#allocation7 + $0x10a8] ss:$16 sps:$4 sm:$0xff]   ;;  %v8274_v51 = vld [vmem:[#allocation7 + $0x10c4] ss:$16 sps:$4 sm:$0xff]  }
 0x4cc   :  { %4039 = vmatprep.subr.bf16.mxu0 %v8196_v52  ;;  %4121 = vmatprep.subr.bf16.mxu1 %v8199_v53  ;;  %v8277_v52 = vld [vmem:[#allocation7 + $0x10cc] ss:$16 sps:$4 sm:$0xff]   ;;  %v8272_v53 = vld [vmem:[#allocation7 + $0x10c0] ss:$16 sps:$4 sm:$0xff]  }
 0x4cf   :  { %4040 = vmatpush1.bf16.msra.mxu0 %v8194_v55  ;;  %4122 = vmatpush1.bf16.msra.mxu1 %v8197_v56  ;;  %v8280_v55 = vld [vmem:[#allocation7 + $0x10e4] ss:$16 sps:$4 sm:$0xff]   ;;  %v8283_v56 = vld [vmem:[#allocation7 + $0x10ec] ss:$16 sps:$4 sm:$0xff]  }
 0x4d0   :  { %4041 = vmatprep.subr.bf16.mxu0 %v8202_v57  ;;  %4123 = vmatprep.subr.bf16.mxu1 %v8205_v58  ;;  %v8278_v57 = vld [vmem:[#allocation7 + $0x10e0] ss:$16 sps:$4 sm:$0xff]   ;;  %v8281_v58 = vld [vmem:[#allocation7 + $0x10e8] ss:$16 sps:$4 sm:$0xff]  }
 0x4d3   :  { %4042 = vmatpush1.bf16.msra.mxu0 %v8200_v60  ;;  %4124 = vmatpush1.bf16.msra.mxu1 %v8203_v61  ;;  %v8289_v60 = vld [vmem:[#allocation7 + $0x110c] ss:$16 sps:$4 sm:$0xff]   ;;  %v8284_v61 = vld [vmem:[#allocation7 + $0x1100] ss:$16 sps:$4 sm:$0xff]  }
 0x4d4   :  { %4043 = vmatprep.subr.bf16.mxu0 %v8208_v62  ;;  %4125 = vmatprep.subr.bf16.mxu1 %v8211_v63  ;;  %v8287_v62 = vld [vmem:[#allocation7 + $0x1108] ss:$16 sps:$4 sm:$0xff]   ;;  %v8292_v63 = vld [vmem:[#allocation7 + $0x1124] ss:$16 sps:$4 sm:$0xff]  }
 0x4d7   :  { %4044 = vmatpush1.bf16.msra.mxu0 %v8206_v0  ;;  %4126 = vmatpush1.bf16.msra.mxu1 %v8209_v1  ;;  %v8295_v0 = vld [vmem:[#allocation7 + $0x112c] ss:$16 sps:$4 sm:$0xff]   ;;  %v8290_v1 = vld [vmem:[#allocation7 + $0x1120] ss:$16 sps:$4 sm:$0xff]  }
 0x4d8   :  { %4045 = vmatprep.subr.bf16.mxu0 %v8214_v2  ;;  %4127 = vmatprep.subr.bf16.mxu1 %v8217_v3  ;;  %v8293_v2 = vld [vmem:[#allocation7 + $0x1128] ss:$16 sps:$4 sm:$0xff]   ;;  %v8298_v3 = vld [vmem:[#allocation7 + $0x1144] ss:$16 sps:$4 sm:$0xff]  }
 0x4db   :  { %4046 = vmatpush1.bf16.msra.mxu0 %v8212_v4  ;;  %4128 = vmatpush1.bf16.msra.mxu1 %v8215_v5  ;;  %v8301_v4 = vld [vmem:[#allocation7 + $0x114c] ss:$16 sps:$4 sm:$0xff]   ;;  %v8296_v5 = vld [vmem:[#allocation7 + $0x1140] ss:$16 sps:$4 sm:$0xff]  }
 0x4dc   :  { %4047 = vmatprep.subr.bf16.mxu0 %v8220_v6  ;;  %4129 = vmatprep.subr.bf16.mxu1 %v8223_v11  ;;  %v8299_v6 = vld [vmem:[#allocation7 + $0x1148] ss:$16 sps:$4 sm:$0xff]   ;;  %v8304_v11 = vld [vmem:[#allocation7 + $0x1164] ss:$16 sps:$4 sm:$0xff]  }
 0x4df   :  { %4048 = vmatpush1.bf16.msra.mxu0 %v8218_v12  ;;  %4130 = vmatpush1.bf16.msra.mxu1 %v8221_v13  ;;  %v8307_v12 = vld [vmem:[#allocation7 + $0x116c] ss:$16 sps:$4 sm:$0xff]   ;;  %v8302_v13 = vld [vmem:[#allocation7 + $0x1160] ss:$16 sps:$4 sm:$0xff]  }
 0x4e0   :  { %4049 = vmatprep.subr.bf16.mxu0 %v8226_v14  ;;  %4131 = vmatprep.subr.bf16.mxu1 %v8229_v15  ;;  %v8305_v14 = vld [vmem:[#allocation7 + $0x1168] ss:$16 sps:$4 sm:$0xff]   ;;  %v8308_v15 = vld [vmem:[#allocation7 + $0x1180] ss:$16 sps:$4 sm:$0xff]  }
 0x4e3   :  { %4050 = vmatpush1.bf16.msra.mxu0 %v8224_v17  ;;  %4132 = vmatpush1.bf16.msra.mxu1 %v8227_v19  ;;  %v8311_v17 = vld [vmem:[#allocation7 + $0x1188] ss:$16 sps:$4 sm:$0xff]   ;;  %v8313_v19 = vld [vmem:[#allocation7 + $0x118c] ss:$16 sps:$4 sm:$0xff]  }
 0x4e4   :  { %4051 = vmatprep.subr.bf16.mxu0 %v8232_v27  ;;  %4133 = vmatprep.subr.bf16.mxu1 %v8235_v20  ;;  %v8316_v27 = vld [vmem:[#allocation7 + $0x11a4] ss:$16 sps:$4 sm:$0xff]   ;;  %v8319_v20 = vld [vmem:[#allocation7 + $0x11ac] ss:$16 sps:$4 sm:$0xff]  }
 0x4e7   :  { %4052 = vmatpush1.bf16.msra.mxu0 %v8230_v25  ;;  %4134 = vmatpush1.bf16.msra.mxu1 %v8233_v26  ;;  %v8322_v25 = vld [vmem:[#allocation7 + $0x11c4] ss:$16 sps:$4 sm:$0xff]   ;;  %v8325_v26 = vld [vmem:[#allocation7 + $0x11cc] ss:$16 sps:$4 sm:$0xff]  }
 0x4e8   :  { %4976 = vmatprep.subr.bf16.mxu0 %v8238_v29  ;;  %5058 = vmatprep.subr.bf16.mxu1 %v8241_v18  ;;  %v8323_v29 = vld [vmem:[#allocation7 + $0x11c8] ss:$16 sps:$4 sm:$0xff]   ;;  %v8328_v18 = vld [vmem:[#allocation7 + $0x11e4] ss:$16 sps:$4 sm:$0xff]  }
 0x4ea   :  { %4054 = vmatmul.mubr.bf16.vlgmr.msra.gmra.mrb[12].mxu0 %v3186_v22  ;;  %4136 = vmatmul.mubr.bf16.vlgmr.msra.gmra.mrb[12].mxu1 %v3186_v22  ;;  %v8329_v22 = vld [vmem:[#allocation7 + $0x11e8] ss:$16 sps:$4 sm:$0xff]  }
 0x4eb   :  { %4977 = vmatpush1.bf16.msra.mxu0 %v8236_v32  ;;  %5059 = vmatpush1.bf16.msra.mxu1 %v8239_v33  ;;  %v8331_v32 = vld [vmem:[#allocation7 + $0x11ec] ss:$16 sps:$4 sm:$0xff]   ;;  %v8326_v33 = vld [vmem:[#allocation7 + $0x11e0] ss:$16 sps:$4 sm:$0xff]  }
 0x4ec   :  { %4978 = vmatprep.subr.bf16.mxu0 %v8244_v34  ;;  %5060 = vmatprep.subr.bf16.mxu1 %v8247_v24  ;;  %v8334_v34 = vld [vmem:[#allocation7 + $0x1204] ss:$16 sps:$4 sm:$0xff]   ;;  %v8337_v24 = vld [vmem:[#allocation7 + $0x120c] ss:$16 sps:$4 sm:$0xff]  }
 0x4ef   :  { %4979 = vmatpush1.bf16.msra.mxu0 %v8242_v36  ;;  %5061 = vmatpush1.bf16.msra.mxu1 %v8245_v37  ;;  %v9102_v36 = vld [vmem:[#allocation8 + $0xc] sm:$0xf] }
 0x4f0   :  { %4980 = vmatprep.subr.bf16.mxu0 %v8250_v38  ;;  %5062 = vmatprep.subr.bf16.mxu1 %v8253_v30  ;;  %v3323_v37 = vrot.slane %v9102_v36, %v9019_v7  ;;  %v3327_v38 = vrot.slane %v9102_v36, %v9021_v8  ;;  %v3335_v30 = vrot.slane %v9102_v36, %v9025_v10 }
 0x4f3   :  { %4981 = vmatpush1.bf16.msra.mxu0 %v8248_v39  ;;  %5063 = vmatpush1.bf16.msra.mxu1 %v8251_v40 }
 0x4f4   :  { %4982 = vmatprep.subr.bf16.mxu0 %v8256_v31  ;;  %5064 = vmatprep.subr.bf16.mxu1 %v8259_v41 }
 0x4f7   :  { %4983 = vmatpush1.bf16.msra.mxu0 %v8254_v42  ;;  %5065 = vmatpush1.bf16.msra.mxu1 %v8257_v43 }
 0x4f8   :  { %4984 = vmatprep.subr.bf16.mxu0 %v8262_v35  ;;  %5066 = vmatprep.subr.bf16.mxu1 %v8265_v44 }
 0x4fb   :  { %4985 = vmatpush1.bf16.msra.mxu0 %v8260_v45  ;;  %5067 = vmatpush1.bf16.msra.mxu1 %v8263_v46 }
 0x4fc   :  { %4986 = vmatprep.subr.bf16.mxu0 %v8268_v47  ;;  %5068 = vmatprep.subr.bf16.mxu1 %v8271_v48 }
 0x4ff   :  { %4987 = vmatpush1.bf16.msra.mxu0 %v8266_v49  ;;  %5069 = vmatpush1.bf16.msra.mxu1 %v8269_v50 }
 0x500   :  { %4988 = vmatprep.subr.bf16.mxu0 %v8274_v51  ;;  %5070 = vmatprep.subr.bf16.mxu1 %v8277_v52 }
 0x503   :  { %4989 = vmatpush1.bf16.msra.mxu0 %v8272_v53  ;;  %5071 = vmatpush1.bf16.msra.mxu1 %v8275_v54 }
 0x504   :  { %4990 = vmatprep.subr.bf16.mxu0 %v8280_v55  ;;  %5072 = vmatprep.subr.bf16.mxu1 %v8283_v56 }
 0x507   :  { %4991 = vmatpush1.bf16.msra.mxu0 %v8278_v57  ;;  %5073 = vmatpush1.bf16.msra.mxu1 %v8281_v58 }
 0x508   :  { %4992 = vmatprep.subr.bf16.mxu0 %v8286_v59  ;;  %5074 = vmatprep.subr.bf16.mxu1 %v8289_v60 }
 0x50b   :  { %4993 = vmatpush1.bf16.msra.mxu0 %v8284_v61  ;;  %5075 = vmatpush1.bf16.msra.mxu1 %v8287_v62 }
 0x50c   :  { %4994 = vmatprep.subr.bf16.mxu0 %v8292_v63  ;;  %5076 = vmatprep.subr.bf16.mxu1 %v8295_v0 }
 0x50f   :  { %4995 = vmatpush1.bf16.msra.mxu0 %v8290_v1  ;;  %5077 = vmatpush1.bf16.msra.mxu1 %v8293_v2 }
 0x510   :  { %4996 = vmatprep.subr.bf16.mxu0 %v8298_v3  ;;  %5078 = vmatprep.subr.bf16.mxu1 %v8301_v4 }
 0x513   :  { %4997 = vmatpush1.bf16.msra.mxu0 %v8296_v5  ;;  %5079 = vmatpush1.bf16.msra.mxu1 %v8299_v6 }
 0x514   :  { %4998 = vmatprep.subr.bf16.mxu0 %v8304_v11  ;;  %5080 = vmatprep.subr.bf16.mxu1 %v8307_v12 }
 0x517   :  { %4999 = vmatpush1.bf16.msra.mxu0 %v8302_v13  ;;  %5081 = vmatpush1.bf16.msra.mxu1 %v8305_v14 }
 0x518   :  { %5000 = vmatprep.subr.bf16.mxu0 %v8310_v16  ;;  %5082 = vmatprep.subr.bf16.mxu1 %v8313_v19  ;;  %v8332_v16 = vld [vmem:[#allocation7 + $0x1200] ss:$16 sps:$4 sm:$0xff]  }
 0x51b   :  { %5001 = vmatpush1.bf16.msra.mxu0 %v8308_v15  ;;  %5083 = vmatpush1.bf16.msra.mxu1 %v8311_v17  ;;  %v8335_v17 = vld [vmem:[#allocation7 + $0x1208] ss:$16 sps:$4 sm:$0xff]  }
 0x51c   :  { %5002 = vmatprep.subr.bf16.mxu0 %v8316_v27  ;;  %5084 = vmatprep.subr.bf16.mxu1 %v8319_v20  ;;  %v8340_v27 = vld [vmem:[#allocation7 + $0x1224] ss:$16 sps:$4 sm:$0xff]   ;;  %v8343_v20 = vld [vmem:[#allocation7 + $0x122c] ss:$16 sps:$4 sm:$0xff]  }
 0x51f   :  { %5003 = vmatpush1.bf16.msra.mxu0 %v8314_v21  ;;  %5085 = vmatpush1.bf16.msra.mxu1 %v8317_v23  ;;  %v8338_v23 = vld [vmem:[#allocation7 + $0x1220] ss:$16 sps:$4 sm:$0xff]  }
 0x520   :  { %5004 = vmatprep.subr.bf16.mxu0 %v8322_v25  ;;  %5086 = vmatprep.subr.bf16.mxu1 %v8325_v26  ;;  %v8341_v25 = vld [vmem:[#allocation7 + $0x1228] ss:$16 sps:$4 sm:$0xff]   ;;  %v8346_v26 = vld [vmem:[#allocation7 + $0x1244] ss:$16 sps:$4 sm:$0xff]  }
 0x523   :  { %5005 = vmatpush1.bf16.msra.mxu0 %v8320_v28  ;;  %5087 = vmatpush1.bf16.msra.mxu1 %v8323_v29  ;;  %v8349_v28 = vld [vmem:[#allocation7 + $0x124c] ss:$16 sps:$4 sm:$0xff]   ;;  %v8344_v29 = vld [vmem:[#allocation7 + $0x1240] ss:$16 sps:$4 sm:$0xff]  }
 0x524   :  { %5006 = vmatprep.subr.bf16.mxu0 %v8328_v18  ;;  %5088 = vmatprep.subr.bf16.mxu1 %v8331_v32  ;;  %v8347_v18 = vld [vmem:[#allocation7 + $0x1248] ss:$16 sps:$4 sm:$0xff]   ;;  %v8352_v32 = vld [vmem:[#allocation7 + $0x1264] ss:$16 sps:$4 sm:$0xff]  }
 0x527   :  { %5007 = vmatpush1.bf16.msra.mxu0 %v8326_v33  ;;  %5089 = vmatpush1.bf16.msra.mxu1 %v8329_v22  ;;  %v8355_v33 = vld [vmem:[#allocation7 + $0x126c] ss:$16 sps:$4 sm:$0xff]   ;;  %v8350_v22 = vld [vmem:[#allocation7 + $0x1260] ss:$16 sps:$4 sm:$0xff]  }
 0x528   :  { %5017 = vmatprep.subr.bf16.mxu0 %v8334_v34  ;;  %5099 = vmatprep.subr.bf16.mxu1 %v8337_v24  ;;  %v8353_v34 = vld [vmem:[#allocation7 + $0x1268] ss:$16 sps:$4 sm:$0xff]   ;;  %v8358_v24 = vld [vmem:[#allocation7 + $0x1284] ss:$16 sps:$4 sm:$0xff]  }
 0x5bd   :  { %v4055_v39 = vpop.f32.mrb[12].mxu0  ;;  %v9110_v40 = vpop.f32.mrb[12].mxu1 }
 0x5be   :  { %v7395_v31 = vadd.f32 %v4055_v39, %v3323_v37  ;;  %v4057_v41 = vpop.f32.mrb[13].mxu0  ;;  %v4139_v42 = vpop.f32.mrb[13].mxu1  ;;  %v8361_v37 = vld [vmem:[#allocation7 + $0x128c] ss:$16 sps:$4 sm:$0xff]   ;;  %v8359_v39 = vld [vmem:[#allocation7 + $0x1288] ss:$16 sps:$4 sm:$0xff]  }
 0x5bf   :  { %v7396_v43 = vadd.f32 %v4057_v41, %v3327_v38  ;;  %v7398_v35 = vadd.f32 %v4139_v42, %v3335_v30  ;;  %v4059_v44 = vpop.f32.mrb[14].mxu0  ;;  %v4141_v45 = vpop.f32.mrb[14].mxu1  ;;  %v3331_v38 = vrot.slane %v9102_v36, %v9023_v9  ;;  %v8356_v30 = vld [vmem:[#allocation7 + $0x1280] ss:$16 sps:$4 sm:$0xff]   ;;  %v8367_v41 = vld [vmem:[#allocation7 + $0x12ac] ss:$16 sps:$4 sm:$0xff]  }
 0x5c0   :  { %v4148_v46 = vmul.f32 %v7395_v31, %v7395_v31  ;;  %v4060_v47 = vpop.f32.mrb[15].mxu0  ;;  %v4142_v48 = vpop.f32.mrb[15].mxu1  ;;  %v4144_v2 = vmul.f32 0.5, %v7395_v31  ;;  %v8370_v44 = vld [vmem:[#allocation7 + $0x12c4] ss:$16 sps:$4 sm:$0xff]  }
 0x5c1   :  { %v4149_v49 = vmul.f32 %v7396_v43, %v7396_v43  ;;  %v4151_v50 = vmul.f32 %v7398_v35, %v7398_v35  ;;  %v4145_v4 = vmul.f32 0.5, %v7396_v43  ;;  %v4147_v11 = vmul.f32 0.5, %v7398_v35  ;;  %v8373_v45 = vld [vmem:[#allocation7 + $0x12cc] ss:$16 sps:$4 sm:$0xff]   ;;  %v8371_v47 = vld [vmem:[#allocation7 + $0x12c8] ss:$16 sps:$4 sm:$0xff]  }
 0x5c2   :  { %v4152_v51 = vmul.f32 %v7395_v31, %v4148_v46  ;;  %v9115_v42 = vadd.f32 %v9110_v40, %v3331_v38  ;;  %v8368_v46 = vld [vmem:[#allocation7 + $0x12c0] ss:$16 sps:$4 sm:$0xff]   ;;  %v8376_v48 = vld [vmem:[#allocation7 + $0x12e4] ss:$16 sps:$4 sm:$0xff]   ;;  %v8379_v40 = vld [vmem:[#allocation7 + $0x12ec] ss:$16 sps:$4 sm:$0xff]  }
 0x5c3   :  { %v4153_v52 = vmul.f32 %v7396_v43, %v4149_v49  ;;  %v4155_v53 = vmul.f32 %v7398_v35, %v4151_v50  ;;  %v8374_v50 = vld [vmem:[#allocation7 + $0x12e0] ss:$16 sps:$4 sm:$0xff]   ;;  %v8431_v38 = vld [vmem:[#allocation7 + $0x1408] ss:$16 sps:$4 sm:$0xff]  }
 0x5c4   :  { %v4156_v54 = vmul.f32 0.044715, %v4152_v51  ;;  %v4150_v36 = vmul.f32 %v9115_v42, %v9115_v42  ;;  %v8377_v51 = vld [vmem:[#allocation7 + $0x12e8] ss:$16 sps:$4 sm:$0xff]  }
 0x5c5   :  { %v4157_v55 = vmul.f32 0.044715, %v4153_v52  ;;  %v4159_v56 = vmul.f32 0.044715, %v4155_v53  ;;  %v8382_v52 = vld [vmem:[#allocation7 + $0x1304] ss:$16 sps:$4 sm:$0xff]  }
 0x5c6   :  { %v4160_v57 = vadd.f32 %v7395_v31, %v4156_v54  ;;  %v8364_v31 = vld [vmem:[#allocation7 + $0x12a4] ss:$16 sps:$4 sm:$0xff]   ;;  %v4154_v49 = vmul.f32 %v9115_v42, %v4150_v36  ;;  %v8385_v53 = vld [vmem:[#allocation7 + $0x130c] ss:$16 sps:$4 sm:$0xff]  }
 0x5c7   :  { %v4161_v58 = vadd.f32 %v7396_v43, %v4157_v55  ;;  %v4163_v59 = vadd.f32 %v7398_v35, %v4159_v56  ;;  %v8362_v43 = vld [vmem:[#allocation7 + $0x12a0] ss:$16 sps:$4 sm:$0xff]   ;;  %v8365_v35 = vld [vmem:[#allocation7 + $0x12a8] ss:$16 sps:$4 sm:$0xff]   ;;  %v8448_v36 = vld [vmem:[#allocation7 + $0x1464] ss:$16 sps:$4 sm:$0xff]  }
 0x5c8   :  { %v4164_v60 = vmul.f32 0.7978846, %v4160_v57  ;;  %v4158_v54 = vmul.f32 0.044715, %v4154_v49  ;;  %v8380_v55 = vld [vmem:[#allocation7 + $0x1300] ss:$16 sps:$4 sm:$0xff]  }
 0x5c9   :  { %v4165_v61 = vmul.f32 0.7978846, %v4161_v58  ;;  %v4167_v62 = vmul.f32 0.7978846, %v4163_v59  ;;  %v8383_v56 = vld [vmem:[#allocation7 + $0x1308] ss:$16 sps:$4 sm:$0xff]  }
 0x5ca   :  { %8684 = vtanh.f32 %v4164_v60  ;;  %v8388_v57 = vld [vmem:[#allocation7 + $0x1324] ss:$16 sps:$4 sm:$0xff]   ;;  %v8391_v58 = vld [vmem:[#allocation7 + $0x132c] ss:$16 sps:$4 sm:$0xff]   ;;  %v4162_v59 = vadd.f32 %v9115_v42, %v4158_v54  ;;  %v8386_v60 = vld [vmem:[#allocation7 + $0x1320] ss:$16 sps:$4 sm:$0xff]  }
 0x5cb   :  { %8686 = vtanh.f32 %v4165_v61  ;;  %v8389_v61 = vld [vmem:[#allocation7 + $0x1328] ss:$16 sps:$4 sm:$0xff]   ;;  %v8457_v49 = vld [vmem:[#allocation7 + $0x148c] ss:$16 sps:$4 sm:$0xff]   ;;  %v8458_v54 = vld [vmem:[#allocation7 + $0x14a0] ss:$16 sps:$4 sm:$0xff]  }
 0x5cc   :  { %8688 = vtanh.f32 %v4167_v62  ;;  %v8394_v62 = vld [vmem:[#allocation7 + $0x1344] ss:$16 sps:$4 sm:$0xff]  }
 0x5d4   :  { %v8685_v63 = vpop.eup %8684 }
 0x5d5   :  { %v4172_v0 = vadd.f32 1.0, %v8685_v63  ;;  %v8687_v1 = vpop.eup %8686  ;;  %v8397_v63 = vld [vmem:[#allocation7 + $0x134c] ss:$16 sps:$4 sm:$0xff]  }
 0x5d6   :  { %v8689_v3 = vpop.eup %8688  ;;  %v4173_v5 = vadd.f32 1.0, %v8687_v1  ;;  %v8392_v1 = vld [vmem:[#allocation7 + $0x1340] ss:$16 sps:$4 sm:$0xff]  }
 0x5d7   :  { %v4176_v6 = vmul.f32 %v4172_v0, %v4144_v2  ;;  %v4175_v12 = vadd.f32 1.0, %v8689_v3  ;;  %v4166_v0 = vmul.f32 0.7978846, %v4162_v59  ;;  %v8395_v2 = vld [vmem:[#allocation7 + $0x1348] ss:$16 sps:$4 sm:$0xff]  }
 0x5d8   :  { %v4177_v13 = vmul.f32 %v4173_v5, %v4145_v4  ;;  %v8400_v3 = vld [vmem:[#allocation7 + $0x1364] ss:$16 sps:$4 sm:$0xff]   ;;  %v8403_v4 = vld [vmem:[#allocation7 + $0x136c] ss:$16 sps:$4 sm:$0xff]   ;;  %v8398_v5 = vld [vmem:[#allocation7 + $0x1360] ss:$16 sps:$4 sm:$0xff]  }
 0x5d9   :  { %v4179_v14 = vmul.f32 %v4175_v12, %v4147_v11  ;;  %v4180_v19 = vpack.c.bf16 %v4176_v6, %v4176_v6  ;;  %8690 = vtanh.f32 %v4166_v0  ;;  %v8401_v6 = vld [vmem:[#allocation7 + $0x1368] ss:$16 sps:$4 sm:$0xff]   ;;  %v8406_v11 = vld [vmem:[#allocation7 + $0x1384] ss:$16 sps:$4 sm:$0xff]   ;;  %v8409_v12 = vld [vmem:[#allocation7 + $0x138c] ss:$16 sps:$4 sm:$0xff]  }
 0x5da   :  { %v4181_v15 = vpack.c.bf16 %v4177_v13, %v4177_v13  ;;  %v8404_v13 = vld [vmem:[#allocation7 + $0x1380] ss:$16 sps:$4 sm:$0xff]   ;;  %v8467_v59 = vld [vmem:[#allocation7 + $0x14c8] ss:$16 sps:$4 sm:$0xff]   ;;  %v8478_v0 = vld [vmem:[#allocation7 + $0x1504] ss:$16 sps:$4 sm:$0xff]  }
 0x5db   :  { %v4183_v21 = vpack.c.bf16 %v4179_v14, %v4179_v14  ;;  %v8407_v14 = vld [vmem:[#allocation7 + $0x1388] ss:$16 sps:$4 sm:$0xff]  }
 0x5dc   :  { %5008 = vmatprep.mubr.bf16.mxu0 %v4181_v15  ;;  %5090 = vmatprep.mubr.bf16.mxu1 %v4181_v15  ;;  %v8412_v15 = vld [vmem:[#allocation7 + $0x13a4] ss:$16 sps:$4 sm:$0xff]  }
 0x5dd   :  { %5009 = vmatmul.mubr.bf16.vlgmr.msra.gmra.mrb[16].mxu0 %v4180_v19  ;;  %5091 = vmatmul.mubr.bf16.vlgmr.msra.gmra.mrb[16].mxu1 %v4180_v19  ;;  %v8413_v19 = vld [vmem:[#allocation7 + $0x13a8] ss:$16 sps:$4 sm:$0xff]  }
 0x5de   :  { %5018 = vmatpush1.bf16.msra.mxu0 %v8332_v16  ;;  %5100 = vmatpush1.bf16.msra.mxu1 %v8335_v17  ;;  %v8415_v16 = vld [vmem:[#allocation7 + $0x13ac] ss:$16 sps:$4 sm:$0xff]   ;;  %v8410_v17 = vld [vmem:[#allocation7 + $0x13a0] ss:$16 sps:$4 sm:$0xff]  }
 0x5df   :  { %5049 = vmatprep.mubr.bf16.mxu0 %v4183_v21  ;;  %5131 = vmatprep.mubr.bf16.mxu1 %v4183_v21 }
 0x5e0   :  { %5019 = vmatprep.subr.bf16.mxu0 %v8340_v27  ;;  %5101 = vmatprep.subr.bf16.mxu1 %v8343_v20  ;;  %v8418_v27 = vld [vmem:[#allocation7 + $0x13c4] ss:$16 sps:$4 sm:$0xff]   ;;  %v8421_v20 = vld [vmem:[#allocation7 + $0x13cc] ss:$16 sps:$4 sm:$0xff]  }
 0x5e2   :  { %5020 = vmatpush1.bf16.msra.mxu0 %v8338_v23  ;;  %5102 = vmatpush1.bf16.msra.mxu1 %v8341_v25  ;;  %v8416_v23 = vld [vmem:[#allocation7 + $0x13c0] ss:$16 sps:$4 sm:$0xff]   ;;  %v8419_v25 = vld [vmem:[#allocation7 + $0x13c8] ss:$16 sps:$4 sm:$0xff]  }
 0x5e3   :  { %5021 = vmatprep.subr.bf16.mxu0 %v8346_v26  ;;  %5103 = vmatprep.subr.bf16.mxu1 %v8349_v28  ;;  %v8691_v21 = vpop.eup %8690  ;;  %v8424_v26 = vld [vmem:[#allocation7 + $0x13e4] ss:$16 sps:$4 sm:$0xff]   ;;  %v8427_v28 = vld [vmem:[#allocation7 + $0x13ec] ss:$16 sps:$4 sm:$0xff]  }
 0x5e6   :  { %5022 = vmatpush1.bf16.msra.mxu0 %v8344_v29  ;;  %5104 = vmatpush1.bf16.msra.mxu1 %v8347_v18  ;;  %v4174_v29 = vadd.f32 1.0, %v8691_v21  ;;  %v4146_v18 = vmul.f32 0.5, %v9115_v42  ;;  %v8437_v42 = vld [vmem:[#allocation7 + $0x1428] ss:$16 sps:$4 sm:$0xff]   ;;  %v8502_v21 = vld [vmem:[#allocation7 + $0x1584] ss:$16 sps:$4 sm:$0xff]  }
 0x5e7   :  { %5023 = vmatprep.subr.bf16.mxu0 %v8352_v32  ;;  %5105 = vmatprep.subr.bf16.mxu1 %v8355_v33  ;;  %v8422_v32 = vld [vmem:[#allocation7 + $0x13e0] ss:$16 sps:$4 sm:$0xff]   ;;  %v8425_v33 = vld [vmem:[#allocation7 + $0x13e8] ss:$16 sps:$4 sm:$0xff]  }
 0x5ea   :  { %5024 = vmatpush1.bf16.msra.mxu0 %v8350_v22  ;;  %5106 = vmatpush1.bf16.msra.mxu1 %v8353_v34  ;;  %v4178_v22 = vmul.f32 %v4174_v29, %v4146_v18  ;;  %v8430_v34 = vld [vmem:[#allocation7 + $0x1404] ss:$16 sps:$4 sm:$0xff]   ;;  %v8506_v29 = vld [vmem:[#allocation7 + $0x15a0] ss:$16 sps:$4 sm:$0xff]   ;;  %v8509_v18 = vld [vmem:[#allocation7 + $0x15a8] ss:$16 sps:$4 sm:$0xff]  }
 0x5eb   :  { %5025 = vmatprep.subr.bf16.mxu0 %v8358_v24  ;;  %5107 = vmatprep.subr.bf16.mxu1 %v8361_v37  ;;  %v8433_v24 = vld [vmem:[#allocation7 + $0x140c] ss:$16 sps:$4 sm:$0xff]   ;;  %v8428_v37 = vld [vmem:[#allocation7 + $0x1400] ss:$16 sps:$4 sm:$0xff]  }
 0x5ee   :  { %5026 = vmatpush1.bf16.msra.mxu0 %v8356_v30  ;;  %5108 = vmatpush1.bf16.msra.mxu1 %v8359_v39  ;;  %v4182_v30 = vpack.c.bf16 %v4178_v22, %v4178_v22  ;;  %v8436_v39 = vld [vmem:[#allocation7 + $0x1424] ss:$16 sps:$4 sm:$0xff]   ;;  %v8512_v22 = vld [vmem:[#allocation7 + $0x15c0] ss:$16 sps:$4 sm:$0xff]  }
 0x5ef   :  { %5027 = vmatprep.subr.bf16.mxu0 %v8364_v31  ;;  %5109 = vmatprep.subr.bf16.mxu1 %v8367_v41  ;;  %v8439_v31 = vld [vmem:[#allocation7 + $0x142c] ss:$16 sps:$4 sm:$0xff]   ;;  %v8434_v41 = vld [vmem:[#allocation7 + $0x1420] ss:$16 sps:$4 sm:$0xff]  }
 0x5f2   :  { %5028 = vmatpush1.bf16.msra.mxu0 %v8362_v43  ;;  %5110 = vmatpush1.bf16.msra.mxu1 %v8365_v35  ;;  %v8442_v43 = vld [vmem:[#allocation7 + $0x1444] ss:$16 sps:$4 sm:$0xff]   ;;  %v8445_v35 = vld [vmem:[#allocation7 + $0x144c] ss:$16 sps:$4 sm:$0xff]  }
 0x5f3   :  { %5029 = vmatprep.subr.bf16.mxu0 %v8370_v44  ;;  %5111 = vmatprep.subr.bf16.mxu1 %v8373_v45  ;;  %v8440_v44 = vld [vmem:[#allocation7 + $0x1440] ss:$16 sps:$4 sm:$0xff]   ;;  %v8443_v45 = vld [vmem:[#allocation7 + $0x1448] ss:$16 sps:$4 sm:$0xff]  }
 0x5f6   :  { %5030 = vmatpush1.bf16.msra.mxu0 %v8368_v46  ;;  %5112 = vmatpush1.bf16.msra.mxu1 %v8371_v47  ;;  %v8451_v46 = vld [vmem:[#allocation7 + $0x146c] ss:$16 sps:$4 sm:$0xff]   ;;  %v8446_v47 = vld [vmem:[#allocation7 + $0x1460] ss:$16 sps:$4 sm:$0xff]  }
 0x5f7   :  { %5031 = vmatprep.subr.bf16.mxu0 %v8376_v48  ;;  %5113 = vmatprep.subr.bf16.mxu1 %v8379_v40  ;;  %v8449_v48 = vld [vmem:[#allocation7 + $0x1468] ss:$16 sps:$4 sm:$0xff]   ;;  %v8454_v40 = vld [vmem:[#allocation7 + $0x1484] ss:$16 sps:$4 sm:$0xff]  }
 0x5fa   :  { %5032 = vmatpush1.bf16.msra.mxu0 %v8374_v50  ;;  %5114 = vmatpush1.bf16.msra.mxu1 %v8377_v51  ;;  %v8452_v50 = vld [vmem:[#allocation7 + $0x1480] ss:$16 sps:$4 sm:$0xff]   ;;  %v8455_v51 = vld [vmem:[#allocation7 + $0x1488] ss:$16 sps:$4 sm:$0xff]  }
 0x5fb   :  { %5033 = vmatprep.subr.bf16.mxu0 %v8382_v52  ;;  %5115 = vmatprep.subr.bf16.mxu1 %v8385_v53  ;;  %v8460_v52 = vld [vmem:[#allocation7 + $0x14a4] ss:$16 sps:$4 sm:$0xff]   ;;  %v8463_v53 = vld [vmem:[#allocation7 + $0x14ac] ss:$16 sps:$4 sm:$0xff]  }
 0x5fe   :  { %5034 = vmatpush1.bf16.msra.mxu0 %v8380_v55  ;;  %5116 = vmatpush1.bf16.msra.mxu1 %v8383_v56  ;;  %v8461_v55 = vld [vmem:[#allocation7 + $0x14a8] ss:$16 sps:$4 sm:$0xff]   ;;  %v8466_v56 = vld [vmem:[#allocation7 + $0x14c4] ss:$16 sps:$4 sm:$0xff]  }
 0x5ff   :  { %5035 = vmatprep.subr.bf16.mxu0 %v8388_v57  ;;  %5117 = vmatprep.subr.bf16.mxu1 %v8391_v58  ;;  %v8469_v57 = vld [vmem:[#allocation7 + $0x14cc] ss:$16 sps:$4 sm:$0xff]   ;;  %v8464_v58 = vld [vmem:[#allocation7 + $0x14c0] ss:$16 sps:$4 sm:$0xff]  }
 0x602   :  { %5036 = vmatpush1.bf16.msra.mxu0 %v8386_v60  ;;  %5118 = vmatpush1.bf16.msra.mxu1 %v8389_v61  ;;  %v8472_v60 = vld [vmem:[#allocation7 + $0x14e4] ss:$16 sps:$4 sm:$0xff]   ;;  %v8475_v61 = vld [vmem:[#allocation7 + $0x14ec] ss:$16 sps:$4 sm:$0xff]  }
 0x603   :  { %5037 = vmatprep.subr.bf16.mxu0 %v8394_v62  ;;  %5119 = vmatprep.subr.bf16.mxu1 %v8397_v63  ;;  %v8470_v62 = vld [vmem:[#allocation7 + $0x14e0] ss:$16 sps:$4 sm:$0xff]   ;;  %v8473_v63 = vld [vmem:[#allocation7 + $0x14e8] ss:$16 sps:$4 sm:$0xff]  }
 0x606   :  { %5038 = vmatpush1.bf16.msra.mxu0 %v8392_v1  ;;  %5120 = vmatpush1.bf16.msra.mxu1 %v8395_v2  ;;  %v8481_v1 = vld [vmem:[#allocation7 + $0x150c] ss:$16 sps:$4 sm:$0xff]   ;;  %v8476_v2 = vld [vmem:[#allocation7 + $0x1500] ss:$16 sps:$4 sm:$0xff]  }
 0x607   :  { %5039 = vmatprep.subr.bf16.mxu0 %v8400_v3  ;;  %5121 = vmatprep.subr.bf16.mxu1 %v8403_v4  ;;  %v8479_v3 = vld [vmem:[#allocation7 + $0x1508] ss:$16 sps:$4 sm:$0xff]   ;;  %v8484_v4 = vld [vmem:[#allocation7 + $0x1524] ss:$16 sps:$4 sm:$0xff]  }
 0x60a   :  { %5040 = vmatpush1.bf16.msra.mxu0 %v8398_v5  ;;  %5122 = vmatpush1.bf16.msra.mxu1 %v8401_v6  ;;  %v8487_v5 = vld [vmem:[#allocation7 + $0x152c] ss:$16 sps:$4 sm:$0xff]   ;;  %v8482_v6 = vld [vmem:[#allocation7 + $0x1520] ss:$16 sps:$4 sm:$0xff]  }
 0x60b   :  { %5041 = vmatprep.subr.bf16.mxu0 %v8406_v11  ;;  %5123 = vmatprep.subr.bf16.mxu1 %v8409_v12  ;;  %v8485_v11 = vld [vmem:[#allocation7 + $0x1528] ss:$16 sps:$4 sm:$0xff]   ;;  %v8490_v12 = vld [vmem:[#allocation7 + $0x1544] ss:$16 sps:$4 sm:$0xff]  }
 0x60e   :  { %5042 = vmatpush1.bf16.msra.mxu0 %v8404_v13  ;;  %5124 = vmatpush1.bf16.msra.mxu1 %v8407_v14  ;;  %v8493_v13 = vld [vmem:[#allocation7 + $0x154c] ss:$16 sps:$4 sm:$0xff]   ;;  %v8488_v14 = vld [vmem:[#allocation7 + $0x1540] ss:$16 sps:$4 sm:$0xff]  }
 0x60f   :  { %5043 = vmatprep.subr.bf16.mxu0 %v8412_v15  ;;  %5125 = vmatprep.subr.bf16.mxu1 %v8415_v16  ;;  %v8491_v15 = vld [vmem:[#allocation7 + $0x1548] ss:$16 sps:$4 sm:$0xff]   ;;  %v8496_v16 = vld [vmem:[#allocation7 + $0x1564] ss:$16 sps:$4 sm:$0xff]  }
 0x612   :  { %5044 = vmatpush1.bf16.msra.mxu0 %v8410_v17  ;;  %5126 = vmatpush1.bf16.msra.mxu1 %v8413_v19  ;;  %v8499_v17 = vld [vmem:[#allocation7 + $0x156c] ss:$16 sps:$4 sm:$0xff]   ;;  %v8494_v19 = vld [vmem:[#allocation7 + $0x1560] ss:$16 sps:$4 sm:$0xff]  }
 0x613   :  { %5045 = vmatprep.subr.bf16.mxu0 %v8418_v27  ;;  %5127 = vmatprep.subr.bf16.mxu1 %v8421_v20  ;;  %v8497_v27 = vld [vmem:[#allocation7 + $0x1568] ss:$16 sps:$4 sm:$0xff]   ;;  %v8500_v20 = vld [vmem:[#allocation7 + $0x1580] ss:$16 sps:$4 sm:$0xff]  }
 0x616   :  { %5046 = vmatpush1.bf16.msra.mxu0 %v8416_v23  ;;  %5128 = vmatpush1.bf16.msra.mxu1 %v8419_v25  ;;  %v8503_v23 = vld [vmem:[#allocation7 + $0x1588] ss:$16 sps:$4 sm:$0xff]   ;;  %v8505_v25 = vld [vmem:[#allocation7 + $0x158c] ss:$16 sps:$4 sm:$0xff]  }
 0x617   :  { %5047 = vmatprep.subr.bf16.mxu0 %v8424_v26  ;;  %5129 = vmatprep.subr.bf16.mxu1 %v8427_v28  ;;  %v8508_v26 = vld [vmem:[#allocation7 + $0x15a4] ss:$16 sps:$4 sm:$0xff]   ;;  %v8511_v28 = vld [vmem:[#allocation7 + $0x15ac] ss:$16 sps:$4 sm:$0xff]  }
 0x61a   :  { %5048 = vmatpush1.bf16.msra.mxu0 %v8422_v32  ;;  %5130 = vmatpush1.bf16.msra.mxu1 %v8425_v33  ;;  %v8514_v32 = vld [vmem:[#allocation7 + $0x15c4] ss:$16 sps:$4 sm:$0xff]   ;;  %v8517_v33 = vld [vmem:[#allocation7 + $0x15cc] ss:$16 sps:$4 sm:$0xff]  }
 0x61b   :  { %5972 = vmatprep.subr.bf16.mxu0 %v8430_v34  ;;  %6054 = vmatprep.subr.bf16.mxu1 %v8433_v24  ;;  %v8515_v34 = vld [vmem:[#allocation7 + $0x15c8] ss:$16 sps:$4 sm:$0xff]   ;;  %v8520_v24 = vld [vmem:[#allocation7 + $0x15e4] ss:$16 sps:$4 sm:$0xff]  }
 0x61d   :  { %5050 = vmatmul.mubr.bf16.vlgmr.msra.gmra.mrb[16].mxu0 %v4182_v30  ;;  %5132 = vmatmul.mubr.bf16.vlgmr.msra.gmra.mrb[16].mxu1 %v4182_v30  ;;  %v8521_v30 = vld [vmem:[#allocation7 + $0x15e8] ss:$16 sps:$4 sm:$0xff]  }
 0x61e   :  { %5973 = vmatpush1.bf16.msra.mxu0 %v8428_v37  ;;  %6055 = vmatpush1.bf16.msra.mxu1 %v8431_v38  ;;  %v8523_v37 = vld [vmem:[#allocation7 + $0x15ec] ss:$16 sps:$4 sm:$0xff]   ;;  %v8518_v38 = vld [vmem:[#allocation7 + $0x15e0] ss:$16 sps:$4 sm:$0xff]  }
 0x61f   :  { %5974 = vmatprep.subr.bf16.mxu0 %v8436_v39  ;;  %6056 = vmatprep.subr.bf16.mxu1 %v8439_v31  ;;  %v8526_v39 = vld [vmem:[#allocation7 + $0x1604] ss:$16 sps:$4 sm:$0xff]   ;;  %v8529_v31 = vld [vmem:[#allocation7 + $0x160c] ss:$16 sps:$4 sm:$0xff]  }
 0x622   :  { %5975 = vmatpush1.bf16.msra.mxu0 %v8434_v41  ;;  %6057 = vmatpush1.bf16.msra.mxu1 %v8437_v42  ;;  %v9122_v41 = vld [vmem:[#allocation8 + $0x10] sm:$0xf] }
 0x623   :  { %5976 = vmatprep.subr.bf16.mxu0 %v8442_v43  ;;  %6058 = vmatprep.subr.bf16.mxu1 %v8445_v35  ;;  %v4319_v42 = vrot.slane %v9122_v41, %v9019_v7  ;;  %v4323_v43 = vrot.slane %v9122_v41, %v9021_v8  ;;  %v4331_v35 = vrot.slane %v9122_v41, %v9025_v10 }
 0x626   :  { %5977 = vmatpush1.bf16.msra.mxu0 %v8440_v44  ;;  %6059 = vmatpush1.bf16.msra.mxu1 %v8443_v45 }
 0x627   :  { %5978 = vmatprep.subr.bf16.mxu0 %v8448_v36  ;;  %6060 = vmatprep.subr.bf16.mxu1 %v8451_v46 }
 0x62a   :  { %5979 = vmatpush1.bf16.msra.mxu0 %v8446_v47  ;;  %6061 = vmatpush1.bf16.msra.mxu1 %v8449_v48 }
 0x62b   :  { %5980 = vmatprep.subr.bf16.mxu0 %v8454_v40  ;;  %6062 = vmatprep.subr.bf16.mxu1 %v8457_v49 }
 0x62e   :  { %5981 = vmatpush1.bf16.msra.mxu0 %v8452_v50  ;;  %6063 = vmatpush1.bf16.msra.mxu1 %v8455_v51 }
 0x62f   :  { %5982 = vmatprep.subr.bf16.mxu0 %v8460_v52  ;;  %6064 = vmatprep.subr.bf16.mxu1 %v8463_v53 }
 0x632   :  { %5983 = vmatpush1.bf16.msra.mxu0 %v8458_v54  ;;  %6065 = vmatpush1.bf16.msra.mxu1 %v8461_v55 }
 0x633   :  { %5984 = vmatprep.subr.bf16.mxu0 %v8466_v56  ;;  %6066 = vmatprep.subr.bf16.mxu1 %v8469_v57 }
 0x636   :  { %5985 = vmatpush1.bf16.msra.mxu0 %v8464_v58  ;;  %6067 = vmatpush1.bf16.msra.mxu1 %v8467_v59 }
 0x637   :  { %5986 = vmatprep.subr.bf16.mxu0 %v8472_v60  ;;  %6068 = vmatprep.subr.bf16.mxu1 %v8475_v61 }
 0x63a   :  { %5987 = vmatpush1.bf16.msra.mxu0 %v8470_v62  ;;  %6069 = vmatpush1.bf16.msra.mxu1 %v8473_v63 }
 0x63b   :  { %5988 = vmatprep.subr.bf16.mxu0 %v8478_v0  ;;  %6070 = vmatprep.subr.bf16.mxu1 %v8481_v1 }
 0x63e   :  { %5989 = vmatpush1.bf16.msra.mxu0 %v8476_v2  ;;  %6071 = vmatpush1.bf16.msra.mxu1 %v8479_v3 }
 0x63f   :  { %5990 = vmatprep.subr.bf16.mxu0 %v8484_v4  ;;  %6072 = vmatprep.subr.bf16.mxu1 %v8487_v5 }
 0x642   :  { %5991 = vmatpush1.bf16.msra.mxu0 %v8482_v6  ;;  %6073 = vmatpush1.bf16.msra.mxu1 %v8485_v11 }
 0x643   :  { %5992 = vmatprep.subr.bf16.mxu0 %v8490_v12  ;;  %6074 = vmatprep.subr.bf16.mxu1 %v8493_v13 }
 0x646   :  { %5993 = vmatpush1.bf16.msra.mxu0 %v8488_v14  ;;  %6075 = vmatpush1.bf16.msra.mxu1 %v8491_v15 }
 0x647   :  { %5994 = vmatprep.subr.bf16.mxu0 %v8496_v16  ;;  %6076 = vmatprep.subr.bf16.mxu1 %v8499_v17 }
 0x64a   :  { %5995 = vmatpush1.bf16.msra.mxu0 %v8494_v19  ;;  %6077 = vmatpush1.bf16.msra.mxu1 %v8497_v27 }
 0x64b   :  { %5996 = vmatprep.subr.bf16.mxu0 %v8502_v21  ;;  %6078 = vmatprep.subr.bf16.mxu1 %v8505_v25  ;;  %v8524_v21 = vld [vmem:[#allocation7 + $0x1600] ss:$16 sps:$4 sm:$0xff]  }
 0x64e   :  { %5997 = vmatpush1.bf16.msra.mxu0 %v8500_v20  ;;  %6079 = vmatpush1.bf16.msra.mxu1 %v8503_v23  ;;  %v8527_v23 = vld [vmem:[#allocation7 + $0x1608] ss:$16 sps:$4 sm:$0xff]  }
 0x64f   :  { %5998 = vmatprep.subr.bf16.mxu0 %v8508_v26  ;;  %6080 = vmatprep.subr.bf16.mxu1 %v8511_v28  ;;  %v8532_v26 = vld [vmem:[#allocation7 + $0x1624] ss:$16 sps:$4 sm:$0xff]   ;;  %v8535_v28 = vld [vmem:[#allocation7 + $0x162c] ss:$16 sps:$4 sm:$0xff]  }
 0x652   :  { %5999 = vmatpush1.bf16.msra.mxu0 %v8506_v29  ;;  %6081 = vmatpush1.bf16.msra.mxu1 %v8509_v18  ;;  %v8530_v18 = vld [vmem:[#allocation7 + $0x1620] ss:$16 sps:$4 sm:$0xff]  }
 0x653   :  { %6000 = vmatprep.subr.bf16.mxu0 %v8514_v32  ;;  %6082 = vmatprep.subr.bf16.mxu1 %v8517_v33  ;;  %v8533_v32 = vld [vmem:[#allocation7 + $0x1628] ss:$16 sps:$4 sm:$0xff]   ;;  %v8538_v33 = vld [vmem:[#allocation7 + $0x1644] ss:$16 sps:$4 sm:$0xff]  }
 0x656   :  { %6001 = vmatpush1.bf16.msra.mxu0 %v8512_v22  ;;  %6083 = vmatpush1.bf16.msra.mxu1 %v8515_v34  ;;  %v8541_v22 = vld [vmem:[#allocation7 + $0x164c] ss:$16 sps:$4 sm:$0xff]   ;;  %v8536_v34 = vld [vmem:[#allocation7 + $0x1640] ss:$16 sps:$4 sm:$0xff]  }
 0x657   :  { %6002 = vmatprep.subr.bf16.mxu0 %v8520_v24  ;;  %6084 = vmatprep.subr.bf16.mxu1 %v8523_v37  ;;  %v8539_v24 = vld [vmem:[#allocation7 + $0x1648] ss:$16 sps:$4 sm:$0xff]   ;;  %v8544_v37 = vld [vmem:[#allocation7 + $0x1664] ss:$16 sps:$4 sm:$0xff]  }
 0x65a   :  { %6003 = vmatpush1.bf16.msra.mxu0 %v8518_v38  ;;  %6085 = vmatpush1.bf16.msra.mxu1 %v8521_v30  ;;  %v8547_v38 = vld [vmem:[#allocation7 + $0x166c] ss:$16 sps:$4 sm:$0xff]   ;;  %v8542_v30 = vld [vmem:[#allocation7 + $0x1660] ss:$16 sps:$4 sm:$0xff]  }
 0x65b   :  { %6013 = vmatprep.subr.bf16.mxu0 %v8526_v39  ;;  %6095 = vmatprep.subr.bf16.mxu1 %v8529_v31  ;;  %v8545_v39 = vld [vmem:[#allocation7 + $0x1668] ss:$16 sps:$4 sm:$0xff]   ;;  %v8550_v31 = vld [vmem:[#allocation7 + $0x1684] ss:$16 sps:$4 sm:$0xff]  }
 0x6f0   :  { %v5051_v44 = vpop.f32.mrb[16].mxu0  ;;  %v9130_v45 = vpop.f32.mrb[16].mxu1 }
 0x6f1   :  { %v7399_v36 = vadd.f32 %v5051_v44, %v4319_v42  ;;  %v5053_v46 = vpop.f32.mrb[17].mxu0  ;;  %v5135_v47 = vpop.f32.mrb[17].mxu1  ;;  %v8553_v42 = vld [vmem:[#allocation7 + $0x168c] ss:$16 sps:$4 sm:$0xff]   ;;  %v8551_v44 = vld [vmem:[#allocation7 + $0x1688] ss:$16 sps:$4 sm:$0xff]  }
 0x6f2   :  { %v7400_v48 = vadd.f32 %v5053_v46, %v4323_v43  ;;  %v7402_v40 = vadd.f32 %v5135_v47, %v4331_v35  ;;  %v5055_v49 = vpop.f32.mrb[18].mxu0  ;;  %v5137_v50 = vpop.f32.mrb[18].mxu1  ;;  %v4327_v43 = vrot.slane %v9122_v41, %v9023_v9  ;;  %v8548_v35 = vld [vmem:[#allocation7 + $0x1680] ss:$16 sps:$4 sm:$0xff]   ;;  %v8559_v46 = vld [vmem:[#allocation7 + $0x16ac] ss:$16 sps:$4 sm:$0xff]  }
 0x6f3   :  { %v5144_v51 = vmul.f32 %v7399_v36, %v7399_v36  ;;  %v5056_v52 = vpop.f32.mrb[19].mxu0  ;;  %v5138_v53 = vpop.f32.mrb[19].mxu1  ;;  %v5140_v11 = vmul.f32 0.5, %v7399_v36  ;;  %v8562_v49 = vld [vmem:[#allocation7 + $0x16c4] ss:$16 sps:$4 sm:$0xff]  }
 0x6f4   :  { %v5145_v54 = vmul.f32 %v7400_v48, %v7400_v48  ;;  %v5147_v55 = vmul.f32 %v7402_v40, %v7402_v40  ;;  %v5141_v13 = vmul.f32 0.5, %v7400_v48  ;;  %v5143_v16 = vmul.f32 0.5, %v7402_v40  ;;  %v8565_v50 = vld [vmem:[#allocation7 + $0x16cc] ss:$16 sps:$4 sm:$0xff]   ;;  %v8563_v52 = vld [vmem:[#allocation7 + $0x16c8] ss:$16 sps:$4 sm:$0xff]  }
 0x6f5   :  { %v5148_v56 = vmul.f32 %v7399_v36, %v5144_v51  ;;  %v9135_v47 = vadd.f32 %v9130_v45, %v4327_v43  ;;  %v8560_v51 = vld [vmem:[#allocation7 + $0x16c0] ss:$16 sps:$4 sm:$0xff]   ;;  %v8568_v53 = vld [vmem:[#allocation7 + $0x16e4] ss:$16 sps:$4 sm:$0xff]   ;;  %v8571_v45 = vld [vmem:[#allocation7 + $0x16ec] ss:$16 sps:$4 sm:$0xff]  }
 0x6f6   :  { %v5149_v57 = vmul.f32 %v7400_v48, %v5145_v54  ;;  %v5151_v58 = vmul.f32 %v7402_v40, %v5147_v55  ;;  %v8566_v55 = vld [vmem:[#allocation7 + $0x16e0] ss:$16 sps:$4 sm:$0xff]   ;;  %v8622_v43 = vld [vmem:[#allocation10] sm:$0xff]  }
 0x6f7   :  { %v5152_v59 = vmul.f32 0.044715, %v5148_v56  ;;  %v5146_v41 = vmul.f32 %v9135_v47, %v9135_v47  ;;  %v8569_v56 = vld [vmem:[#allocation7 + $0x16e8] ss:$16 sps:$4 sm:$0xff]  }
 0x6f8   :  { %v5153_v60 = vmul.f32 0.044715, %v5149_v57  ;;  %v5155_v61 = vmul.f32 0.044715, %v5151_v58  ;;  %v8574_v57 = vld [vmem:[#allocation7 + $0x1704] ss:$16 sps:$4 sm:$0xff]  }
 0x6f9   :  { %v5156_v62 = vadd.f32 %v7399_v36, %v5152_v59  ;;  %v8556_v36 = vld [vmem:[#allocation7 + $0x16a4] ss:$16 sps:$4 sm:$0xff]   ;;  %v5150_v54 = vmul.f32 %v9135_v47, %v5146_v41  ;;  %v8577_v58 = vld [vmem:[#allocation7 + $0x170c] ss:$16 sps:$4 sm:$0xff]  }
 0x6fa   :  { %v5157_v63 = vadd.f32 %v7400_v48, %v5153_v60  ;;  %v5159_v0 = vadd.f32 %v7402_v40, %v5155_v61  ;;  %v8554_v48 = vld [vmem:[#allocation7 + $0x16a0] ss:$16 sps:$4 sm:$0xff]   ;;  %v8557_v40 = vld [vmem:[#allocation7 + $0x16a8] ss:$16 sps:$4 sm:$0xff]  }
 0x6fb   :  { %v5160_v1 = vmul.f32 0.7978846, %v5156_v62  ;;  %v5154_v59 = vmul.f32 0.044715, %v5150_v54  ;;  %v8572_v60 = vld [vmem:[#allocation7 + $0x1700] ss:$16 sps:$4 sm:$0xff]  }
 0x6fc   :  { %v5161_v2 = vmul.f32 0.7978846, %v5157_v63  ;;  %v5163_v3 = vmul.f32 0.7978846, %v5159_v0  ;;  %v8575_v61 = vld [vmem:[#allocation7 + $0x1708] ss:$16 sps:$4 sm:$0xff]  }
 0x6fd   :  { %8692 = vtanh.f32 %v5160_v1  ;;  %v8580_v62 = vld [vmem:[#allocation7 + $0x1724] ss:$16 sps:$4 sm:$0xff]   ;;  %v8583_v63 = vld [vmem:[#allocation7 + $0x172c] ss:$16 sps:$4 sm:$0xff]   ;;  %v5158_v0 = vadd.f32 %v9135_v47, %v5154_v59  ;;  %v8578_v1 = vld [vmem:[#allocation7 + $0x1720] ss:$16 sps:$4 sm:$0xff]  }
 0x6fe   :  { %8694 = vtanh.f32 %v5161_v2  ;;  %v8581_v2 = vld [vmem:[#allocation7 + $0x1728] ss:$16 sps:$4 sm:$0xff]   ;;  %v8632_v41 = vld [vmem:[#allocation10 + $0x58] sm:$0xff]   ;;  %v8642_v59 = vld [vmem:[#allocation10 + $0x28] sm:$0xff]  }
 0x6ff   :  { %8696 = vtanh.f32 %v5163_v3  ;;  %v8586_v3 = vld [vmem:[#allocation7 + $0x1744] ss:$16 sps:$4 sm:$0xff]   ;;  %v8637_v54 = vld [vmem:[#allocation10 + $0xe0] sm:$0xff]  }
 0x707   :  { %v8693_v4 = vpop.eup %8692 }
 0x708   :  { %v5168_v5 = vadd.f32 1.0, %v8693_v4  ;;  %v8695_v6 = vpop.eup %8694  ;;  %v8589_v4 = vld [vmem:[#allocation7 + $0x174c] ss:$16 sps:$4 sm:$0xff]  }
 0x709   :  { %v8697_v12 = vpop.eup %8696  ;;  %v5169_v14 = vadd.f32 1.0, %v8695_v6  ;;  %v8584_v6 = vld [vmem:[#allocation7 + $0x1740] ss:$16 sps:$4 sm:$0xff]  }
 0x70a   :  { %v5172_v15 = vmul.f32 %v5168_v5, %v5140_v11  ;;  %v5171_v17 = vadd.f32 1.0, %v8697_v12  ;;  %v5162_v5 = vmul.f32 0.7978846, %v5158_v0  ;;  %v8587_v11 = vld [vmem:[#allocation7 + $0x1748] ss:$16 sps:$4 sm:$0xff]  }
 0x70b   :  { %v5173_v19 = vmul.f32 %v5169_v14, %v5141_v13  ;;  %v8592_v12 = vld [vmem:[#allocation7 + $0x1764] ss:$16 sps:$4 sm:$0xff]   ;;  %v8595_v13 = vld [vmem:[#allocation7 + $0x176c] ss:$16 sps:$4 sm:$0xff]   ;;  %v8590_v14 = vld [vmem:[#allocation7 + $0x1760] ss:$16 sps:$4 sm:$0xff]  }
 0x70c   :  { %v5175_v27 = vmul.f32 %v5171_v17, %v5143_v16  ;;  %v5176_v25 = vpack.c.bf16 %v5172_v15, %v5172_v15  ;;  %8698 = vtanh.f32 %v5162_v5  ;;  %v8593_v15 = vld [vmem:[#allocation7 + $0x1768] ss:$16 sps:$4 sm:$0xff]   ;;  %v8598_v16 = vld [vmem:[#allocation7 + $0x1784] ss:$16 sps:$4 sm:$0xff]   ;;  %v8601_v17 = vld [vmem:[#allocation7 + $0x178c] ss:$16 sps:$4 sm:$0xff]  }
 0x70d   :  { %v5177_v20 = vpack.c.bf16 %v5173_v19, %v5173_v19  ;;  %v8596_v19 = vld [vmem:[#allocation7 + $0x1780] ss:$16 sps:$4 sm:$0xff]   ;;  %v8647_v0 = vld [vmem:[#allocation10 + $0xb0] sm:$0xff]   ;;  %v5310_v5 = vld [vmem:[#allocation8 + $0x14] sm:$0xf] }
 0x70e   :  { %v5179_v29 = vpack.c.bf16 %v5175_v27, %v5175_v27  ;;  %v8599_v27 = vld [vmem:[#allocation7 + $0x1788] ss:$16 sps:$4 sm:$0xff]  }
 0x70f   :  { %6004 = vmatprep.mubr.bf16.mxu0 %v5177_v20  ;;  %6086 = vmatprep.mubr.bf16.mxu1 %v5177_v20  ;;  %v8604_v20 = vld [vmem:[#allocation7 + $0x17a4] ss:$16 sps:$4 sm:$0xff]  }
 0x710   :  { %6005 = vmatmul.mubr.bf16.vlgmr.msra.gmra.mrb[20].mxu0 %v5176_v25  ;;  %6087 = vmatmul.mubr.bf16.vlgmr.msra.gmra.mrb[20].mxu1 %v5176_v25  ;;  %v8605_v25 = vld [vmem:[#allocation7 + $0x17a8] ss:$16 sps:$4 sm:$0xff]  }
 0x711   :  { %6014 = vmatpush1.bf16.msra.mxu0 %v8524_v21  ;;  %6096 = vmatpush1.bf16.msra.mxu1 %v8527_v23  ;;  %v8607_v21 = vld [vmem:[#allocation7 + $0x17ac] ss:$16 sps:$4 sm:$0xff]   ;;  %v8602_v23 = vld [vmem:[#allocation7 + $0x17a0] ss:$16 sps:$4 sm:$0xff]  }
 0x712   :  { %6045 = vmatprep.mubr.bf16.mxu0 %v5179_v29  ;;  %6127 = vmatprep.mubr.bf16.mxu1 %v5179_v29 }
 0x713   :  { %6015 = vmatprep.subr.bf16.mxu0 %v8532_v26  ;;  %6097 = vmatprep.subr.bf16.mxu1 %v8535_v28  ;;  %v8610_v26 = vld [vmem:[#allocation7 + $0x17c4] ss:$16 sps:$4 sm:$0xff]   ;;  %v8613_v28 = vld [vmem:[#allocation7 + $0x17cc] ss:$16 sps:$4 sm:$0xff]  }
 0x715   :  { %6016 = vmatpush1.bf16.msra.mxu0 %v8530_v18  ;;  %6098 = vmatpush1.bf16.msra.mxu1 %v8533_v32  ;;  %v8608_v18 = vld [vmem:[#allocation7 + $0x17c0] ss:$16 sps:$4 sm:$0xff]   ;;  %v8611_v32 = vld [vmem:[#allocation7 + $0x17c8] ss:$16 sps:$4 sm:$0xff]  }
 0x716   :  { %6017 = vmatprep.subr.bf16.mxu0 %v8538_v33  ;;  %6099 = vmatprep.subr.bf16.mxu1 %v8541_v22  ;;  %v8699_v29 = vpop.eup %8698  ;;  %v8616_v33 = vld [vmem:[#allocation7 + $0x17e4] ss:$16 sps:$4 sm:$0xff]   ;;  %v8619_v22 = vld [vmem:[#allocation7 + $0x17ec] ss:$16 sps:$4 sm:$0xff]  }
 0x719   :  { %6018 = vmatpush1.bf16.msra.mxu0 %v8536_v34  ;;  %6100 = vmatpush1.bf16.msra.mxu1 %v8539_v24  ;;  %v5170_v34 = vadd.f32 1.0, %v8699_v29  ;;  %v5142_v24 = vmul.f32 0.5, %v9135_v47  ;;  %v8627_v47 = vld [vmem:[#allocation10 + $0x88] sm:$0xff]  }
 0x71a   :  { %6019 = vmatprep.subr.bf16.mxu0 %v8544_v37  ;;  %6101 = vmatprep.subr.bf16.mxu1 %v8547_v38  ;;  %v8614_v37 = vld [vmem:[#allocation7 + $0x17e0] ss:$16 sps:$4 sm:$0xff]   ;;  %v8617_v38 = vld [vmem:[#allocation7 + $0x17e8] ss:$16 sps:$4 sm:$0xff]  }
 0x71d   :  { %6020 = vmatpush1.bf16.msra.mxu0 %v8542_v30  ;;  %6102 = vmatpush1.bf16.msra.mxu1 %v8545_v39  ;;  %v5174_v30 = vmul.f32 %v5170_v34, %v5142_v24 }
 0x71e   :  { %6021 = vmatprep.subr.bf16.mxu0 %v8550_v31  ;;  %6103 = vmatprep.subr.bf16.mxu1 %v8553_v42  ;;  %v8620_v31 = vld [vmem:[#allocation10 + $0x40] sm:$0xff]  }
 0x71f   :  { %v5178_v39 = vpack.c.bf16 %v5174_v30, %v5174_v30  ;;  %v8621_v42 = vld [vmem:[#allocation10 + $0xc0] sm:$0xff]  }
 0x721   :  { %6022 = vmatpush1.bf16.msra.mxu0 %v8548_v35  ;;  %6104 = vmatpush1.bf16.msra.mxu1 %v8551_v44  ;;  %v8623_v35 = vld [vmem:[#allocation10 + $0x80] sm:$0xff]   ;;  %v8624_v44 = vld [vmem:[#allocation10 + $0x48] sm:$0xff]  }
 0x722   :  { %6023 = vmatprep.subr.bf16.mxu0 %v8556_v36  ;;  %6105 = vmatprep.subr.bf16.mxu1 %v8559_v46  ;;  %v8625_v36 = vld [vmem:[#allocation10 + $0xc8] sm:$0xff]  }
 0x723   :  { %v8626_v46 = vld [vmem:[#allocation10 + $0x8] sm:$0xff]  }
 0x725   :  { %6024 = vmatpush1.bf16.msra.mxu0 %v8554_v48  ;;  %6106 = vmatpush1.bf16.msra.mxu1 %v8557_v40  ;;  %v8628_v48 = vld [vmem:[#allocation10 + $0x50] sm:$0xff]  }
 0x726   :  { %6025 = vmatprep.subr.bf16.mxu0 %v8562_v49  ;;  %6107 = vmatprep.subr.bf16.mxu1 %v8565_v50  ;;  %v8629_v40 = vld [vmem:[#allocation10 + $0xd0] sm:$0xff]  }
 0x727   :  { %v8630_v49 = vld [vmem:[#allocation10 + $0x10] sm:$0xff]  }
 0x728   :  { %v8631_v50 = vld [vmem:[#allocation10 + $0x90] sm:$0xff]  }
 0x729   :  { %6026 = vmatpush1.bf16.msra.mxu0 %v8560_v51  ;;  %6108 = vmatpush1.bf16.msra.mxu1 %v8563_v52  ;;  %v8633_v51 = vld [vmem:[#allocation10 + $0xd8] sm:$0xff]  }
 0x72a   :  { %6027 = vmatprep.subr.bf16.mxu0 %v8568_v53  ;;  %6109 = vmatprep.subr.bf16.mxu1 %v8571_v45  ;;  %v8634_v52 = vld [vmem:[#allocation10 + $0x18] sm:$0xff]   ;;  %v8636_v45 = vld [vmem:[#allocation10 + $0x60] sm:$0xff]  }
 0x72b   :  { %v8635_v53 = vld [vmem:[#allocation10 + $0x98] sm:$0xff]  }
 0x72d   :  { %6028 = vmatpush1.bf16.msra.mxu0 %v8566_v55  ;;  %6110 = vmatpush1.bf16.msra.mxu1 %v8569_v56  ;;  %v8638_v55 = vld [vmem:[#allocation10 + $0x20] sm:$0xff]  }
 0x72e   :  { %6029 = vmatprep.subr.bf16.mxu0 %v8574_v57  ;;  %6111 = vmatprep.subr.bf16.mxu1 %v8577_v58  ;;  %v8639_v56 = vld [vmem:[#allocation10 + $0xa0] sm:$0xff]   ;;  %v8640_v57 = vld [vmem:[#allocation10 + $0x68] sm:$0xff]  }
 0x72f   :  { %v8641_v58 = vld [vmem:[#allocation10 + $0xe8] sm:$0xff]  }
 0x731   :  { %6030 = vmatpush1.bf16.msra.mxu0 %v8572_v60  ;;  %6112 = vmatpush1.bf16.msra.mxu1 %v8575_v61  ;;  %v8643_v60 = vld [vmem:[#allocation10 + $0xa8] sm:$0xff]   ;;  %v8644_v61 = vld [vmem:[#allocation10 + $0x70] sm:$0xff]  }
 0x732   :  { %6031 = vmatprep.subr.bf16.mxu0 %v8580_v62  ;;  %6113 = vmatprep.subr.bf16.mxu1 %v8583_v63  ;;  %v8645_v62 = vld [vmem:[#allocation10 + $0xf0] sm:$0xff]  }
 0x733   :  { %v8646_v63 = vld [vmem:[#allocation10 + $0x30] sm:$0xff]  }
 0x735   :  { %6032 = vmatpush1.bf16.msra.mxu0 %v8578_v1  ;;  %6114 = vmatpush1.bf16.msra.mxu1 %v8581_v2  ;;  %v8648_v1 = vld [vmem:[#allocation10 + $0x78] sm:$0xff]  }
 0x736   :  { %6033 = vmatprep.subr.bf16.mxu0 %v8586_v3  ;;  %6115 = vmatprep.subr.bf16.mxu1 %v8589_v4  ;;  %v8649_v2 = vld [vmem:[#allocation10 + $0xf8] sm:$0xff]  }
 0x737   :  { %v8650_v3 = vld [vmem:[#allocation10 + $0x38] sm:$0xff]  }
 0x738   :  { %v8651_v4 = vld [vmem:[#allocation10 + $0xb8] sm:$0xff]  }
 0x739   :  { %6034 = vmatpush1.bf16.msra.mxu0 %v8584_v6  ;;  %6116 = vmatpush1.bf16.msra.mxu1 %v8587_v11  ;;  %v5315_v6 = vrot.slane %v5310_v5, %v9019_v7  ;;  %v5323_v11 = vrot.slane %v5310_v5, %v9023_v9 }
 0x73a   :  { %6035 = vmatprep.subr.bf16.mxu0 %v8592_v12  ;;  %6117 = vmatprep.subr.bf16.mxu1 %v8595_v13  ;;  %v5319_v12 = vrot.slane %v5310_v5, %v9021_v8  ;;  %v5327_v13 = vrot.slane %v5310_v5, %v9025_v10 }
 0x73d   :  { %6036 = vmatpush1.bf16.msra.mxu0 %v8590_v14  ;;  %6118 = vmatpush1.bf16.msra.mxu1 %v8593_v15 }
 0x73e   :  { %6037 = vmatprep.subr.bf16.mxu0 %v8598_v16  ;;  %6119 = vmatprep.subr.bf16.mxu1 %v8601_v17 }
 0x741   :  { %6038 = vmatpush1.bf16.msra.mxu0 %v8596_v19  ;;  %6120 = vmatpush1.bf16.msra.mxu1 %v8599_v27 }
 0x742   :  { %6039 = vmatprep.subr.bf16.mxu0 %v8604_v20  ;;  %6121 = vmatprep.subr.bf16.mxu1 %v8607_v21 }
 0x745   :  { %6040 = vmatpush1.bf16.msra.mxu0 %v8602_v23  ;;  %6122 = vmatpush1.bf16.msra.mxu1 %v8605_v25 }
 0x746   :  { %6041 = vmatprep.subr.bf16.mxu0 %v8610_v26  ;;  %6123 = vmatprep.subr.bf16.mxu1 %v8613_v28 }
 0x749   :  { %6042 = vmatpush1.bf16.msra.mxu0 %v8608_v18  ;;  %6124 = vmatpush1.bf16.msra.mxu1 %v8611_v32 }
 0x74a   :  { %6043 = vmatprep.subr.bf16.mxu0 %v8616_v33  ;;  %6125 = vmatprep.subr.bf16.mxu1 %v8619_v22 }
 0x74d   :  { %6044 = vmatpush1.bf16.msra.mxu0 %v8614_v37  ;;  %6126 = vmatpush1.bf16.msra.mxu1 %v8617_v38 }
 0x74e   :  { %7339 = vmatprep.subr.bf16.mxu0 %v8620_v31  ;;  %7361 = vmatprep.subr.bf16.mxu1 %v8621_v42 }
 0x750   :  { %6046 = vmatmul.mubr.bf16.vlgmr.msra.gmra.mrb[20].mxu0 %v5178_v39  ;;  %6128 = vmatmul.mubr.bf16.vlgmr.msra.gmra.mrb[20].mxu1 %v5178_v39 }
 0x751   :  { %7340 = vmatpush3.bf16.msra.mxu0 %v8622_v43  ;;  %7362 = vmatpush3.bf16.msra.mxu1 %v8623_v35 }
 0x752   :  { %7341 = vmatprep.subr.bf16.mxu0 %v8624_v44  ;;  %7363 = vmatprep.subr.bf16.mxu1 %v8625_v36 }
 0x755   :  { %7342 = vmatpush3.bf16.msra.mxu0 %v8626_v46  ;;  %7364 = vmatpush3.bf16.msra.mxu1 %v8627_v47 }
 0x756   :  { %7343 = vmatprep.subr.bf16.mxu0 %v8628_v48  ;;  %7365 = vmatprep.subr.bf16.mxu1 %v8629_v40 }
 0x759   :  { %7344 = vmatpush3.bf16.msra.mxu0 %v8630_v49  ;;  %7366 = vmatpush3.bf16.msra.mxu1 %v8631_v50 }
 0x75a   :  { %7345 = vmatprep.subr.bf16.mxu0 %v8632_v41  ;;  %7367 = vmatprep.subr.bf16.mxu1 %v8633_v51 }
 0x75d   :  { %7346 = vmatpush3.bf16.msra.mxu0 %v8634_v52  ;;  %7368 = vmatpush3.bf16.msra.mxu1 %v8635_v53 }
 0x75e   :  { %7347 = vmatprep.subr.bf16.mxu0 %v8636_v45  ;;  %7369 = vmatprep.subr.bf16.mxu1 %v8637_v54 }
 0x761   :  { %7348 = vmatpush3.bf16.msra.mxu0 %v8638_v55  ;;  %7370 = vmatpush3.bf16.msra.mxu1 %v8639_v56 }
 0x762   :  { %7349 = vmatprep.subr.bf16.mxu0 %v8640_v57  ;;  %7371 = vmatprep.subr.bf16.mxu1 %v8641_v58 }
 0x765   :  { %7350 = vmatpush3.bf16.msra.mxu0 %v8642_v59  ;;  %7372 = vmatpush3.bf16.msra.mxu1 %v8643_v60 }
 0x766   :  { %7351 = vmatprep.subr.bf16.mxu0 %v8644_v61  ;;  %7373 = vmatprep.subr.bf16.mxu1 %v8645_v62 }
 0x769   :  { %7352 = vmatpush3.bf16.msra.mxu0 %v8646_v63  ;;  %7374 = vmatpush3.bf16.msra.mxu1 %v8647_v0  ;;  %v7306_v0 = vld [vmem:[#allocation11] ss:$0 sm:$0xff] }
 0x76a   :  { %7353 = vmatprep.subr.bf16.mxu0 %v8648_v1  ;;  %7375 = vmatprep.subr.bf16.mxu1 %v8649_v2 }
 0x76d   :  { %7354 = vmatpush3.bf16.msra.mxu0 %v8650_v3  ;;  %7376 = vmatpush3.bf16.msra.mxu1 %v8651_v4 }
 0x823   :  { %v6047_v14 = vpop.f32.mrb[20].mxu0  ;;  %v6129_v15 = vpop.f32.mrb[20].mxu1 }
 0x824   :  { %v7403_v16 = vadd.f32 %v6047_v14, %v5315_v6  ;;  %v7405_v17 = vadd.f32 %v6129_v15, %v5323_v11  ;;  %v6049_v19 = vpop.f32.mrb[21].mxu0  ;;  %v6131_v27 = vpop.f32.mrb[21].mxu1 }
 0x825   :  { %v7404_v20 = vadd.f32 %v6049_v19, %v5319_v12  ;;  %v7406_v21 = vadd.f32 %v6131_v27, %v5327_v13  ;;  %v6051_v23 = vpop.f32.mrb[22].mxu0  ;;  %v6133_v25 = vpop.f32.mrb[22].mxu1 }
 0x826   :  { %v6140_v26 = vmul.f32 %v7403_v16, %v7403_v16  ;;  %v6142_v28 = vmul.f32 %v7405_v17, %v7405_v17  ;;  %v6052_v29 = vpop.f32.mrb[23].mxu0  ;;  %v6134_v7 = vpop.f32.mrb[23].mxu1  ;;  %v6136_v40 = vmul.f32 0.5, %v7403_v16  ;;  %v6138_v41 = vmul.f32 0.5, %v7405_v17 }
 0x827   :  { %v6141_v18 = vmul.f32 %v7404_v20, %v7404_v20  ;;  %v6143_v9 = vmul.f32 %v7406_v21, %v7406_v21  ;;  %v6137_v51 = vmul.f32 0.5, %v7404_v20  ;;  %v6139_v53 = vmul.f32 0.5, %v7406_v21 }
 0x828   :  { %v6144_v32 = vmul.f32 %v7403_v16, %v6140_v26  ;;  %v6146_v8 = vmul.f32 %v7405_v17, %v6142_v28 }
 0x829   :  { %v6145_v33 = vmul.f32 %v7404_v20, %v6141_v18  ;;  %v6147_v10 = vmul.f32 %v7406_v21, %v6143_v9 }
 0x82a   :  { %v6148_v22 = vmul.f32 0.044715, %v6144_v32  ;;  %v6150_v34 = vmul.f32 0.044715, %v6146_v8 }
 0x82b   :  { %v6149_v24 = vmul.f32 0.044715, %v6145_v33  ;;  %v6151_v37 = vmul.f32 0.044715, %v6147_v10 }
 0x82c   :  { %v6152_v38 = vadd.f32 %v7403_v16, %v6148_v22  ;;  %v6154_v30 = vadd.f32 %v7405_v17, %v6150_v34 }
 0x82d   :  { %v6153_v39 = vadd.f32 %v7404_v20, %v6149_v24  ;;  %v6155_v31 = vadd.f32 %v7406_v21, %v6151_v37 }
 0x82e   :  { %v6156_v42 = vmul.f32 0.7978846, %v6152_v38  ;;  %v6158_v43 = vmul.f32 0.7978846, %v6154_v30 }
 0x82f   :  { %v6157_v35 = vmul.f32 0.7978846, %v6153_v39  ;;  %v6159_v44 = vmul.f32 0.7978846, %v6155_v31 }
 0x830   :  { %8700 = vtanh.f32 %v6156_v42 }
 0x831   :  { %8702 = vtanh.f32 %v6158_v43 }
 0x832   :  { %8704 = vtanh.f32 %v6157_v35 }
 0x833   :  { %8706 = vtanh.f32 %v6159_v44 }
 0x83a   :  { %v8701_v36 = vpop.eup %8700 }
 0x83b   :  { %v8703_v46 = vpop.eup %8702  ;;  %v6164_v47 = vadd.f32 1.0, %v8701_v36 }
 0x83c   :  { %v8705_v48 = vpop.eup %8704  ;;  %v6166_v49 = vadd.f32 1.0, %v8703_v46 }
 0x83d   :  { %v8707_v50 = vpop.eup %8706  ;;  %v6165_v52 = vadd.f32 1.0, %v8705_v48  ;;  %v6168_v54 = vmul.f32 %v6164_v47, %v6136_v40 }
 0x83e   :  { %v6167_v45 = vadd.f32 1.0, %v8707_v50  ;;  %v6170_v56 = vmul.f32 %v6166_v49, %v6138_v41 }
 0x83f   :  { %v6169_v55 = vmul.f32 %v6165_v52, %v6137_v51  ;;  %v6172_v60 = vpack.c.bf16 %v6168_v54, %v6168_v54 }
 0x840   :  { %v6171_v57 = vmul.f32 %v6167_v45, %v6139_v53  ;;  %v6174_v61 = vpack.c.bf16 %v6170_v56, %v6170_v56 }
 0x841   :  { %v6173_v58 = vpack.c.bf16 %v6169_v55, %v6169_v55 }
 0x842   :  { %v6175_v59 = vpack.c.bf16 %v6171_v57, %v6171_v57 }
 0x843   :  { %6471 = vmatprep.mubr.bf16.mxu0 %v6173_v58 }
 0x844   :  { %6511 = vmatprep.mubr.bf16.mxu1 %v6175_v59  ;;  %6472 = vmatmul.mubr.bf16.vlgmr.msra.gmra.mrb[24].mxu0 %v6172_v60 }
 0x845   :  { %6512 = vmatmul.mubr.bf16.vlgmr.msra.gmra.mrb[24].mxu1 %v6174_v61 }
 0x917   :  { %v7355_v62 = vpop.f32.mrb[24].mxu0 }
 0x918   :  { %v7377_v63 = vpop.f32.mrb[24].mxu1  ;;  %v7356_v1 = vpop.f32.mrb[25].mxu0 }
 0x919   :  { %v7357_v2 = vadd.f32 %v7356_v1, %v7355_v62  ;;  %v7378_v3 = vpop.f32.mrb[25].mxu1  ;;  %v7358_v4 = vpop.f32.mrb[26].mxu0 }
 0x91a   :  { %v7379_v5 = vadd.f32 %v7378_v3, %v7377_v63  ;;  %v7380_v6 = vpop.f32.mrb[26].mxu1  ;;  %v7359_v11 = vpop.f32.mrb[27].mxu0 }
 0x91b   :  { %v6474_v12 = vadd.f32 %v7357_v2, %v7306_v0  ;;  %v7381_v13 = vpop.f32.mrb[27].mxu1 }
 0x91d   :  { %v6514_v14 = vadd.f32 %v7379_v5, %v6474_v12 }
 0x91f   :  { %6519 = vst [vmem:[#allocation13] sm:$0xff] %v6514_v14 }
 0x920   :  { %8851 = shalt.err (!%p8848_p10)
}
 0x921   :  { %s8852_s9 = scalar_lea.hbm %s9165_s7, 128 }
 0x922   :  { %p8853_p11 = scmp.ne.s32.totalorder %s9165_s7, %s8852_s9  ;;  %p8856_p12 = scmp.lt.u32.totalorder %s8852_s9, %s9165_s7 }
 0x924   :  { %p8858_p13 = pnand %p8856_p12, %p8853_p11 }
 0x926   :  { %8861 = shalt.err (!%p8858_p13)
}
 0x927   :  { %6529 = dma.vmem_to_hbm [thread:$0]  %s6527_s6, 128, %s9165_s7, [#allocation4]  }
 0x928   :  { %8870 = dma.done.wait [#allocation4], 128  }
 0x929   :  { %8871 = vsyncadd [#allocation4], 4294967168 }
 0x92a   :  { %6533 = vsyncpa [#allocation3], 1 }
 0x92b   :  { %6534 = vsyncpa [#allocation6], 1 }
 0x92c   :  { %6535 = vsyncpa [#allocation9], 1 }
 0x92d   :  { %6536 = vsyncpa [#allocation12], 1 }
 0x92e   :  { %6537 = vsyncpa [#allocation4], 1 }

</bundles_post_ra>
